<compile_context>
chip_gen: v7x
topology: tpu7x:2x2x1
jax: 0.10.0
libtpu: 0.0.40
codegen_flags: <defaults>
</compile_context>

<pallas_src>
import functools

import jax
import jax.numpy as jnp
from jax.experimental import pallas as pl
from jax.experimental.pallas import tpu as pltpu

_VMEM_LIMIT_BYTES = 48 * 1024 * 1024    # <= v7x 64 MiB physical, > v5e/v6e defaults
_VMEM_BUDGET_BYTES = 36 * 1024 * 1024   # per-step working-set target (headroom left)


def _pick_tile_rows(n, c_in, c_out_p):
    """Largest row tile (multiple of 128 dividing N, or N itself) within budget."""
    def working_set(t):
        keys = 2 * c_in * n * 4           # (C_in, N) keys, double-buffered
        qry = 2 * c_in * t * 4            # (C_in, T) query tile, double-buffered
        sq = 2 * n * 4                    # (1, N) squared norms
        dist = 2 * t * n * 4              # dist slab + one live copy across k-loop
        acc = t * c_in * 4                # neighbour-max accumulator
        out = 2 * t * c_out_p * 4         # output tile, double-buffered
        return keys + qry + sq + dist + acc + out

    for t in (512, 384, 256, 128):
        if n % t == 0 and working_set(t) <= _VMEM_BUDGET_BYTES:
            return t
    return n   # small point clouds: one row tile per batch element


def _graph_layer_kernel(xt_ref, xtq_ref, sq_ref, w_ref, shift_ref, o_ref,
                        *, k, gram_in_bf16):
    xt = xt_ref[0]        # (C_in, N)  keys, channel-major, lane-dense
    xtq = xtq_ref[0]      # (C_in, T)  query tile (same array, different view)
    sq = sq_ref[0]        # (1, N)     |x_j|^2, lane oriented
    c_in = xt.shape[0]
    n = xt.shape[1]
    t = xtq.shape[1]

    # --- row-relative squared distances ------------------------------------
    # Fold the -2 into the tiny query operand (C_in*T muls instead of T*N).
    neg2q = xtq * jnp.float32(-2.0)                                   # (C_in, T)
    if gram_in_bf16:
        # Distances only feed a ranking; bf16 halves MXU passes (v5e/v6e win)
        # but can flip near-tie neighbour choices vs an f32 reference.
        gram = jax.lax.dot_general(
            neg2q.astype(jnp.bfloat16), xt.astype(jnp.bfloat16),
            (((0,), (0,)), ((), ())), preferred_element_type=jnp.float32)
    else:
        gram = jax.lax.dot_general(
            neg2q, xt, (((0,), (0,)), ((), ())),
            preferred_element_type=jnp.float32,
            precision=jax.lax.Precision.HIGHEST)                      # (T, N)
    dist = sq + gram                                                  # (T, N)

    col = jax.lax.broadcasted_iota(jnp.int32, (t, n), 1)

    # --- fused k-NN selection + neighbour-feature max ----------------------
    # Each step: row-min (XLU) -> exact one-hot with lowest-index tie-break
    # -> MXU gather (one-hot @ x^T, exact since exactly one 1.0 per row)
    # -> running max; selected entry knocked out with +inf.
    def body(_, carry):
        d, acc = carry
        rowmin = jnp.min(d, axis=-1, keepdims=True)                   # (T, 1)
        cand = jnp.where(d == rowmin, col, jnp.int32(n))
        min_col = jnp.min(cand, axis=-1, keepdims=True)               # (T, 1)
        sel = col == min_col                                          # (T, N) one-hot
        gathered = jax.lax.dot_general(
            sel.astype(jnp.float32), xt, (((1,), (1,)), ((), ())),
            preferred_element_type=jnp.float32,
            precision=jax.lax.Precision.HIGHEST)                      # (T, C_in)
        acc = jnp.maximum(acc, gathered)
        d = jnp.where(sel, jnp.float32(jnp.inf), d)
        return d, acc

    acc0 = jnp.full((t, c_in), -jnp.inf, jnp.float32)
    _, acc = jax.lax.fori_loop(0, k, body, (dist, acc0), unroll=True)

    # --- 1x1 conv (+ folded conv bias & inference BN) + ReLU ----------------
    y = jnp.dot(acc, w_ref[...], preferred_element_type=jnp.float32,
                precision=jax.lax.Precision.HIGHEST)                  # (T, C_out_p)
    o_ref[0] = jnp.maximum(y + shift_ref[...], 0.0)


def graph_layer(x, w, b, gamma, beta, running_mean, running_var,
                *, k=16, eps=1e-5, gram_in_bf16=False, tile_rows=None):
    """x: (B, N, C_in) float32. Returns (B, N, C_out) float32."""
    B, N, C_in = x.shape
    C_out = w.shape[0]
    assert 1 <= k <= N, f"k={k} must be in [1, N={N}]"

    x = x.astype(jnp.float32)
    x_t = jnp.transpose(x, (0, 2, 1))                  # (B, C_in, N) lane-dense
    sq = jnp.sum(x * x, axis=2)[:, None, :]            # (B, 1, N)  |x_j|^2

    # Fold BatchNorm (inference mode) and the conv bias into weights/shift.
    scale = gamma / jnp.sqrt(running_var + eps)                       # (C_out,)
    w_fold = (w * scale[:, None]).T.astype(jnp.float32)               # (C_in, C_out)
    shift = (b * scale + beta - running_mean * scale).astype(jnp.float32)

    # Pad output channels to a multiple of 128 -> lane-dense (unmasked) stores.
    c_out_p = ((C_out + 127) // 128) * 128
    w_pad = jnp.zeros((C_in, c_out_p), jnp.float32).at[:, :C_out].set(w_fold)
    shift_pad = jnp.zeros((1, c_out_p), jnp.float32).at[:, :C_out].set(shift[None, :])

    if tile_rows is None:
        tile_rows = _pick_tile_rows(N, C_in, c_out_p)
    assert N % tile_rows == 0, f"tile_rows={tile_rows} must divide N={N}"
    n_row_tiles = N // tile_rows

    kernel = functools.partial(_graph_layer_kernel, k=k, gram_in_bf16=gram_in_bf16)

    out_p = pl.pallas_call(
        kernel,
        out_shape=jax.ShapeDtypeStruct((B, N, c_out_p), jnp.float32),
        grid_spec=pltpu.PrefetchScalarGridSpec(
            num_scalar_prefetch=0,
            grid=(B, n_row_tiles),      # row-tile axis inner: keys DMA reused per batch
            in_specs=[
                pl.BlockSpec((1, C_in, N), lambda bi, ri: (bi, 0, 0)),          # keys
                pl.BlockSpec((1, C_in, tile_rows), lambda bi, ri: (bi, 0, ri)),  # queries
                pl.BlockSpec((1, 1, N), lambda bi, ri: (bi, 0, 0)),             # |x_j|^2
                pl.BlockSpec((C_in, c_out_p), lambda bi, ri: (0, 0)),           # weights
                pl.BlockSpec((1, c_out_p), lambda bi, ri: (0, 0)),              # shift
            ],
            out_specs=pl.BlockSpec((1, tile_rows, c_out_p), lambda bi, ri: (bi, ri, 0)),
        ),
        compiler_params=pltpu.CompilerParams(
            dimension_semantics=("parallel", "parallel"),
            vmem_limit_bytes=_VMEM_LIMIT_BYTES),
    )(x_t, x_t, sq, w_pad, shift_pad)

    return out_p[:, :, :C_out]


def graph_layer_reference(x, w, b, gamma, beta, rm, rv, *, k=16, eps=1e-5):
    """Pure-JAX reference with identical (inference-mode BN) semantics."""
    sq = jnp.sum(x * x, axis=2, keepdims=True)                        # (B, N, 1)
    gram = jnp.einsum("bnc,bmc->bnm", x, x,
                      precision=jax.lax.Precision.HIGHEST)
    dist = sq - 2.0 * gram + jnp.transpose(sq, (0, 2, 1))             # (B, N, N)
    _, idx = jax.lax.top_k(-dist, k)                                  # (B, N, k)
    knn_x = jax.vmap(lambda xb, ib: xb[ib])(x, idx)                   # (B, N, k, C)
    xmax = jnp.max(knn_x, axis=2)                                     # (B, N, C)
    y = jnp.einsum("bnc,oc->bno", xmax, w,
                   precision=jax.lax.Precision.HIGHEST) + b
    scale = gamma / jnp.sqrt(rv + eps)
    shift = beta - rm * scale
    return jnp.maximum(y * scale + shift, 0.0)


if __name__ == "__main__":
    B, N, C_IN, C_OUT, K = 2, 64, 16, 32, 16

    key = jax.random.PRNGKey(0)
    kx, kw, kb, kg, kbe, krm, krv = jax.random.split(key, 7)

    x = jax.random.normal(kx, (B, N, C_IN), dtype=jnp.float32)
    # Conv1d(in_channel, out_channel, 1): weight (C_out, C_in), bias (C_out,)
    w = 0.1 * jax.random.normal(kw, (C_OUT, C_IN), dtype=jnp.float32)
    b = 0.1 * jax.random.normal(kb, (C_OUT,), dtype=jnp.float32)
    # BatchNorm1d(out_channel) parameters / running stats (deterministic)
    gamma = 1.0 + 0.1 * jax.random.normal(kg, (C_OUT,), dtype=jnp.float32)
    beta = 0.1 * jax.random.normal(kbe, (C_OUT,), dtype=jnp.float32)
    running_mean = 0.1 * jax.random.normal(krm, (C_OUT,), dtype=jnp.float32)
    running_var = 0.5 + jnp.abs(jax.random.normal(krv, (C_OUT,), dtype=jnp.float32))

    out = graph_layer(x, w, b, gamma, beta, running_mean, running_var, k=K)
    out = jax.block_until_ready(out)

    ref = graph_layer_reference(x, w, b, gamma, beta, running_mean, running_var, k=K)
    assert out.shape == (B, N, C_OUT)
    assert jnp.allclose(out, ref, atol=1e-2, rtol=1e-2), (
        f"max abs err = {jnp.max(jnp.abs(out - ref))}")

    print("KERNEL_OK")
</pallas_src>

<mosaic_0001>
module attributes {stable_mosaic.version = 11 : i64} {
  func.func @_graph_layer_kernel(%arg0: i32, %arg1: i32, %arg2: memref<1x16x64xf32, #tpu.memory_space<vmem>>, %arg3: memref<1x16x64xf32, #tpu.memory_space<vmem>>, %arg4: memref<1x1x64xf32, #tpu.memory_space<vmem>>, %arg5: memref<16x128xf32, #tpu.memory_space<vmem>>, %arg6: memref<1x128xf32, #tpu.memory_space<vmem>>, %arg7: memref<1x64x128xf32, #tpu.memory_space<vmem>>) attributes {dimension_semantics = [#tpu.dimension_semantics<parallel>, #tpu.dimension_semantics<parallel>], iteration_bounds = array<i64: 2, 1>, scalar_prefetch = 0 : i64, scratch_operands = 0 : i64, tpu.core_type = #tpu.core_type<tc>, window_params = [{transform_indices = @transform_0, window_bounds = array<i64: 1, 16, 64>}, {transform_indices = @transform_1, window_bounds = array<i64: 1, 16, 64>}, {transform_indices = @transform_2, window_bounds = array<i64: 1, 1, 64>}, {pipeline_mode = #tpu.pipeline_mode<synchronous>, transform_indices = @transform_3, window_bounds = array<i64: 16, 128>}, {pipeline_mode = #tpu.pipeline_mode<synchronous>, transform_indices = @transform_4, window_bounds = array<i64: 1, 128>}, {transform_indices = @transform_5, window_bounds = array<i64: 1, 64, 128>}]} {
    %c0 = arith.constant 0 : index
    %c0_0 = arith.constant 0 : index
    %c0_1 = arith.constant 0 : index
    %0 = vector.load %arg2[%c0, %c0_0, %c0_1] : memref<1x16x64xf32, #tpu.memory_space<vmem>>, vector<1x16x64xf32>
    %1 = vector.shape_cast %0 : vector<1x16x64xf32> to vector<16x64xf32>
    %c0_2 = arith.constant 0 : index
    %c0_3 = arith.constant 0 : index
    %c0_4 = arith.constant 0 : index
    %2 = vector.load %arg3[%c0_2, %c0_3, %c0_4] : memref<1x16x64xf32, #tpu.memory_space<vmem>>, vector<1x16x64xf32>
    %3 = vector.shape_cast %2 : vector<1x16x64xf32> to vector<16x64xf32>
    %c0_5 = arith.constant 0 : index
    %c0_6 = arith.constant 0 : index
    %c0_7 = arith.constant 0 : index
    %4 = vector.load %arg4[%c0_5, %c0_6, %c0_7] : memref<1x1x64xf32, #tpu.memory_space<vmem>>, vector<1x1x64xf32>
    %5 = vector.shape_cast %4 : vector<1x1x64xf32> to vector<1x64xf32>
    %cst = arith.constant -2.000000e+00 : f32
    %6 = vector.broadcast %cst : f32 to vector<16x64xf32>
    %7 = arith.mulf %3, %6 : vector<16x64xf32>
    %cst_8 = arith.constant dense<0.000000e+00> : vector<64x64xf32>
    %8 = tpu.matmul %7, %1, %cst_8 {dimension_numbers = #tpu.dot_dimension_numbers<[0], [0], [1], [1], [0, 1, 1, 1], [], []>, precision = #tpu.contract_precision<fp32>} : vector<16x64xf32>, vector<16x64xf32>, vector<64x64xf32> -> vector<64x64xf32>
    %9 = vector.broadcast %5 : vector<1x64xf32> to vector<64x64xf32>
    %10 = arith.addf %9, %8 : vector<64x64xf32>
    %11 = tpu.iota {dimensions = array<i32: 1>} : vector<64x64xi32>
    %cst_9 = arith.constant 0xFF800000 : f32
    %12 = vector.broadcast %cst_9 : f32 to vector<64x16xf32>
    %c0_i32 = arith.constant 0 : i32
    %cst_10 = arith.constant dense<0x7F800000> : vector<64xf32>
    %13 = vector.multi_reduction <minimumf>, %10, %cst_10 [1] : vector<64x64xf32> to vector<64xf32>
    %14 = vector.shape_cast %13 : vector<64xf32> to vector<64x1xf32>
    %15 = vector.broadcast %14 : vector<64x1xf32> to vector<64x64xf32>
    %16 = arith.cmpf oeq, %10, %15 : vector<64x64xf32>
    %c64_i32 = arith.constant 64 : i32
    %17 = vector.broadcast %c64_i32 : i32 to vector<64x64xi32>
    %18 = arith.select %16, %11, %17 : vector<64x64xi1>, vector<64x64xi32>
    %cst_11 = arith.constant dense<2147483647> : vector<64xi32>
    %19 = vector.multi_reduction <minsi>, %18, %cst_11 [1] : vector<64x64xi32> to vector<64xi32>
    %20 = vector.shape_cast %19 : vector<64xi32> to vector<64x1xi32>
    %21 = vector.broadcast %20 : vector<64x1xi32> to vector<64x64xi32>
    %22 = arith.cmpi eq, %11, %21 : vector<64x64xi32>
    %23 = arith.extui %22 : vector<64x64xi1> to vector<64x64xi32>
    %24 = arith.sitofp %23 : vector<64x64xi32> to vector<64x64xf32>
    %cst_12 = arith.constant dense<0.000000e+00> : vector<64x16xf32>
    %25 = tpu.matmul %24, %1, %cst_12 {dimension_numbers = #tpu.dot_dimension_numbers<[1], [1], [0], [0], [0, 0, 1, 0], [], []>, precision = #tpu.contract_precision<fp32>} : vector<64x64xf32>, vector<16x64xf32>, vector<64x16xf32> -> vector<64x16xf32>
    %26 = arith.maximumf %12, %25 : vector<64x16xf32>
    %cst_13 = arith.constant 0x7F800000 : f32
    %27 = vector.broadcast %cst_13 : f32 to vector<64x64xf32>
    %28 = arith.select %22, %27, %10 : vector<64x64xi1>, vector<64x64xf32>
    %c1_i32 = arith.constant 1 : i32
    %cst_14 = arith.constant dense<0x7F800000> : vector<64xf32>
    %29 = vector.multi_reduction <minimumf>, %28, %cst_14 [1] : vector<64x64xf32> to vector<64xf32>
    %30 = vector.shape_cast %29 : vector<64xf32> to vector<64x1xf32>
    %31 = vector.broadcast %30 : vector<64x1xf32> to vector<64x64xf32>
    %32 = arith.cmpf oeq, %28, %31 : vector<64x64xf32>
    %c64_i32_15 = arith.constant 64 : i32
    %33 = vector.broadcast %c64_i32_15 : i32 to vector<64x64xi32>
    %34 = arith.select %32, %11, %33 : vector<64x64xi1>, vector<64x64xi32>
    %cst_16 = arith.constant dense<2147483647> : vector<64xi32>
    %35 = vector.multi_reduction <minsi>, %34, %cst_16 [1] : vector<64x64xi32> to vector<64xi32>
    %36 = vector.shape_cast %35 : vector<64xi32> to vector<64x1xi32>
    %37 = vector.broadcast %36 : vector<64x1xi32> to vector<64x64xi32>
    %38 = arith.cmpi eq, %11, %37 : vector<64x64xi32>
    %39 = arith.extui %38 : vector<64x64xi1> to vector<64x64xi32>
    %40 = arith.sitofp %39 : vector<64x64xi32> to vector<64x64xf32>
    %cst_17 = arith.constant dense<0.000000e+00> : vector<64x16xf32>
    %41 = tpu.matmul %40, %1, %cst_17 {dimension_numbers = #tpu.dot_dimension_numbers<[1], [1], [0], [0], [0, 0, 1, 0], [], []>, precision = #tpu.contract_precision<fp32>} : vector<64x64xf32>, vector<16x64xf32>, vector<64x16xf32> -> vector<64x16xf32>
    %42 = arith.maximumf %26, %41 : vector<64x16xf32>
    %cst_18 = arith.constant 0x7F800000 : f32
    %43 = vector.broadcast %cst_18 : f32 to vector<64x64xf32>
    %44 = arith.select %38, %43, %28 : vector<64x64xi1>, vector<64x64xf32>
    %c2_i32 = arith.constant 2 : i32
    %cst_19 = arith.constant dense<0x7F800000> : vector<64xf32>
    %45 = vector.multi_reduction <minimumf>, %44, %cst_19 [1] : vector<64x64xf32> to vector<64xf32>
    %46 = vector.shape_cast %45 : vector<64xf32> to vector<64x1xf32>
    %47 = vector.broadcast %46 : vector<64x1xf32> to vector<64x64xf32>
    %48 = arith.cmpf oeq, %44, %47 : vector<64x64xf32>
    %c64_i32_20 = arith.constant 64 : i32
    %49 = vector.broadcast %c64_i32_20 : i32 to vector<64x64xi32>
    %50 = arith.select %48, %11, %49 : vector<64x64xi1>, vector<64x64xi32>
    %cst_21 = arith.constant dense<2147483647> : vector<64xi32>
    %51 = vector.multi_reduction <minsi>, %50, %cst_21 [1] : vector<64x64xi32> to vector<64xi32>
    %52 = vector.shape_cast %51 : vector<64xi32> to vector<64x1xi32>
    %53 = vector.broadcast %52 : vector<64x1xi32> to vector<64x64xi32>
    %54 = arith.cmpi eq, %11, %53 : vector<64x64xi32>
    %55 = arith.extui %54 : vector<64x64xi1> to vector<64x64xi32>
    %56 = arith.sitofp %55 : vector<64x64xi32> to vector<64x64xf32>
    %cst_22 = arith.constant dense<0.000000e+00> : vector<64x16xf32>
    %57 = tpu.matmul %56, %1, %cst_22 {dimension_numbers = #tpu.dot_dimension_numbers<[1], [1], [0], [0], [0, 0, 1, 0], [], []>, precision = #tpu.contract_precision<fp32>} : vector<64x64xf32>, vector<16x64xf32>, vector<64x16xf32> -> vector<64x16xf32>
    %58 = arith.maximumf %42, %57 : vector<64x16xf32>
    %cst_23 = arith.constant 0x7F800000 : f32
    %59 = vector.broadcast %cst_23 : f32 to vector<64x64xf32>
    %60 = arith.select %54, %59, %44 : vector<64x64xi1>, vector<64x64xf32>
    %c3_i32 = arith.constant 3 : i32
    %cst_24 = arith.constant dense<0x7F800000> : vector<64xf32>
    %61 = vector.multi_reduction <minimumf>, %60, %cst_24 [1] : vector<64x64xf32> to vector<64xf32>
    %62 = vector.shape_cast %61 : vector<64xf32> to vector<64x1xf32>
    %63 = vector.broadcast %62 : vector<64x1xf32> to vector<64x64xf32>
    %64 = arith.cmpf oeq, %60, %63 : vector<64x64xf32>
    %c64_i32_25 = arith.constant 64 : i32
    %65 = vector.broadcast %c64_i32_25 : i32 to vector<64x64xi32>
    %66 = arith.select %64, %11, %65 : vector<64x64xi1>, vector<64x64xi32>
    %cst_26 = arith.constant dense<2147483647> : vector<64xi32>
    %67 = vector.multi_reduction <minsi>, %66, %cst_26 [1] : vector<64x64xi32> to vector<64xi32>
    %68 = vector.shape_cast %67 : vector<64xi32> to vector<64x1xi32>
    %69 = vector.broadcast %68 : vector<64x1xi32> to vector<64x64xi32>
    %70 = arith.cmpi eq, %11, %69 : vector<64x64xi32>
    %71 = arith.extui %70 : vector<64x64xi1> to vector<64x64xi32>
    %72 = arith.sitofp %71 : vector<64x64xi32> to vector<64x64xf32>
    %cst_27 = arith.constant dense<0.000000e+00> : vector<64x16xf32>
    %73 = tpu.matmul %72, %1, %cst_27 {dimension_numbers = #tpu.dot_dimension_numbers<[1], [1], [0], [0], [0, 0, 1, 0], [], []>, precision = #tpu.contract_precision<fp32>} : vector<64x64xf32>, vector<16x64xf32>, vector<64x16xf32> -> vector<64x16xf32>
    %74 = arith.maximumf %58, %73 : vector<64x16xf32>
    %cst_28 = arith.constant 0x7F800000 : f32
    %75 = vector.broadcast %cst_28 : f32 to vector<64x64xf32>
    %76 = arith.select %70, %75, %60 : vector<64x64xi1>, vector<64x64xf32>
    %c4_i32 = arith.constant 4 : i32
    %cst_29 = arith.constant dense<0x7F800000> : vector<64xf32>
    %77 = vector.multi_reduction <minimumf>, %76, %cst_29 [1] : vector<64x64xf32> to vector<64xf32>
    %78 = vector.shape_cast %77 : vector<64xf32> to vector<64x1xf32>
    %79 = vector.broadcast %78 : vector<64x1xf32> to vector<64x64xf32>
    %80 = arith.cmpf oeq, %76, %79 : vector<64x64xf32>
    %c64_i32_30 = arith.constant 64 : i32
    %81 = vector.broadcast %c64_i32_30 : i32 to vector<64x64xi32>
    %82 = arith.select %80, %11, %81 : vector<64x64xi1>, vector<64x64xi32>
    %cst_31 = arith.constant dense<2147483647> : vector<64xi32>
    %83 = vector.multi_reduction <minsi>, %82, %cst_31 [1] : vector<64x64xi32> to vector<64xi32>
    %84 = vector.shape_cast %83 : vector<64xi32> to vector<64x1xi32>
    %85 = vector.broadcast %84 : vector<64x1xi32> to vector<64x64xi32>
    %86 = arith.cmpi eq, %11, %85 : vector<64x64xi32>
    %87 = arith.extui %86 : vector<64x64xi1> to vector<64x64xi32>
    %88 = arith.sitofp %87 : vector<64x64xi32> to vector<64x64xf32>
    %cst_32 = arith.constant dense<0.000000e+00> : vector<64x16xf32>
    %89 = tpu.matmul %88, %1, %cst_32 {dimension_numbers = #tpu.dot_dimension_numbers<[1], [1], [0], [0], [0, 0, 1, 0], [], []>, precision = #tpu.contract_precision<fp32>} : vector<64x64xf32>, vector<16x64xf32>, vector<64x16xf32> -> vector<64x16xf32>
    %90 = arith.maximumf %74, %89 : vector<64x16xf32>
    %cst_33 = arith.constant 0x7F800000 : f32
    %91 = vector.broadcast %cst_33 : f32 to vector<64x64xf32>
    %92 = arith.select %86, %91, %76 : vector<64x64xi1>, vector<64x64xf32>
    %c5_i32 = arith.constant 5 : i32
    %cst_34 = arith.constant dense<0x7F800000> : vector<64xf32>
    %93 = vector.multi_reduction <minimumf>, %92, %cst_34 [1] : vector<64x64xf32> to vector<64xf32>
    %94 = vector.shape_cast %93 : vector<64xf32> to vector<64x1xf32>
    %95 = vector.broadcast %94 : vector<64x1xf32> to vector<64x64xf32>
    %96 = arith.cmpf oeq, %92, %95 : vector<64x64xf32>
    %c64_i32_35 = arith.constant 64 : i32
    %97 = vector.broadcast %c64_i32_35 : i32 to vector<64x64xi32>
    %98 = arith.select %96, %11, %97 : vector<64x64xi1>, vector<64x64xi32>
    %cst_36 = arith.constant dense<2147483647> : vector<64xi32>
    %99 = vector.multi_reduction <minsi>, %98, %cst_36 [1] : vector<64x64xi32> to vector<64xi32>
    %100 = vector.shape_cast %99 : vector<64xi32> to vector<64x1xi32>
    %101 = vector.broadcast %100 : vector<64x1xi32> to vector<64x64xi32>
    %102 = arith.cmpi eq, %11, %101 : vector<64x64xi32>
    %103 = arith.extui %102 : vector<64x64xi1> to vector<64x64xi32>
    %104 = arith.sitofp %103 : vector<64x64xi32> to vector<64x64xf32>
    %cst_37 = arith.constant dense<0.000000e+00> : vector<64x16xf32>
    %105 = tpu.matmul %104, %1, %cst_37 {dimension_numbers = #tpu.dot_dimension_numbers<[1], [1], [0], [0], [0, 0, 1, 0], [], []>, precision = #tpu.contract_precision<fp32>} : vector<64x64xf32>, vector<16x64xf32>, vector<64x16xf32> -> vector<64x16xf32>
    %106 = arith.maximumf %90, %105 : vector<64x16xf32>
    %cst_38 = arith.constant 0x7F800000 : f32
    %107 = vector.broadcast %cst_38 : f32 to vector<64x64xf32>
    %108 = arith.select %102, %107, %92 : vector<64x64xi1>, vector<64x64xf32>
    %c6_i32 = arith.constant 6 : i32
    %cst_39 = arith.constant dense<0x7F800000> : vector<64xf32>
    %109 = vector.multi_reduction <minimumf>, %108, %cst_39 [1] : vector<64x64xf32> to vector<64xf32>
    %110 = vector.shape_cast %109 : vector<64xf32> to vector<64x1xf32>
    %111 = vector.broadcast %110 : vector<64x1xf32> to vector<64x64xf32>
    %112 = arith.cmpf oeq, %108, %111 : vector<64x64xf32>
    %c64_i32_40 = arith.constant 64 : i32
    %113 = vector.broadcast %c64_i32_40 : i32 to vector<64x64xi32>
    %114 = arith.select %112, %11, %113 : vector<64x64xi1>, vector<64x64xi32>
    %cst_41 = arith.constant dense<2147483647> : vector<64xi32>
    %115 = vector.multi_reduction <minsi>, %114, %cst_41 [1] : vector<64x64xi32> to vector<64xi32>
    %116 = vector.shape_cast %115 : vector<64xi32> to vector<64x1xi32>
    %117 = vector.broadcast %116 : vector<64x1xi32> to vector<64x64xi32>
    %118 = arith.cmpi eq, %11, %117 : vector<64x64xi32>
    %119 = arith.extui %118 : vector<64x64xi1> to vector<64x64xi32>
    %120 = arith.sitofp %119 : vector<64x64xi32> to vector<64x64xf32>
    %cst_42 = arith.constant dense<0.000000e+00> : vector<64x16xf32>
    %121 = tpu.matmul %120, %1, %cst_42 {dimension_numbers = #tpu.dot_dimension_numbers<[1], [1], [0], [0], [0, 0, 1, 0], [], []>, precision = #tpu.contract_precision<fp32>} : vector<64x64xf32>, vector<16x64xf32>, vector<64x16xf32> -> vector<64x16xf32>
    %122 = arith.maximumf %106, %121 : vector<64x16xf32>
    %cst_43 = arith.constant 0x7F800000 : f32
    %123 = vector.broadcast %cst_43 : f32 to vector<64x64xf32>
    %124 = arith.select %118, %123, %108 : vector<64x64xi1>, vector<64x64xf32>
    %c7_i32 = arith.constant 7 : i32
    %cst_44 = arith.constant dense<0x7F800000> : vector<64xf32>
    %125 = vector.multi_reduction <minimumf>, %124, %cst_44 [1] : vector<64x64xf32> to vector<64xf32>
    %126 = vector.shape_cast %125 : vector<64xf32> to vector<64x1xf32>
    %127 = vector.broadcast %126 : vector<64x1xf32> to vector<64x64xf32>
    %128 = arith.cmpf oeq, %124, %127 : vector<64x64xf32>
    %c64_i32_45 = arith.constant 64 : i32
    %129 = vector.broadcast %c64_i32_45 : i32 to vector<64x64xi32>
    %130 = arith.select %128, %11, %129 : vector<64x64xi1>, vector<64x64xi32>
    %cst_46 = arith.constant dense<2147483647> : vector<64xi32>
    %131 = vector.multi_reduction <minsi>, %130, %cst_46 [1] : vector<64x64xi32> to vector<64xi32>
    %132 = vector.shape_cast %131 : vector<64xi32> to vector<64x1xi32>
    %133 = vector.broadcast %132 : vector<64x1xi32> to vector<64x64xi32>
    %134 = arith.cmpi eq, %11, %133 : vector<64x64xi32>
    %135 = arith.extui %134 : vector<64x64xi1> to vector<64x64xi32>
    %136 = arith.sitofp %135 : vector<64x64xi32> to vector<64x64xf32>
    %cst_47 = arith.constant dense<0.000000e+00> : vector<64x16xf32>
    %137 = tpu.matmul %136, %1, %cst_47 {dimension_numbers = #tpu.dot_dimension_numbers<[1], [1], [0], [0], [0, 0, 1, 0], [], []>, precision = #tpu.contract_precision<fp32>} : vector<64x64xf32>, vector<16x64xf32>, vector<64x16xf32> -> vector<64x16xf32>
    %138 = arith.maximumf %122, %137 : vector<64x16xf32>
    %cst_48 = arith.constant 0x7F800000 : f32
    %139 = vector.broadcast %cst_48 : f32 to vector<64x64xf32>
    %140 = arith.select %134, %139, %124 : vector<64x64xi1>, vector<64x64xf32>
    %c8_i32 = arith.constant 8 : i32
    %cst_49 = arith.constant dense<0x7F800000> : vector<64xf32>
    %141 = vector.multi_reduction <minimumf>, %140, %cst_49 [1] : vector<64x64xf32> to vector<64xf32>
    %142 = vector.shape_cast %141 : vector<64xf32> to vector<64x1xf32>
    %143 = vector.broadcast %142 : vector<64x1xf32> to vector<64x64xf32>
    %144 = arith.cmpf oeq, %140, %143 : vector<64x64xf32>
    %c64_i32_50 = arith.constant 64 : i32
    %145 = vector.broadcast %c64_i32_50 : i32 to vector<64x64xi32>
    %146 = arith.select %144, %11, %145 : vector<64x64xi1>, vector<64x64xi32>
    %cst_51 = arith.constant dense<2147483647> : vector<64xi32>
    %147 = vector.multi_reduction <minsi>, %146, %cst_51 [1] : vector<64x64xi32> to vector<64xi32>
    %148 = vector.shape_cast %147 : vector<64xi32> to vector<64x1xi32>
    %149 = vector.broadcast %148 : vector<64x1xi32> to vector<64x64xi32>
    %150 = arith.cmpi eq, %11, %149 : vector<64x64xi32>
    %151 = arith.extui %150 : vector<64x64xi1> to vector<64x64xi32>
    %152 = arith.sitofp %151 : vector<64x64xi32> to vector<64x64xf32>
    %cst_52 = arith.constant dense<0.000000e+00> : vector<64x16xf32>
    %153 = tpu.matmul %152, %1, %cst_52 {dimension_numbers = #tpu.dot_dimension_numbers<[1], [1], [0], [0], [0, 0, 1, 0], [], []>, precision = #tpu.contract_precision<fp32>} : vector<64x64xf32>, vector<16x64xf32>, vector<64x16xf32> -> vector<64x16xf32>
    %154 = arith.maximumf %138, %153 : vector<64x16xf32>
    %cst_53 = arith.constant 0x7F800000 : f32
    %155 = vector.broadcast %cst_53 : f32 to vector<64x64xf32>
    %156 = arith.select %150, %155, %140 : vector<64x64xi1>, vector<64x64xf32>
    %c9_i32 = arith.constant 9 : i32
    %cst_54 = arith.constant dense<0x7F800000> : vector<64xf32>
    %157 = vector.multi_reduction <minimumf>, %156, %cst_54 [1] : vector<64x64xf32> to vector<64xf32>
    %158 = vector.shape_cast %157 : vector<64xf32> to vector<64x1xf32>
    %159 = vector.broadcast %158 : vector<64x1xf32> to vector<64x64xf32>
    %160 = arith.cmpf oeq, %156, %159 : vector<64x64xf32>
    %c64_i32_55 = arith.constant 64 : i32
    %161 = vector.broadcast %c64_i32_55 : i32 to vector<64x64xi32>
    %162 = arith.select %160, %11, %161 : vector<64x64xi1>, vector<64x64xi32>
    %cst_56 = arith.constant dense<2147483647> : vector<64xi32>
    %163 = vector.multi_reduction <minsi>, %162, %cst_56 [1] : vector<64x64xi32> to vector<64xi32>
    %164 = vector.shape_cast %163 : vector<64xi32> to vector<64x1xi32>
    %165 = vector.broadcast %164 : vector<64x1xi32> to vector<64x64xi32>
    %166 = arith.cmpi eq, %11, %165 : vector<64x64xi32>
    %167 = arith.extui %166 : vector<64x64xi1> to vector<64x64xi32>
    %168 = arith.sitofp %167 : vector<64x64xi32> to vector<64x64xf32>
    %cst_57 = arith.constant dense<0.000000e+00> : vector<64x16xf32>
    %169 = tpu.matmul %168, %1, %cst_57 {dimension_numbers = #tpu.dot_dimension_numbers<[1], [1], [0], [0], [0, 0, 1, 0], [], []>, precision = #tpu.contract_precision<fp32>} : vector<64x64xf32>, vector<16x64xf32>, vector<64x16xf32> -> vector<64x16xf32>
    %170 = arith.maximumf %154, %169 : vector<64x16xf32>
    %cst_58 = arith.constant 0x7F800000 : f32
    %171 = vector.broadcast %cst_58 : f32 to vector<64x64xf32>
    %172 = arith.select %166, %171, %156 : vector<64x64xi1>, vector<64x64xf32>
    %c10_i32 = arith.constant 10 : i32
    %cst_59 = arith.constant dense<0x7F800000> : vector<64xf32>
    %173 = vector.multi_reduction <minimumf>, %172, %cst_59 [1] : vector<64x64xf32> to vector<64xf32>
    %174 = vector.shape_cast %173 : vector<64xf32> to vector<64x1xf32>
    %175 = vector.broadcast %174 : vector<64x1xf32> to vector<64x64xf32>
    %176 = arith.cmpf oeq, %172, %175 : vector<64x64xf32>
    %c64_i32_60 = arith.constant 64 : i32
    %177 = vector.broadcast %c64_i32_60 : i32 to vector<64x64xi32>
    %178 = arith.select %176, %11, %177 : vector<64x64xi1>, vector<64x64xi32>
    %cst_61 = arith.constant dense<2147483647> : vector<64xi32>
    %179 = vector.multi_reduction <minsi>, %178, %cst_61 [1] : vector<64x64xi32> to vector<64xi32>
    %180 = vector.shape_cast %179 : vector<64xi32> to vector<64x1xi32>
    %181 = vector.broadcast %180 : vector<64x1xi32> to vector<64x64xi32>
    %182 = arith.cmpi eq, %11, %181 : vector<64x64xi32>
    %183 = arith.extui %182 : vector<64x64xi1> to vector<64x64xi32>
    %184 = arith.sitofp %183 : vector<64x64xi32> to vector<64x64xf32>
    %cst_62 = arith.constant dense<0.000000e+00> : vector<64x16xf32>
    %185 = tpu.matmul %184, %1, %cst_62 {dimension_numbers = #tpu.dot_dimension_numbers<[1], [1], [0], [0], [0, 0, 1, 0], [], []>, precision = #tpu.contract_precision<fp32>} : vector<64x64xf32>, vector<16x64xf32>, vector<64x16xf32> -> vector<64x16xf32>
    %186 = arith.maximumf %170, %185 : vector<64x16xf32>
    %cst_63 = arith.constant 0x7F800000 : f32
    %187 = vector.broadcast %cst_63 : f32 to vector<64x64xf32>
    %188 = arith.select %182, %187, %172 : vector<64x64xi1>, vector<64x64xf32>
    %c11_i32 = arith.constant 11 : i32
    %cst_64 = arith.constant dense<0x7F800000> : vector<64xf32>
    %189 = vector.multi_reduction <minimumf>, %188, %cst_64 [1] : vector<64x64xf32> to vector<64xf32>
    %190 = vector.shape_cast %189 : vector<64xf32> to vector<64x1xf32>
    %191 = vector.broadcast %190 : vector<64x1xf32> to vector<64x64xf32>
    %192 = arith.cmpf oeq, %188, %191 : vector<64x64xf32>
    %c64_i32_65 = arith.constant 64 : i32
    %193 = vector.broadcast %c64_i32_65 : i32 to vector<64x64xi32>
    %194 = arith.select %192, %11, %193 : vector<64x64xi1>, vector<64x64xi32>
    %cst_66 = arith.constant dense<2147483647> : vector<64xi32>
    %195 = vector.multi_reduction <minsi>, %194, %cst_66 [1] : vector<64x64xi32> to vector<64xi32>
    %196 = vector.shape_cast %195 : vector<64xi32> to vector<64x1xi32>
    %197 = vector.broadcast %196 : vector<64x1xi32> to vector<64x64xi32>
    %198 = arith.cmpi eq, %11, %197 : vector<64x64xi32>
    %199 = arith.extui %198 : vector<64x64xi1> to vector<64x64xi32>
    %200 = arith.sitofp %199 : vector<64x64xi32> to vector<64x64xf32>
    %cst_67 = arith.constant dense<0.000000e+00> : vector<64x16xf32>
    %201 = tpu.matmul %200, %1, %cst_67 {dimension_numbers = #tpu.dot_dimension_numbers<[1], [1], [0], [0], [0, 0, 1, 0], [], []>, precision = #tpu.contract_precision<fp32>} : vector<64x64xf32>, vector<16x64xf32>, vector<64x16xf32> -> vector<64x16xf32>
    %202 = arith.maximumf %186, %201 : vector<64x16xf32>
    %cst_68 = arith.constant 0x7F800000 : f32
    %203 = vector.broadcast %cst_68 : f32 to vector<64x64xf32>
    %204 = arith.select %198, %203, %188 : vector<64x64xi1>, vector<64x64xf32>
    %c12_i32 = arith.constant 12 : i32
    %cst_69 = arith.constant dense<0x7F800000> : vector<64xf32>
    %205 = vector.multi_reduction <minimumf>, %204, %cst_69 [1] : vector<64x64xf32> to vector<64xf32>
    %206 = vector.shape_cast %205 : vector<64xf32> to vector<64x1xf32>
    %207 = vector.broadcast %206 : vector<64x1xf32> to vector<64x64xf32>
    %208 = arith.cmpf oeq, %204, %207 : vector<64x64xf32>
    %c64_i32_70 = arith.constant 64 : i32
    %209 = vector.broadcast %c64_i32_70 : i32 to vector<64x64xi32>
    %210 = arith.select %208, %11, %209 : vector<64x64xi1>, vector<64x64xi32>
    %cst_71 = arith.constant dense<2147483647> : vector<64xi32>
    %211 = vector.multi_reduction <minsi>, %210, %cst_71 [1] : vector<64x64xi32> to vector<64xi32>
    %212 = vector.shape_cast %211 : vector<64xi32> to vector<64x1xi32>
    %213 = vector.broadcast %212 : vector<64x1xi32> to vector<64x64xi32>
    %214 = arith.cmpi eq, %11, %213 : vector<64x64xi32>
    %215 = arith.extui %214 : vector<64x64xi1> to vector<64x64xi32>
    %216 = arith.sitofp %215 : vector<64x64xi32> to vector<64x64xf32>
    %cst_72 = arith.constant dense<0.000000e+00> : vector<64x16xf32>
    %217 = tpu.matmul %216, %1, %cst_72 {dimension_numbers = #tpu.dot_dimension_numbers<[1], [1], [0], [0], [0, 0, 1, 0], [], []>, precision = #tpu.contract_precision<fp32>} : vector<64x64xf32>, vector<16x64xf32>, vector<64x16xf32> -> vector<64x16xf32>
    %218 = arith.maximumf %202, %217 : vector<64x16xf32>
    %cst_73 = arith.constant 0x7F800000 : f32
    %219 = vector.broadcast %cst_73 : f32 to vector<64x64xf32>
    %220 = arith.select %214, %219, %204 : vector<64x64xi1>, vector<64x64xf32>
    %c13_i32 = arith.constant 13 : i32
    %cst_74 = arith.constant dense<0x7F800000> : vector<64xf32>
    %221 = vector.multi_reduction <minimumf>, %220, %cst_74 [1] : vector<64x64xf32> to vector<64xf32>
    %222 = vector.shape_cast %221 : vector<64xf32> to vector<64x1xf32>
    %223 = vector.broadcast %222 : vector<64x1xf32> to vector<64x64xf32>
    %224 = arith.cmpf oeq, %220, %223 : vector<64x64xf32>
    %c64_i32_75 = arith.constant 64 : i32
    %225 = vector.broadcast %c64_i32_75 : i32 to vector<64x64xi32>
    %226 = arith.select %224, %11, %225 : vector<64x64xi1>, vector<64x64xi32>
    %cst_76 = arith.constant dense<2147483647> : vector<64xi32>
    %227 = vector.multi_reduction <minsi>, %226, %cst_76 [1] : vector<64x64xi32> to vector<64xi32>
    %228 = vector.shape_cast %227 : vector<64xi32> to vector<64x1xi32>
    %229 = vector.broadcast %228 : vector<64x1xi32> to vector<64x64xi32>
    %230 = arith.cmpi eq, %11, %229 : vector<64x64xi32>
    %231 = arith.extui %230 : vector<64x64xi1> to vector<64x64xi32>
    %232 = arith.sitofp %231 : vector<64x64xi32> to vector<64x64xf32>
    %cst_77 = arith.constant dense<0.000000e+00> : vector<64x16xf32>
    %233 = tpu.matmul %232, %1, %cst_77 {dimension_numbers = #tpu.dot_dimension_numbers<[1], [1], [0], [0], [0, 0, 1, 0], [], []>, precision = #tpu.contract_precision<fp32>} : vector<64x64xf32>, vector<16x64xf32>, vector<64x16xf32> -> vector<64x16xf32>
    %234 = arith.maximumf %218, %233 : vector<64x16xf32>
    %cst_78 = arith.constant 0x7F800000 : f32
    %235 = vector.broadcast %cst_78 : f32 to vector<64x64xf32>
    %236 = arith.select %230, %235, %220 : vector<64x64xi1>, vector<64x64xf32>
    %c14_i32 = arith.constant 14 : i32
    %cst_79 = arith.constant dense<0x7F800000> : vector<64xf32>
    %237 = vector.multi_reduction <minimumf>, %236, %cst_79 [1] : vector<64x64xf32> to vector<64xf32>
    %238 = vector.shape_cast %237 : vector<64xf32> to vector<64x1xf32>
    %239 = vector.broadcast %238 : vector<64x1xf32> to vector<64x64xf32>
    %240 = arith.cmpf oeq, %236, %239 : vector<64x64xf32>
    %c64_i32_80 = arith.constant 64 : i32
    %241 = vector.broadcast %c64_i32_80 : i32 to vector<64x64xi32>
    %242 = arith.select %240, %11, %241 : vector<64x64xi1>, vector<64x64xi32>
    %cst_81 = arith.constant dense<2147483647> : vector<64xi32>
    %243 = vector.multi_reduction <minsi>, %242, %cst_81 [1] : vector<64x64xi32> to vector<64xi32>
    %244 = vector.shape_cast %243 : vector<64xi32> to vector<64x1xi32>
    %245 = vector.broadcast %244 : vector<64x1xi32> to vector<64x64xi32>
    %246 = arith.cmpi eq, %11, %245 : vector<64x64xi32>
    %247 = arith.extui %246 : vector<64x64xi1> to vector<64x64xi32>
    %248 = arith.sitofp %247 : vector<64x64xi32> to vector<64x64xf32>
    %cst_82 = arith.constant dense<0.000000e+00> : vector<64x16xf32>
    %249 = tpu.matmul %248, %1, %cst_82 {dimension_numbers = #tpu.dot_dimension_numbers<[1], [1], [0], [0], [0, 0, 1, 0], [], []>, precision = #tpu.contract_precision<fp32>} : vector<64x64xf32>, vector<16x64xf32>, vector<64x16xf32> -> vector<64x16xf32>
    %250 = arith.maximumf %234, %249 : vector<64x16xf32>
    %cst_83 = arith.constant 0x7F800000 : f32
    %251 = vector.broadcast %cst_83 : f32 to vector<64x64xf32>
    %252 = arith.select %246, %251, %236 : vector<64x64xi1>, vector<64x64xf32>
    %c15_i32 = arith.constant 15 : i32
    %cst_84 = arith.constant dense<0x7F800000> : vector<64xf32>
    %253 = vector.multi_reduction <minimumf>, %252, %cst_84 [1] : vector<64x64xf32> to vector<64xf32>
    %254 = vector.shape_cast %253 : vector<64xf32> to vector<64x1xf32>
    %255 = vector.broadcast %254 : vector<64x1xf32> to vector<64x64xf32>
    %256 = arith.cmpf oeq, %252, %255 : vector<64x64xf32>
    %c64_i32_85 = arith.constant 64 : i32
    %257 = vector.broadcast %c64_i32_85 : i32 to vector<64x64xi32>
    %258 = arith.select %256, %11, %257 : vector<64x64xi1>, vector<64x64xi32>
    %cst_86 = arith.constant dense<2147483647> : vector<64xi32>
    %259 = vector.multi_reduction <minsi>, %258, %cst_86 [1] : vector<64x64xi32> to vector<64xi32>
    %260 = vector.shape_cast %259 : vector<64xi32> to vector<64x1xi32>
    %261 = vector.broadcast %260 : vector<64x1xi32> to vector<64x64xi32>
    %262 = arith.cmpi eq, %11, %261 : vector<64x64xi32>
    %263 = arith.extui %262 : vector<64x64xi1> to vector<64x64xi32>
    %264 = arith.sitofp %263 : vector<64x64xi32> to vector<64x64xf32>
    %cst_87 = arith.constant dense<0.000000e+00> : vector<64x16xf32>
    %265 = tpu.matmul %264, %1, %cst_87 {dimension_numbers = #tpu.dot_dimension_numbers<[1], [1], [0], [0], [0, 0, 1, 0], [], []>, precision = #tpu.contract_precision<fp32>} : vector<64x64xf32>, vector<16x64xf32>, vector<64x16xf32> -> vector<64x16xf32>
    %266 = arith.maximumf %250, %265 : vector<64x16xf32>
    %cst_88 = arith.constant 0x7F800000 : f32
    %267 = vector.broadcast %cst_88 : f32 to vector<64x64xf32>
    %268 = arith.select %262, %267, %252 : vector<64x64xi1>, vector<64x64xf32>
    %c0_89 = arith.constant 0 : index
    %c0_90 = arith.constant 0 : index
    %269 = vector.load %arg5[%c0_89, %c0_90] : memref<16x128xf32, #tpu.memory_space<vmem>>, vector<16x128xf32>
    %cst_91 = arith.constant dense<0.000000e+00> : vector<64x128xf32>
    %270 = tpu.matmul %266, %269, %cst_91 {dimension_numbers = #tpu.dot_dimension_numbers<[1], [0], [0], [1], [0, 0, 1, 1], [], []>, precision = #tpu.contract_precision<fp32>} : vector<64x16xf32>, vector<16x128xf32>, vector<64x128xf32> -> vector<64x128xf32>
    %c0_92 = arith.constant 0 : index
    %c0_93 = arith.constant 0 : index
    %271 = vector.load %arg6[%c0_92, %c0_93] : memref<1x128xf32, #tpu.memory_space<vmem>>, vector<1x128xf32>
    %272 = vector.broadcast %271 : vector<1x128xf32> to vector<64x128xf32>
    %273 = arith.addf %270, %272 : vector<64x128xf32>
    %cst_94 = arith.constant 0.000000e+00 : f32
    %274 = vector.broadcast %cst_94 : f32 to vector<64x128xf32>
    %275 = arith.maximumf %273, %274 : vector<64x128xf32>
    %c0_95 = arith.constant 0 : index
    %c0_96 = arith.constant 0 : index
    %c0_97 = arith.constant 0 : index
    %276 = vector.load %arg7[%c0_95, %c0_96, %c0_97] : memref<1x64x128xf32, #tpu.memory_space<vmem>>, vector<1x64x128xf32>
    %277 = vector.shape_cast %276 : vector<1x64x128xf32> to vector<64x128xf32>
    %278 = vector.shape_cast %275 : vector<64x128xf32> to vector<1x64x128xf32>
    tpu.vector_store %arg7[%c0_95, %c0_96, %c0_97], %278 {strides = array<i32>} : memref<1x64x128xf32, #tpu.memory_space<vmem>>, vector<1x64x128xf32>,
    return
  }
  func.func @transform_0(%arg0: i32, %arg1: i32) -> (i32, i32, i32) {
    %c0_i32 = arith.constant 0 : i32
    %c0_i32_0 = arith.constant 0 : i32
    %c0_i32_1 = arith.constant 0 : i32
    return %arg0, %c0_i32, %c0_i32_0 : i32, i32, i32
  }
  func.func @transform_1(%arg0: i32, %arg1: i32) -> (i32, i32, i32) {
    %c0_i32 = arith.constant 0 : i32
    %c0_i32_0 = arith.constant 0 : i32
    return %arg0, %c0_i32, %arg1 : i32, i32, i32
  }
  func.func @transform_2(%arg0: i32, %arg1: i32) -> (i32, i32, i32) {
    %c0_i32 = arith.constant 0 : i32
    %c0_i32_0 = arith.constant 0 : i32
    %c0_i32_1 = arith.constant 0 : i32
    return %arg0, %c0_i32, %c0_i32_0 : i32, i32, i32
  }
  func.func @transform_3(%arg0: i32, %arg1: i32) -> (i32, i32) {
    %c0_i32 = arith.constant 0 : i32
    %c0_i32_0 = arith.constant 0 : i32
    %c0_i32_1 = arith.constant 0 : i32
    return %c0_i32, %c0_i32_0 : i32, i32
  }
  func.func @transform_4(%arg0: i32, %arg1: i32) -> (i32, i32) {
    %c0_i32 = arith.constant 0 : i32
    %c0_i32_0 = arith.constant 0 : i32
    %c0_i32_1 = arith.constant 0 : i32
    return %c0_i32, %c0_i32_0 : i32, i32
  }
  func.func @transform_5(%arg0: i32, %arg1: i32) -> (i32, i32, i32) {
    %c0_i32 = arith.constant 0 : i32
    %c0_i32_0 = arith.constant 0 : i32
    return %arg0, %arg1, %c0_i32 : i32, i32, i32
  }
}

</mosaic_0001>

<bundles_post_ra>
// kernel: tpu_custom_call.1
= control target key start
LH: loop header
LB: loop body
LE: loop exit
PB: predicated region body
PF: predicated region fallthrough
CT: control target
= control target key end

     0   :  { %s27635_s0 = inlined_call_operand.hbm [shape: f32[2,16,64], index: 0, kind: input, shape index: {}]   ;;  %s27636_s1 = inlined_call_operand.hbm [shape: f32[2,16,64], index: 1, kind: input, shape index: {}]   ;;  %s27637_s2 = inlined_call_operand.vmem [shape: f32[2,1,64], index: 2, kind: input, shape index: {}]   ;;  %s27638_s3 = inlined_call_operand.hbm [shape: f32[16,128], index: 3, kind: input, shape index: {}]   ;;  %s27639_s4 = inlined_call_operand.vmem [shape: f32[1,128], index: 4, kind: input, shape index: {}]   ;;  %s27640_s5 = inlined_call_operand.hbm [shape: f32[2,64,128], index: 5, kind: output, shape index: {}]  }
   0x1   :  { %27652 = sst [smem:[#allocation15_spill]] %s27635_s0 }
   0x2   :  { %27653 = sst [smem:[#allocation16_spill]] %s27638_s3 }
   0x3   :  { %10 = vsyncpa [#allocation3], 0 }
   0x4   :  { %12 = vsyncpa [#allocation3 + $0x1], 0 }
   0x5   :  { %13 = vsyncpa [#allocation6], 0 }
   0x6   :  { %15 = vsyncpa [#allocation6 + $0x1], 0 }
   0x7   :  { %16 = vsyncpa [#allocation4], 0 }
   0x8   :  { %18 = vsyncpa [#allocation4 + $0x1], 0  ;;  %s22664_s18 = smov 0   ;;  %s22666_s19 = smov 0  }
   0x9   :  { %s22668_s20 = smov 0   ;;  %s22670_s21 = smov 0  }
   0xa   :  { %s22672_s22 = smov 0   ;;  %s22674_s23 = smov 0  }
   0xb LB: > { %27654 = sst [smem:[#allocation13_spill]] %s22619_s22  ;;  %s22695_s24 = sadd.s32 4294967295, %s22623_s23   ;;  %s22623_s23 = sphi %s22674_s23, %s24_s23   ;;  %s22619_s22 = sphi %s22672_s22, %s27731_s22   ;;  %s22615_s21 = sphi %s22670_s21, %s27730_s21   ;;  %s22611_s20 = sphi %s22668_s20, %s27734_s20   ;;  %s22607_s19 = sphi %s22666_s19, %s27733_s19   ;;  %s22603_s18 = sphi %s22664_s18, %s27732_s18  }
   0xc   : > { %s17857_s25 = sadd.s32 4294967294, %s22623_s23   ;;  %p56_p0 = scmp.ne.s32.totalorder %s22607_s19, %s22603_s18 }
   0xd   : > { %p27641_p1 = scmp.eq.s32.totalorder %s22695_s24, 0  ;;  %p184_p3 = scmp.eq.s32.totalorder %s17857_s25, 1 }
   0xe   : > { %p17858_p5 = scmp.ge.s32.totalorder %s22623_s23, 1  ;;  %p191_p7 = scmp.lt.s32.totalorder %s22623_s23, 3 }
   0xf   : > { %p22704_p4 = por %p27641_p1, %p56_p0  ;;  %p22709_p6 = por %p184_p3, %p56_p0 }
  0x10   : > { %p22714_p8 = pnand %p17858_p5, %p191_p7  ;;  %s22625_s29 = smov [#allocation7]  }
  0x11   : > { %s27655_s26 = scalar_select %p22704_p4, 1, 0 }
  0x12   : > { %s27656_s27 = scalar_select %p22709_p6, 1, 0 }
  0x13   : > { %s27657_s28 = scalar_select %p22714_p8, 1, 0 }
  0x14   : > { %s203_s30 = sshll.u32 %s22625_s29, 4  ;;  %p22372_p9 = pneg %p22714_p8  ;;  %s204_s30 = int_to_ptr.vmem [resolvable:$true] %s203_s30 }
  0x15   : > { %s36_s7 = sadd.s32 1, %s22619_s22  ;;  %s27659_s3 = sld [smem:[#allocation16_spill]] }
  0x16   : > { %p22723_p11 = pnand %p22372_p9, %p27641_p1 }
  0x18   : > { %p22447_p13 = pneg %p22723_p11 }
  0x1b   : > { %s22445_s10 = scalar_lea.hbm %s27659_s3, 256 }
  0x1c   : > { %p22446_p12 = scmp.ne.s32.totalorder %s27659_s3, %s22445_s10  ;;  %p22452_p5 = scmp.lt.u32.totalorder %s22445_s10, %s27659_s3 }
  0x1e   : > { %p22448_p0 = pnand %p22447_p13, %p22446_p12 }
  0x20   : > { %p22449_p3 = pneg %p22448_p0 }
  0x22   : > { %p22454_p7 = pnand %p22452_p5, %p22449_p3 }
  0x24   : > { %22457 = shalt.err (!%p22454_p7)
}
  0x25   : > { %s22458_s15 = scalar_lea.vmem %s204_s30, 256  ;;  %p22466_p2 = scmp.lt.s32.totalorder %s204_s30, %s204_s30 }
  0x26   : > { %p22459_p9 = scmp.ne.s32.totalorder %s204_s30, %s22458_s15  ;;  %p22467_p6 = scmp.lt.s32.totalorder %s22458_s15, %s22458_s15 }
  0x28   : > { %p22461_p10 = pnand %p22459_p9, %p22447_p13  ;;  %p22468_p4 = por %p22467_p6, %p22466_p2 }
  0x2a   : > { %p22462_p1 = pneg %p22461_p10 }
  0x2c   : > { %p22469_p8 = pnand %p22468_p4, %p22462_p1 }
  0x2e   : > { %22472 = shalt.err (!%p22469_p8)
}
  0x2f   : > { %s27644_s16 = smov 128   ;;  %s27646_s17 = smov 8  }
  0x30   : > { %22375 = dma.hbm_to_vmem [thread:$0]  (!%p22723_p11), %s27659_s3, 256, %s204_s30, [#allocation6], %s27644_s16, %s27644_s16, %s27646_s17  }
  0x31   : > { %p38_p1 = scmp.ge.s32.totalorder %s36_s7, 2  ;;  %s43_s8 = sadd.s32 1, %s22611_s20 }
  0x32   : > { %p50_p2 = scmp.ne.s32.totalorder %s22611_s20, %s22607_s19  ;;  %p51_p4 = scmp.eq.s32.totalorder %s22623_s23, 0 }
  0x33   : > { %s27736_s7 = smov (%p38_p1, %s36_s7), 0  ;;  %p27662_p8 = scmp.eq.s32.totalorder %s22695_s24, 1 }
  0x34   : > { %27660 = sst [smem:[#allocation14_spill]] %s27736_s7  ;;  %p22753_p6 = por %p51_p4, %p50_p2 }
  0x35   : > { %p22759_p10 = por %p27662_p8, %p50_p2  ;;  %s40_s10 = ssub.s32 %s22619_s22, %s27736_s7 }
  0x36   : > { %p22388_p12 = scmp.lt.s32.totalorder %s22623_s23, 2  ;;  %p41_p11 = scmp.eq.s32.totalorder %s40_s10, 0 }
  0x37   : > { %s220_s30 = sand.u32 1, %s22611_s20   ;;  %s18391_s13 = sshll.u32 %s22619_s22, 8 }
  0x38   : > { %s17861_s11 = sshll.u32 %s220_s30, 4  ;;  %s27664_s0 = sld [smem:[#allocation15_spill]] }
  0x39   : > { %s22768_s12 = scalar_select %p41_p11, %s22611_s20, %s43_s8  }
  0x3a   : > { %s224_s29 = scalar_lea.vmem [#allocation2], %s17861_s11  ;;  %p22780_p13 = pnand %p22388_p12, %p22753_p6 }
  0x3b   : > { %s231_s16 = sshll.u32 %s224_s29, 4  ;;  %s22787_s14 = scalar_lea.hbm %s27636_s1, %s18391_s13  ;;  %s22776_s16 = int_to_ptr.vmem [resolvable:$true] %s231_s16 }
  0x3c   : > { %s245_s15 = scalar_lea.vmem [#allocation5], %s17861_s11  ;;  %s22791_s7 = scalar_lea.sflag [#allocation3], %s220_s30 }
  0x3d   : > { %s22789_s3 = sshll.u32 %s245_s15, 4  ;;  %p22475_p3 = pneg %p22780_p13  ;;  %s22823_s3 = int_to_ptr.vmem [resolvable:$true] %s22789_s3 }
  0x3e   : > { %s22774_s25 = scalar_lea.hbm %s27664_s0, %s18391_s13  ;;  %s22478_s17 = scalar_lea.hbm %s27664_s0, 512 }
  0x3f   : > { %s22473_s29 = scalar_lea.hbm %s22774_s25, 256  ;;  %p22479_p9 = scmp.lt.u32.totalorder %s22774_s25, %s27664_s0 }
  0x40   : > { %p22474_p0 = scmp.ne.s32.totalorder %s22774_s25, %s22473_s29  ;;  %p22480_p1 = scmp.lt.u32.totalorder %s22478_s17, %s22473_s29 }
  0x41   : > { %p22482_p4 = scmp.lt.u32.totalorder %s22473_s29, %s22774_s25 }
  0x42   : > { %p22476_p5 = pnand %p22475_p3, %p22474_p0  ;;  %p22481_p2 = por %p22480_p1, %p22479_p9 }
  0x44   : > { %p22477_p7 = pneg %p22476_p5  ;;  %p22483_p6 = por %p22482_p4, %p22481_p2 }
  0x46   : > { %p22484_p8 = pnand %p22483_p6, %p22477_p7 }
  0x48   : > { %22487 = shalt.err (!%p22484_p8)
}
  0x49   : > { %s22488_s30 = scalar_lea.vmem %s22776_s16, 256  ;;  %s22628_s22 = smov [#allocation2]  }
  0x4a   : > { %p22489_p12 = scmp.ne.s32.totalorder %s22776_s16, %s22488_s30  ;;  %s22493_s11 = sshll.u32 %s22628_s22, 4  ;;  %s22494_s11 = int_to_ptr.vmem [resolvable:$false] %s22493_s11 }
  0x4b   : > { %s22495_s15 = scalar_lea.vmem %s22494_s11, 512  ;;  %p22496_p5 = scmp.lt.s32.totalorder %s22776_s16, %s22494_s11 }
  0x4c   : > { %p22491_p11 = pnand %p22489_p12, %p22475_p3  ;;  %p22497_p9 = scmp.lt.s32.totalorder %s22495_s15, %s22488_s30 }
  0x4e   : > { %p22492_p0 = pneg %p22491_p11  ;;  %p22498_p1 = por %p22497_p9, %p22496_p5 }
  0x50   : > { %p22499_p2 = pnand %p22498_p1, %p22492_p0 }
  0x52   : > { %22502 = shalt.err (!%p22499_p2)
}
  0x53   : > { %s27666_s29 = smov 8   ;;  %s27667_s9 = smov 128  }
  0x54   : > { %22379 = dma.hbm_to_vmem [thread:$0]  (!%p22780_p13), %s22774_s25, 256, %s22776_s16, %s22791_s7, %s27667_s9, %s27667_s9, %s27666_s29  }
  0x55   : > { %s241_s17 = sand.u32 1, %s22623_s23   ;;  %s22503_s13 = scalar_lea.hbm %s22787_s14, 256 }
  0x56   : > { %s22826_s8 = scalar_lea.sflag [#allocation6], %s241_s17  ;;  %p22504_p7 = scmp.ne.s32.totalorder %s22787_s14, %s22503_s13 }
  0x57   : > { %s22508_s11 = scalar_lea.hbm %s27636_s1, 512  ;;  %p22509_p8 = scmp.lt.u32.totalorder %s22787_s14, %s27636_s1 }
  0x58   : > { %p22506_p4 = pnand %p22504_p7, %p22475_p3  ;;  %p22510_p12 = scmp.lt.u32.totalorder %s22508_s11, %s22503_s13 }
  0x59   : > { %p22512_p0 = scmp.lt.u32.totalorder %s22503_s13, %s22787_s14 }
  0x5a   : > { %p22507_p6 = pneg %p22506_p4  ;;  %p22511_p11 = por %p22510_p12, %p22509_p8 }
  0x5c   : > { %p22513_p5 = por %p22512_p0, %p22511_p11 }
  0x5e   : > { %p22514_p9 = pnand %p22513_p5, %p22507_p6 }
  0x60   : > { %22517 = shalt.err (!%p22514_p9)
}
  0x61   : > { %s22518_s7 = scalar_lea.vmem %s22823_s3, 256  ;;  %s22629_s16 = smov [#allocation5]  }
  0x62   : > { %p22519_p1 = scmp.ne.s32.totalorder %s22823_s3, %s22518_s7  ;;  %s22523_s25 = sshll.u32 %s22629_s16, 4  ;;  %s22524_s25 = int_to_ptr.vmem [resolvable:$false] %s22523_s25 }
  0x63   : > { %s22525_s0 = scalar_lea.vmem %s22524_s25, 512  ;;  %p22526_p4 = scmp.lt.s32.totalorder %s22823_s3, %s22524_s25 }
  0x64   : > { %p22521_p2 = pnand %p22519_p1, %p22475_p3  ;;  %p22527_p8 = scmp.lt.s32.totalorder %s22525_s0, %s22518_s7 }
  0x66   : > { %p22522_p7 = pneg %p22521_p2  ;;  %p22528_p12 = por %p22527_p8, %p22526_p4 }
  0x68   : > { %p22529_p11 = pnand %p22528_p12, %p22522_p7 }
  0x6a   : > { %22532 = shalt.err (!%p22529_p11)
}
  0x6b   : > { %22382 = dma.hbm_to_vmem [thread:$0]  (!%p22780_p13), %s22787_s14, 256, %s22823_s3, %s22826_s8, %s27667_s9, %s27667_s9, %s27666_s29  }
  0x6c   : > { %p27668_p3 = scmp.ne.s32.totalorder %s27657_s28, 0 }
  0x6d   : > { %s22858_s17 = sand.u32 (!%p27668_p3), 1, %s22607_s19   ;;  %p27669_p6 = scmp.ne.s32.totalorder (!%p27668_p3), %s27655_s26, 0 }
  0x6e   : > { %271 = sbr.rel (%p27668_p3) target bundleno = 8305 (0x2071), region = 40  ;;  %s17868_s13 = sshll.u32 (!%p27668_p3), %s22858_s17, 4 }
  0x6f   : > { %s274_s30 = scalar_lea.sflag (!%p27668_p3), [#allocation3], %s22858_s17  ;;  %s277_s22 = scalar_lea.vmem (!%p27668_p3), [#allocation2], %s17868_s13 }
  0x75   : > { %22586 = dma.done.wait (%p27669_p6), %s274_s30, 256  }
  0x76   : > { %22588 = vsyncadd (%p27669_p6), %s274_s30, 4294967040  ;;  %s282_s3 = sand.u32 1, %s22695_s24   ;;  %s286_s28 = scalar_lea.vmem [#allocation5], %s17868_s13 }
  0x77   : > { %s283_s10 = scalar_lea.sflag [#allocation6], %s282_s3 }
  0x78   : > { %22590 = dma.done.wait (%p27669_p6), %s283_s10, 256  }
  0x79   : > { %22592 = vsyncadd (%p27669_p6), %s283_s10, 4294967040  ;;  %p27670_p13 = scmp.eq.s32.totalorder %s22695_s24, 0 }
  0x7b   : > { %22594 = dma.done.wait (%p27670_p13), [#allocation6], 256   ;;  %p27671_p0 = pmov %p27670_p13 }
  0x7c   : > { %v331_v0 = vld [vmem:[%s286_s28] sm:$0xff]  ;;  %v332_v1 = vld [vmem:[%s286_s28 + $0x8] sm:$0xff]  ;;  %vm1169_vm0 = vcmask 523264   ;;  %vm368_vm1 = vcmask 130048   ;;  %p325_p5 = scmp.lt.s32.totalorder %s22615_s21, 1  ;;  %s17871_s11 = sshll.u32 %s22858_s17, 6 }
  0x7d   : > { %22596 = vsyncadd (%p27671_p0), [#allocation6], 4294967040  ;;  %v334_v2 = vmul.f32 -2.0, %v331_v0  ;;  %v335_v3 = vmul.f32 -2.0, %v332_v1  ;;  %v329_v4 = vld [vmem:[%s277_s22] sm:$0xff]  ;;  %v330_v5 = vld [vmem:[%s277_s22 + $0x8] sm:$0xff] }
  0x7e   : > { %v394_v6 = vand.u32 4294901760, %v329_v4  ;;  %v397_v7 = vand.u32 4294901760, %v330_v5  ;;  %v1379_v9 = vsel %vm1169_vm0, %v329_v4, 0  ;;  %v1382_v10 = vsel %vm1169_vm0, %v330_v5, 0  ;;  %s326_s24 = scalar_select %p325_p5, %s22615_s21, 1 }
  0x7f   : > { %336 = vxpose.xlu0.b32.start [1/2] (short) (narrow) %v334_v2, 64  ;;  %v1385_v11 = vand.u32 4294901760, %v1379_v9  ;;  %v1388_v12 = vand.u32 4294901760, %v1382_v10  ;;  %s324_s15 = scalar_lea.vmem [#allocation8], %s17871_s11  ;;  %s18393_s16 = sshll.u32 %s22615_s21, 10 }
  0x80   : > { %v22875_v8 = vpack.c.bf16 %v397_v7, %v394_v6  ;;  %v542_v25 = vsub.f32 %v329_v4, %v394_v6  ;;  %v549_v26 = vsub.f32 %v330_v5, %v397_v7  ;;  %s327_s29 = scalar_lea.vmem %s27637_s2, %s326_s24  ;;  %s17729_s7 = sshll.u32 %s324_s15, 4  ;;  %s27581_s7 = int_to_ptr.vmem [resolvable:$true] %s17729_s7 }
  0x81   : > { %v22881_v13 = vpack.c.bf16 %v1388_v12, %v1385_v11  ;;  %v1533_v14 = vsub.f32 %v1379_v9, %v1385_v11  ;;  %v1540_v15 = vsub.f32 %v1382_v10, %v1388_v12  ;;  %s27586_s13 = scalar_lea.hbm %s27640_s5, %s18393_s16  ;;  %s17714_s21 = scalar_lea.sflag [#allocation4], %s22858_s17 }
  0x82   : > { %21203 = vmatprep.subr.bf16.mxu0 %v22875_v8  ;;  %v543_v27 = vand.u32 4294901760, %v542_v25  ;;  %v550_v28 = vand.u32 4294901760, %v549_v26  ;;  %v22892_v34 = vpack.c.bf16 %v549_v26, %v542_v25  ;;  %s22533_s30 = scalar_lea.vmem %s27581_s7, 1024  ;;  %s22631_s22 = smov [#allocation8]  }
  0x83   : > { %337 = vxpose.xlu0.b32.end [2/2] (short) (narrow) %v335_v3, 64  ;;  %21205 = vmatpush3.bf16.msra.mxu0 %v22875_v8  ;;  %v1534_v16 = vand.u32 4294901760, %v1533_v14  ;;  %v1541_v17 = vand.u32 4294901760, %v1540_v15  ;;  %v22883_v18 = vpack.c.bf16 %v1540_v15, %v1533_v14  ;;  %p22534_p9 = scmp.ne.s32.totalorder %s27581_s7, %s22533_s30  ;;  %s22537_s3 = sshll.u32 %s22631_s22, 4  ;;  %s22538_s3 = int_to_ptr.vmem [resolvable:$false] %s22537_s3 }
  0x84   : > { %21227 = vmatprep.subr.bf16.mxu1 %v22881_v13  ;;  %v544_v29 = vsub.f32 %v542_v25, %v543_v27  ;;  %v551_v30 = vsub.f32 %v549_v26, %v550_v28  ;;  %v22894_v35 = vpack.c.bf16 %v550_v28, %v543_v27  ;;  %s22539_s10 = scalar_lea.vmem %s22538_s3, 2048  ;;  %p22540_p7 = scmp.lt.s32.totalorder %s27581_s7, %s22538_s3 }
  0x85   : > { %21229 = vmatpush3.bf16.xpose.msra.mxu1 %v22881_v13  ;;  %v1535_v19 = vsub.f32 %v1533_v14, %v1534_v16  ;;  %v1542_v20 = vsub.f32 %v1540_v15, %v1541_v17  ;;  %v22887_v21 = vpack.c.bf16 %v1541_v17, %v1534_v16  ;;  %p22535_p1 = pnand %p22534_p9, %p22759_p10  ;;  %p22541_p4 = scmp.lt.s32.totalorder %s22539_s10, %s22533_s30 }
  0x86   : > { %v545_v31 = vand.u32 4294901760, %v544_v29  ;;  %v552_v32 = vand.u32 4294901760, %v551_v30 }
  0x87   : > { %v1536_v22 = vand.u32 4294901760, %v1535_v19  ;;  %v1543_v23 = vand.u32 4294901760, %v1542_v20  ;;  %p22536_p2 = pneg %p22535_p1  ;;  %p22542_p8 = por %p22541_p4, %p22540_p7 }
  0x88   : > { %v21206_v33 = vpack.c.bf16 %v552_v32, %v545_v31 }
  0x89   : > { %v22889_v24 = vpack.c.bf16 %v1543_v23, %v1536_v22  ;;  %p22543_p12 = pnand %p22542_p8, %p22536_p2 }
  0x8a   : > { %21207 = vmatprep.subr.bf16.mxu0 %v21206_v33 }
  0x8b   : > { %21231 = vmatprep.subr.bf16.mxu1 %v22889_v24 }
  0xff   : > { %v352_v36 = vpop.trf.xlu0 }
 0x100   : > { %v370_v37 = vsel %vm368_vm1, %v352_v36, 0 }
 0x101   : > { %v22897_v38 = vand.u32 4294901760, %v370_v37 }
 0x103   : > { %v22900_v39 = vsub.f32 %v370_v37, %v22897_v38  ;;  %v353_v40 = vpop.trf.xlu0 }
 0x104   : > { %v373_v41 = vsel %vm368_vm1, %v353_v40, 0 }
 0x105   : > { %v22903_v42 = vand.u32 4294901760, %v373_v41  ;;  %v462_v43 = vand.u32 4294901760, %v22900_v39 }
 0x107   : > { %v22907_v44 = vsub.f32 %v373_v41, %v22903_v42  ;;  %v354_v45 = vpop.trf.xlu0  ;;  %v463_v46 = vsub.f32 %v22900_v39, %v462_v43 }
 0x108   : > { %v376_v47 = vsel %vm368_vm1, %v354_v45, 0 }
 0x109   : > { %v22913_v48 = vand.u32 4294901760, %v376_v47  ;;  %v464_v49 = vand.u32 4294901760, %v463_v46  ;;  %v472_v50 = vand.u32 4294901760, %v22907_v44 }
 0x10b   : > { %v22917_v51 = vsub.f32 %v376_v47, %v22913_v48  ;;  %19478 = vmatprep.mubr.f32.mxu0 %v464_v49  ;;  %v355_v52 = vpop.trf.xlu0  ;;  %v473_v53 = vsub.f32 %v22907_v44, %v472_v50 }
 0x10c   : > { %v379_v54 = vsel %vm368_vm1, %v355_v52, 0 }
 0x10d   : > { %v22923_v55 = vand.u32 4294901760, %v379_v54  ;;  %v474_v56 = vand.u32 4294901760, %v473_v53  ;;  %v482_v57 = vand.u32 4294901760, %v22917_v51 }
 0x10f   : > { %v22927_v58 = vsub.f32 %v379_v54, %v22923_v55  ;;  %v356_v59 = vpop.trf.xlu0  ;;  %19479 = vmatmul.mubr.f32.vlgmr.msra.gmra.mrb[0].mxu0 %v474_v56  ;;  %v483_v60 = vsub.f32 %v22917_v51, %v482_v57 }
 0x110   : > { %v382_v61 = vsel %vm368_vm1, %v356_v59, 0  ;;  %21209 = vmatpush3.bf16.msra.mxu0 %v21206_v33 }
 0x111   : > { %v22933_v62 = vand.u32 4294901760, %v382_v61  ;;  %v484_v63 = vand.u32 4294901760, %v483_v60  ;;  %v492_v0 = vand.u32 4294901760, %v22927_v58  ;;  %21211 = vmatprep.subr.bf16.mxu0 %v22892_v34 }
 0x113   : > { %v501_v1 = vsub.f32 %v382_v61, %v22933_v62  ;;  %v357_v2 = vpop.trf.xlu0  ;;  %19481 = vmatprep.mubr.f32.mxu0 %v484_v63  ;;  %v493_v3 = vsub.f32 %v22927_v58, %v492_v0 }
 0x114   : > { %v385_v4 = vsel %vm368_vm1, %v357_v2, 0 }
 0x115   : > { %v22940_v5 = vand.u32 4294901760, %v385_v4  ;;  %v494_v6 = vand.u32 4294901760, %v493_v3  ;;  %v502_v7 = vand.u32 4294901760, %v501_v1 }
 0x117   : > { %v511_v9 = vsub.f32 %v385_v4, %v22940_v5  ;;  %v358_v10 = vpop.trf.xlu0  ;;  %19482 = vmatmul.mubr.f32.gmra.mrb[2].mxu0 %v494_v6  ;;  %v503_v11 = vsub.f32 %v501_v1, %v502_v7 }
 0x118   : > { %v388_v12 = vsel %vm368_vm1, %v358_v10, 0 }
 0x119   : > { %v22944_v14 = vand.u32 4294901760, %v388_v12  ;;  %v504_v15 = vand.u32 4294901760, %v503_v11  ;;  %v512_v16 = vand.u32 4294901760, %v511_v9 }
 0x11b   : > { %v521_v17 = vsub.f32 %v388_v12, %v22944_v14  ;;  %v359_v19 = vpop.trf.xlu0  ;;  %19484 = vmatprep.mubr.f32.mxu0 %v504_v15  ;;  %v513_v20 = vsub.f32 %v511_v9, %v512_v16 }
 0x11c   : > { %v391_v22 = vsel %vm368_vm1, %v359_v19, 0 }
 0x11d   : > { %v530_v23 = vand.u32 4294901760, %v391_v22  ;;  %v514_v25 = vand.u32 4294901760, %v513_v20  ;;  %v522_v26 = vand.u32 4294901760, %v521_v17 }
 0x11f   : > { %v531_v27 = vsub.f32 %v391_v22, %v530_v23  ;;  %19485 = vmatmul.mubr.f32.gmra.mrb[4].mxu0 %v514_v25  ;;  %v523_v28 = vsub.f32 %v521_v17, %v522_v26 }
 0x121   : > { %v524_v29 = vand.u32 4294901760, %v523_v28  ;;  %v532_v30 = vand.u32 4294901760, %v531_v27 }
 0x123   : > { %19487 = vmatprep.mubr.f32.mxu0 %v524_v29  ;;  %v533_v31 = vsub.f32 %v531_v27, %v532_v30 }
 0x125   : > { %v534_v32 = vand.u32 4294901760, %v533_v31 }
 0x127   : > { %19488 = vmatmul.mubr.f32.gmra.mrb[6].mxu0 %v534_v32 }
 0x128   : > { %19494 = vmatprep.mubr.f32.mxu0 %v22897_v38 }
 0x12b   : > { %19495 = vmatmul.mubr.f32.vlgmr.msra.gmra.mrb[0].mxu0 %v22903_v42 }
 0x12c   : > { %21213 = vmatpush3.bf16.msra.mxu0 %v22892_v34  ;;  %19497 = vmatprep.mubr.f32.mxu0 %v22913_v48 }
 0x12d   : > { %21215 = vmatprep.subr.bf16.mxu0 %v22875_v8 }
 0x12f   : > { %19498 = vmatmul.mubr.f32.gmra.mrb[2].mxu0 %v22923_v55 }
 0x130   : > { %19500 = vmatprep.mubr.f32.mxu0 %v22933_v62 }
 0x133   : > { %19501 = vmatmul.mubr.f32.gmra.mrb[4].mxu0 %v22940_v5 }
 0x134   : > { %19503 = vmatprep.mubr.f32.mxu0 %v22944_v14 }
 0x137   : > { %19504 = vmatmul.mubr.f32.gmra.mrb[6].mxu0 %v530_v23 }
 0x138   : > { %19510 = vmatprep.mubr.f32.mxu0 %v22900_v39 }
 0x13b   : > { %19511 = vmatmul.mubr.f32.vlgmr.msra.gmra.mrb[0].mxu0 %v22907_v44 }
 0x13c   : > { %21217 = vmatpush3.bf16.msra.mxu0 %v22875_v8  ;;  %19513 = vmatprep.mubr.f32.mxu0 %v22917_v51 }
 0x13d   : > { %21219 = vmatprep.subr.bf16.mxu0 %v22894_v35 }
 0x13f   : > { %19514 = vmatmul.mubr.f32.gmra.mrb[2].mxu0 %v22927_v58 }
 0x140   : > { %19516 = vmatprep.mubr.f32.mxu0 %v501_v1 }
 0x143   : > { %19517 = vmatmul.mubr.f32.gmra.mrb[4].mxu0 %v511_v9 }
 0x144   : > { %19519 = vmatprep.mubr.f32.mxu0 %v521_v17 }
 0x147   : > { %19520 = vmatmul.mubr.f32.gmra.mrb[6].mxu0 %v531_v27 }
 0x148   : > { %19526 = vmatprep.mubr.f32.mxu0 %v462_v43 }
 0x14b   : > { %19527 = vmatmul.mubr.f32.vlgmr.msra.gmra.mrb[0].mxu0 %v472_v50 }
 0x14c   : > { %21221 = vmatpush3.bf16.msra.mxu0 %v22894_v35  ;;  %19529 = vmatprep.mubr.f32.mxu0 %v482_v57  ;;  %v1167_v57 = vlaneseq }
 0x14d   : > { %21223 = vmatprep.subr.bf16.mxu0 %v22875_v8 }
 0x14e   : > { %v23026_v58 = vand.u32 127, %v1167_v57 }
 0x14f   : > { %19530 = vmatmul.mubr.f32.gmra.mrb[2].mxu0 %v492_v0 }
 0x150   : > { %19532 = vmatprep.mubr.f32.mxu0 %v502_v7 }
 0x153   : > { %19533 = vmatmul.mubr.f32.gmra.mrb[4].mxu0 %v512_v16 }
 0x154   : > { %19535 = vmatprep.mubr.f32.mxu0 %v522_v26 }
 0x157   : > { %19536 = vmatmul.mubr.f32.gmra.mrb[6].mxu0 %v532_v30 }
 0x158   : > { %19542 = vmatprep.mubr.f32.mxu0 %v22897_v38 }
 0x15b   : > { %19543 = vmatmul.mubr.f32.vlgmr.msra.gmra.mrb[0].mxu0 %v22903_v42 }
 0x15c   : > { %21225 = vmatpush3.bf16.msra.mxu0 %v22875_v8  ;;  %19545 = vmatprep.mubr.f32.mxu0 %v22913_v48  ;;  %v17872_v8 = vld [vmem:[%s327_s29] ss:$0 sm:$0xff] }
 0x15d   : > { %21251 = vmatprep.subr.bf16.mxu0 %v22881_v13 }
 0x15f   : > { %19546 = vmatmul.mubr.f32.gmra.mrb[2].mxu0 %v22923_v55 }
 0x160   : > { %19548 = vmatprep.mubr.f32.mxu0 %v22933_v62 }
 0x163   : > { %19549 = vmatmul.mubr.f32.gmra.mrb[4].mxu0 %v22940_v5 }
 0x164   : > { %19551 = vmatprep.mubr.f32.mxu0 %v22944_v14 }
 0x167   : > { %19552 = vmatmul.mubr.f32.gmra.mrb[6].mxu0 %v530_v23 }
 0x168   : > { %19558 = vmatprep.mubr.f32.mxu0 %v22897_v38 }
 0x16b   : > { %19559 = vmatmul.mubr.f32.vlgmr.msra.gmra.mrb[0].mxu0 %v22903_v42 }
 0x16c   : > { %19561 = vmatprep.mubr.f32.mxu0 %v22913_v48  ;;  %21253 = vmatpush3.bf16.xpose.msra.mxu0 %v22881_v13 }
 0x16d   : > { %21255 = vmatprep.subr.bf16.mxu0 %v22889_v24 }
 0x16f   : > { %19562 = vmatmul.mubr.f32.gmra.mrb[2].mxu0 %v22923_v55 }
 0x170   : > { %19564 = vmatprep.mubr.f32.mxu0 %v22933_v62 }
 0x173   : > { %19565 = vmatmul.mubr.f32.gmra.mrb[4].mxu0 %v22940_v5 }
 0x174   : > { %19567 = vmatprep.mubr.f32.mxu0 %v22944_v14 }
 0x177   : > { %19568 = vmatmul.mubr.f32.gmra.mrb[6].mxu0 %v530_v23 }
 0x23e   : > { %v19560_v33 = vpop.f32.mrb[0].mxu0 }
 0x23f   : > { %v22994_v34 = vadd.f32 %v19560_v33, %v17872_v8  ;;  %v1107_v35 = vpop.f32.mrb[1].mxu0 }
 0x240   : > { %v22996_v36 = vadd.f32 %v17872_v8, %v1107_v35 }
 0x241   : > { %v1173_v37 = vsel %vm1169_vm0, %v22994_v34, inf }
 0x242   : > { %1174 = vmin.xlane.f32.xlu1 %v1173_v37  ;;  %v19563_v38 = vpop.f32.mrb[2].mxu0  ;;  %v1170_v42 = vsel %vm1169_vm0, %v22996_v36, inf }
 0x243   : > { %v1119_v39 = vpop.f32.mrb[3].mxu0  ;;  %v23002_v41 = vadd.f32 %v19563_v38, %v17872_v8 }
 0x244   : > { %v23000_v40 = vadd.f32 %v17872_v8, %v1119_v39 }
 0x245   : > { %v1179_v47 = vsel %vm1169_vm0, %v23002_v41, inf }
 0x246   : > { %1171 = vmin.xlane.f32.xlu1 %v1170_v42  ;;  %v19566_v43 = vpop.f32.mrb[4].mxu0  ;;  %v1176_v44 = vsel %vm1169_vm0, %v23000_v40, inf }
 0x247   : > { %1177 = vmin.xlane.f32.xlu0 %v1176_v44  ;;  %v1131_v45 = vpop.f32.mrb[5].mxu0  ;;  %v23008_v46 = vadd.f32 %v19566_v43, %v17872_v8 }
 0x248   : > { %v23012_v50 = vadd.f32 %v17872_v8, %v1131_v45 }
 0x249   : > { %v1185_v51 = vsel %vm1169_vm0, %v23008_v46, inf }
 0x24a   : > { %1180 = vmin.xlane.f32.xlu1 %v1179_v47  ;;  %v19569_v48 = vpop.f32.mrb[6].mxu0  ;;  %v1182_v53 = vsel %vm1169_vm0, %v23012_v50, inf }
 0x24b   : > { %v1143_v49 = vpop.f32.mrb[7].mxu0  ;;  %v23020_v54 = vadd.f32 %v19569_v48, %v17872_v8 }
 0x24c   : > { %v23016_v52 = vadd.f32 %v17872_v8, %v1143_v49 }
 0x24d   : > { %v1191_v56 = vsel %vm1169_vm0, %v23020_v54, inf }
 0x24e   : > { %1186 = vmin.xlane.f32.xlu1 %v1185_v51  ;;  %v1188_v55 = vsel %vm1169_vm0, %v23016_v52, inf }
 0x252   : > { %1183 = vmin.xlane.f32.xlu1 %v1182_v53 }
 0x256   : > { %1189 = vmin.xlane.f32.xlu1 %v1188_v55 }
 0x25a   : > { %1192 = vmin.xlane.f32.xlu1 %v1191_v56 }
 0x2cf   : > { %v1175_v59 = vpop.xlane.xlu1 %1174 }
 0x2d0   : > { %vm1195_vm2 = vcmp.eq.f32.partialorder %v22994_v34, %v1175_v59 }
 0x2d1   : > { %v1203_v60 = vsel %vm1195_vm2, %v23026_v58, 64 }
 0x2d2   : > { %v1225_v61 = vsel %vm1169_vm0, %v1203_v60, 2147483647 }
 0x2d3   : > { %v1172_v62 = vpop.xlane.xlu1 %1171  ;;  %v1227_v63 = vshra.s32 %v1225_v61, 16  ;;  %v1226_v43 = vand.u32 65535, %v1225_v61 }
 0x2d4   : > { %vm1194_vm3 = vcmp.eq.f32.partialorder %v22996_v36, %v1172_v62  ;;  %v1178_v0 = vpop.xlane.xlu0 %1177 }
 0x2d5   : > { %v1202_v1 = vsel %vm1194_vm3, %v23026_v58, 64  ;;  %vm1196_vm4 = vcmp.eq.f32.partialorder %v23000_v40, %v1178_v0  ;;  %v1229_v2 = vcvt.s32.f32 %v1227_v63  ;;  %v1228_v45 = vcvt.s32.f32 %v1226_v43 }
 0x2d6   : > { %v1210_v3 = vsel %vm1169_vm0, %v1202_v1, 2147483647  ;;  %v1204_v4 = vsel %vm1196_vm4, %v23026_v58, 64 }
 0x2d7   : > { %v1181_v5 = vpop.xlane.xlu1 %1180  ;;  %1230 = vmin.xlane.f32.xlu1 %v1229_v2  ;;  %v1212_v6 = vshra.s32 %v1210_v3, 16  ;;  %v1240_v11 = vsel %vm1169_vm0, %v1204_v4, 2147483647  ;;  %v1211_v47 = vand.u32 65535, %v1210_v3 }
 0x2d8   : > { %vm1197_vm5 = vcmp.eq.f32.partialorder %v23002_v41, %v1181_v5  ;;  %v1242_v17 = vshra.s32 %v1240_v11, 16  ;;  %v1241_v59 = vand.u32 65535, %v1240_v11 }
 0x2d9   : > { %v1205_v7 = vsel %vm1197_vm5, %v23026_v58, 64  ;;  %v1214_v9 = vcvt.s32.f32 %v1212_v6  ;;  %v1213_v51 = vcvt.s32.f32 %v1211_v47 }
 0x2da   : > { %v1255_v10 = vsel %vm1169_vm0, %v1205_v7, 2147483647  ;;  %v1244_v23 = vcvt.s32.f32 %v1242_v17  ;;  %v1243_v61 = vcvt.s32.f32 %v1241_v59 }
 0x2db   : > { %v1187_v12 = vpop.xlane.xlu1 %1186  ;;  %1215 = vmin.xlane.f32.xlu1 %v1214_v9  ;;  %v1257_v14 = vshra.s32 %v1255_v10, 16  ;;  %v1256_v53 = vand.u32 65535, %v1255_v10 }
 0x2dc   : > { %vm1199_vm6 = vcmp.eq.f32.partialorder %v23008_v46, %v1187_v12 }
 0x2dd   : > { %v1207_v15 = vsel %vm1199_vm6, %v23026_v58, 64  ;;  %v1259_v16 = vcvt.s32.f32 %v1257_v14  ;;  %v1258_v57 = vcvt.s32.f32 %v1256_v53 }
 0x2de   : > { %v1285_v19 = vsel %vm1169_vm0, %v1207_v15, 2147483647 }
 0x2df   : > { %v1184_v20 = vpop.xlane.xlu1 %1183  ;;  %1260 = vmin.xlane.f32.xlu1 %v1259_v16  ;;  %v1287_v25 = vshra.s32 %v1285_v19, 16  ;;  %v1286_v63 = vand.u32 65535, %v1285_v19 }
 0x2e0   : > { %vm1198_vm7 = vcmp.eq.f32.partialorder %v23012_v50, %v1184_v20 }
 0x2e1   : > { %v1206_v22 = vsel %vm1198_vm7, %v23026_v58, 64  ;;  %v1289_v29 = vcvt.s32.f32 %v1287_v25 }
 0x2e2   : > { %v1270_v26 = vsel %vm1169_vm0, %v1206_v22, 2147483647 }
 0x2e3   : > { %1245 = vmin.xlane.f32.xlu1 %v1244_v23  ;;  %v1190_v27 = vpop.xlane.xlu1 %1189  ;;  %v1272_v30 = vshra.s32 %v1270_v26, 16  ;;  %v1271_v3 = vand.u32 65535, %v1270_v26 }
 0x2e4   : > { %vm1200_vm8 = vcmp.eq.f32.partialorder %v23016_v52, %v1190_v27 }
 0x2e5   : > { %v1208_v28 = vsel %vm1200_vm8, %v23026_v58, 64  ;;  %v1274_v33 = vcvt.s32.f32 %v1272_v30  ;;  %v1273_v6 = vcvt.s32.f32 %v1271_v3 }
 0x2e6   : > { %v1300_v31 = vsel %vm1169_vm0, %v1208_v28, 2147483647 }
 0x2e7   : > { %1290 = vmin.xlane.f32.xlu1 %v1289_v29  ;;  %v1193_v32 = vpop.xlane.xlu1 %1192  ;;  %v1302_v35 = vshra.s32 %v1300_v31, 16  ;;  %v1301_v7 = vand.u32 65535, %v1300_v31 }
 0x2e8   : > { %vm1201_vm9 = vcmp.eq.f32.partialorder %v23020_v54, %v1193_v32  ;;  %v27650_v32 = vmov 0.0  }
 0x2e9   : > { %v1209_v8 = vsel %vm1201_vm9, %v23026_v58, 64  ;;  %v1304_v38 = vcvt.s32.f32 %v1302_v35  ;;  %v1303_v11 = vcvt.s32.f32 %v1301_v7 }
 0x2ea   : > { %v1315_v37 = vsel %vm1169_vm0, %v1209_v8, 2147483647 }
 0x2eb   : > { %1275 = vmin.xlane.f32.xlu1 %v1274_v33  ;;  %v1317_v39 = vshra.s32 %v1315_v37, 16  ;;  %v1316_v12 = vand.u32 65535, %v1315_v37 }
 0x2ed   : > { %v1319_v42 = vcvt.s32.f32 %v1317_v39 }
 0x2ef   : > { %1305 = vmin.xlane.f32.xlu1 %v1304_v38 }
 0x2f3   : > { %1320 = vmin.xlane.f32.xlu1 %v1319_v42 }
 0x364   : > { %v1231_v44 = vpop.xlane.xlu1 %1230 }
 0x365   : > { %vm1232_vm10 = vcmp.eq.f32.partialorder %v1229_v2, %v1231_v44  ;;  %v1288_v2 = vcvt.s32.f32 %v1286_v63  ;;  %v1237_v19 = vcvt.f32.s32 %v1231_v44 }
 0x366   : > { %v1233_v48 = vsel %vm1232_vm10, %v1228_v45, inf }
 0x367   : > { %1234 = vmin.xlane.f32.xlu1 %v1233_v48  ;;  %v1238_v22 = vshll.u32 %v1237_v19, 16 }
 0x368   : > { %v1216_v49 = vpop.xlane.xlu1 %1215 }
 0x369   : > { %vm1217_vm11 = vcmp.eq.f32.partialorder %v1214_v9, %v1216_v49 }
 0x36a   : > { %v1218_v55 = vsel %vm1217_vm11, %v1213_v51, inf }
 0x36b   : > { %1219 = vmin.xlane.f32.xlu1 %v1218_v55 }
 0x36c   : > { %v1261_v56 = vpop.xlane.xlu1 %1260 }
 0x36d   : > { %vm1262_vm12 = vcmp.eq.f32.partialorder %v1259_v16, %v1261_v56  ;;  %v1318_v16 = vcvt.s32.f32 %v1316_v12 }
 0x36e   : > { %v1263_v60 = vsel %vm1262_vm12, %v1258_v57, inf }
 0x36f   : > { %1264 = vmin.xlane.f32.xlu1 %v1263_v60 }
 0x370   : > { %v1246_v62 = vpop.xlane.xlu1 %1245 }
 0x371   : > { %vm1247_vm13 = vcmp.eq.f32.partialorder %v1244_v23, %v1246_v62  ;;  %v1222_v23 = vcvt.f32.s32 %v1216_v49  ;;  %v1252_v43 = vcvt.f32.s32 %v1246_v62 }
 0x372   : > { %v1248_v0 = vsel %vm1247_vm13, %v1243_v61, inf }
 0x373   : > { %1249 = vmin.xlane.f32.xlu1 %v1248_v0  ;;  %v1223_v28 = vshll.u32 %v1222_v23, 16 }
 0x374   : > { %v23052_v1 = vpop.xlane.xlu1 %1290 }
 0x375   : > { %vm1292_vm14 = vcmp.eq.f32.partialorder %v1289_v29, %v23052_v1  ;;  %v1267_v29 = vcvt.f32.s32 %v1261_v56  ;;  %v1253_v56 = vshll.u32 %v1252_v43, 16 }
 0x376   : > { %v1293_v4 = vsel %vm1292_vm14, %v1288_v2, inf }
 0x377   : > { %1294 = vmin.xlane.f32.xlu0 %v1293_v4 }
 0x378   : > { %v23055_v5 = vpop.xlane.xlu1 %1275 }
 0x379   : > { %vm1277_vm15 = vcmp.eq.f32.partialorder %v1274_v33, %v23055_v5 }
 0x37a   : > { %v1278_v9 = vsel %vm1277_vm15, %v1273_v6, inf  ;;  %v1282_v6 = vcvt.f32.s32 %v23055_v5 }
 0x37b   : > { %1279 = vmin.xlane.f32.xlu1 %v1278_v9 }
 0x37c   : > { %v23058_v10 = vpop.xlane.xlu1 %1305 }
 0x37d   : > { %vm1307_vm2 = vcmp.eq.f32.partialorder %v1304_v38, %v23058_v10  ;;  %v1312_v23 = vcvt.f32.s32 %v23058_v10 }
 0x37e   : > { %v1308_v14 = vsel %vm1307_vm2, %v1303_v11, inf }
 0x37f   : > { %1309 = vmin.xlane.f32.xlu1 %v1308_v14 }
 0x380   : > { %v23061_v15 = vpop.xlane.xlu1 %1320 }
 0x381   : > { %vm1322_vm3 = vcmp.eq.f32.partialorder %v1319_v42, %v23061_v15  ;;  %v1268_v42 = vshll.u32 %v1267_v29, 16 }
 0x382   : > { %v1323_v17 = vsel %vm1322_vm3, %v1318_v16, inf }
 0x383   : > { %1324 = vmin.xlane.f32.xlu0 %v1323_v17 }
 0x3f4   : > { %v1235_v20 = vpop.xlane.xlu1 %1234 }
 0x3f5   : > { %v1236_v25 = vcvt.f32.s32 %v1235_v20 }
 0x3f7   : > { %v1239_v26 = vadd.s32 %v1238_v22, %v1236_v25 }
 0x3f8   : > { %v1220_v27 = vpop.xlane.xlu1 %1219 }
 0x3f9   : > { %v1221_v30 = vcvt.f32.s32 %v1220_v27  ;;  %vm1331_vm4 = vcmp.eq.s32.totalorder %v23026_v58, %v1239_v26 }
 0x3fa   : > { %v23066_v31 = vsel %vm1331_vm4, inf, %v22994_v34  ;;  %v23069_v8 = vsel %vm1331_vm4, 1.0, %v27650_v32 }
 0x3fb   : > { %v1224_v33 = vadd.s32 %v1223_v28, %v1221_v30  ;;  %v2155_v35 = vsel %vm1169_vm0, %v23066_v31, inf  ;;  %v1358_v37 = vsel %vm1169_vm0, %v23069_v8, 0 }
 0x3fc   : > { %2156 = vmin.xlane.f32.xlu0 %v2155_v35  ;;  %v1265_v38 = vpop.xlane.xlu1 %1264  ;;  %v23075_v39 = vsub.f32 %v1358_v37, %v1358_v37 }
 0x3fd   : > { %v1266_v44 = vcvt.f32.s32 %v1265_v38  ;;  %vm1330_vm5 = vcmp.eq.s32.totalorder %v23026_v58, %v1224_v33  ;;  %v1313_v38 = vshll.u32 %v1312_v23, 16 }
 0x3fe   : > { %v23079_v34 = vsel %vm1330_vm5, inf, %v22996_v36  ;;  %v23082_v45 = vsel %vm1330_vm5, 1.0, %v27650_v32  ;;  %v1463_v51 = vand.u32 4294901760, %v23075_v39  ;;  %v1297_v36 = vcvt.f32.s32 %v23052_v1 }
 0x3ff   : > { %v1269_v47 = vadd.s32 %v1268_v42, %v1266_v44  ;;  %v2152_v48 = vsel %vm1169_vm0, %v23079_v34, inf  ;;  %v1355_v49 = vsel %vm1169_vm0, %v23082_v45, 0  ;;  %v1327_v42 = vcvt.f32.s32 %v23061_v15 }
 0x400   : > { %2153 = vmin.xlane.f32.xlu1 %v2152_v48  ;;  %v1250_v53 = vpop.xlane.xlu1 %1249  ;;  %v23089_v55 = vsub.f32 %v1355_v49, %v1355_v49  ;;  %v1464_v1 = vsub.f32 %v23075_v39, %v1463_v51  ;;  %v1298_v4 = vshll.u32 %v1297_v36, 16 }
 0x401   : > { %v1251_v57 = vcvt.f32.s32 %v1250_v53  ;;  %vm1333_vm6 = vcmp.eq.s32.totalorder %v23026_v58, %v1269_v47 }
 0x402   : > { %v23094_v59 = vsel %vm1333_vm6, inf, %v23002_v41  ;;  %v23097_v60 = vsel %vm1333_vm6, 1.0, %v27650_v32  ;;  %v1453_v62 = vand.u32 4294901760, %v23089_v55  ;;  %v1465_v5 = vand.u32 4294901760, %v1464_v1 }
 0x403   : > { %v1254_v61 = vadd.s32 %v1253_v56, %v1251_v57  ;;  %v2161_v63 = vsel %vm1169_vm0, %v23094_v59, inf  ;;  %v1364_v0 = vsel %vm1169_vm0, %v23097_v60, 0 }
 0x404   : > { %v1295_v2 = vpop.xlane.xlu0 %1294  ;;  %2162 = vmin.xlane.f32.xlu0 %v2161_v63  ;;  %v1454_v41 = vsub.f32 %v23089_v55, %v1453_v62  ;;  %v23110_v3 = vsub.f32 %v1364_v0, %v1364_v0  ;;  %v1328_v63 = vshll.u32 %v1327_v42, 16 }
 0x405   : > { %v1296_v7 = vcvt.f32.s32 %v1295_v2  ;;  %vm1332_vm7 = vcmp.eq.s32.totalorder %v23026_v58, %v1254_v61 }
 0x406   : > { %v1455_v9 = vand.u32 4294901760, %v1454_v41  ;;  %v23115_v11 = vsel %vm1332_vm7, inf, %v23000_v40  ;;  %v23118_v12 = vsel %vm1332_vm7, 1.0, %v27650_v32  ;;  %v1483_v14 = vand.u32 4294901760, %v23110_v3 }
 0x407   : > { %v1299_v16 = vadd.s32 %v1298_v4, %v1296_v7  ;;  %v2158_v17 = vsel %vm1169_vm0, %v23115_v11, inf  ;;  %v1361_v19 = vsel %vm1169_vm0, %v23118_v12, 0  ;;  %v1283_v40 = vshll.u32 %v1282_v6, 16 }
 0x408   : > { %19574 = vmatprep.mubr.f32.mxu1 %v1455_v9  ;;  %2159 = vmin.xlane.f32.xlu1 %v2158_v17  ;;  %v1280_v20 = vpop.xlane.xlu1 %1279  ;;  %v23125_v22 = vsub.f32 %v1361_v19, %v1361_v19  ;;  %v1484_v29 = vsub.f32 %v23110_v3, %v1483_v14 }
 0x409   : > { %v1281_v25 = vcvt.f32.s32 %v1280_v20  ;;  %19575 = vmatmul.mubr.f32.vlgmr.msra.gmra.mrb[0].mxu1 %v1465_v5  ;;  %vm1335_vm8 = vcmp.eq.s32.totalorder %v23026_v58, %v1299_v16 }
 0x40a   : > { %v23130_v26 = vsel %vm1335_vm8, 1.0, %v27650_v32  ;;  %v23133_v27 = vsel %vm1335_vm8, inf, %v23008_v46  ;;  %v1473_v28 = vand.u32 4294901760, %v23125_v22  ;;  %21233 = vmatpush3.bf16.xpose.msra.mxu1 %v22889_v24  ;;  %v1485_v49 = vand.u32 4294901760, %v1484_v29 }
 0x40b   : > { %v1284_v30 = vadd.s32 %v1283_v40, %v1281_v25  ;;  %v1370_v10 = vsel %vm1169_vm0, %v23130_v26, 0  ;;  %v2167_v33 = vsel %vm1169_vm0, %v23133_v27, inf  ;;  %21235 = vmatprep.subr.bf16.mxu1 %v22883_v18 }
 0x40c   : > { %2168 = vmin.xlane.f32.xlu0 %v2167_v33  ;;  %v1310_v46 = vpop.xlane.xlu1 %1309  ;;  %v1474_v35 = vsub.f32 %v23125_v22, %v1473_v28  ;;  %v23148_v37 = vsub.f32 %v1370_v10, %v1370_v10 }
 0x40d   : > { %v1311_v43 = vcvt.f32.s32 %v1310_v46  ;;  %vm1334_vm9 = vcmp.eq.s32.totalorder %v23026_v58, %v1284_v30 }
 0x40e   : > { %v1475_v44 = vand.u32 4294901760, %v1474_v35  ;;  %v23153_v47 = vsel %vm1334_vm9, inf, %v23012_v50  ;;  %v23156_v48 = vsel %vm1334_vm9, 1.0, %v27650_v32  ;;  %v1503_v15 = vand.u32 4294901760, %v23148_v37 }
 0x40f   : > { %v1314_v53 = vadd.s32 %v1313_v38, %v1311_v43  ;;  %v2164_v56 = vsel %vm1169_vm0, %v23153_v47, inf  ;;  %v1367_v36 = vsel %vm1169_vm0, %v23156_v48, 0 }
 0x410   : > { %v1325_v57 = vpop.xlane.xlu0 %1324  ;;  %19577 = vmatprep.mubr.f32.mxu1 %v1475_v44  ;;  %2165 = vmin.xlane.f32.xlu1 %v2164_v56  ;;  %v1492_v61 = vsub.f32 %v1367_v36, %v1367_v36  ;;  %v1504_v7 = vsub.f32 %v23148_v37, %v1503_v15 }
 0x411   : > { %v1326_v50 = vcvt.f32.s32 %v1325_v57  ;;  %19578 = vmatmul.mubr.f32.gmra.mrb[2].mxu1 %v1485_v49  ;;  %vm1336_vm10 = vcmp.eq.s32.totalorder %v23026_v58, %v1314_v53 }
 0x412   : > { %v23165_v0 = vsel %vm1336_vm10, inf, %v23016_v52  ;;  %v23168_v1 = vsel %vm1336_vm10, 1.0, %v27650_v32  ;;  %v1493_v2 = vand.u32 4294901760, %v1492_v61  ;;  %v1505_v23 = vand.u32 4294901760, %v1504_v7 }
 0x413   : > { %v1329_v41 = vadd.s32 %v1328_v63, %v1326_v50  ;;  %v2170_v4 = vsel %vm1169_vm0, %v23165_v0, inf  ;;  %v1373_v6 = vsel %vm1169_vm0, %v23168_v1, 0 }
 0x414   : > { %2171 = vmin.xlane.f32.xlu1 %v2170_v4  ;;  %v1494_v9 = vsub.f32 %v1492_v61, %v1493_v2  ;;  %v1512_v16 = vsub.f32 %v1373_v6, %v1373_v6 }
 0x415   : > { %vm1337_vm11 = vcmp.eq.s32.totalorder %v23026_v58, %v1329_v41 }
 0x416   : > { %v23179_v52 = vsel %vm1337_vm11, 1.0, %v27650_v32  ;;  %v23182_v17 = vsel %vm1337_vm11, inf, %v23020_v54  ;;  %v1495_v19 = vand.u32 4294901760, %v1494_v9  ;;  %v1513_v5 = vand.u32 4294901760, %v1512_v16 }
 0x417   : > { %v1376_v20 = vsel %vm1169_vm0, %v23179_v52, 0  ;;  %v2173_v40 = vsel %vm1169_vm0, %v23182_v17, inf }
 0x418   : > { %2174 = vmin.xlane.f32.xlu0 %v2173_v40  ;;  %19580 = vmatprep.mubr.f32.mxu1 %v1495_v19  ;;  %v1514_v25 = vsub.f32 %v1512_v16, %v1513_v5  ;;  %v1522_v29 = vsub.f32 %v1376_v20, %v1376_v20 }
 0x419   : > { %19581 = vmatmul.mubr.f32.gmra.mrb[4].mxu1 %v1505_v23 }
 0x41a   : > { %v1515_v30 = vand.u32 4294901760, %v1514_v25  ;;  %v1523_v10 = vand.u32 4294901760, %v1522_v29 }
 0x41c   : > { %19583 = vmatprep.mubr.f32.mxu1 %v1515_v30  ;;  %v1524_v33 = vsub.f32 %v1522_v29, %v1523_v10 }
 0x41e   : > { %v1525_v54 = vand.u32 4294901760, %v1524_v33 }
 0x420   : > { %19584 = vmatmul.mubr.f32.gmra.mrb[6].mxu1 %v1525_v54 }
 0x421   : > { %19590 = vmatprep.mubr.msk.f32.mxu1 %vm1169_vm0, %v23082_v45 }
 0x424   : > { %19591 = vmatmul.mubr.msk.f32.vlgmr.msra.gmra.mrb[0].mxu1 %vm1169_vm0, %v23069_v8 }
 0x425   : > { %19593 = vmatprep.mubr.msk.f32.mxu1 %vm1169_vm0, %v23118_v12  ;;  %21237 = vmatpush3.bf16.xpose.msra.mxu1 %v22883_v18 }
 0x426   : > { %21239 = vmatprep.subr.bf16.mxu1 %v22881_v13 }
 0x428   : > { %19594 = vmatmul.mubr.msk.f32.gmra.mrb[2].mxu1 %vm1169_vm0, %v23097_v60 }
 0x429   : > { %19596 = vmatprep.mubr.msk.f32.mxu1 %vm1169_vm0, %v23156_v48 }
 0x42c   : > { %19597 = vmatmul.mubr.msk.f32.gmra.mrb[4].mxu1 %vm1169_vm0, %v23130_v26 }
 0x42d   : > { %19599 = vmatprep.mubr.msk.f32.mxu1 %vm1169_vm0, %v23168_v1 }
 0x430   : > { %19600 = vmatmul.mubr.msk.f32.gmra.mrb[6].mxu1 %vm1169_vm0, %v23179_v52 }
 0x431   : > { %19606 = vmatprep.mubr.f32.mxu1 %v23089_v55 }
 0x434   : > { %19607 = vmatmul.mubr.f32.vlgmr.msra.gmra.mrb[0].mxu1 %v23075_v39 }
 0x435   : > { %19609 = vmatprep.mubr.f32.mxu1 %v23125_v22  ;;  %21241 = vmatpush3.bf16.xpose.msra.mxu1 %v22881_v13 }
 0x436   : > { %21243 = vmatprep.subr.bf16.mxu1 %v22887_v21 }
 0x438   : > { %19610 = vmatmul.mubr.f32.gmra.mrb[2].mxu1 %v23110_v3 }
 0x439   : > { %19612 = vmatprep.mubr.f32.mxu1 %v1492_v61 }
 0x43c   : > { %19613 = vmatmul.mubr.f32.gmra.mrb[4].mxu1 %v23148_v37 }
 0x43d   : > { %19615 = vmatprep.mubr.f32.mxu1 %v1512_v16 }
 0x440   : > { %19616 = vmatmul.mubr.f32.gmra.mrb[6].mxu1 %v1522_v29 }
 0x441   : > { %19622 = vmatprep.mubr.f32.mxu1 %v1453_v62 }
 0x444   : > { %19623 = vmatmul.mubr.f32.vlgmr.msra.gmra.mrb[0].mxu1 %v1463_v51 }
 0x445   : > { %19625 = vmatprep.mubr.f32.mxu1 %v1473_v28  ;;  %21245 = vmatpush3.bf16.xpose.msra.mxu1 %v22887_v21 }
 0x446   : > { %21247 = vmatprep.subr.bf16.mxu1 %v22881_v13 }
 0x448   : > { %19626 = vmatmul.mubr.f32.gmra.mrb[2].mxu1 %v1483_v14 }
 0x449   : > { %19628 = vmatprep.mubr.f32.mxu1 %v1493_v2 }
 0x44c   : > { %19629 = vmatmul.mubr.f32.gmra.mrb[4].mxu1 %v1503_v15 }
 0x44d   : > { %19631 = vmatprep.mubr.f32.mxu1 %v1513_v5 }
 0x450   : > { %19632 = vmatmul.mubr.f32.gmra.mrb[6].mxu1 %v1523_v10 }
 0x451   : > { %19638 = vmatprep.mubr.msk.f32.mxu1 %vm1169_vm0, %v23082_v45 }
 0x454   : > { %19639 = vmatmul.mubr.msk.f32.vlgmr.msra.gmra.mrb[0].mxu1 %vm1169_vm0, %v23069_v8 }
 0x455   : > { %19641 = vmatprep.mubr.msk.f32.mxu1 %vm1169_vm0, %v23118_v12  ;;  %21249 = vmatpush3.bf16.xpose.msra.mxu1 %v22881_v13 }
 0x456   : > { %21275 = vmatprep.subr.bf16.mxu1 %v22881_v13 }
 0x458   : > { %19642 = vmatmul.mubr.msk.f32.gmra.mrb[2].mxu1 %vm1169_vm0, %v23097_v60 }
 0x459   : > { %19644 = vmatprep.mubr.msk.f32.mxu1 %vm1169_vm0, %v23156_v48 }
 0x45c   : > { %19645 = vmatmul.mubr.msk.f32.gmra.mrb[4].mxu1 %vm1169_vm0, %v23130_v26 }
 0x45d   : > { %19647 = vmatprep.mubr.msk.f32.mxu1 %vm1169_vm0, %v23168_v1 }
 0x460   : > { %19648 = vmatmul.mubr.msk.f32.gmra.mrb[6].mxu1 %vm1169_vm0, %v23179_v52 }
 0x461   : > { %19654 = vmatprep.mubr.msk.f32.mxu1 %vm1169_vm0, %v23082_v45 }
 0x464   : > { %19655 = vmatmul.mubr.msk.f32.vlgmr.msra.gmra.mrb[0].mxu1 %vm1169_vm0, %v23069_v8 }
 0x465   : > { %19657 = vmatprep.mubr.msk.f32.mxu1 %vm1169_vm0, %v23118_v12  ;;  %21277 = vmatpush3.bf16.xpose.msra.mxu1 %v22881_v13 }
 0x466   : > { %21279 = vmatprep.subr.bf16.mxu1 %v22889_v24 }
 0x468   : > { %19658 = vmatmul.mubr.msk.f32.gmra.mrb[2].mxu1 %vm1169_vm0, %v23097_v60 }
 0x469   : > { %19660 = vmatprep.mubr.msk.f32.mxu1 %vm1169_vm0, %v23156_v48 }
 0x46c   : > { %19661 = vmatmul.mubr.msk.f32.gmra.mrb[4].mxu1 %vm1169_vm0, %v23130_v26 }
 0x46d   : > { %19663 = vmatprep.mubr.msk.f32.mxu1 %vm1169_vm0, %v23168_v1 }
 0x470   : > { %19664 = vmatmul.mubr.msk.f32.gmra.mrb[6].mxu1 %vm1169_vm0, %v23179_v52 }
 0x489   : > { %v2157_v8 = vpop.xlane.xlu0 %2156 }
 0x48a   : > { %vm2177_vm12 = vcmp.eq.f32.partialorder %v23066_v31, %v2157_v8 }
 0x48b   : > { %v2185_v39 = vsel %vm2177_vm12, %v23026_v58, 64 }
 0x48c   : > { %v2207_v45 = vsel %vm1169_vm0, %v2185_v39, 2147483647 }
 0x48d   : > { %v2154_v51 = vpop.xlane.xlu1 %2153  ;;  %v2209_v55 = vshra.s32 %v2207_v45, 16  ;;  %v2208_v5 = vand.u32 65535, %v2207_v45 }
 0x48e   : > { %vm2176_vm13 = vcmp.eq.f32.partialorder %v23079_v34, %v2154_v51 }
 0x48f   : > { %v2184_v60 = vsel %vm2176_vm13, %v23026_v58, 64  ;;  %v2211_v62 = vcvt.s32.f32 %v2209_v55  ;;  %v2210_v40 = vcvt.s32.f32 %v2208_v5 }
 0x490   : > { %v2192_v3 = vsel %vm1169_vm0, %v2184_v60, 2147483647 }
 0x491   : > { %2212 = vmin.xlane.f32.xlu0 %v2211_v62  ;;  %v2163_v12 = vpop.xlane.xlu0 %2162  ;;  %v2194_v14 = vshra.s32 %v2192_v3, 16  ;;  %v2193_v23 = vand.u32 65535, %v2192_v3 }
 0x492   : > { %vm2179_vm14 = vcmp.eq.f32.partialorder %v23094_v59, %v2163_v12 }
 0x493   : > { %v2187_v22 = vsel %vm2179_vm14, %v23026_v58, 64  ;;  %v2196_v26 = vcvt.s32.f32 %v2194_v14  ;;  %v2195_v30 = vcvt.s32.f32 %v2193_v23 }
 0x494   : > { %v2237_v28 = vsel %vm1169_vm0, %v2187_v22, 2147483647 }
 0x495   : > { %2197 = vmin.xlane.f32.xlu1 %v2196_v26  ;;  %v2160_v46 = vpop.xlane.xlu1 %2159  ;;  %v2239_v35 = vshra.s32 %v2237_v28, 16  ;;  %v2238_v10 = vand.u32 65535, %v2237_v28 }
 0x496   : > { %vm2178_vm15 = vcmp.eq.f32.partialorder %v23115_v11, %v2160_v46 }
 0x497   : > { %v2186_v37 = vsel %vm2178_vm15, %v23026_v58, 64  ;;  %v2241_v38 = vcvt.s32.f32 %v2239_v35  ;;  %v2240_v8 = vcvt.s32.f32 %v2238_v10 }
 0x498   : > { %v2222_v42 = vsel %vm1169_vm0, %v2186_v37, 2147483647 }
 0x499   : > { %2242 = vmin.xlane.f32.xlu0 %v2241_v38  ;;  %v2169_v43 = vpop.xlane.xlu0 %2168  ;;  %v2224_v44 = vshra.s32 %v2222_v42, 16  ;;  %v2223_v39 = vand.u32 65535, %v2222_v42 }
 0x49a   : > { %vm2181_vm2 = vcmp.eq.f32.partialorder %v23133_v27, %v2169_v43 }
 0x49b   : > { %v2189_v48 = vsel %vm2181_vm2, %v23026_v58, 64  ;;  %v2226_v49 = vcvt.s32.f32 %v2224_v44  ;;  %v2225_v45 = vcvt.s32.f32 %v2223_v39 }
 0x49c   : > { %v2267_v53 = vsel %vm1169_vm0, %v2189_v48, 2147483647 }
 0x49d   : > { %2227 = vmin.xlane.f32.xlu1 %v2226_v49  ;;  %v2166_v56 = vpop.xlane.xlu1 %2165  ;;  %v2269_v36 = vshra.s32 %v2267_v53, 16  ;;  %v2268_v60 = vand.u32 65535, %v2267_v53 }
 0x49e   : > { %vm2180_vm3 = vcmp.eq.f32.partialorder %v23153_v47, %v2166_v56 }
 0x49f   : > { %v2188_v15 = vsel %vm2180_vm3, %v23026_v58, 64  ;;  %v2271_v57 = vcvt.s32.f32 %v2269_v36  ;;  %v2270_v12 = vcvt.s32.f32 %v2268_v60 }
 0x4a0   : > { %v2252_v61 = vsel %vm1169_vm0, %v2188_v15, 2147483647 }
 0x4a1   : > { %2272 = vmin.xlane.f32.xlu0 %v2271_v57  ;;  %v2172_v63 = vpop.xlane.xlu1 %2171  ;;  %v2254_v50 = vshra.s32 %v2252_v61, 16  ;;  %v2253_v14 = vand.u32 65535, %v2252_v61 }
 0x4a2   : > { %vm2182_vm4 = vcmp.eq.f32.partialorder %v23165_v0, %v2172_v63 }
 0x4a3   : > { %v2190_v1 = vsel %vm2182_vm4, %v23026_v58, 64  ;;  %v2256_v2 = vcvt.s32.f32 %v2254_v50  ;;  %v2255_v28 = vcvt.s32.f32 %v2253_v14 }
 0x4a4   : > { %v2282_v41 = vsel %vm1169_vm0, %v2190_v1, 2147483647 }
 0x4a5   : > { %v2175_v4 = vpop.xlane.xlu0 %2174  ;;  %2257 = vmin.xlane.f32.xlu1 %v2256_v2  ;;  %v2284_v6 = vshra.s32 %v2282_v41, 16  ;;  %v2283_v46 = vand.u32 65535, %v2282_v41 }
 0x4a6   : > { %vm2183_vm5 = vcmp.eq.f32.partialorder %v23182_v17, %v2175_v4 }
 0x4a7   : > { %v2191_v7 = vsel %vm2183_vm5, %v23026_v58, 64  ;;  %v2286_v9 = vcvt.s32.f32 %v2284_v6 }
 0x4a8   : > { %v2297_v16 = vsel %vm1169_vm0, %v2191_v7, 2147483647 }
 0x4a9   : > { %2287 = vmin.xlane.f32.xlu1 %v2286_v9  ;;  %v2299_v52 = vshra.s32 %v2297_v16, 16  ;;  %v2298_v42 = vand.u32 65535, %v2297_v16 }
 0x4ab   : > { %v2301_v19 = vcvt.s32.f32 %v2299_v52  ;;  %v2300_v53 = vcvt.s32.f32 %v2298_v42 }
 0x4ad   : > { %2302 = vmin.xlane.f32.xlu0 %v2301_v19 }
 0x51e   : > { %v2213_v20 = vpop.xlane.xlu0 %2212 }
 0x51f   : > { %vm2214_vm6 = vcmp.eq.f32.partialorder %v2211_v62, %v2213_v20  ;;  %v2219_v1 = vcvt.f32.s32 %v2213_v20 }
 0x520   : > { %v2215_v25 = vsel %vm2214_vm6, %v2210_v40, inf }
 0x521   : > { %2216 = vmin.xlane.f32.xlu0 %v2215_v25  ;;  %v2220_v41 = vshll.u32 %v2219_v1, 16 }
 0x522   : > { %v2198_v29 = vpop.xlane.xlu1 %2197 }
 0x523   : > { %vm2199_vm7 = vcmp.eq.f32.partialorder %v2196_v26, %v2198_v29  ;;  %v2204_v4 = vcvt.f32.s32 %v2198_v29 }
 0x524   : > { %v2200_v33 = vsel %vm2199_vm7, %v2195_v30, inf }
 0x525   : > { %2201 = vmin.xlane.f32.xlu1 %v2200_v33  ;;  %v2205_v16 = vshll.u32 %v2204_v4, 16 }
 0x526   : > { %v2243_v54 = vpop.xlane.xlu0 %2242 }
 0x527   : > { %vm2244_vm8 = vcmp.eq.f32.partialorder %v2241_v38, %v2243_v54  ;;  %v2285_v38 = vcvt.s32.f32 %v2283_v46  ;;  %v2249_v52 = vcvt.f32.s32 %v2243_v54 }
 0x528   : > { %v2245_v51 = vsel %vm2244_vm8, %v2240_v8, inf }
 0x529   : > { %2246 = vmin.xlane.f32.xlu0 %v2245_v51  ;;  %v2250_v10 = vshll.u32 %v2249_v52, 16 }
 0x52a   : > { %v23285_v55 = vpop.xlane.xlu1 %2227 }
 0x52b   : > { %vm2229_vm9 = vcmp.eq.f32.partialorder %v2226_v49, %v23285_v55  ;;  %v2234_v33 = vcvt.f32.s32 %v23285_v55 }
 0x52c   : > { %v2230_v62 = vsel %vm2229_vm9, %v2225_v45, inf }
 0x52d   : > { %2231 = vmin.xlane.f32.xlu1 %v2230_v62 }
 0x52e   : > { %v23288_v3 = vpop.xlane.xlu0 %2272 }
 0x52f   : > { %vm2274_vm10 = vcmp.eq.f32.partialorder %v2271_v57, %v23288_v3 }
 0x530   : > { %v2275_v22 = vsel %vm2274_vm10, %v2270_v12, inf  ;;  %v2235_v12 = vshll.u32 %v2234_v33, 16 }
 0x531   : > { %2276 = vmin.xlane.f32.xlu0 %v2275_v22 }
 0x532   : > { %v23291_v26 = vpop.xlane.xlu1 %2257 }
 0x533   : > { %vm2259_vm11 = vcmp.eq.f32.partialorder %v2256_v2, %v23291_v26  ;;  %v2264_v1 = vcvt.f32.s32 %v23291_v26 }
 0x534   : > { %v2260_v35 = vsel %vm2259_vm11, %v2255_v28, inf }
 0x535   : > { %2261 = vmin.xlane.f32.xlu1 %v2260_v35 }
 0x536   : > { %v23294_v37 = vpop.xlane.xlu1 %2287 }
 0x537   : > { %v23296_v43 = vpop.f32.mrb[0].mxu1  ;;  %vm2289_vm12 = vcmp.eq.f32.partialorder %v2286_v9, %v23294_v37 }
 0x538   : > { %v23299_v44 = vpop.f32.mrb[1].mxu1  ;;  %v2290_v48 = vsel %vm2289_vm12, %v2285_v38, inf }
 0x539   : > { %2291 = vmin.xlane.f32.xlu1 %v2290_v48 }
 0x53a   : > { %v23301_v49 = vpop.xlane.xlu0 %2302 }
 0x53b   : > { %v23303_v56 = vpop.f32.mrb[2].mxu1  ;;  %vm2304_vm13 = vcmp.eq.f32.partialorder %v2301_v19, %v23301_v49 }
 0x53c   : > { %v23306_v36 = vpop.f32.mrb[3].mxu1  ;;  %v2305_v15 = vsel %vm2304_vm13, %v2300_v53, inf }
 0x53d   : > { %2306 = vmin.xlane.f32.xlu0 %v2305_v15 }
 0x53f   : > { %v23308_v57 = vpop.f32.mrb[4].mxu1 }
 0x540   : > { %v23310_v61 = vpop.f32.mrb[5].mxu1 }
 0x543   : > { %v23312_v63 = vpop.f32.mrb[6].mxu1 }
 0x544   : > { %v23314_v50 = vpop.f32.mrb[7].mxu1 }
 0x5ae   : > { %v2217_v2 = vpop.xlane.xlu0 %2216 }
 0x5af   : > { %v2218_v6 = vcvt.f32.s32 %v2217_v2 }
 0x5b1   : > { %v2221_v7 = vadd.s32 %v2220_v41, %v2218_v6 }
 0x5b2   : > { %v2202_v9 = vpop.xlane.xlu1 %2201 }
 0x5b3   : > { %v2203_v19 = vcvt.f32.s32 %v2202_v9  ;;  %vm2313_vm14 = vcmp.eq.s32.totalorder %v23026_v58, %v2221_v7 }
 0x5b4   : > { %v23318_v5 = vsel %vm2313_vm14, inf, %v23066_v31  ;;  %v23321_v40 = vsel %vm2313_vm14, 1.0, %v27650_v32 }
 0x5b5   : > { %v2206_v23 = vadd.s32 %v2205_v16, %v2203_v19  ;;  %v3139_v20 = vsel %vm1169_vm0, %v23318_v5, inf  ;;  %v2340_v25 = vsel %vm1169_vm0, %v23321_v40, 0 }
 0x5b6   : > { %3140 = vmin.xlane.f32.xlu0 %v3139_v20  ;;  %v23327_v29 = vsub.f32 %v2340_v25, %v2340_v25  ;;  %v2247_v30 = vpop.xlane.xlu0 %2246  ;;  %v2294_v20 = vcvt.f32.s32 %v23294_v37 }
 0x5b7   : > { %v2248_v54 = vcvt.f32.s32 %v2247_v30  ;;  %vm2312_vm15 = vcmp.eq.s32.totalorder %v23026_v58, %v2206_v23 }
 0x5b8   : > { %v23332_v31 = vsel %vm2312_vm15, inf, %v23079_v34  ;;  %v23335_v8 = vsel %vm2312_vm15, 1.0, %v27650_v32  ;;  %v2439_v39 = vand.u32 4294901760, %v23327_v29  ;;  %v2279_v34 = vcvt.f32.s32 %v23288_v3 }
 0x5b9   : > { %v2251_v51 = vadd.s32 %v2250_v10, %v2248_v54  ;;  %v3136_v45 = vsel %vm1169_vm0, %v23332_v31, inf  ;;  %v2337_v60 = vsel %vm1169_vm0, %v23335_v8, 0 }
 0x5ba   : > { %3137 = vmin.xlane.f32.xlu1 %v3136_v45  ;;  %v2232_v55 = vpop.xlane.xlu1 %2231  ;;  %v23342_v62 = vsub.f32 %v2337_v60, %v2337_v60  ;;  %v2440_v3 = vsub.f32 %v23327_v29, %v2439_v39  ;;  %v2280_v15 = vshll.u32 %v2279_v34, 16  ;;  %v2309_v34 = vcvt.f32.s32 %v23301_v49 }
 0x5bb   : > { %v2233_v14 = vcvt.f32.s32 %v2232_v55  ;;  %vm2315_vm2 = vcmp.eq.s32.totalorder %v23026_v58, %v2251_v51 }
 0x5bc   : > { %v23347_v22 = vsel %vm2315_vm2, inf, %v23094_v59  ;;  %v23350_v28 = vsel %vm2315_vm2, 1.0, %v27650_v32  ;;  %v2429_v46 = vand.u32 4294901760, %v23342_v62  ;;  %v2441_v26 = vand.u32 4294901760, %v2440_v3 }
 0x5bd   : > { %v2236_v35 = vadd.s32 %v2235_v12, %v2233_v14  ;;  %v3145_v38 = vsel %vm1169_vm0, %v23347_v22, inf  ;;  %v2346_v42 = vsel %vm1169_vm0, %v23350_v28, 0  ;;  %v2295_v12 = vshll.u32 %v2294_v20, 16 }
 0x5be   : > { %3146 = vmin.xlane.f32.xlu0 %v3145_v38  ;;  %v2277_v48 = vpop.xlane.xlu0 %2276  ;;  %v2430_v59 = vsub.f32 %v23342_v62, %v2429_v46  ;;  %v23363_v53 = vsub.f32 %v2346_v42, %v2346_v42 }
 0x5bf   : > { %v2278_v2 = vcvt.f32.s32 %v2277_v48  ;;  %vm2314_vm3 = vcmp.eq.s32.totalorder %v23026_v58, %v2236_v35 }
 0x5c0   : > { %v2431_v41 = vand.u32 4294901760, %v2430_v59  ;;  %v23368_v4 = vsel %vm2314_vm3, inf, %v23115_v11  ;;  %v23371_v6 = vsel %vm2314_vm3, 1.0, %v27650_v32  ;;  %v2459_v7 = vand.u32 4294901760, %v23363_v53 }
 0x5c1   : > { %v2281_v9 = vadd.s32 %v2280_v15, %v2278_v2  ;;  %v3142_v16 = vsel %vm1169_vm0, %v23368_v4, inf  ;;  %v2343_v52 = vsel %vm1169_vm0, %v23371_v6, 0  ;;  %v2265_v11 = vshll.u32 %v2264_v1, 16 }
 0x5c2   : > { %19670 = vmatprep.mubr.f32.mxu0 %v2431_v41  ;;  %3143 = vmin.xlane.f32.xlu1 %v3142_v16  ;;  %v2262_v19 = vpop.xlane.xlu1 %2261  ;;  %v23378_v23 = vsub.f32 %v2343_v52, %v2343_v52  ;;  %v2460_v54 = vsub.f32 %v23363_v53, %v2459_v7  ;;  %v2310_v41 = vshll.u32 %v2309_v34, 16 }
 0x5c3   : > { %v2263_v25 = vcvt.f32.s32 %v2262_v19  ;;  %19671 = vmatmul.mubr.f32.vlgmr.msra.gmra.mrb[8].mxu0 %v2441_v26  ;;  %vm2317_vm4 = vcmp.eq.s32.totalorder %v23026_v58, %v2281_v9 }
 0x5c4   : > { %v23383_v30 = vsel %vm2317_vm4, inf, %v23133_v27  ;;  %v23386_v10 = vsel %vm2317_vm4, 1.0, %v27650_v32  ;;  %v2449_v33 = vand.u32 4294901760, %v23378_v23  ;;  %21257 = vmatpush3.bf16.xpose.msra.mxu0 %v22889_v24  ;;  %v2461_v3 = vand.u32 4294901760, %v2460_v54 }
 0x5c5   : > { %v2266_v51 = vadd.s32 %v2265_v11, %v2263_v25  ;;  %v3151_v37 = vsel %vm1169_vm0, %v23383_v30, inf  ;;  %v2352_v45 = vsel %vm1169_vm0, %v23386_v10, 0  ;;  %21259 = vmatprep.subr.bf16.mxu0 %v22883_v18 }
 0x5c6   : > { %3152 = vmin.xlane.f32.xlu0 %v3151_v37  ;;  %v2292_v27 = vpop.xlane.xlu1 %2291  ;;  %v2450_v60 = vsub.f32 %v23378_v23, %v2449_v33  ;;  %v23401_v55 = vsub.f32 %v2352_v45, %v2352_v45 }
 0x5c7   : > { %v2293_v14 = vcvt.f32.s32 %v2292_v27  ;;  %vm2316_vm5 = vcmp.eq.s32.totalorder %v23026_v58, %v2266_v51 }
 0x5c8   : > { %v2451_v35 = vand.u32 4294901760, %v2450_v60  ;;  %v23406_v38 = vsel %vm2316_vm5, inf, %v23153_v47  ;;  %v23409_v42 = vsel %vm2316_vm5, 1.0, %v27650_v32  ;;  %v2479_v49 = vand.u32 4294901760, %v23401_v55 }
 0x5c9   : > { %v2296_v48 = vadd.s32 %v2295_v12, %v2293_v14  ;;  %v3148_v59 = vsel %vm1169_vm0, %v23406_v38, inf  ;;  %v2349_v15 = vsel %vm1169_vm0, %v23409_v42, 0 }
 0x5ca   : > { %v2307_v1 = vpop.xlane.xlu0 %2306  ;;  %19673 = vmatprep.mubr.f32.mxu0 %v2451_v35  ;;  %3149 = vmin.xlane.f32.xlu1 %v3148_v59  ;;  %v2468_v2 = vsub.f32 %v2349_v15, %v2349_v15  ;;  %v2480_v20 = vsub.f32 %v23401_v55, %v2479_v49 }
 0x5cb   : > { %v2308_v47 = vcvt.f32.s32 %v2307_v1  ;;  %19674 = vmatmul.mubr.f32.gmra.mrb[10].mxu0 %v2461_v3  ;;  %vm2318_vm6 = vcmp.eq.s32.totalorder %v23026_v58, %v2296_v48 }
 0x5cc   : > { %v23418_v9 = vsel %vm2318_vm6, inf, %v23165_v0  ;;  %v23421_v16 = vsel %vm2318_vm6, 1.0, %v27650_v32  ;;  %v2469_v52 = vand.u32 4294901760, %v2468_v2  ;;  %v2481_v12 = vand.u32 4294901760, %v2480_v20 }
 0x5cd   : > { %v2311_v26 = vadd.s32 %v2310_v41, %v2308_v47  ;;  %v3154_v19 = vsel %vm1169_vm0, %v23418_v9, inf  ;;  %v2355_v11 = vsel %vm1169_vm0, %v23421_v16, 0 }
 0x5ce   : > { %3155 = vmin.xlane.f32.xlu1 %v3154_v19  ;;  %v2470_v25 = vsub.f32 %v2468_v2, %v2469_v52  ;;  %v2488_v54 = vsub.f32 %v2355_v11, %v2355_v11 }
 0x5cf   : > { %vm2319_vm7 = vcmp.eq.s32.totalorder %v23026_v58, %v2311_v26 }
 0x5d0   : > { %v23432_v0 = vsel %vm2319_vm7, inf, %v23182_v17  ;;  %v23435_v51 = vsel %vm2319_vm7, 1.0, %v27650_v32  ;;  %v2471_v37 = vand.u32 4294901760, %v2470_v25  ;;  %v2489_v45 = vand.u32 4294901760, %v2488_v54 }
 0x5d1   : > { %v3157_v27 = vsel %vm1169_vm0, %v23432_v0, inf  ;;  %v2358_v60 = vsel %vm1169_vm0, %v23435_v51, 0 }
 0x5d2   : > { %3158 = vmin.xlane.f32.xlu0 %v3157_v27  ;;  %19676 = vmatprep.mubr.f32.mxu0 %v2471_v37  ;;  %v2490_v34 = vsub.f32 %v2488_v54, %v2489_v45  ;;  %v2498_v14 = vsub.f32 %v2358_v60, %v2358_v60 }
 0x5d3   : > { %19677 = vmatmul.mubr.f32.gmra.mrb[12].mxu0 %v2481_v12 }
 0x5d4   : > { %v2491_v35 = vand.u32 4294901760, %v2490_v34  ;;  %v2499_v17 = vand.u32 4294901760, %v2498_v14 }
 0x5d6   : > { %19679 = vmatprep.mubr.f32.mxu0 %v2491_v35  ;;  %v2500_v3 = vsub.f32 %v2498_v14, %v2499_v17 }
 0x5d8   : > { %v2501_v48 = vand.u32 4294901760, %v2500_v3 }
 0x5da   : > { %19680 = vmatmul.mubr.f32.gmra.mrb[14].mxu0 %v2501_v48 }
 0x5db   : > { %19686 = vmatprep.mubr.msk.f32.mxu0 %vm1169_vm0, %v23335_v8 }
 0x5de   : > { %19687 = vmatmul.mubr.msk.f32.vlgmr.msra.gmra.mrb[8].mxu0 %vm1169_vm0, %v23321_v40 }
 0x5df   : > { %19689 = vmatprep.mubr.msk.f32.mxu0 %vm1169_vm0, %v23371_v6  ;;  %21261 = vmatpush3.bf16.xpose.msra.mxu0 %v22883_v18 }
 0x5e0   : > { %21263 = vmatprep.subr.bf16.mxu0 %v22881_v13 }
 0x5e2   : > { %19690 = vmatmul.mubr.msk.f32.gmra.mrb[10].mxu0 %vm1169_vm0, %v23350_v28 }
 0x5e3   : > { %19692 = vmatprep.mubr.msk.f32.mxu0 %vm1169_vm0, %v23409_v42 }
 0x5e6   : > { %19693 = vmatmul.mubr.msk.f32.gmra.mrb[12].mxu0 %vm1169_vm0, %v23386_v10 }
 0x5e7   : > { %19695 = vmatprep.mubr.msk.f32.mxu0 %vm1169_vm0, %v23421_v16 }
 0x5ea   : > { %19696 = vmatmul.mubr.msk.f32.gmra.mrb[14].mxu0 %vm1169_vm0, %v23435_v51 }
 0x5eb   : > { %19702 = vmatprep.mubr.f32.mxu0 %v23342_v62 }
 0x5ee   : > { %19703 = vmatmul.mubr.f32.vlgmr.msra.gmra.mrb[8].mxu0 %v23327_v29 }
 0x5ef   : > { %19705 = vmatprep.mubr.f32.mxu0 %v23378_v23  ;;  %21265 = vmatpush3.bf16.xpose.msra.mxu0 %v22881_v13 }
 0x5f0   : > { %21267 = vmatprep.subr.bf16.mxu0 %v22887_v21 }
 0x5f2   : > { %19706 = vmatmul.mubr.f32.gmra.mrb[10].mxu0 %v23363_v53 }
 0x5f3   : > { %19708 = vmatprep.mubr.f32.mxu0 %v2468_v2 }
 0x5f6   : > { %19709 = vmatmul.mubr.f32.gmra.mrb[12].mxu0 %v23401_v55 }
 0x5f7   : > { %19711 = vmatprep.mubr.f32.mxu0 %v2488_v54 }
 0x5fa   : > { %19712 = vmatmul.mubr.f32.gmra.mrb[14].mxu0 %v2498_v14 }
 0x5fb   : > { %19718 = vmatprep.mubr.f32.mxu0 %v2429_v46 }
 0x5fe   : > { %19719 = vmatmul.mubr.f32.vlgmr.msra.gmra.mrb[8].mxu0 %v2439_v39 }
 0x5ff   : > { %19721 = vmatprep.mubr.f32.mxu0 %v2449_v33  ;;  %21269 = vmatpush3.bf16.xpose.msra.mxu0 %v22887_v21 }
 0x600   : > { %21271 = vmatprep.subr.bf16.mxu0 %v22881_v13 }
 0x602   : > { %19722 = vmatmul.mubr.f32.gmra.mrb[10].mxu0 %v2459_v7 }
 0x603   : > { %19724 = vmatprep.mubr.f32.mxu0 %v2469_v52 }
 0x606   : > { %19725 = vmatmul.mubr.f32.gmra.mrb[12].mxu0 %v2479_v49 }
 0x607   : > { %19727 = vmatprep.mubr.f32.mxu0 %v2489_v45 }
 0x60a   : > { %19728 = vmatmul.mubr.f32.gmra.mrb[14].mxu0 %v2499_v17 }
 0x60b   : > { %19734 = vmatprep.mubr.msk.f32.mxu0 %vm1169_vm0, %v23335_v8 }
 0x60e   : > { %19735 = vmatmul.mubr.msk.f32.vlgmr.msra.gmra.mrb[8].mxu0 %vm1169_vm0, %v23321_v40 }
 0x60f   : > { %19737 = vmatprep.mubr.msk.f32.mxu0 %vm1169_vm0, %v23371_v6  ;;  %21273 = vmatpush3.bf16.xpose.msra.mxu0 %v22881_v13 }
 0x610   : > { %21299 = vmatprep.subr.bf16.mxu0 %v22881_v13 }
 0x612   : > { %19738 = vmatmul.mubr.msk.f32.gmra.mrb[10].mxu0 %vm1169_vm0, %v23350_v28 }
 0x613   : > { %19740 = vmatprep.mubr.msk.f32.mxu0 %vm1169_vm0, %v23409_v42 }
 0x616   : > { %19741 = vmatmul.mubr.msk.f32.gmra.mrb[12].mxu0 %vm1169_vm0, %v23386_v10 }
 0x617   : > { %19743 = vmatprep.mubr.msk.f32.mxu0 %vm1169_vm0, %v23421_v16 }
 0x61a   : > { %19744 = vmatmul.mubr.msk.f32.gmra.mrb[14].mxu0 %vm1169_vm0, %v23435_v51 }
 0x61b   : > { %19750 = vmatprep.mubr.msk.f32.mxu0 %vm1169_vm0, %v23335_v8 }
 0x61e   : > { %19751 = vmatmul.mubr.msk.f32.vlgmr.msra.gmra.mrb[8].mxu0 %vm1169_vm0, %v23321_v40 }
 0x61f   : > { %19753 = vmatprep.mubr.msk.f32.mxu0 %vm1169_vm0, %v23371_v6  ;;  %21301 = vmatpush3.bf16.xpose.msra.mxu0 %v22881_v13 }
 0x620   : > { %21303 = vmatprep.subr.bf16.mxu0 %v22889_v24 }
 0x622   : > { %19754 = vmatmul.mubr.msk.f32.gmra.mrb[10].mxu0 %vm1169_vm0, %v23350_v28 }
 0x623   : > { %19756 = vmatprep.mubr.msk.f32.mxu0 %vm1169_vm0, %v23409_v42 }
 0x626   : > { %19757 = vmatmul.mubr.msk.f32.gmra.mrb[12].mxu0 %vm1169_vm0, %v23386_v10 }
 0x627   : > { %19759 = vmatprep.mubr.msk.f32.mxu0 %vm1169_vm0, %v23421_v16 }
 0x62a   : > { %19760 = vmatmul.mubr.msk.f32.gmra.mrb[14].mxu0 %vm1169_vm0, %v23435_v51 }
 0x643   : > { %v3141_v40 = vpop.xlane.xlu0 %3140 }
 0x644   : > { %vm3161_vm8 = vcmp.eq.f32.partialorder %v23318_v5, %v3141_v40 }
 0x645   : > { %v3169_v29 = vsel %vm3161_vm8, %v23026_v58, 64 }
 0x646   : > { %v3191_v8 = vsel %vm1169_vm0, %v3169_v29, 2147483647 }
 0x647   : > { %v3138_v39 = vpop.xlane.xlu1 %3137  ;;  %v3193_v62 = vshra.s32 %v3191_v8, 16  ;;  %v3192_v3 = vand.u32 65535, %v3191_v8 }
 0x648   : > { %vm3160_vm9 = vcmp.eq.f32.partialorder %v23332_v31, %v3138_v39 }
 0x649   : > { %v3168_v28 = vsel %vm3160_vm9, %v23026_v58, 64  ;;  %v3195_v46 = vcvt.s32.f32 %v3193_v62  ;;  %v3194_v40 = vcvt.s32.f32 %v3192_v3 }
 0x64a   : > { %v3176_v53 = vsel %vm1169_vm0, %v3168_v28, 2147483647 }
 0x64b   : > { %3196 = vmin.xlane.f32.xlu0 %v3195_v46  ;;  %v3147_v6 = vpop.xlane.xlu0 %3146  ;;  %v3178_v7 = vshra.s32 %v3176_v53, 16  ;;  %v3177_v29 = vand.u32 65535, %v3176_v53 }
 0x64c   : > { %vm3163_vm10 = vcmp.eq.f32.partialorder %v23347_v22, %v3147_v6 }
 0x64d   : > { %v3171_v23 = vsel %vm3163_vm10, %v23026_v58, 64  ;;  %v3180_v10 = vcvt.s32.f32 %v3178_v7  ;;  %v3179_v28 = vcvt.s32.f32 %v3177_v29 }
 0x64e   : > { %v3221_v33 = vsel %vm1169_vm0, %v3171_v23, 2147483647 }
 0x64f   : > { %3181 = vmin.xlane.f32.xlu1 %v3180_v10  ;;  %v3144_v55 = vpop.xlane.xlu1 %3143  ;;  %v3223_v42 = vshra.s32 %v3221_v33, 16  ;;  %v3222_v6 = vand.u32 65535, %v3221_v33 }
 0x650   : > { %vm3162_vm11 = vcmp.eq.f32.partialorder %v23368_v4, %v3144_v55 }
 0x651   : > { %v3170_v59 = vsel %vm3162_vm11, %v23026_v58, 64  ;;  %v3225_v15 = vcvt.s32.f32 %v3223_v42  ;;  %v3224_v55 = vcvt.s32.f32 %v3222_v6 }
 0x652   : > { %v3206_v49 = vsel %vm1169_vm0, %v3170_v59, 2147483647 }
 0x653   : > { %3226 = vmin.xlane.f32.xlu0 %v3225_v15  ;;  %v3153_v1 = vpop.xlane.xlu0 %3152  ;;  %v3208_v2 = vshra.s32 %v3206_v49, 16  ;;  %v3207_v8 = vand.u32 65535, %v3206_v49 }
 0x654   : > { %vm3165_vm12 = vcmp.eq.f32.partialorder %v23383_v30, %v3153_v1 }
 0x655   : > { %v3173_v41 = vsel %vm3165_vm12, %v23026_v58, 64  ;;  %v3210_v47 = vcvt.s32.f32 %v3208_v2 }
 0x656   : > { %v3251_v16 = vsel %vm1169_vm0, %v3173_v41, 2147483647 }
 0x657   : > { %3211 = vmin.xlane.f32.xlu1 %v3210_v47  ;;  %v3150_v52 = vpop.xlane.xlu1 %3149  ;;  %v3253_v26 = vshra.s32 %v3251_v16, 16  ;;  %v3252_v59 = vand.u32 65535, %v3251_v16 }
 0x658   : > { %vm3164_vm13 = vcmp.eq.f32.partialorder %v23406_v38, %v3150_v52 }
 0x659   : > { %v3172_v19 = vsel %vm3164_vm13, %v23026_v58, 64  ;;  %v3255_v11 = vcvt.s32.f32 %v3253_v26 }
 0x65a   : > { %v3236_v20 = vsel %vm1169_vm0, %v3172_v19, 2147483647 }
 0x65b   : > { %3256 = vmin.xlane.f32.xlu0 %v3255_v11  ;;  %v3156_v25 = vpop.xlane.xlu1 %3155  ;;  %v3238_v54 = vshra.s32 %v3236_v20, 16  ;;  %v3237_v2 = vand.u32 65535, %v3236_v20 }
 0x65c   : > { %vm3166_vm14 = vcmp.eq.f32.partialorder %v23418_v9, %v3156_v25 }
 0x65d   : > { %v3174_v51 = vsel %vm3166_vm14, %v23026_v58, 64  ;;  %v3240_v37 = vcvt.s32.f32 %v3238_v54 }
 0x65e   : > { %v3266_v45 = vsel %vm1169_vm0, %v3174_v51, 2147483647 }
 0x65f   : > { %v3159_v27 = vpop.xlane.xlu0 %3158  ;;  %3241 = vmin.xlane.f32.xlu1 %v3240_v37  ;;  %v3268_v60 = vshra.s32 %v3266_v45, 16  ;;  %v3267_v52 = vand.u32 65535, %v3266_v45 }
 0x660   : > { %vm3167_vm15 = vcmp.eq.f32.partialorder %v23432_v0, %v3159_v27 }
 0x661   : > { %v3175_v12 = vsel %vm3167_vm15, %v23026_v58, 64  ;;  %v3270_v34 = vcvt.s32.f32 %v3268_v60 }
 0x662   : > { %v3281_v14 = vsel %vm1169_vm0, %v3175_v12, 2147483647 }
 0x663   : > { %3271 = vmin.xlane.f32.xlu1 %v3270_v34  ;;  %v3283_v35 = vshra.s32 %v3281_v14, 16  ;;  %v3282_v19 = vand.u32 65535, %v3281_v14 }
 0x665   : > { %v3285_v17 = vcvt.s32.f32 %v3283_v35  ;;  %v3284_v45 = vcvt.s32.f32 %v3282_v19 }
 0x667   : > { %3286 = vmin.xlane.f32.xlu0 %v3285_v17 }
 0x6d8   : > { %v23538_v48 = vpop.xlane.xlu0 %3196 }
 0x6d9   : > { %vm3198_vm2 = vcmp.eq.f32.partialorder %v3195_v46, %v23538_v48  ;;  %v3209_v46 = vcvt.s32.f32 %v3207_v8 }
 0x6da   : > { %v3199_v39 = vsel %vm3198_vm2, %v3194_v40, inf }
 0x6db   : > { %3200 = vmin.xlane.f32.xlu0 %v3199_v39 }
 0x6dc   : > { %v23541_v62 = vpop.xlane.xlu1 %3181 }
 0x6dd   : > { %vm3183_vm3 = vcmp.eq.f32.partialorder %v3180_v10, %v23541_v62  ;;  %v3254_v10 = vcvt.s32.f32 %v3252_v59 }
 0x6de   : > { %v3184_v7 = vsel %vm3183_vm3, %v3179_v28, inf }
 0x6df   : > { %3185 = vmin.xlane.f32.xlu1 %v3184_v7  ;;  %v3203_v7 = vcvt.f32.s32 %v23538_v48 }
 0x6e0   : > { %v23544_v23 = vpop.xlane.xlu0 %3226 }
 0x6e1   : > { %vm3228_vm4 = vcmp.eq.f32.partialorder %v3225_v15, %v23544_v23  ;;  %v3239_v15 = vcvt.s32.f32 %v3237_v2  ;;  %v3204_v8 = vshll.u32 %v3203_v7, 16  ;;  %v3233_v2 = vcvt.f32.s32 %v23544_v23 }
 0x6e2   : > { %v3229_v42 = vsel %vm3228_vm4, %v3224_v55, inf }
 0x6e3   : > { %3230 = vmin.xlane.f32.xlu0 %v3229_v42  ;;  %v3188_v42 = vcvt.f32.s32 %v23541_v62  ;;  %v3234_v19 = vshll.u32 %v3233_v2, 16 }
 0x6e4   : > { %v23547_v53 = vpop.xlane.xlu1 %3211 }
 0x6e5   : > { %vm3213_vm5 = vcmp.eq.f32.partialorder %v3210_v47, %v23547_v53  ;;  %v3269_v47 = vcvt.s32.f32 %v3267_v52 }
 0x6e6   : > { %v3214_v1 = vsel %vm3213_vm5, %v3209_v46, inf }
 0x6e7   : > { %3215 = vmin.xlane.f32.xlu1 %v3214_v1 }
 0x6e8   : > { %v23550_v33 = vpop.xlane.xlu0 %3256 }
 0x6e9   : > { %vm3258_vm6 = vcmp.eq.f32.partialorder %v3255_v11, %v23550_v33 }
 0x6ea   : > { %v3259_v41 = vsel %vm3258_vm6, %v3254_v10, inf  ;;  %v3189_v10 = vshll.u32 %v3188_v42, 16 }
 0x6eb   : > { %3260 = vmin.xlane.f32.xlu0 %v3259_v41 }
 0x6ec   : > { %v23553_v49 = vpop.xlane.xlu1 %3241 }
 0x6ed   : > { %vm3243_vm7 = vcmp.eq.f32.partialorder %v3240_v37, %v23553_v49 }
 0x6ee   : > { %v3244_v26 = vsel %vm3243_vm7, %v3239_v15, inf }
 0x6ef   : > { %3245 = vmin.xlane.f32.xlu1 %v3244_v26 }
 0x6f0   : > { %v23556_v16 = vpop.xlane.xlu1 %3271 }
 0x6f1   : > { %v23558_v25 = vpop.f32.mrb[8].mxu0  ;;  %vm3273_vm8 = vcmp.eq.f32.partialorder %v3270_v34, %v23556_v16 }
 0x6f2   : > { %v3121_v11 = vmax.f32 %v23296_v43, %v23558_v25  ;;  %v23563_v20 = vpop.f32.mrb[9].mxu0  ;;  %v3274_v54 = vsel %vm3273_vm8, %v3269_v47, inf }
 0x6f3   : > { %3275 = vmin.xlane.f32.xlu1 %v3274_v54  ;;  %v3218_v54 = vcvt.f32.s32 %v23547_v53 }
 0x6f4   : > { %v23567_v37 = vpop.xlane.xlu0 %3286 }
 0x6f5   : > { %v23569_v27 = vpop.f32.mrb[10].mxu0  ;;  %vm3288_vm9 = vcmp.eq.f32.partialorder %v3285_v17, %v23567_v37 }
 0x6f6   : > { %v23574_v12 = vpop.f32.mrb[11].mxu0  ;;  %v3289_v34 = vsel %vm3288_vm9, %v3284_v45, inf }
 0x6f7   : > { %3290 = vmin.xlane.f32.xlu0 %v3289_v34 }
 0x6f9   : > { %v23578_v35 = vpop.f32.mrb[12].mxu0 }
 0x6fa   : > { %v23582_v40 = vpop.f32.mrb[13].mxu0 }
 0x6fd   : > { %v23586_v29 = vpop.f32.mrb[14].mxu0 }
 0x6fe   : > { %v23590_v28 = vpop.f32.mrb[15].mxu0 }
 0x768   : > { %v3201_v55 = vpop.xlane.xlu0 %3200 }
 0x769   : > { %v3202_v46 = vcvt.f32.s32 %v3201_v55 }
 0x76b   : > { %v3205_v59 = vadd.s32 %v3204_v8, %v3202_v46 }
 0x76c   : > { %v3186_v1 = vpop.xlane.xlu1 %3185 }
 0x76d   : > { %v3187_v41 = vcvt.f32.s32 %v3186_v1  ;;  %vm3297_vm10 = vcmp.eq.s32.totalorder %v23026_v58, %v3205_v59  ;;  %v3219_v59 = vshll.u32 %v3218_v54, 16 }
 0x76e   : > { %v23599_v15 = vsel %vm3297_vm10, inf, %v23318_v5  ;;  %v23602_v52 = vsel %vm3297_vm10, 1.0, %v27650_v32 }
 0x76f   : > { %v3190_v48 = vadd.s32 %v3189_v10, %v3187_v41  ;;  %v4123_v26 = vsel %vm1169_vm0, %v23599_v15, inf  ;;  %v3324_v62 = vsel %vm1169_vm0, %v23602_v52, 0 }
 0x770   : > { %4124 = vmin.xlane.f32.xlu0 %v4123_v26  ;;  %v23608_v47 = vsub.f32 %v3324_v62, %v3324_v62  ;;  %v3231_v23 = vpop.xlane.xlu0 %3230 }
 0x771   : > { %v3232_v45 = vcvt.f32.s32 %v3231_v23  ;;  %vm3296_vm11 = vcmp.eq.s32.totalorder %v23026_v58, %v3190_v48 }
 0x772   : > { %v23613_v5 = vsel %vm3296_vm11, inf, %v23332_v31  ;;  %v23616_v34 = vsel %vm3296_vm11, 1.0, %v27650_v32  ;;  %v3423_v7 = vand.u32 4294901760, %v23608_v47  ;;  %v3263_v31 = vcvt.f32.s32 %v23550_v33 }
 0x773   : > { %v3235_v55 = vadd.s32 %v3234_v19, %v3232_v45  ;;  %v4120_v8 = vsel %vm1169_vm0, %v23613_v5, inf  ;;  %v3321_v42 = vsel %vm1169_vm0, %v23616_v34, 0  ;;  %v3248_v45 = vcvt.f32.s32 %v23553_v49 }
 0x774   : > { %4121 = vmin.xlane.f32.xlu1 %v4120_v8  ;;  %v3216_v53 = vpop.xlane.xlu1 %3215  ;;  %v23623_v46 = vsub.f32 %v3321_v42, %v3321_v42  ;;  %v3424_v33 = vsub.f32 %v23608_v47, %v3423_v7  ;;  %v3264_v54 = vshll.u32 %v3263_v31, 16 }
 0x775   : > { %v3217_v1 = vcvt.f32.s32 %v3216_v53  ;;  %vm3299_vm12 = vcmp.eq.s32.totalorder %v23026_v58, %v3235_v55 }
 0x776   : > { %v23628_v10 = vsel %vm3299_vm12, inf, %v23347_v22  ;;  %v23631_v2 = vsel %vm3299_vm12, 1.0, %v27650_v32  ;;  %v3413_v41 = vand.u32 4294901760, %v23623_v46  ;;  %v3425_v49 = vand.u32 4294901760, %v3424_v33 }
 0x777   : > { %v3220_v48 = vadd.s32 %v3219_v59, %v3217_v1  ;;  %v4129_v26 = vsel %vm1169_vm0, %v23628_v10, inf  ;;  %v3330_v62 = vsel %vm1169_vm0, %v23631_v2, 0 }
 0x778   : > { %4130 = vmin.xlane.f32.xlu0 %v4129_v26  ;;  %v3261_v23 = vpop.xlane.xlu0 %3260  ;;  %v3414_v22 = vsub.f32 %v23623_v46, %v3413_v41  ;;  %v23644_v19 = vsub.f32 %v3330_v62, %v3330_v62 }
 0x779   : > { %v3262_v55 = vcvt.f32.s32 %v3261_v23  ;;  %vm3298_vm13 = vcmp.eq.s32.totalorder %v23026_v58, %v3220_v48  ;;  %v3278_v23 = vcvt.f32.s32 %v23556_v16 }
 0x77a   : > { %v3415_v8 = vand.u32 4294901760, %v3414_v22  ;;  %v23649_v42 = vsel %vm3298_vm13, inf, %v23368_v4  ;;  %v23652_v53 = vsel %vm3298_vm13, 1.0, %v27650_v32  ;;  %v3443_v59 = vand.u32 4294901760, %v23644_v19 }
 0x77b   : > { %v3265_v1 = vadd.s32 %v3264_v54, %v3262_v55  ;;  %v4126_v26 = vsel %vm1169_vm0, %v23649_v42, inf  ;;  %v3327_v31 = vsel %vm1169_vm0, %v23652_v53, 0  ;;  %v3249_v4 = vshll.u32 %v3248_v45, 16 }
 0x77c   : > { %19766 = vmatprep.mubr.f32.mxu1 %v3415_v8  ;;  %4127 = vmin.xlane.f32.xlu1 %v4126_v26  ;;  %v3246_v48 = vpop.xlane.xlu1 %3245  ;;  %v23659_v62 = vsub.f32 %v3327_v31, %v3327_v31  ;;  %v3444_v8 = vsub.f32 %v23644_v19, %v3443_v59 }
 0x77d   : > { %v3247_v22 = vcvt.f32.s32 %v3246_v48  ;;  %19767 = vmatmul.mubr.f32.vlgmr.msra.gmra.mrb[8].mxu1 %v3425_v49  ;;  %vm3301_vm14 = vcmp.eq.s32.totalorder %v23026_v58, %v3265_v1  ;;  %v3279_v49 = vshll.u32 %v3278_v23, 16  ;;  %v3293_v48 = vcvt.f32.s32 %v23567_v37 }
 0x77e   : > { %v23664_v54 = vsel %vm3301_vm14, inf, %v23383_v30  ;;  %v23667_v55 = vsel %vm3301_vm14, 1.0, %v27650_v32  ;;  %v3433_v33 = vand.u32 4294901760, %v23659_v62  ;;  %21281 = vmatpush3.bf16.xpose.msra.mxu1 %v22889_v24 }
 0x77f   : > { %v3250_v45 = vadd.s32 %v3249_v4, %v3247_v22  ;;  %v4135_v16 = vsel %vm1169_vm0, %v23664_v54, inf  ;;  %v3336_v1 = vsel %vm1169_vm0, %v23667_v55, 0  ;;  %21283 = vmatprep.subr.bf16.mxu1 %v22883_v18 }
 0x780   : > { %4136 = vmin.xlane.f32.xlu0 %v4135_v16  ;;  %v3276_v30 = vpop.xlane.xlu1 %3275  ;;  %v3434_v26 = vsub.f32 %v23659_v62, %v3433_v33  ;;  %v23682_v31 = vsub.f32 %v3336_v1, %v3336_v1  ;;  %v3445_v16 = vand.u32 4294901760, %v3444_v8 }
 0x781   : > { %v3277_v4 = vcvt.f32.s32 %v3276_v30  ;;  %vm3300_vm15 = vcmp.eq.s32.totalorder %v23026_v58, %v3250_v45  ;;  %v3294_v30 = vshll.u32 %v3293_v48, 16 }
 0x782   : > { %v3435_v22 = vand.u32 4294901760, %v3434_v26  ;;  %v23687_v6 = vsel %vm3300_vm15, inf, %v23406_v38  ;;  %v23690_v39 = vsel %vm3300_vm15, 1.0, %v27650_v32  ;;  %v3463_v37 = vand.u32 4294901760, %v23682_v31 }
 0x783   : > { %v3280_v17 = vadd.s32 %v3279_v49, %v3277_v4  ;;  %v4132_v3 = vsel %vm1169_vm0, %v23687_v6, inf  ;;  %v3333_v23 = vsel %vm1169_vm0, %v23690_v39, 0 }
 0x784   : > { %v3291_v1 = vpop.xlane.xlu0 %3290  ;;  %19769 = vmatprep.mubr.f32.mxu1 %v3435_v22  ;;  %4133 = vmin.xlane.f32.xlu1 %v4132_v3  ;;  %v3452_v45 = vsub.f32 %v3333_v23, %v3333_v23  ;;  %v3464_v48 = vsub.f32 %v23682_v31, %v3463_v37 }
 0x785   : > { %v3292_v38 = vcvt.f32.s32 %v3291_v1  ;;  %19770 = vmatmul.mubr.f32.gmra.mrb[10].mxu1 %v3445_v16  ;;  %vm3302_vm2 = vcmp.eq.s32.totalorder %v23026_v58, %v3280_v17 }
 0x786   : > { %v23699_v8 = vsel %vm3302_vm2, inf, %v23418_v9  ;;  %v23702_v26 = vsel %vm3302_vm2, 1.0, %v27650_v32  ;;  %v3453_v49 = vand.u32 4294901760, %v3452_v45  ;;  %v3465_v60 = vand.u32 4294901760, %v3464_v48 }
 0x787   : > { %v3295_v4 = vadd.s32 %v3294_v30, %v3292_v38  ;;  %v4138_v14 = vsel %vm1169_vm0, %v23699_v8, inf  ;;  %v3339_v3 = vsel %vm1169_vm0, %v23702_v26, 0 }
 0x788   : > { %4139 = vmin.xlane.f32.xlu1 %v4138_v14  ;;  %v3454_v17 = vsub.f32 %v3452_v45, %v3453_v49  ;;  %v3472_v22 = vsub.f32 %v3339_v3, %v3339_v3 }
 0x789   : > { %vm3303_vm3 = vcmp.eq.s32.totalorder %v23026_v58, %v3295_v4 }
 0x78a   : > { %v23713_v9 = vsel %vm3303_vm3, inf, %v23432_v0  ;;  %v23716_v16 = vsel %vm3303_vm3, 1.0, %v27650_v32  ;;  %v3455_v23 = vand.u32 4294901760, %v3454_v17  ;;  %v3473_v1 = vand.u32 4294901760, %v3472_v22 }
 0x78b   : > { %v4141_v30 = vsel %vm1169_vm0, %v23713_v9, inf  ;;  %v3342_v38 = vsel %vm1169_vm0, %v23716_v16, 0 }
 0x78c   : > { %4142 = vmin.xlane.f32.xlu0 %v4141_v30  ;;  %19772 = vmatprep.mubr.f32.mxu1 %v3455_v23  ;;  %v3474_v14 = vsub.f32 %v3472_v22, %v3473_v1  ;;  %v3482_v3 = vsub.f32 %v3342_v38, %v3342_v38 }
 0x78d   : > { %19773 = vmatmul.mubr.f32.gmra.mrb[12].mxu1 %v3465_v60 }
 0x78e   : > { %v3475_v4 = vand.u32 4294901760, %v3474_v14  ;;  %v3483_v0 = vand.u32 4294901760, %v3482_v3 }
 0x790   : > { %19775 = vmatprep.mubr.f32.mxu1 %v3475_v4  ;;  %v3484_v51 = vsub.f32 %v3482_v3, %v3483_v0 }
 0x792   : > { %v3485_v32 = vand.u32 4294901760, %v3484_v51 }
 0x794   : > { %19776 = vmatmul.mubr.f32.gmra.mrb[14].mxu1 %v3485_v32 }
 0x795   : > { %19782 = vmatprep.mubr.msk.f32.mxu1 %vm1169_vm0, %v23616_v34 }
 0x798   : > { %19783 = vmatmul.mubr.msk.f32.vlgmr.msra.gmra.mrb[8].mxu1 %vm1169_vm0, %v23602_v52 }
 0x799   : > { %19785 = vmatprep.mubr.msk.f32.mxu1 %vm1169_vm0, %v23652_v53  ;;  %21285 = vmatpush3.bf16.xpose.msra.mxu1 %v22883_v18 }
 0x79a   : > { %21287 = vmatprep.subr.bf16.mxu1 %v22881_v13 }
 0x79c   : > { %19786 = vmatmul.mubr.msk.f32.gmra.mrb[10].mxu1 %vm1169_vm0, %v23631_v2 }
 0x79d   : > { %19788 = vmatprep.mubr.msk.f32.mxu1 %vm1169_vm0, %v23690_v39 }
 0x7a0   : > { %19789 = vmatmul.mubr.msk.f32.gmra.mrb[12].mxu1 %vm1169_vm0, %v23667_v55 }
 0x7a1   : > { %19791 = vmatprep.mubr.msk.f32.mxu1 %vm1169_vm0, %v23702_v26 }
 0x7a4   : > { %19792 = vmatmul.mubr.msk.f32.gmra.mrb[14].mxu1 %vm1169_vm0, %v23716_v16 }
 0x7a5   : > { %19798 = vmatprep.mubr.f32.mxu1 %v23623_v46 }
 0x7a8   : > { %19799 = vmatmul.mubr.f32.vlgmr.msra.gmra.mrb[8].mxu1 %v23608_v47 }
 0x7a9   : > { %19801 = vmatprep.mubr.f32.mxu1 %v23659_v62  ;;  %21289 = vmatpush3.bf16.xpose.msra.mxu1 %v22881_v13 }
 0x7aa   : > { %21291 = vmatprep.subr.bf16.mxu1 %v22887_v21 }
 0x7ac   : > { %19802 = vmatmul.mubr.f32.gmra.mrb[10].mxu1 %v23644_v19 }
 0x7ad   : > { %19804 = vmatprep.mubr.f32.mxu1 %v3452_v45 }
 0x7b0   : > { %19805 = vmatmul.mubr.f32.gmra.mrb[12].mxu1 %v23682_v31 }
 0x7b1   : > { %19807 = vmatprep.mubr.f32.mxu1 %v3472_v22 }
 0x7b4   : > { %19808 = vmatmul.mubr.f32.gmra.mrb[14].mxu1 %v3482_v3 }
 0x7b5   : > { %19814 = vmatprep.mubr.f32.mxu1 %v3413_v41 }
 0x7b8   : > { %19815 = vmatmul.mubr.f32.vlgmr.msra.gmra.mrb[8].mxu1 %v3423_v7 }
 0x7b9   : > { %19817 = vmatprep.mubr.f32.mxu1 %v3433_v33  ;;  %21293 = vmatpush3.bf16.xpose.msra.mxu1 %v22887_v21 }
 0x7ba   : > { %21295 = vmatprep.subr.bf16.mxu1 %v22881_v13 }
 0x7bc   : > { %19818 = vmatmul.mubr.f32.gmra.mrb[10].mxu1 %v3443_v59 }
 0x7bd   : > { %19820 = vmatprep.mubr.f32.mxu1 %v3453_v49 }
 0x7c0   : > { %19821 = vmatmul.mubr.f32.gmra.mrb[12].mxu1 %v3463_v37 }
 0x7c1   : > { %19823 = vmatprep.mubr.f32.mxu1 %v3473_v1 }
 0x7c4   : > { %19824 = vmatmul.mubr.f32.gmra.mrb[14].mxu1 %v3483_v0 }
 0x7c5   : > { %19830 = vmatprep.mubr.msk.f32.mxu1 %vm1169_vm0, %v23616_v34 }
 0x7c8   : > { %19831 = vmatmul.mubr.msk.f32.vlgmr.msra.gmra.mrb[8].mxu1 %vm1169_vm0, %v23602_v52 }
 0x7c9   : > { %19833 = vmatprep.mubr.msk.f32.mxu1 %vm1169_vm0, %v23652_v53  ;;  %21297 = vmatpush3.bf16.xpose.msra.mxu1 %v22881_v13 }
 0x7ca   : > { %21323 = vmatprep.subr.bf16.mxu1 %v22881_v13 }
 0x7cc   : > { %19834 = vmatmul.mubr.msk.f32.gmra.mrb[10].mxu1 %vm1169_vm0, %v23631_v2 }
 0x7cd   : > { %19836 = vmatprep.mubr.msk.f32.mxu1 %vm1169_vm0, %v23690_v39 }
 0x7d0   : > { %19837 = vmatmul.mubr.msk.f32.gmra.mrb[12].mxu1 %vm1169_vm0, %v23667_v55 }
 0x7d1   : > { %19839 = vmatprep.mubr.msk.f32.mxu1 %vm1169_vm0, %v23702_v26 }
 0x7d4   : > { %19840 = vmatmul.mubr.msk.f32.gmra.mrb[14].mxu1 %vm1169_vm0, %v23716_v16 }
 0x7d5   : > { %19846 = vmatprep.mubr.msk.f32.mxu1 %vm1169_vm0, %v23616_v34 }
 0x7d8   : > { %19847 = vmatmul.mubr.msk.f32.vlgmr.msra.gmra.mrb[8].mxu1 %vm1169_vm0, %v23602_v52 }
 0x7d9   : > { %19849 = vmatprep.mubr.msk.f32.mxu1 %vm1169_vm0, %v23652_v53  ;;  %21325 = vmatpush3.bf16.xpose.msra.mxu1 %v22881_v13 }
 0x7da   : > { %21327 = vmatprep.subr.bf16.mxu1 %v22889_v24 }
 0x7dc   : > { %19850 = vmatmul.mubr.msk.f32.gmra.mrb[10].mxu1 %vm1169_vm0, %v23631_v2 }
 0x7dd   : > { %19852 = vmatprep.mubr.msk.f32.mxu1 %vm1169_vm0, %v23690_v39 }
 0x7e0   : > { %19853 = vmatmul.mubr.msk.f32.gmra.mrb[12].mxu1 %vm1169_vm0, %v23667_v55 }
 0x7e1   : > { %19855 = vmatprep.mubr.msk.f32.mxu1 %vm1169_vm0, %v23702_v26 }
 0x7e4   : > { %19856 = vmatmul.mubr.msk.f32.gmra.mrb[14].mxu1 %vm1169_vm0, %v23716_v16 }
 0x7fd   : > { %v4125_v32 = vpop.xlane.xlu0 %4124 }
 0x7fe   : > { %vm4145_vm4 = vcmp.eq.f32.partialorder %v23599_v15, %v4125_v32 }
 0x7ff   : > { %v4153_v51 = vsel %vm4145_vm4, %v23026_v58, 64 }
 0x800   : > { %v4175_v60 = vsel %vm1169_vm0, %v4153_v51, 2147483647 }
 0x801   : > { %v4122_v52 = vpop.xlane.xlu1 %4121  ;;  %v4177_v47 = vshra.s32 %v4175_v60, 16 }
 0x802   : > { %vm4144_vm5 = vcmp.eq.f32.partialorder %v23613_v5, %v4122_v52 }
 0x803   : > { %v4152_v39 = vsel %vm4144_vm5, %v23026_v58, 64  ;;  %v4179_v34 = vcvt.s32.f32 %v4177_v47 }
 0x804   : > { %v4160_v7 = vsel %vm1169_vm0, %v4152_v39, 2147483647 }
 0x805   : > { %4180 = vmin.xlane.f32.xlu0 %v4179_v34  ;;  %v4131_v46 = vpop.xlane.xlu0 %4130  ;;  %v4162_v2 = vshra.s32 %v4160_v7, 16 }
 0x806   : > { %vm4147_vm6 = vcmp.eq.f32.partialorder %v23628_v10, %v4131_v46 }
 0x807   : > { %v4155_v41 = vsel %vm4147_vm6, %v23026_v58, 64  ;;  %v4164_v19 = vcvt.s32.f32 %v4162_v2  ;;  %v4176_v2 = vand.u32 65535, %v4175_v60 }
 0x808   : > { %v4205_v53 = vsel %vm1169_vm0, %v4155_v41, 2147483647 }
 0x809   : > { %4165 = vmin.xlane.f32.xlu1 %v4164_v19  ;;  %v4128_v59 = vpop.xlane.xlu1 %4127  ;;  %v4207_v62 = vshra.s32 %v4205_v53, 16 }
 0x80a   : > { %vm4146_vm7 = vcmp.eq.f32.partialorder %v23649_v42, %v4128_v59  ;;  %v4178_v59 = vcvt.s32.f32 %v4176_v2 }
 0x80b   : > { %v4154_v55 = vsel %vm4146_vm7, %v23026_v58, 64  ;;  %v4209_v33 = vcvt.s32.f32 %v4207_v62  ;;  %v4161_v62 = vand.u32 65535, %v4160_v7 }
 0x80c   : > { %v4190_v31 = vsel %vm1169_vm0, %v4154_v55, 2147483647 }
 0x80d   : > { %4210 = vmin.xlane.f32.xlu0 %v4209_v33  ;;  %v4137_v37 = vpop.xlane.xlu0 %4136  ;;  %v4192_v45 = vshra.s32 %v4190_v31, 16  ;;  %v4191_v60 = vand.u32 65535, %v4190_v31 }
 0x80e   : > { %vm4149_vm8 = vcmp.eq.f32.partialorder %v23664_v54, %v4137_v37 }
 0x80f   : > { %v4157_v26 = vsel %vm4149_vm8, %v23026_v58, 64  ;;  %v4194_v49 = vcvt.s32.f32 %v4192_v45  ;;  %v4163_v45 = vcvt.s32.f32 %v4161_v62 }
 0x810   : > { %v4235_v48 = vsel %vm1169_vm0, %v4157_v26, 2147483647  ;;  %v4206_v26 = vand.u32 65535, %v4205_v53 }
 0x811   : > { %4195 = vmin.xlane.f32.xlu1 %v4194_v49  ;;  %v4134_v17 = vpop.xlane.xlu1 %4133  ;;  %v4237_v22 = vshra.s32 %v4235_v48, 16 }
 0x812   : > { %vm4148_vm9 = vcmp.eq.f32.partialorder %v23687_v6, %v4134_v17 }
 0x813   : > { %v4156_v16 = vsel %vm4148_vm9, %v23026_v58, 64  ;;  %v4239_v23 = vcvt.s32.f32 %v4237_v22 }
 0x814   : > { %v4220_v1 = vsel %vm1169_vm0, %v4156_v16, 2147483647  ;;  %v4208_v16 = vcvt.s32.f32 %v4206_v26  ;;  %v27674_v26 = vmax.f32 %v23306_v36, %v23574_v12 }
 0x815   : > { %4240 = vmin.xlane.f32.xlu0 %v4239_v23  ;;  %v4140_v30 = vpop.xlane.xlu1 %4139  ;;  %v4222_v38 = vshra.s32 %v4220_v1, 16 }
 0x816   : > { %vm4150_vm10 = vcmp.eq.f32.partialorder %v23699_v8, %v4140_v30 }
 0x817   : > { %v4158_v14 = vsel %vm4150_vm10, %v23026_v58, 64  ;;  %v4224_v3 = vcvt.s32.f32 %v4222_v38  ;;  %v4236_v38 = vand.u32 65535, %v4235_v48 }
 0x818   : > { %v4250_v4 = vsel %vm1169_vm0, %v4158_v14, 2147483647 }
 0x819   : > { %v4143_v0 = vpop.xlane.xlu0 %4142  ;;  %4225 = vmin.xlane.f32.xlu1 %v4224_v3  ;;  %v4252_v32 = vshra.s32 %v4250_v4, 16 }
 0x81a   : > { %vm4151_vm11 = vcmp.eq.f32.partialorder %v23713_v9, %v4143_v0  ;;  %v4221_v0 = vand.u32 65535, %v4220_v1 }
 0x81b   : > { %v4159_v51 = vsel %vm4151_vm11, %v23026_v58, 64  ;;  %v4254_v52 = vcvt.s32.f32 %v4252_v32 }
 0x81c   : > { %v4265_v47 = vsel %vm1169_vm0, %v4159_v51, 2147483647  ;;  %v4251_v51 = vand.u32 65535, %v4250_v4  ;;  %v27672_v4 = vmax.f32 %v23299_v44, %v23563_v20 }
 0x81d   : > { %4255 = vmin.xlane.f32.xlu1 %v4254_v52  ;;  %v4267_v39 = vshra.s32 %v4265_v47, 16  ;;  %v4266_v2 = vand.u32 65535, %v4265_v47 }
 0x81f   : > { %v4269_v46 = vcvt.s32.f32 %v4267_v39 }
 0x821   : > { %4270 = vmin.xlane.f32.xlu0 %v4269_v46 }
 0x892   : > { %v23819_v41 = vpop.xlane.xlu0 %4180 }
 0x893   : > { %vm4182_vm12 = vcmp.eq.f32.partialorder %v4179_v34, %v23819_v41  ;;  %v4193_v34 = vcvt.s32.f32 %v4191_v60 }
 0x894   : > { %v4183_v55 = vsel %vm4182_vm12, %v4178_v59, inf }
 0x895   : > { %4184 = vmin.xlane.f32.xlu0 %v4183_v55 }
 0x896   : > { %v23822_v37 = vpop.xlane.xlu1 %4165 }
 0x897   : > { %vm4167_vm13 = vcmp.eq.f32.partialorder %v4164_v19, %v23822_v37  ;;  %v4238_v19 = vcvt.s32.f32 %v4236_v38 }
 0x898   : > { %v4168_v17 = vsel %vm4167_vm13, %v4163_v45, inf  ;;  %v4268_v45 = vcvt.s32.f32 %v4266_v2 }
 0x899   : > { %4169 = vmin.xlane.f32.xlu1 %v4168_v17  ;;  %v27675_v17 = vmax.f32 %v23308_v57, %v23578_v35  ;;  %v4187_v57 = vcvt.f32.s32 %v23819_v41 }
 0x89a   : > { %v23825_v22 = vpop.xlane.xlu0 %4210 }
 0x89b   : > { %vm4212_vm14 = vcmp.eq.f32.partialorder %v4209_v33, %v23825_v22  ;;  %v4223_v33 = vcvt.s32.f32 %v4221_v0 }
 0x89c   : > { %v4213_v30 = vsel %vm4212_vm14, %v4208_v16, inf }
 0x89d   : > { %4214 = vmin.xlane.f32.xlu0 %v4213_v30  ;;  %v27677_v30 = vmax.f32 %v23312_v63, %v23586_v29  ;;  %v4217_v63 = vcvt.f32.s32 %v23825_v22 }
 0x89e   : > { %v23828_v7 = vpop.xlane.xlu1 %4195 }
 0x89f   : > { %vm4197_vm15 = vcmp.eq.f32.partialorder %v4194_v49, %v23828_v7  ;;  %v4253_v49 = vcvt.s32.f32 %v4251_v51  ;;  %v4202_v2 = vcvt.f32.s32 %v23828_v7 }
 0x8a0   : > { %v4198_v14 = vsel %vm4197_vm15, %v4193_v34, inf  ;;  %v27678_v34 = vmax.f32 %v23314_v50, %v23590_v28  ;;  %v27679_v50 = vmov 0.0  }
 0x8a1   : > { %4199 = vmin.xlane.f32.xlu1 %v4198_v14  ;;  %v4188_v14 = vshll.u32 %v4187_v57, 16 }
 0x8a2   : > { %v23831_v53 = vpop.xlane.xlu0 %4240 }
 0x8a3   : > { %vm4242_vm2 = vcmp.eq.f32.partialorder %v4239_v23, %v23831_v53 }
 0x8a4   : > { %v4243_v32 = vsel %vm4242_vm2, %v4238_v19, inf }
 0x8a5   : > { %4244 = vmin.xlane.f32.xlu0 %v4243_v32 }
 0x8a6   : > { %v23834_v31 = vpop.xlane.xlu1 %4225 }
 0x8a7   : > { %vm4227_vm3 = vcmp.eq.f32.partialorder %v4224_v3, %v23834_v31  ;;  %v4232_v57 = vcvt.f32.s32 %v23834_v31 }
 0x8a8   : > { %v4228_v39 = vsel %vm4227_vm3, %v4223_v33, inf }
 0x8a9   : > { %4229 = vmin.xlane.f32.xlu1 %v4228_v39 }
 0x8aa   : > { %v23837_v48 = vpop.xlane.xlu1 %4255 }
 0x8ab   : > { %v19848_v59 = vpop.f32.mrb[8].mxu1  ;;  %vm4257_vm4 = vcmp.eq.f32.partialorder %v4254_v52, %v23837_v48  ;;  %v27673_v52 = vmax.f32 %v23303_v56, %v23569_v27  ;;  %v27676_v56 = vmax.f32 %v23310_v61, %v23582_v40  ;;  %v4172_v61 = vcvt.f32.s32 %v23822_v37 }
 0x8ac   : > { %v23843_v23 = vmax.f32 %v3121_v11, %v19848_v59  ;;  %v4058_v1 = vpop.f32.mrb[9].mxu1  ;;  %v4258_v62 = vsel %vm4257_vm4, %v4253_v49, inf  ;;  %v4218_v49 = vshll.u32 %v4217_v63, 16 }
 0x8ad   : > { %v23848_v3 = vmax.f32 %v27672_v4, %v4058_v1  ;;  %4259 = vmin.xlane.f32.xlu1 %v4258_v62  ;;  %v4173_v32 = vshll.u32 %v4172_v61, 16 }
 0x8ae   : > { %v23850_v55 = vpop.xlane.xlu0 %4270 }
 0x8af   : > { %v19851_v47 = vpop.f32.mrb[10].mxu1  ;;  %vm4272_vm5 = vcmp.eq.f32.partialorder %v4269_v46, %v23850_v55 }
 0x8b0   : > { %v23856_v43 = vmax.f32 %v27673_v52, %v19851_v47  ;;  %v4070_v25 = vpop.f32.mrb[11].mxu1  ;;  %v4273_v11 = vsel %vm4272_vm5, %v4268_v45, inf }
 0x8b1   : > { %v23861_v44 = vmax.f32 %v27674_v26, %v4070_v25  ;;  %4274 = vmin.xlane.f32.xlu0 %v4273_v11  ;;  %v4203_v25 = vshll.u32 %v4202_v2, 16 }
 0x8b3   : > { %v19854_v20 = vpop.f32.mrb[12].mxu1 }
 0x8b4   : > { %v23866_v16 = vmax.f32 %v27675_v17, %v19854_v20  ;;  %v4082_v46 = vpop.f32.mrb[13].mxu1 }
 0x8b5   : > { %v23871_v27 = vmax.f32 %v27676_v56, %v4082_v46 }
 0x8b7   : > { %v19857_v60 = vpop.f32.mrb[14].mxu1 }
 0x8b8   : > { %v23876_v36 = vmax.f32 %v27677_v30, %v19857_v60  ;;  %v4094_v12 = vpop.f32.mrb[15].mxu1 }
 0x8b9   : > { %v23881_v38 = vmax.f32 %v27678_v34, %v4094_v12 }
 0x922   : > { %v4185_v35 = vpop.xlane.xlu0 %4184 }
 0x923   : > { %v4186_v40 = vcvt.f32.s32 %v4185_v35 }
 0x925   : > { %v4189_v19 = vadd.s32 %v4188_v14, %v4186_v40 }
 0x926   : > { %v4170_v0 = vpop.xlane.xlu1 %4169 }
 0x927   : > { %v4171_v29 = vcvt.f32.s32 %v4170_v0  ;;  %vm4281_vm6 = vcmp.eq.s32.totalorder %v23026_v58, %v4189_v19 }
 0x928   : > { %v23888_v33 = vsel %vm4281_vm6, inf, %v23599_v15  ;;  %v23891_v28 = vsel %vm4281_vm6, 1.0, %v27679_v50 }
 0x929   : > { %v4174_v41 = vadd.s32 %v4173_v32, %v4171_v29  ;;  %v5107_v51 = vsel %vm1169_vm0, %v23888_v33, inf  ;;  %v4308_v37 = vsel %vm1169_vm0, %v23891_v28, 0 }
 0x92a   : > { %5108 = vmin.xlane.f32.xlu0 %v5107_v51  ;;  %v23897_v39 = vsub.f32 %v4308_v37, %v4308_v37  ;;  %v4215_v22 = vpop.xlane.xlu0 %4214  ;;  %v4262_v51 = vcvt.f32.s32 %v23837_v48 }
 0x92b   : > { %v4216_v59 = vcvt.f32.s32 %v4215_v22  ;;  %vm4280_vm7 = vcmp.eq.s32.totalorder %v23026_v58, %v4174_v41 }
 0x92c   : > { %v23902_v15 = vsel %vm4280_vm7, inf, %v23613_v5  ;;  %v23905_v1 = vsel %vm4280_vm7, 1.0, %v27679_v50  ;;  %v4407_v62 = vand.u32 4294901760, %v23897_v39  ;;  %v4247_v5 = vcvt.f32.s32 %v23831_v53 }
 0x92d   : > { %v4219_v4 = vadd.s32 %v4218_v49, %v4216_v59  ;;  %v5104_v45 = vsel %vm1169_vm0, %v23902_v15, inf  ;;  %v4305_v47 = vsel %vm1169_vm0, %v23905_v1, 0 }
 0x92e   : > { %5105 = vmin.xlane.f32.xlu1 %v5104_v45  ;;  %v4200_v7 = vpop.xlane.xlu1 %4199  ;;  %v23912_v52 = vsub.f32 %v4305_v47, %v4305_v47  ;;  %v4408_v53 = vsub.f32 %v23897_v39, %v4407_v62  ;;  %v4248_v34 = vshll.u32 %v4247_v5, 16  ;;  %v4277_v5 = vcvt.f32.s32 %v23850_v55 }
 0x92f   : > { %v4201_v11 = vcvt.f32.s32 %v4200_v7  ;;  %vm4283_vm8 = vcmp.eq.s32.totalorder %v23026_v58, %v4219_v4 }
 0x930   : > { %v23917_v26 = vsel %vm4283_vm8, inf, %v23628_v10  ;;  %v23920_v20 = vsel %vm4283_vm8, 1.0, %v27679_v50  ;;  %v4397_v17 = vand.u32 4294901760, %v23912_v52  ;;  %v4409_v63 = vand.u32 4294901760, %v4408_v53 }
 0x931   : > { %v4204_v46 = vadd.s32 %v4203_v25, %v4201_v11  ;;  %v5113_v56 = vsel %vm1169_vm0, %v23917_v26, inf  ;;  %v4314_v60 = vsel %vm1169_vm0, %v23920_v20, 0  ;;  %v4263_v25 = vshll.u32 %v4262_v51, 16 }
 0x932   : > { %5114 = vmin.xlane.f32.xlu0 %v5113_v56  ;;  %v4245_v30 = vpop.xlane.xlu0 %4244  ;;  %v4398_v10 = vsub.f32 %v23912_v52, %v4397_v17  ;;  %v23933_v12 = vsub.f32 %v4314_v60, %v4314_v60 }
 0x933   : > { %v4246_v35 = vcvt.f32.s32 %v4245_v30  ;;  %vm4282_vm9 = vcmp.eq.s32.totalorder %v23026_v58, %v4204_v46 }
 0x934   : > { %v4399_v14 = vand.u32 4294901760, %v4398_v10  ;;  %v23938_v61 = vsel %vm4282_vm9, inf, %v23649_v42  ;;  %v23941_v40 = vsel %vm4282_vm9, 1.0, %v27679_v50  ;;  %v4427_v19 = vand.u32 4294901760, %v23933_v12 }
 0x935   : > { %v4249_v0 = vadd.s32 %v4248_v34, %v4246_v35  ;;  %v5110_v32 = vsel %vm1169_vm0, %v23938_v61, inf  ;;  %v4311_v31 = vsel %vm1169_vm0, %v23941_v40, 0  ;;  %v4233_v42 = vshll.u32 %v4232_v57, 16 }
 0x936   : > { %19862 = vmatprep.mubr.f32.mxu0 %v4399_v14  ;;  %5111 = vmin.xlane.f32.xlu1 %v5110_v32  ;;  %v4230_v29 = vpop.xlane.xlu1 %4229  ;;  %v23948_v41 = vsub.f32 %v4311_v31, %v4311_v31  ;;  %v4428_v59 = vsub.f32 %v23933_v12, %v4427_v19  ;;  %v4278_v14 = vshll.u32 %v4277_v5, 16 }
 0x937   : > { %v4231_v37 = vcvt.f32.s32 %v4230_v29  ;;  %19863 = vmatmul.mubr.f32.vlgmr.msra.gmra.mrb[16].mxu0 %v4409_v63  ;;  %vm4285_vm10 = vcmp.eq.s32.totalorder %v23026_v58, %v4249_v0 }
 0x938   : > { %v23953_v22 = vsel %vm4285_vm10, inf, %v23664_v54  ;;  %v23956_v49 = vsel %vm4285_vm10, 1.0, %v27679_v50  ;;  %v4417_v2 = vand.u32 4294901760, %v23948_v41  ;;  %21305 = vmatpush3.bf16.xpose.msra.mxu0 %v22889_v24  ;;  %v4429_v53 = vand.u32 4294901760, %v4428_v59 }
 0x939   : > { %v4234_v4 = vadd.s32 %v4233_v42, %v4231_v37  ;;  %v5119_v48 = vsel %vm1169_vm0, %v23953_v22, inf  ;;  %v4320_v45 = vsel %vm1169_vm0, %v23956_v49, 0  ;;  %21307 = vmatprep.subr.bf16.mxu0 %v22883_v18 }
 0x93a   : > { %5120 = vmin.xlane.f32.xlu0 %v5119_v48  ;;  %v4260_v54 = vpop.xlane.xlu1 %4259  ;;  %v4418_v47 = vsub.f32 %v23948_v41, %v4417_v2  ;;  %v23971_v7 = vsub.f32 %v4320_v45, %v4320_v45 }
 0x93b   : > { %v4261_v11 = vcvt.f32.s32 %v4260_v54  ;;  %vm4284_vm11 = vcmp.eq.s32.totalorder %v23026_v58, %v4234_v4 }
 0x93c   : > { %v4419_v46 = vand.u32 4294901760, %v4418_v47  ;;  %v23976_v56 = vsel %vm4284_vm11, inf, %v23687_v6  ;;  %v23979_v60 = vsel %vm4284_vm11, 1.0, %v27679_v50  ;;  %v4447_v55 = vand.u32 4294901760, %v23971_v7 }
 0x93d   : > { %v4264_v30 = vadd.s32 %v4263_v25, %v4261_v11  ;;  %v5116_v10 = vsel %vm1169_vm0, %v23976_v56, inf  ;;  %v4317_v34 = vsel %vm1169_vm0, %v23979_v60, 0 }
 0x93e   : > { %v4275_v57 = vpop.xlane.xlu0 %4274  ;;  %19865 = vmatprep.mubr.f32.mxu0 %v4419_v46  ;;  %5117 = vmin.xlane.f32.xlu1 %v5116_v10  ;;  %v4436_v35 = vsub.f32 %v4317_v34, %v4317_v34  ;;  %v4448_v42 = vsub.f32 %v23971_v7, %v4447_v55 }
 0x93f   : > { %v4276_v6 = vcvt.f32.s32 %v4275_v57  ;;  %19866 = vmatmul.mubr.f32.gmra.mrb[18].mxu0 %v4429_v53  ;;  %vm4286_vm12 = vcmp.eq.s32.totalorder %v23026_v58, %v4264_v30 }
 0x940   : > { %v23988_v0 = vsel %vm4286_vm12, inf, %v23699_v8  ;;  %v23991_v32 = vsel %vm4286_vm12, 1.0, %v27679_v50  ;;  %v4437_v63 = vand.u32 4294901760, %v4436_v35  ;;  %v4449_v47 = vand.u32 4294901760, %v4448_v42 }
 0x941   : > { %v4279_v31 = vadd.s32 %v4278_v14, %v4276_v6  ;;  %v5122_v29 = vsel %vm1169_vm0, %v23988_v0, inf  ;;  %v4323_v51 = vsel %vm1169_vm0, %v23991_v32, 0 }
 0x942   : > { %5123 = vmin.xlane.f32.xlu1 %v5122_v29  ;;  %v4438_v37 = vsub.f32 %v4436_v35, %v4437_v63  ;;  %v4456_v59 = vsub.f32 %v4323_v51, %v4323_v51 }
 0x943   : > { %vm4287_vm13 = vcmp.eq.s32.totalorder %v23026_v58, %v4279_v31 }
 0x944   : > { %v24002_v8 = vsel %vm4287_vm13, inf, %v23713_v9  ;;  %v24005_v4 = vsel %vm4287_vm13, 1.0, %v27679_v50  ;;  %v4439_v48 = vand.u32 4294901760, %v4438_v37  ;;  %v4457_v45 = vand.u32 4294901760, %v4456_v59 }
 0x945   : > { %v5125_v54 = vsel %vm1169_vm0, %v24002_v8, inf  ;;  %v4326_v25 = vsel %vm1169_vm0, %v24005_v4, 0 }
 0x946   : > { %5126 = vmin.xlane.f32.xlu0 %v5125_v54  ;;  %19868 = vmatprep.mubr.f32.mxu0 %v4439_v48  ;;  %v4458_v5 = vsub.f32 %v4456_v59, %v4457_v45  ;;  %v4466_v11 = vsub.f32 %v4326_v25, %v4326_v25 }
 0x947   : > { %19869 = vmatmul.mubr.f32.gmra.mrb[20].mxu0 %v4449_v47 }
 0x948   : > { %v4459_v46 = vand.u32 4294901760, %v4458_v5  ;;  %v4467_v9 = vand.u32 4294901760, %v4466_v11 }
 0x94a   : > { %19871 = vmatprep.mubr.f32.mxu0 %v4459_v46  ;;  %v4468_v53 = vsub.f32 %v4466_v11, %v4467_v9 }
 0x94c   : > { %v4469_v30 = vand.u32 4294901760, %v4468_v53 }
 0x94e   : > { %19872 = vmatmul.mubr.f32.gmra.mrb[22].mxu0 %v4469_v30 }
 0x94f   : > { %19878 = vmatprep.mubr.msk.f32.mxu0 %vm1169_vm0, %v23905_v1 }
 0x952   : > { %19879 = vmatmul.mubr.msk.f32.vlgmr.msra.gmra.mrb[16].mxu0 %vm1169_vm0, %v23891_v28 }
 0x953   : > { %19881 = vmatprep.mubr.msk.f32.mxu0 %vm1169_vm0, %v23941_v40  ;;  %21309 = vmatpush3.bf16.xpose.msra.mxu0 %v22883_v18 }
 0x954   : > { %21311 = vmatprep.subr.bf16.mxu0 %v22881_v13 }
 0x956   : > { %19882 = vmatmul.mubr.msk.f32.gmra.mrb[18].mxu0 %vm1169_vm0, %v23920_v20 }
 0x957   : > { %19884 = vmatprep.mubr.msk.f32.mxu0 %vm1169_vm0, %v23979_v60 }
 0x95a   : > { %19885 = vmatmul.mubr.msk.f32.gmra.mrb[20].mxu0 %vm1169_vm0, %v23956_v49 }
 0x95b   : > { %19887 = vmatprep.mubr.msk.f32.mxu0 %vm1169_vm0, %v23991_v32 }
 0x95e   : > { %19888 = vmatmul.mubr.msk.f32.gmra.mrb[22].mxu0 %vm1169_vm0, %v24005_v4 }
 0x95f   : > { %19894 = vmatprep.mubr.f32.mxu0 %v23912_v52 }
 0x962   : > { %19895 = vmatmul.mubr.f32.vlgmr.msra.gmra.mrb[16].mxu0 %v23897_v39 }
 0x963   : > { %19897 = vmatprep.mubr.f32.mxu0 %v23948_v41  ;;  %21313 = vmatpush3.bf16.xpose.msra.mxu0 %v22881_v13 }
 0x964   : > { %21315 = vmatprep.subr.bf16.mxu0 %v22887_v21 }
 0x966   : > { %19898 = vmatmul.mubr.f32.gmra.mrb[18].mxu0 %v23933_v12 }
 0x967   : > { %19900 = vmatprep.mubr.f32.mxu0 %v4436_v35 }
 0x96a   : > { %19901 = vmatmul.mubr.f32.gmra.mrb[20].mxu0 %v23971_v7 }
 0x96b   : > { %19903 = vmatprep.mubr.f32.mxu0 %v4456_v59 }
 0x96e   : > { %19904 = vmatmul.mubr.f32.gmra.mrb[22].mxu0 %v4466_v11 }
 0x96f   : > { %19910 = vmatprep.mubr.f32.mxu0 %v4397_v17 }
 0x972   : > { %19911 = vmatmul.mubr.f32.vlgmr.msra.gmra.mrb[16].mxu0 %v4407_v62 }
 0x973   : > { %19913 = vmatprep.mubr.f32.mxu0 %v4417_v2  ;;  %21317 = vmatpush3.bf16.xpose.msra.mxu0 %v22887_v21 }
 0x974   : > { %21319 = vmatprep.subr.bf16.mxu0 %v22881_v13 }
 0x976   : > { %19914 = vmatmul.mubr.f32.gmra.mrb[18].mxu0 %v4427_v19 }
 0x977   : > { %19916 = vmatprep.mubr.f32.mxu0 %v4437_v63 }
 0x97a   : > { %19917 = vmatmul.mubr.f32.gmra.mrb[20].mxu0 %v4447_v55 }
 0x97b   : > { %19919 = vmatprep.mubr.f32.mxu0 %v4457_v45 }
 0x97e   : > { %19920 = vmatmul.mubr.f32.gmra.mrb[22].mxu0 %v4467_v9 }
 0x97f   : > { %19926 = vmatprep.mubr.msk.f32.mxu0 %vm1169_vm0, %v23905_v1 }
 0x982   : > { %19927 = vmatmul.mubr.msk.f32.vlgmr.msra.gmra.mrb[16].mxu0 %vm1169_vm0, %v23891_v28 }
 0x983   : > { %19929 = vmatprep.mubr.msk.f32.mxu0 %vm1169_vm0, %v23941_v40  ;;  %21321 = vmatpush3.bf16.xpose.msra.mxu0 %v22881_v13 }
 0x984   : > { %21347 = vmatprep.subr.bf16.mxu0 %v22881_v13 }
 0x986   : > { %19930 = vmatmul.mubr.msk.f32.gmra.mrb[18].mxu0 %vm1169_vm0, %v23920_v20 }
 0x987   : > { %19932 = vmatprep.mubr.msk.f32.mxu0 %vm1169_vm0, %v23979_v60 }
 0x98a   : > { %19933 = vmatmul.mubr.msk.f32.gmra.mrb[20].mxu0 %vm1169_vm0, %v23956_v49 }
 0x98b   : > { %19935 = vmatprep.mubr.msk.f32.mxu0 %vm1169_vm0, %v23991_v32 }
 0x98e   : > { %19936 = vmatmul.mubr.msk.f32.gmra.mrb[22].mxu0 %vm1169_vm0, %v24005_v4 }
 0x98f   : > { %19942 = vmatprep.mubr.msk.f32.mxu0 %vm1169_vm0, %v23905_v1 }
 0x992   : > { %19943 = vmatmul.mubr.msk.f32.vlgmr.msra.gmra.mrb[16].mxu0 %vm1169_vm0, %v23891_v28 }
 0x993   : > { %19945 = vmatprep.mubr.msk.f32.mxu0 %vm1169_vm0, %v23941_v40  ;;  %21349 = vmatpush3.bf16.xpose.msra.mxu0 %v22881_v13 }
 0x994   : > { %21351 = vmatprep.subr.bf16.mxu0 %v22889_v24 }
 0x996   : > { %19946 = vmatmul.mubr.msk.f32.gmra.mrb[18].mxu0 %vm1169_vm0, %v23920_v20 }
 0x997   : > { %19948 = vmatprep.mubr.msk.f32.mxu0 %vm1169_vm0, %v23979_v60 }
 0x99a   : > { %19949 = vmatmul.mubr.msk.f32.gmra.mrb[20].mxu0 %vm1169_vm0, %v23956_v49 }
 0x99b   : > { %19951 = vmatprep.mubr.msk.f32.mxu0 %vm1169_vm0, %v23991_v32 }
 0x99e   : > { %19952 = vmatmul.mubr.msk.f32.gmra.mrb[22].mxu0 %vm1169_vm0, %v24005_v4 }
 0x9b7   : > { %v5109_v28 = vpop.xlane.xlu0 %5108 }
 0x9b8   : > { %vm5129_vm14 = vcmp.eq.f32.partialorder %v23888_v33, %v5109_v28 }
 0x9b9   : > { %v5137_v39 = vsel %vm5129_vm14, %v23026_v58, 64 }
 0x9ba   : > { %v5159_v1 = vsel %vm1169_vm0, %v5137_v39, 2147483647 }
 0x9bb   : > { %v5106_v62 = vpop.xlane.xlu1 %5105  ;;  %v5161_v52 = vshra.s32 %v5159_v1, 16  ;;  %v5160_v53 = vand.u32 65535, %v5159_v1 }
 0x9bc   : > { %vm5128_vm15 = vcmp.eq.f32.partialorder %v23902_v15, %v5106_v62 }
 0x9bd   : > { %v5136_v20 = vsel %vm5128_vm15, %v23026_v58, 64  ;;  %v5163_v17 = vcvt.s32.f32 %v5161_v52  ;;  %v5162_v28 = vcvt.s32.f32 %v5160_v53 }
 0x9be   : > { %v5144_v12 = vsel %vm1169_vm0, %v5136_v20, 2147483647 }
 0x9bf   : > { %5164 = vmin.xlane.f32.xlu0 %v5163_v17  ;;  %v5115_v40 = vpop.xlane.xlu0 %5114  ;;  %v5146_v19 = vshra.s32 %v5144_v12, 16  ;;  %v5145_v39 = vand.u32 65535, %v5144_v12 }
 0x9c0   : > { %vm5131_vm2 = vcmp.eq.f32.partialorder %v23917_v26, %v5115_v40 }
 0x9c1   : > { %v5139_v41 = vsel %vm5131_vm2, %v23026_v58, 64  ;;  %v5148_v49 = vcvt.s32.f32 %v5146_v19  ;;  %v5147_v20 = vcvt.s32.f32 %v5145_v39 }
 0x9c2   : > { %v5189_v2 = vsel %vm1169_vm0, %v5139_v41, 2147483647 }
 0x9c3   : > { %5149 = vmin.xlane.f32.xlu1 %v5148_v49  ;;  %v5112_v7 = vpop.xlane.xlu1 %5111  ;;  %v5191_v60 = vshra.s32 %v5189_v2, 16  ;;  %v5190_v40 = vand.u32 65535, %v5189_v2 }
 0x9c4   : > { %vm5130_vm3 = vcmp.eq.f32.partialorder %v23938_v61, %v5112_v7 }
 0x9c5   : > { %v5138_v10 = vsel %vm5130_vm3, %v23026_v58, 64  ;;  %v5193_v34 = vcvt.s32.f32 %v5191_v60  ;;  %v5192_v7 = vcvt.s32.f32 %v5190_v40 }
 0x9c6   : > { %v5174_v55 = vsel %vm1169_vm0, %v5138_v10, 2147483647 }
 0x9c7   : > { %5194 = vmin.xlane.f32.xlu0 %v5193_v34  ;;  %v5121_v57 = vpop.xlane.xlu0 %5120  ;;  %v5176_v35 = vshra.s32 %v5174_v55, 16  ;;  %v5175_v1 = vand.u32 65535, %v5174_v55 }
 0x9c8   : > { %vm5133_vm4 = vcmp.eq.f32.partialorder %v23953_v22, %v5121_v57 }
 0x9c9   : > { %v5141_v14 = vsel %vm5133_vm4, %v23026_v58, 64  ;;  %v5178_v6 = vcvt.s32.f32 %v5176_v35 }
 0x9ca   : > { %v5219_v32 = vsel %vm1169_vm0, %v5141_v14, 2147483647 }
 0x9cb   : > { %5179 = vmin.xlane.f32.xlu1 %v5178_v6  ;;  %v5118_v63 = vpop.xlane.xlu1 %5117  ;;  %v5221_v31 = vshra.s32 %v5219_v32, 16  ;;  %v5220_v10 = vand.u32 65535, %v5219_v32 }
 0x9cc   : > { %vm5132_vm5 = vcmp.eq.f32.partialorder %v23976_v56, %v5118_v63 }
 0x9cd   : > { %v5140_v29 = vsel %vm5132_vm5, %v23026_v58, 64  ;;  %v5223_v42 = vcvt.s32.f32 %v5221_v31 }
 0x9ce   : > { %v5204_v51 = vsel %vm1169_vm0, %v5140_v29, 2147483647 }
 0x9cf   : > { %5224 = vmin.xlane.f32.xlu0 %v5223_v42  ;;  %v5124_v37 = vpop.xlane.xlu1 %5123  ;;  %v5206_v59 = vshra.s32 %v5204_v51, 16  ;;  %v5205_v35 = vand.u32 65535, %v5204_v51 }
 0x9d0   : > { %vm5134_vm6 = vcmp.eq.f32.partialorder %v23988_v0, %v5124_v37 }
 0x9d1   : > { %v5142_v4 = vsel %vm5134_vm6, %v23026_v58, 64  ;;  %v5208_v48 = vcvt.s32.f32 %v5206_v59 }
 0x9d2   : > { %v5234_v45 = vsel %vm1169_vm0, %v5142_v4, 2147483647 }
 0x9d3   : > { %v5127_v54 = vpop.xlane.xlu0 %5126  ;;  %5209 = vmin.xlane.f32.xlu1 %v5208_v48  ;;  %v5236_v47 = vshra.s32 %v5234_v45, 16  ;;  %v5235_v63 = vand.u32 65535, %v5234_v45 }
 0x9d4   : > { %vm5135_vm7 = vcmp.eq.f32.partialorder %v24002_v8, %v5127_v54 }
 0x9d5   : > { %v5143_v25 = vsel %vm5135_vm7, %v23026_v58, 64  ;;  %v5238_v5 = vcvt.s32.f32 %v5236_v47 }
 0x9d6   : > { %v5249_v11 = vsel %vm1169_vm0, %v5143_v25, 2147483647 }
 0x9d7   : > { %5239 = vmin.xlane.f32.xlu1 %v5238_v5  ;;  %v5251_v46 = vshra.s32 %v5249_v11, 16  ;;  %v5250_v29 = vand.u32 65535, %v5249_v11 }
 0x9d9   : > { %v5253_v9 = vcvt.s32.f32 %v5251_v46  ;;  %v5252_v45 = vcvt.s32.f32 %v5250_v29 }
 0x9db   : > { %5254 = vmin.xlane.f32.xlu0 %v5253_v9 }
 0xa4c   : > { %v24108_v30 = vpop.xlane.xlu0 %5164 }
 0xa4d   : > { %vm5166_vm8 = vcmp.eq.f32.partialorder %v5163_v17, %v24108_v30  ;;  %v5177_v17 = vcvt.s32.f32 %v5175_v1 }
 0xa4e   : > { %v5167_v62 = vsel %vm5166_vm8, %v5162_v28, inf }
 0xa4f   : > { %5168 = vmin.xlane.f32.xlu0 %v5167_v62 }
 0xa50   : > { %v24111_v52 = vpop.xlane.xlu1 %5149 }
 0xa51   : > { %vm5151_vm9 = vcmp.eq.f32.partialorder %v5148_v49, %v24111_v52  ;;  %v5222_v49 = vcvt.s32.f32 %v5220_v10 }
 0xa52   : > { %v5152_v19 = vsel %vm5151_vm9, %v5147_v20, inf }
 0xa53   : > { %5153 = vmin.xlane.f32.xlu1 %v5152_v19  ;;  %v5171_v19 = vcvt.f32.s32 %v24108_v30 }
 0xa54   : > { %v24114_v41 = vpop.xlane.xlu0 %5194 }
 0xa55   : > { %vm5196_vm10 = vcmp.eq.f32.partialorder %v5193_v34, %v24114_v41  ;;  %v5207_v34 = vcvt.s32.f32 %v5205_v35  ;;  %v5172_v1 = vshll.u32 %v5171_v19, 16  ;;  %v5201_v35 = vcvt.f32.s32 %v24114_v41 }
 0xa56   : > { %v5197_v60 = vsel %vm5196_vm10, %v5192_v7, inf }
 0xa57   : > { %5198 = vmin.xlane.f32.xlu0 %v5197_v60  ;;  %v5156_v60 = vcvt.f32.s32 %v24111_v52  ;;  %v5202_v29 = vshll.u32 %v5201_v35, 16 }
 0xa58   : > { %v24117_v12 = vpop.xlane.xlu1 %5179 }
 0xa59   : > { %vm5181_vm11 = vcmp.eq.f32.partialorder %v5178_v6, %v24117_v12  ;;  %v5237_v6 = vcvt.s32.f32 %v5235_v63 }
 0xa5a   : > { %v5182_v57 = vsel %vm5181_vm11, %v5177_v17, inf }
 0xa5b   : > { %5183 = vmin.xlane.f32.xlu1 %v5182_v57 }
 0xa5c   : > { %v24120_v2 = vpop.xlane.xlu0 %5224 }
 0xa5d   : > { %vm5226_vm12 = vcmp.eq.f32.partialorder %v5223_v42, %v24120_v2 }
 0xa5e   : > { %v5227_v14 = vsel %vm5226_vm12, %v5222_v49, inf  ;;  %v5157_v49 = vshll.u32 %v5156_v60, 16 }
 0xa5f   : > { %5228 = vmin.xlane.f32.xlu0 %v5227_v14 }
 0xa60   : > { %v24123_v55 = vpop.xlane.xlu1 %5209 }
 0xa61   : > { %vm5211_vm13 = vcmp.eq.f32.partialorder %v5208_v48, %v24123_v55 }
 0xa62   : > { %v5212_v31 = vsel %vm5211_vm13, %v5207_v34, inf }
 0xa63   : > { %5213 = vmin.xlane.f32.xlu1 %v5212_v31 }
 0xa64   : > { %v24126_v32 = vpop.xlane.xlu1 %5239 }
 0xa65   : > { %v24128_v37 = vpop.f32.mrb[16].mxu0  ;;  %vm5241_vm14 = vcmp.eq.f32.partialorder %v5238_v5, %v24126_v32 }
 0xa66   : > { %v24133_v51 = vpop.f32.mrb[17].mxu0  ;;  %v5242_v59 = vsel %vm5241_vm14, %v5237_v6, inf }
 0xa67   : > { %5243 = vmin.xlane.f32.xlu1 %v5242_v59  ;;  %v5186_v59 = vcvt.f32.s32 %v24117_v12 }
 0xa68   : > { %v24137_v48 = vpop.xlane.xlu0 %5254 }
 0xa69   : > { %v24139_v54 = vpop.f32.mrb[18].mxu0  ;;  %vm5256_vm15 = vcmp.eq.f32.partialorder %v5253_v9, %v24137_v48 }
 0xa6a   : > { %v24144_v25 = vpop.f32.mrb[19].mxu0  ;;  %v5257_v5 = vsel %vm5256_vm15, %v5252_v45, inf }
 0xa6b   : > { %5258 = vmin.xlane.f32.xlu0 %v5257_v5 }
 0xa6d   : > { %v24148_v46 = vpop.f32.mrb[20].mxu0 }
 0xa6e   : > { %v24152_v28 = vpop.f32.mrb[21].mxu0 }
 0xa71   : > { %v24156_v39 = vpop.f32.mrb[22].mxu0 }
 0xa72   : > { %v24160_v20 = vpop.f32.mrb[23].mxu0 }
 0xadc   : > { %v5169_v7 = vpop.xlane.xlu0 %5168 }
 0xadd   : > { %v5170_v17 = vcvt.f32.s32 %v5169_v7 }
 0xadf   : > { %v5173_v10 = vadd.s32 %v5172_v1, %v5170_v17 }
 0xae0   : > { %v5154_v57 = vpop.xlane.xlu1 %5153 }
 0xae1   : > { %v5155_v14 = vcvt.f32.s32 %v5154_v57  ;;  %vm5265_vm2 = vcmp.eq.s32.totalorder %v23026_v58, %v5173_v10  ;;  %v5187_v10 = vshll.u32 %v5186_v59, 16 }
 0xae2   : > { %v24169_v34 = vsel %vm5265_vm2, inf, %v23888_v33  ;;  %v24172_v63 = vsel %vm5265_vm2, 1.0, %v27679_v50 }
 0xae3   : > { %v5158_v30 = vadd.s32 %v5157_v49, %v5155_v14  ;;  %v6091_v31 = vsel %vm1169_vm0, %v24169_v34, inf  ;;  %v5292_v52 = vsel %vm1169_vm0, %v24172_v63, 0 }
 0xae4   : > { %6092 = vmin.xlane.f32.xlu0 %v6091_v31  ;;  %v24178_v6 = vsub.f32 %v5292_v52, %v5292_v52  ;;  %v5199_v41 = vpop.xlane.xlu0 %5198 }
 0xae5   : > { %v5200_v45 = vcvt.f32.s32 %v5199_v41  ;;  %vm5264_vm3 = vcmp.eq.s32.totalorder %v23026_v58, %v5158_v30 }
 0xae6   : > { %v24183_v33 = vsel %vm5264_vm3, inf, %v23902_v15  ;;  %v24186_v5 = vsel %vm5264_vm3, 1.0, %v27679_v50  ;;  %v5391_v60 = vand.u32 4294901760, %v24178_v6  ;;  %v5231_v15 = vcvt.f32.s32 %v24120_v2 }
 0xae7   : > { %v5203_v19 = vadd.s32 %v5202_v29, %v5200_v45  ;;  %v6088_v7 = vsel %vm1169_vm0, %v24183_v33, inf  ;;  %v5289_v1 = vsel %vm1169_vm0, %v24186_v5, 0  ;;  %v5216_v45 = vcvt.f32.s32 %v24123_v55 }
 0xae8   : > { %6089 = vmin.xlane.f32.xlu1 %v6088_v7  ;;  %v5184_v12 = vpop.xlane.xlu1 %5183  ;;  %v24193_v17 = vsub.f32 %v5289_v1, %v5289_v1  ;;  %v5392_v52 = vsub.f32 %v24178_v6, %v5391_v60  ;;  %v5232_v59 = vshll.u32 %v5231_v15, 16 }
 0xae9   : > { %v5185_v57 = vcvt.f32.s32 %v5184_v12  ;;  %vm5267_vm4 = vcmp.eq.s32.totalorder %v23026_v58, %v5203_v19 }
 0xaea   : > { %v24198_v49 = vsel %vm5267_vm4, inf, %v23917_v26  ;;  %v24201_v35 = vsel %vm5267_vm4, 1.0, %v27679_v50  ;;  %v5381_v14 = vand.u32 4294901760, %v24193_v17 }
 0xaeb   : > { %v5188_v30 = vadd.s32 %v5187_v10, %v5185_v57  ;;  %v6097_v31 = vsel %vm1169_vm0, %v24198_v49, inf  ;;  %v5298_v2 = vsel %vm1169_vm0, %v24201_v35, 0 }
 0xaec   : > { %6098 = vmin.xlane.f32.xlu0 %v6097_v31  ;;  %v5229_v41 = vpop.xlane.xlu0 %5228  ;;  %v5382_v26 = vsub.f32 %v24193_v17, %v5381_v14  ;;  %v24214_v29 = vsub.f32 %v5298_v2, %v5298_v2  ;;  %v5393_v2 = vand.u32 4294901760, %v5392_v52 }
 0xaed   : > { %v5230_v19 = vcvt.f32.s32 %v5229_v41  ;;  %vm5266_vm5 = vcmp.eq.s32.totalorder %v23026_v58, %v5188_v30  ;;  %v5246_v41 = vcvt.f32.s32 %v24126_v32 }
 0xaee   : > { %v5383_v7 = vand.u32 4294901760, %v5382_v26  ;;  %v24219_v1 = vsel %vm5266_vm5, inf, %v23938_v61  ;;  %v24222_v12 = vsel %vm5266_vm5, 1.0, %v27679_v50  ;;  %v5411_v10 = vand.u32 4294901760, %v24214_v29 }
 0xaef   : > { %v5233_v57 = vadd.s32 %v5232_v59, %v5230_v19  ;;  %v6094_v31 = vsel %vm1169_vm0, %v24219_v1, inf  ;;  %v5295_v55 = vsel %vm1169_vm0, %v24222_v12, 0  ;;  %v5217_v61 = vshll.u32 %v5216_v45, 16 }
 0xaf0   : > { %19958 = vmatprep.mubr.f32.mxu1 %v5383_v7  ;;  %6095 = vmin.xlane.f32.xlu1 %v6094_v31  ;;  %v5214_v15 = vpop.xlane.xlu1 %5213  ;;  %v24229_v30 = vsub.f32 %v5295_v55, %v5295_v55  ;;  %v5412_v7 = vsub.f32 %v24214_v29, %v5411_v10  ;;  %v5247_v55 = vshll.u32 %v5246_v41, 16 }
 0xaf1   : > { %v5215_v26 = vcvt.f32.s32 %v5214_v15  ;;  %19959 = vmatmul.mubr.f32.vlgmr.msra.gmra.mrb[16].mxu1 %v5393_v2  ;;  %vm5269_vm6 = vcmp.eq.s32.totalorder %v23026_v58, %v5233_v57  ;;  %v5261_v15 = vcvt.f32.s32 %v24137_v48 }
 0xaf2   : > { %v24234_v59 = vsel %vm5269_vm6, inf, %v23953_v22  ;;  %v24237_v52 = vsel %vm5269_vm6, 1.0, %v27679_v50  ;;  %v5401_v19 = vand.u32 4294901760, %v24229_v30  ;;  %21329 = vmatpush3.bf16.xpose.msra.mxu1 %v22889_v24 }
 0xaf3   : > { %v5218_v45 = vadd.s32 %v5217_v61, %v5215_v26  ;;  %v6103_v32 = vsel %vm1169_vm0, %v24234_v59, inf  ;;  %v5304_v57 = vsel %vm1169_vm0, %v24237_v52, 0  ;;  %21331 = vmatprep.subr.bf16.mxu1 %v22883_v18 }
 0xaf4   : > { %6104 = vmin.xlane.f32.xlu0 %v6103_v32  ;;  %v5244_v22 = vpop.xlane.xlu1 %5243  ;;  %v5402_v31 = vsub.f32 %v24229_v30, %v5401_v19  ;;  %v24252_v2 = vsub.f32 %v5304_v57, %v5304_v57  ;;  %v5413_v32 = vand.u32 4294901760, %v5412_v7 }
 0xaf5   : > { %v5245_v61 = vcvt.f32.s32 %v5244_v22  ;;  %vm5268_vm7 = vcmp.eq.s32.totalorder %v23026_v58, %v5218_v45  ;;  %v5262_v22 = vshll.u32 %v5261_v15, 16 }
 0xaf6   : > { %v5403_v26 = vand.u32 4294901760, %v5402_v31  ;;  %v24257_v40 = vsel %vm5268_vm7, inf, %v23976_v56  ;;  %v24260_v62 = vsel %vm5268_vm7, 1.0, %v27679_v50  ;;  %v5431_v48 = vand.u32 4294901760, %v24252_v2 }
 0xaf7   : > { %v5248_v9 = vadd.s32 %v5247_v55, %v5245_v61  ;;  %v6100_v53 = vsel %vm1169_vm0, %v24257_v40, inf  ;;  %v5301_v41 = vsel %vm1169_vm0, %v24260_v62, 0 }
 0xaf8   : > { %v5259_v57 = vpop.xlane.xlu0 %5258  ;;  %19961 = vmatprep.mubr.f32.mxu1 %v5403_v26  ;;  %6101 = vmin.xlane.f32.xlu1 %v6100_v53  ;;  %v5420_v45 = vsub.f32 %v5301_v41, %v5301_v41  ;;  %v5432_v53 = vsub.f32 %v24252_v2, %v5431_v48 }
 0xaf9   : > { %v5260_v56 = vcvt.f32.s32 %v5259_v57  ;;  %19962 = vmatmul.mubr.f32.gmra.mrb[18].mxu1 %v5413_v32  ;;  %vm5270_vm8 = vcmp.eq.s32.totalorder %v23026_v58, %v5248_v9 }
 0xafa   : > { %v24269_v7 = vsel %vm5270_vm8, inf, %v23988_v0  ;;  %v24272_v31 = vsel %vm5270_vm8, 1.0, %v27679_v50  ;;  %v5421_v55 = vand.u32 4294901760, %v5420_v45 }
 0xafb   : > { %v5263_v61 = vadd.s32 %v5262_v22, %v5260_v56  ;;  %v6106_v11 = vsel %vm1169_vm0, %v24269_v7, inf  ;;  %v5307_v15 = vsel %vm1169_vm0, %v24272_v31, 0  ;;  %v5433_v56 = vand.u32 4294901760, %v5432_v53 }
 0xafc   : > { %6107 = vmin.xlane.f32.xlu1 %v6106_v11  ;;  %v5422_v9 = vsub.f32 %v5420_v45, %v5421_v55  ;;  %v5440_v26 = vsub.f32 %v5307_v15, %v5307_v15 }
 0xafd   : > { %vm5271_vm9 = vcmp.eq.s32.totalorder %v23026_v58, %v5263_v61 }
 0xafe   : > { %v24283_v0 = vsel %vm5271_vm9, inf, %v24002_v8  ;;  %v24286_v32 = vsel %vm5271_vm9, 1.0, %v27679_v50  ;;  %v5423_v41 = vand.u32 4294901760, %v5422_v9  ;;  %v5441_v57 = vand.u32 4294901760, %v5440_v26 }
 0xaff   : > { %v6109_v22 = vsel %vm1169_vm0, %v24283_v0, inf  ;;  %v5310_v47 = vsel %vm1169_vm0, %v24286_v32, 0 }
 0xb00   : > { %6110 = vmin.xlane.f32.xlu0 %v6109_v22  ;;  %19964 = vmatprep.mubr.f32.mxu1 %v5423_v41  ;;  %v5442_v11 = vsub.f32 %v5440_v26, %v5441_v57  ;;  %v5450_v15 = vsub.f32 %v5310_v47, %v5310_v47 }
 0xb01   : > { %19965 = vmatmul.mubr.f32.gmra.mrb[20].mxu1 %v5433_v56 }
 0xb02   : > { %v5443_v61 = vand.u32 4294901760, %v5442_v11  ;;  %v5451_v8 = vand.u32 4294901760, %v5450_v15 }
 0xb04   : > { %19967 = vmatprep.mubr.f32.mxu1 %v5443_v61  ;;  %v5452_v4 = vsub.f32 %v5450_v15, %v5451_v8 }
 0xb06   : > { %v5453_v42 = vand.u32 4294901760, %v5452_v4 }
 0xb08   : > { %19968 = vmatmul.mubr.f32.gmra.mrb[22].mxu1 %v5453_v42 }
 0xb09   : > { %19974 = vmatprep.mubr.msk.f32.mxu1 %vm1169_vm0, %v24186_v5 }
 0xb0c   : > { %19975 = vmatmul.mubr.msk.f32.vlgmr.msra.gmra.mrb[16].mxu1 %vm1169_vm0, %v24172_v63 }
 0xb0d   : > { %19977 = vmatprep.mubr.msk.f32.mxu1 %vm1169_vm0, %v24222_v12  ;;  %21333 = vmatpush3.bf16.xpose.msra.mxu1 %v22883_v18 }
 0xb0e   : > { %21335 = vmatprep.subr.bf16.mxu1 %v22881_v13 }
 0xb10   : > { %19978 = vmatmul.mubr.msk.f32.gmra.mrb[18].mxu1 %vm1169_vm0, %v24201_v35 }
 0xb11   : > { %19980 = vmatprep.mubr.msk.f32.mxu1 %vm1169_vm0, %v24260_v62 }
 0xb14   : > { %19981 = vmatmul.mubr.msk.f32.gmra.mrb[20].mxu1 %vm1169_vm0, %v24237_v52 }
 0xb15   : > { %19983 = vmatprep.mubr.msk.f32.mxu1 %vm1169_vm0, %v24272_v31 }
 0xb18   : > { %19984 = vmatmul.mubr.msk.f32.gmra.mrb[22].mxu1 %vm1169_vm0, %v24286_v32 }
 0xb19   : > { %19990 = vmatprep.mubr.f32.mxu1 %v24193_v17 }
 0xb1c   : > { %19991 = vmatmul.mubr.f32.vlgmr.msra.gmra.mrb[16].mxu1 %v24178_v6 }
 0xb1d   : > { %19993 = vmatprep.mubr.f32.mxu1 %v24229_v30  ;;  %21337 = vmatpush3.bf16.xpose.msra.mxu1 %v22881_v13 }
 0xb1e   : > { %21339 = vmatprep.subr.bf16.mxu1 %v22887_v21 }
 0xb20   : > { %19994 = vmatmul.mubr.f32.gmra.mrb[18].mxu1 %v24214_v29 }
 0xb21   : > { %19996 = vmatprep.mubr.f32.mxu1 %v5420_v45 }
 0xb24   : > { %19997 = vmatmul.mubr.f32.gmra.mrb[20].mxu1 %v24252_v2 }
 0xb25   : > { %19999 = vmatprep.mubr.f32.mxu1 %v5440_v26 }
 0xb28   : > { %20000 = vmatmul.mubr.f32.gmra.mrb[22].mxu1 %v5450_v15 }
 0xb29   : > { %20006 = vmatprep.mubr.f32.mxu1 %v5381_v14 }
 0xb2c   : > { %20007 = vmatmul.mubr.f32.vlgmr.msra.gmra.mrb[16].mxu1 %v5391_v60 }
 0xb2d   : > { %20009 = vmatprep.mubr.f32.mxu1 %v5401_v19  ;;  %21341 = vmatpush3.bf16.xpose.msra.mxu1 %v22887_v21 }
 0xb2e   : > { %21343 = vmatprep.subr.bf16.mxu1 %v22881_v13 }
 0xb30   : > { %20010 = vmatmul.mubr.f32.gmra.mrb[18].mxu1 %v5411_v10 }
 0xb31   : > { %20012 = vmatprep.mubr.f32.mxu1 %v5421_v55 }
 0xb34   : > { %20013 = vmatmul.mubr.f32.gmra.mrb[20].mxu1 %v5431_v48 }
 0xb35   : > { %20015 = vmatprep.mubr.f32.mxu1 %v5441_v57 }
 0xb38   : > { %20016 = vmatmul.mubr.f32.gmra.mrb[22].mxu1 %v5451_v8 }
 0xb39   : > { %20022 = vmatprep.mubr.msk.f32.mxu1 %vm1169_vm0, %v24186_v5 }
 0xb3c   : > { %20023 = vmatmul.mubr.msk.f32.vlgmr.msra.gmra.mrb[16].mxu1 %vm1169_vm0, %v24172_v63 }
 0xb3d   : > { %20025 = vmatprep.mubr.msk.f32.mxu1 %vm1169_vm0, %v24222_v12  ;;  %21345 = vmatpush3.bf16.xpose.msra.mxu1 %v22881_v13 }
 0xb3e   : > { %21371 = vmatprep.subr.bf16.mxu1 %v22881_v13 }
 0xb40   : > { %20026 = vmatmul.mubr.msk.f32.gmra.mrb[18].mxu1 %vm1169_vm0, %v24201_v35 }
 0xb41   : > { %20028 = vmatprep.mubr.msk.f32.mxu1 %vm1169_vm0, %v24260_v62 }
 0xb44   : > { %20029 = vmatmul.mubr.msk.f32.gmra.mrb[20].mxu1 %vm1169_vm0, %v24237_v52 }
 0xb45   : > { %20031 = vmatprep.mubr.msk.f32.mxu1 %vm1169_vm0, %v24272_v31 }
 0xb48   : > { %20032 = vmatmul.mubr.msk.f32.gmra.mrb[22].mxu1 %vm1169_vm0, %v24286_v32 }
 0xb49   : > { %20038 = vmatprep.mubr.msk.f32.mxu1 %vm1169_vm0, %v24186_v5 }
 0xb4c   : > { %20039 = vmatmul.mubr.msk.f32.vlgmr.msra.gmra.mrb[16].mxu1 %vm1169_vm0, %v24172_v63 }
 0xb4d   : > { %20041 = vmatprep.mubr.msk.f32.mxu1 %vm1169_vm0, %v24222_v12  ;;  %21373 = vmatpush3.bf16.xpose.msra.mxu1 %v22881_v13 }
 0xb4e   : > { %21375 = vmatprep.subr.bf16.mxu1 %v22889_v24 }
 0xb50   : > { %20042 = vmatmul.mubr.msk.f32.gmra.mrb[18].mxu1 %vm1169_vm0, %v24201_v35 }
 0xb51   : > { %20044 = vmatprep.mubr.msk.f32.mxu1 %vm1169_vm0, %v24260_v62 }
 0xb54   : > { %20045 = vmatmul.mubr.msk.f32.gmra.mrb[20].mxu1 %vm1169_vm0, %v24237_v52 }
 0xb55   : > { %20047 = vmatprep.mubr.msk.f32.mxu1 %vm1169_vm0, %v24272_v31 }
 0xb58   : > { %20048 = vmatmul.mubr.msk.f32.gmra.mrb[22].mxu1 %vm1169_vm0, %v24286_v32 }
 0xb71   : > { %v6093_v42 = vpop.xlane.xlu0 %6092 }
 0xb72   : > { %vm6113_vm10 = vcmp.eq.f32.partialorder %v24169_v34, %v6093_v42 }
 0xb73   : > { %v6121_v4 = vsel %vm6113_vm10, %v23026_v58, 64 }
 0xb74   : > { %v6143_v47 = vsel %vm1169_vm0, %v6121_v4, 2147483647 }
 0xb75   : > { %v6090_v63 = vpop.xlane.xlu1 %6089  ;;  %v6145_v6 = vshra.s32 %v6143_v47, 16 }
 0xb76   : > { %vm6112_vm11 = vcmp.eq.f32.partialorder %v24183_v33, %v6090_v63 }
 0xb77   : > { %v6120_v62 = vsel %vm6112_vm11, %v23026_v58, 64  ;;  %v6147_v5 = vcvt.s32.f32 %v6145_v6 }
 0xb78   : > { %v6128_v60 = vsel %vm1169_vm0, %v6120_v62, 2147483647 }
 0xb79   : > { %6148 = vmin.xlane.f32.xlu0 %v6147_v5  ;;  %v6099_v17 = vpop.xlane.xlu0 %6098  ;;  %v6130_v35 = vshra.s32 %v6128_v60, 16 }
 0xb7a   : > { %vm6115_vm12 = vcmp.eq.f32.partialorder %v24198_v49, %v6099_v17 }
 0xb7b   : > { %v6123_v14 = vsel %vm6115_vm12, %v23026_v58, 64  ;;  %v6132_v29 = vcvt.s32.f32 %v6130_v35  ;;  %v6144_v35 = vand.u32 65535, %v6143_v47 }
 0xb7c   : > { %v6173_v12 = vsel %vm1169_vm0, %v6123_v14, 2147483647 }
 0xb7d   : > { %6133 = vmin.xlane.f32.xlu1 %v6132_v29  ;;  %v6096_v10 = vpop.xlane.xlu1 %6095  ;;  %v6175_v30 = vshra.s32 %v6173_v12, 16 }
 0xb7e   : > { %vm6114_vm13 = vcmp.eq.f32.partialorder %v24219_v1, %v6096_v10  ;;  %v6146_v10 = vcvt.s32.f32 %v6144_v35 }
 0xb7f   : > { %v6122_v52 = vsel %vm6114_vm13, %v23026_v58, 64  ;;  %v6177_v19 = vcvt.s32.f32 %v6175_v30  ;;  %v6129_v30 = vand.u32 65535, %v6128_v60 }
 0xb80   : > { %v6158_v2 = vsel %vm1169_vm0, %v6122_v52, 2147483647 }
 0xb81   : > { %6178 = vmin.xlane.f32.xlu0 %v6177_v19  ;;  %v6105_v48 = vpop.xlane.xlu0 %6104  ;;  %v6160_v45 = vshra.s32 %v6158_v2, 16  ;;  %v6159_v47 = vand.u32 65535, %v6158_v2 }
 0xb82   : > { %vm6117_vm14 = vcmp.eq.f32.partialorder %v24234_v59, %v6105_v48 }
 0xb83   : > { %v6125_v31 = vsel %vm6117_vm14, %v23026_v58, 64  ;;  %v6162_v55 = vcvt.s32.f32 %v6160_v45  ;;  %v6131_v45 = vcvt.s32.f32 %v6129_v30 }
 0xb84   : > { %v6203_v53 = vsel %vm1169_vm0, %v6125_v31, 2147483647  ;;  %v6174_v31 = vand.u32 65535, %v6173_v12 }
 0xb85   : > { %6163 = vmin.xlane.f32.xlu1 %v6162_v55  ;;  %v6102_v9 = vpop.xlane.xlu1 %6101  ;;  %v6205_v26 = vshra.s32 %v6203_v53, 16 }
 0xb86   : > { %vm6116_vm15 = vcmp.eq.f32.partialorder %v24257_v40, %v6102_v9 }
 0xb87   : > { %v6124_v32 = vsel %vm6116_vm15, %v23026_v58, 64  ;;  %v6207_v41 = vcvt.s32.f32 %v6205_v26 }
 0xb88   : > { %v6188_v57 = vsel %vm1169_vm0, %v6124_v32, 2147483647  ;;  %v6176_v32 = vcvt.s32.f32 %v6174_v31 }
 0xb89   : > { %6208 = vmin.xlane.f32.xlu0 %v6207_v41  ;;  %v6108_v22 = vpop.xlane.xlu1 %6107  ;;  %v6190_v56 = vshra.s32 %v6188_v57, 16 }
 0xb8a   : > { %vm6118_vm2 = vcmp.eq.f32.partialorder %v24269_v7, %v6108_v22 }
 0xb8b   : > { %v6126_v11 = vsel %vm6118_vm2, %v23026_v58, 64  ;;  %v6192_v15 = vcvt.s32.f32 %v6190_v56  ;;  %v6204_v56 = vand.u32 65535, %v6203_v53 }
 0xb8c   : > { %v6218_v61 = vsel %vm1169_vm0, %v6126_v11, 2147483647 }
 0xb8d   : > { %v6111_v8 = vpop.xlane.xlu0 %6110  ;;  %6193 = vmin.xlane.f32.xlu1 %v6192_v15  ;;  %v6220_v42 = vshra.s32 %v6218_v61, 16 }
 0xb8e   : > { %vm6119_vm3 = vcmp.eq.f32.partialorder %v24283_v0, %v6111_v8  ;;  %v6189_v8 = vand.u32 65535, %v6188_v57 }
 0xb8f   : > { %v6127_v4 = vsel %vm6119_vm3, %v23026_v58, 64  ;;  %v6222_v63 = vcvt.s32.f32 %v6220_v42 }
 0xb90   : > { %v6233_v6 = vsel %vm1169_vm0, %v6127_v4, 2147483647  ;;  %v6219_v4 = vand.u32 65535, %v6218_v61  ;;  %v27681_v61 = vmax.f32 %v23848_v3, %v24133_v51 }
 0xb91   : > { %6223 = vmin.xlane.f32.xlu1 %v6222_v63  ;;  %v6235_v62 = vshra.s32 %v6233_v6, 16  ;;  %v6234_v35 = vand.u32 65535, %v6233_v6 }
 0xb93   : > { %v6237_v17 = vcvt.s32.f32 %v6235_v62  ;;  %v6236_v31 = vcvt.s32.f32 %v6234_v35 }
 0xb95   : > { %6238 = vmin.xlane.f32.xlu0 %v6237_v17 }
 0xc06   : > { %v24389_v14 = vpop.xlane.xlu0 %6148 }
 0xc07   : > { %vm6150_vm4 = vcmp.eq.f32.partialorder %v6147_v5, %v24389_v14  ;;  %v6161_v5 = vcvt.s32.f32 %v6159_v47  ;;  %v27684_v47 = vmax.f32 %v23866_v16, %v24148_v46  ;;  %v6155_v16 = vcvt.f32.s32 %v24389_v14 }
 0xc08   : > { %v6151_v52 = vsel %vm6150_vm4, %v6146_v10, inf }
 0xc09   : > { %6152 = vmin.xlane.f32.xlu0 %v6151_v52 }
 0xc0a   : > { %v24392_v48 = vpop.xlane.xlu1 %6133 }
 0xc0b   : > { %vm6135_vm5 = vcmp.eq.f32.partialorder %v6132_v29, %v24392_v48  ;;  %v6206_v29 = vcvt.s32.f32 %v6204_v56  ;;  %v27686_v56 = vmax.f32 %v23876_v36, %v24156_v39 }
 0xc0c   : > { %v6136_v9 = vsel %vm6135_vm5, %v6131_v45, inf }
 0xc0d   : > { %6137 = vmin.xlane.f32.xlu1 %v6136_v9 }
 0xc0e   : > { %v24395_v26 = vpop.xlane.xlu0 %6178 }
 0xc0f   : > { %vm6180_vm6 = vcmp.eq.f32.partialorder %v6177_v19, %v24395_v26  ;;  %v6191_v19 = vcvt.s32.f32 %v6189_v8  ;;  %v6156_v8 = vshll.u32 %v6155_v16, 16  ;;  %v6185_v36 = vcvt.f32.s32 %v24395_v26 }
 0xc10   : > { %v6181_v22 = vsel %vm6180_vm6, %v6176_v32, inf  ;;  %v27683_v32 = vmax.f32 %v23861_v44, %v24144_v25 }
 0xc11   : > { %6182 = vmin.xlane.f32.xlu0 %v6181_v22  ;;  %v6186_v35 = vshll.u32 %v6185_v36, 16 }
 0xc12   : > { %v24398_v60 = vpop.xlane.xlu1 %6163 }
 0xc13   : > { %vm6165_vm7 = vcmp.eq.f32.partialorder %v6162_v55, %v24398_v60  ;;  %v6221_v55 = vcvt.s32.f32 %v6219_v4 }
 0xc14   : > { %v6166_v11 = vsel %vm6165_vm7, %v6161_v5, inf }
 0xc15   : > { %6167 = vmin.xlane.f32.xlu1 %v6166_v11  ;;  %v27687_v11 = vmax.f32 %v23881_v38, %v24160_v20 }
 0xc16   : > { %v24401_v12 = vpop.xlane.xlu0 %6208 }
 0xc17   : > { %vm6210_vm8 = vcmp.eq.f32.partialorder %v6207_v41, %v24401_v12  ;;  %v27680_v41 = vmax.f32 %v23843_v23, %v24128_v37 }
 0xc18   : > { %v6211_v42 = vsel %vm6210_vm8, %v6206_v29, inf }
 0xc19   : > { %6212 = vmin.xlane.f32.xlu0 %v6211_v42 }
 0xc1a   : > { %v24404_v2 = vpop.xlane.xlu1 %6193 }
 0xc1b   : > { %vm6195_vm9 = vcmp.eq.f32.partialorder %v6192_v15, %v24404_v2  ;;  %v6200_v16 = vcvt.f32.s32 %v24404_v2 }
 0xc1c   : > { %v6196_v62 = vsel %vm6195_vm9, %v6191_v19, inf }
 0xc1d   : > { %6197 = vmin.xlane.f32.xlu1 %v6196_v62 }
 0xc1e   : > { %v24407_v53 = vpop.xlane.xlu1 %6223 }
 0xc1f   : > { %v20040_v10 = vpop.f32.mrb[16].mxu1  ;;  %vm6225_vm10 = vcmp.eq.f32.partialorder %v6222_v63, %v24407_v53  ;;  %v27682_v63 = vmax.f32 %v23856_v43, %v24139_v54  ;;  %v27685_v43 = vmax.f32 %v23871_v27, %v24152_v28  ;;  %v6140_v27 = vcvt.f32.s32 %v24392_v48 }
 0xc20   : > { %v24413_v57 = vmax.f32 %v27680_v41, %v20040_v10  ;;  %v6026_v30 = vpop.f32.mrb[17].mxu1  ;;  %v6226_v52 = vsel %vm6225_vm10, %v6221_v55, inf  ;;  %v6170_v10 = vcvt.f32.s32 %v24398_v60 }
 0xc21   : > { %v24418_v15 = vmax.f32 %v27681_v61, %v6026_v30  ;;  %6227 = vmin.xlane.f32.xlu1 %v6226_v52  ;;  %v6141_v4 = vshll.u32 %v6140_v27, 16 }
 0xc22   : > { %v24420_v45 = vpop.xlane.xlu0 %6238 }
 0xc23   : > { %v20043_v6 = vpop.f32.mrb[18].mxu1  ;;  %vm6240_vm11 = vcmp.eq.f32.partialorder %v6237_v17, %v24420_v45 }
 0xc24   : > { %v24426_v23 = vmax.f32 %v27682_v63, %v20043_v6  ;;  %v6038_v37 = vpop.f32.mrb[19].mxu1  ;;  %v6241_v9 = vsel %vm6240_vm11, %v6236_v31, inf }
 0xc25   : > { %v24431_v3 = vmax.f32 %v27683_v32, %v6038_v37  ;;  %6242 = vmin.xlane.f32.xlu0 %v6241_v9  ;;  %v6171_v37 = vshll.u32 %v6170_v10, 16 }
 0xc27   : > { %v20046_v51 = vpop.f32.mrb[20].mxu1 }
 0xc28   : > { %v24436_v22 = vmax.f32 %v27684_v47, %v20046_v51  ;;  %v6050_v17 = vpop.f32.mrb[21].mxu1 }
 0xc29   : > { %v24441_v54 = vmax.f32 %v27685_v43, %v6050_v17 }
 0xc2b   : > { %v20049_v5 = vpop.f32.mrb[22].mxu1 }
 0xc2c   : > { %v24446_v44 = vmax.f32 %v27686_v56, %v20049_v5  ;;  %v6062_v25 = vpop.f32.mrb[23].mxu1 }
 0xc2d   : > { %v24451_v29 = vmax.f32 %v27687_v11, %v6062_v25 }
 0xc96   : > { %v6153_v46 = vpop.xlane.xlu0 %6152 }
 0xc97   : > { %v6154_v28 = vcvt.f32.s32 %v6153_v46 }
 0xc99   : > { %v6157_v42 = vadd.s32 %v6156_v8, %v6154_v28 }
 0xc9a   : > { %v6138_v19 = vpop.xlane.xlu1 %6137 }
 0xc9b   : > { %v6139_v39 = vcvt.f32.s32 %v6138_v19  ;;  %vm6249_vm12 = vcmp.eq.s32.totalorder %v23026_v58, %v6157_v42 }
 0xc9c   : > { %v24458_v62 = vsel %vm6249_vm12, inf, %v24169_v34  ;;  %v24461_v38 = vsel %vm6249_vm12, 1.0, %v27679_v50 }
 0xc9d   : > { %v6142_v20 = vadd.s32 %v6141_v4, %v6139_v39  ;;  %v7075_v14 = vsel %vm1169_vm0, %v24458_v62, inf  ;;  %v6276_v48 = vsel %vm1169_vm0, %v24461_v38, 0 }
 0xc9e   : > { %7076 = vmin.xlane.f32.xlu0 %v7075_v14  ;;  %v24467_v55 = vsub.f32 %v6276_v48, %v6276_v48  ;;  %v6183_v26 = vpop.xlane.xlu0 %6182  ;;  %v6230_v14 = vcvt.f32.s32 %v24407_v53 }
 0xc9f   : > { %v6184_v41 = vcvt.f32.s32 %v6183_v26  ;;  %vm6248_vm13 = vcmp.eq.s32.totalorder %v23026_v58, %v6142_v20 }
 0xca0   : > { %v24472_v34 = vsel %vm6248_vm13, inf, %v24183_v33  ;;  %v24475_v30 = vsel %vm6248_vm13, 1.0, %v27679_v50  ;;  %v6375_v6 = vand.u32 4294901760, %v24467_v55  ;;  %v6215_v33 = vcvt.f32.s32 %v24401_v12 }
 0xca1   : > { %v6187_v52 = vadd.s32 %v6186_v35, %v6184_v41  ;;  %v7072_v61 = vsel %vm1169_vm0, %v24472_v34, inf  ;;  %v6273_v31 = vsel %vm1169_vm0, %v24475_v30, 0 }
 0xca2   : > { %7073 = vmin.xlane.f32.xlu1 %v7072_v61  ;;  %v6168_v60 = vpop.xlane.xlu1 %6167  ;;  %v24482_v63 = vsub.f32 %v6273_v31, %v6273_v31  ;;  %v6376_v5 = vsub.f32 %v24467_v55, %v6375_v6  ;;  %v6216_v11 = vshll.u32 %v6215_v33, 16  ;;  %v6245_v33 = vcvt.f32.s32 %v24420_v45 }
 0xca3   : > { %v6169_v9 = vcvt.f32.s32 %v6168_v60  ;;  %vm6251_vm14 = vcmp.eq.s32.totalorder %v23026_v58, %v6187_v52 }
 0xca4   : > { %v24487_v32 = vsel %vm6251_vm14, inf, %v24198_v49  ;;  %v24490_v51 = vsel %vm6251_vm14, 1.0, %v27679_v50  ;;  %v6365_v47 = vand.u32 4294901760, %v24482_v63  ;;  %v6377_v36 = vand.u32 4294901760, %v6376_v5 }
 0xca5   : > { %v6172_v17 = vadd.s32 %v6171_v37, %v6169_v9  ;;  %v7081_v43 = vsel %vm1169_vm0, %v24487_v32, inf  ;;  %v6282_v12 = vsel %vm1169_vm0, %v24490_v51, 0  ;;  %v6231_v37 = vshll.u32 %v6230_v14, 16 }
 0xca6   : > { %7082 = vmin.xlane.f32.xlu0 %v7081_v43  ;;  %v6213_v56 = vpop.xlane.xlu0 %6212  ;;  %v6366_v49 = vsub.f32 %v24482_v63, %v6365_v47  ;;  %v24503_v25 = vsub.f32 %v6282_v12, %v6282_v12 }
 0xca7   : > { %v6214_v46 = vcvt.f32.s32 %v6213_v56  ;;  %vm6250_vm15 = vcmp.eq.s32.totalorder %v23026_v58, %v6172_v17 }
 0xca8   : > { %v6367_v8 = vand.u32 4294901760, %v6366_v49  ;;  %v24508_v27 = vsel %vm6250_vm15, inf, %v24219_v1  ;;  %v24511_v28 = vsel %vm6250_vm15, 1.0, %v27679_v50  ;;  %v6395_v42 = vand.u32 4294901760, %v24503_v25 }
 0xca9   : > { %v6217_v19 = vadd.s32 %v6216_v11, %v6214_v46  ;;  %v7078_v4 = vsel %vm1169_vm0, %v24508_v27, inf  ;;  %v6279_v2 = vsel %vm1169_vm0, %v24511_v28, 0  ;;  %v6201_v1 = vshll.u32 %v6200_v16, 16 }
 0xcaa   : > { %20054 = vmatprep.mubr.f32.mxu0 %v6367_v8  ;;  %7079 = vmin.xlane.f32.xlu1 %v7078_v4  ;;  %v6198_v39 = vpop.xlane.xlu1 %6197  ;;  %v24518_v20 = vsub.f32 %v6279_v2, %v6279_v2  ;;  %v6396_v41 = vsub.f32 %v24503_v25, %v6395_v42  ;;  %v6246_v8 = vshll.u32 %v6245_v33, 16 }
 0xcab   : > { %v6199_v48 = vcvt.f32.s32 %v6198_v39  ;;  %20055 = vmatmul.mubr.f32.vlgmr.msra.gmra.mrb[24].mxu0 %v6377_v36  ;;  %vm6253_vm2 = vcmp.eq.s32.totalorder %v23026_v58, %v6217_v19 }
 0xcac   : > { %v24523_v26 = vsel %vm6253_vm2, inf, %v24234_v59  ;;  %v24526_v35 = vsel %vm6253_vm2, 1.0, %v27679_v50  ;;  %v6385_v10 = vand.u32 4294901760, %v24518_v20  ;;  %21353 = vmatpush3.bf16.xpose.msra.mxu0 %v22889_v24  ;;  %v6397_v12 = vand.u32 4294901760, %v6396_v41 }
 0xcad   : > { %v6202_v52 = vadd.s32 %v6201_v1, %v6199_v48  ;;  %v7087_v53 = vsel %vm1169_vm0, %v24523_v26, inf  ;;  %v6288_v61 = vsel %vm1169_vm0, %v24526_v35, 0  ;;  %21355 = vmatprep.subr.bf16.mxu0 %v22883_v18 }
 0xcae   : > { %7088 = vmin.xlane.f32.xlu0 %v7087_v53  ;;  %v6228_v59 = vpop.xlane.xlu1 %6227  ;;  %v6386_v31 = vsub.f32 %v24518_v20, %v6385_v10  ;;  %v24541_v60 = vsub.f32 %v6288_v61, %v6288_v61 }
 0xcaf   : > { %v6229_v9 = vcvt.f32.s32 %v6228_v59  ;;  %vm6252_vm3 = vcmp.eq.s32.totalorder %v23026_v58, %v6202_v52 }
 0xcb0   : > { %v6387_v17 = vand.u32 4294901760, %v6386_v31  ;;  %v24546_v43 = vsel %vm6252_vm3, inf, %v24257_v40  ;;  %v24549_v5 = vsel %vm6252_vm3, 1.0, %v27679_v50  ;;  %v6415_v45 = vand.u32 4294901760, %v24541_v60 }
 0xcb1   : > { %v6232_v56 = vadd.s32 %v6231_v37, %v6229_v9  ;;  %v7084_v49 = vsel %vm1169_vm0, %v24546_v43, inf  ;;  %v6285_v11 = vsel %vm1169_vm0, %v24549_v5, 0 }
 0xcb2   : > { %v6243_v16 = vpop.xlane.xlu0 %6242  ;;  %20057 = vmatprep.mubr.f32.mxu0 %v6387_v17  ;;  %7085 = vmin.xlane.f32.xlu1 %v7084_v49  ;;  %v6404_v46 = vsub.f32 %v6285_v11, %v6285_v11  ;;  %v6416_v1 = vsub.f32 %v24541_v60, %v6415_v45 }
 0xcb3   : > { %v6244_v40 = vcvt.f32.s32 %v6243_v16  ;;  %20058 = vmatmul.mubr.f32.gmra.mrb[26].mxu0 %v6397_v12  ;;  %vm6254_vm4 = vcmp.eq.s32.totalorder %v23026_v58, %v6232_v56 }
 0xcb4   : > { %v24558_v19 = vsel %vm6254_vm4, inf, %v24269_v7  ;;  %v24561_v4 = vsel %vm6254_vm4, 1.0, %v27679_v50  ;;  %v6405_v36 = vand.u32 4294901760, %v6404_v46  ;;  %v6417_v31 = vand.u32 4294901760, %v6416_v1 }
 0xcb5   : > { %v6247_v2 = vadd.s32 %v6246_v8, %v6244_v40  ;;  %v7090_v39 = vsel %vm1169_vm0, %v24558_v19, inf  ;;  %v6291_v14 = vsel %vm1169_vm0, %v24561_v4, 0 }
 0xcb6   : > { %7091 = vmin.xlane.f32.xlu1 %v7090_v39  ;;  %v6406_v48 = vsub.f32 %v6404_v46, %v6405_v36  ;;  %v6424_v41 = vsub.f32 %v6291_v14, %v6291_v14 }
 0xcb7   : > { %vm6255_vm5 = vcmp.eq.s32.totalorder %v23026_v58, %v6247_v2 }
 0xcb8   : > { %v24572_v7 = vsel %vm6255_vm5, inf, %v24283_v0  ;;  %v24575_v52 = vsel %vm6255_vm5, 1.0, %v27679_v50  ;;  %v6407_v53 = vand.u32 4294901760, %v6406_v48  ;;  %v6425_v61 = vand.u32 4294901760, %v6424_v41 }
 0xcb9   : > { %v7093_v59 = vsel %vm1169_vm0, %v24572_v7, inf  ;;  %v6294_v37 = vsel %vm1169_vm0, %v24575_v52, 0 }
 0xcba   : > { %7094 = vmin.xlane.f32.xlu0 %v7093_v59  ;;  %20060 = vmatprep.mubr.f32.mxu0 %v6407_v53  ;;  %v6426_v33 = vsub.f32 %v6424_v41, %v6425_v61  ;;  %v6434_v9 = vsub.f32 %v6294_v37, %v6294_v37 }
 0xcbb   : > { %20061 = vmatmul.mubr.f32.gmra.mrb[28].mxu0 %v6417_v31 }
 0xcbc   : > { %v6427_v17 = vand.u32 4294901760, %v6426_v33  ;;  %v6435_v0 = vand.u32 4294901760, %v6434_v9 }
 0xcbe   : > { %20063 = vmatprep.mubr.f32.mxu0 %v6427_v17  ;;  %v6436_v12 = vsub.f32 %v6434_v9, %v6435_v0 }
 0xcc0   : > { %v6437_v56 = vand.u32 4294901760, %v6436_v12 }
 0xcc2   : > { %20064 = vmatmul.mubr.f32.gmra.mrb[30].mxu0 %v6437_v56 }
 0xcc3   : > { %20070 = vmatprep.mubr.msk.f32.mxu0 %vm1169_vm0, %v24475_v30 }
 0xcc6   : > { %20071 = vmatmul.mubr.msk.f32.vlgmr.msra.gmra.mrb[24].mxu0 %vm1169_vm0, %v24461_v38 }
 0xcc7   : > { %20073 = vmatprep.mubr.msk.f32.mxu0 %vm1169_vm0, %v24511_v28  ;;  %21357 = vmatpush3.bf16.xpose.msra.mxu0 %v22883_v18 }
 0xcc8   : > { %21359 = vmatprep.subr.bf16.mxu0 %v22881_v13 }
 0xcca   : > { %20074 = vmatmul.mubr.msk.f32.gmra.mrb[26].mxu0 %vm1169_vm0, %v24490_v51 }
 0xccb   : > { %20076 = vmatprep.mubr.msk.f32.mxu0 %vm1169_vm0, %v24549_v5 }
 0xcce   : > { %20077 = vmatmul.mubr.msk.f32.gmra.mrb[28].mxu0 %vm1169_vm0, %v24526_v35 }
 0xccf   : > { %20079 = vmatprep.mubr.msk.f32.mxu0 %vm1169_vm0, %v24561_v4 }
 0xcd2   : > { %20080 = vmatmul.mubr.msk.f32.gmra.mrb[30].mxu0 %vm1169_vm0, %v24575_v52 }
 0xcd3   : > { %20086 = vmatprep.mubr.f32.mxu0 %v24482_v63 }
 0xcd6   : > { %20087 = vmatmul.mubr.f32.vlgmr.msra.gmra.mrb[24].mxu0 %v24467_v55 }
 0xcd7   : > { %20089 = vmatprep.mubr.f32.mxu0 %v24518_v20  ;;  %21361 = vmatpush3.bf16.xpose.msra.mxu0 %v22881_v13 }
 0xcd8   : > { %21363 = vmatprep.subr.bf16.mxu0 %v22887_v21 }
 0xcda   : > { %20090 = vmatmul.mubr.f32.gmra.mrb[26].mxu0 %v24503_v25 }
 0xcdb   : > { %20092 = vmatprep.mubr.f32.mxu0 %v6404_v46 }
 0xcde   : > { %20093 = vmatmul.mubr.f32.gmra.mrb[28].mxu0 %v24541_v60 }
 0xcdf   : > { %20095 = vmatprep.mubr.f32.mxu0 %v6424_v41 }
 0xce2   : > { %20096 = vmatmul.mubr.f32.gmra.mrb[30].mxu0 %v6434_v9 }
 0xce3   : > { %20102 = vmatprep.mubr.f32.mxu0 %v6365_v47 }
 0xce6   : > { %20103 = vmatmul.mubr.f32.vlgmr.msra.gmra.mrb[24].mxu0 %v6375_v6 }
 0xce7   : > { %20105 = vmatprep.mubr.f32.mxu0 %v6385_v10  ;;  %21365 = vmatpush3.bf16.xpose.msra.mxu0 %v22887_v21 }
 0xce8   : > { %21367 = vmatprep.subr.bf16.mxu0 %v22881_v13 }
 0xcea   : > { %20106 = vmatmul.mubr.f32.gmra.mrb[26].mxu0 %v6395_v42 }
 0xceb   : > { %20108 = vmatprep.mubr.f32.mxu0 %v6405_v36 }
 0xcee   : > { %20109 = vmatmul.mubr.f32.gmra.mrb[28].mxu0 %v6415_v45 }
 0xcef   : > { %20111 = vmatprep.mubr.f32.mxu0 %v6425_v61 }
 0xcf2   : > { %20112 = vmatmul.mubr.f32.gmra.mrb[30].mxu0 %v6435_v0 }
 0xcf3   : > { %20118 = vmatprep.mubr.msk.f32.mxu0 %vm1169_vm0, %v24475_v30 }
 0xcf6   : > { %20119 = vmatmul.mubr.msk.f32.vlgmr.msra.gmra.mrb[24].mxu0 %vm1169_vm0, %v24461_v38 }
 0xcf7   : > { %20121 = vmatprep.mubr.msk.f32.mxu0 %vm1169_vm0, %v24511_v28  ;;  %21369 = vmatpush3.bf16.xpose.msra.mxu0 %v22881_v13 }
 0xcf8   : > { %21395 = vmatprep.subr.bf16.mxu0 %v22881_v13 }
 0xcfa   : > { %20122 = vmatmul.mubr.msk.f32.gmra.mrb[26].mxu0 %vm1169_vm0, %v24490_v51 }
 0xcfb   : > { %20124 = vmatprep.mubr.msk.f32.mxu0 %vm1169_vm0, %v24549_v5 }
 0xcfe   : > { %20125 = vmatmul.mubr.msk.f32.gmra.mrb[28].mxu0 %vm1169_vm0, %v24526_v35 }
 0xcff   : > { %20127 = vmatprep.mubr.msk.f32.mxu0 %vm1169_vm0, %v24561_v4 }
 0xd02   : > { %20128 = vmatmul.mubr.msk.f32.gmra.mrb[30].mxu0 %vm1169_vm0, %v24575_v52 }
 0xd03   : > { %20134 = vmatprep.mubr.msk.f32.mxu0 %vm1169_vm0, %v24475_v30 }
 0xd06   : > { %20135 = vmatmul.mubr.msk.f32.vlgmr.msra.gmra.mrb[24].mxu0 %vm1169_vm0, %v24461_v38 }
 0xd07   : > { %20137 = vmatprep.mubr.msk.f32.mxu0 %vm1169_vm0, %v24511_v28  ;;  %21397 = vmatpush3.bf16.xpose.msra.mxu0 %v22881_v13 }
 0xd08   : > { %21399 = vmatprep.subr.bf16.mxu0 %v22889_v24 }
 0xd0a   : > { %20138 = vmatmul.mubr.msk.f32.gmra.mrb[26].mxu0 %vm1169_vm0, %v24490_v51 }
 0xd0b   : > { %20140 = vmatprep.mubr.msk.f32.mxu0 %vm1169_vm0, %v24549_v5 }
 0xd0e   : > { %20141 = vmatmul.mubr.msk.f32.gmra.mrb[28].mxu0 %vm1169_vm0, %v24526_v35 }
 0xd0f   : > { %20143 = vmatprep.mubr.msk.f32.mxu0 %vm1169_vm0, %v24561_v4 }
 0xd12   : > { %20144 = vmatmul.mubr.msk.f32.gmra.mrb[30].mxu0 %vm1169_vm0, %v24575_v52 }
 0xd2b   : > { %v7077_v38 = vpop.xlane.xlu0 %7076 }
 0xd2c   : > { %vm7097_vm6 = vcmp.eq.f32.partialorder %v24458_v62, %v7077_v38 }
 0xd2d   : > { %v7105_v55 = vsel %vm7097_vm6, %v23026_v58, 64 }
 0xd2e   : > { %v7127_v30 = vsel %vm1169_vm0, %v7105_v55, 2147483647 }
 0xd2f   : > { %v7074_v6 = vpop.xlane.xlu1 %7073  ;;  %v7129_v63 = vshra.s32 %v7127_v30, 16  ;;  %v7128_v12 = vand.u32 65535, %v7127_v30 }
 0xd30   : > { %vm7096_vm7 = vcmp.eq.f32.partialorder %v24472_v34, %v7074_v6 }
 0xd31   : > { %v7104_v51 = vsel %vm7096_vm7, %v23026_v58, 64  ;;  %v7131_v47 = vcvt.s32.f32 %v7129_v63  ;;  %v7130_v38 = vcvt.s32.f32 %v7128_v12 }
 0xd32   : > { %v7112_v25 = vsel %vm1169_vm0, %v7104_v51, 2147483647 }
 0xd33   : > { %7132 = vmin.xlane.f32.xlu0 %v7131_v47  ;;  %v7083_v28 = vpop.xlane.xlu0 %7082  ;;  %v7114_v42 = vshra.s32 %v7112_v25, 16  ;;  %v7113_v55 = vand.u32 65535, %v7112_v25 }
 0xd34   : > { %vm7099_vm8 = vcmp.eq.f32.partialorder %v24487_v32, %v7083_v28 }
 0xd35   : > { %v7107_v20 = vsel %vm7099_vm8, %v23026_v58, 64  ;;  %v7116_v35 = vcvt.s32.f32 %v7114_v42  ;;  %v7115_v51 = vcvt.s32.f32 %v7113_v55 }
 0xd36   : > { %v7157_v10 = vsel %vm1169_vm0, %v7107_v20, 2147483647 }
 0xd37   : > { %7117 = vmin.xlane.f32.xlu1 %v7116_v35  ;;  %v7080_v60 = vpop.xlane.xlu1 %7079  ;;  %v7159_v5 = vshra.s32 %v7157_v10, 16  ;;  %v7158_v28 = vand.u32 65535, %v7157_v10 }
 0xd38   : > { %vm7098_vm9 = vcmp.eq.f32.partialorder %v24508_v27, %v7080_v60 }
 0xd39   : > { %v7106_v49 = vsel %vm7098_vm9, %v23026_v58, 64  ;;  %v7161_v11 = vcvt.s32.f32 %v7159_v5  ;;  %v7160_v60 = vcvt.s32.f32 %v7158_v28 }
 0xd3a   : > { %v7142_v45 = vsel %vm1169_vm0, %v7106_v49, 2147483647 }
 0xd3b   : > { %7162 = vmin.xlane.f32.xlu0 %v7161_v11  ;;  %v7089_v16 = vpop.xlane.xlu0 %7088  ;;  %v7144_v46 = vshra.s32 %v7142_v45, 16  ;;  %v7143_v30 = vand.u32 65535, %v7142_v45 }
 0xd3c   : > { %vm7101_vm10 = vcmp.eq.f32.partialorder %v24523_v26, %v7089_v16 }
 0xd3d   : > { %v7109_v8 = vsel %vm7101_vm10, %v23026_v58, 64  ;;  %v7146_v40 = vcvt.s32.f32 %v7144_v46 }
 0xd3e   : > { %v7187_v4 = vsel %vm1169_vm0, %v7109_v8, 2147483647 }
 0xd3f   : > { %7147 = vmin.xlane.f32.xlu1 %v7146_v40  ;;  %v7086_v36 = vpop.xlane.xlu1 %7085  ;;  %v7189_v2 = vshra.s32 %v7187_v4, 16  ;;  %v7188_v49 = vand.u32 65535, %v7187_v4 }
 0xd40   : > { %vm7100_vm11 = vcmp.eq.f32.partialorder %v24546_v43, %v7086_v36 }
 0xd41   : > { %v7108_v39 = vsel %vm7100_vm11, %v23026_v58, 64  ;;  %v7191_v1 = vcvt.s32.f32 %v7189_v2 }
 0xd42   : > { %v7172_v14 = vsel %vm1169_vm0, %v7108_v39, 2147483647 }
 0xd43   : > { %7192 = vmin.xlane.f32.xlu0 %v7191_v1  ;;  %v7092_v48 = vpop.xlane.xlu1 %7091  ;;  %v7174_v41 = vshra.s32 %v7172_v14, 16  ;;  %v7173_v46 = vand.u32 65535, %v7172_v14 }
 0xd44   : > { %vm7102_vm12 = vcmp.eq.f32.partialorder %v24558_v19, %v7092_v48 }
 0xd45   : > { %v7110_v52 = vsel %vm7102_vm12, %v23026_v58, 64  ;;  %v7176_v53 = vcvt.s32.f32 %v7174_v41 }
 0xd46   : > { %v7202_v61 = vsel %vm1169_vm0, %v7110_v52, 2147483647 }
 0xd47   : > { %v7095_v59 = vpop.xlane.xlu0 %7094  ;;  %7177 = vmin.xlane.f32.xlu1 %v7176_v53  ;;  %v7204_v31 = vshra.s32 %v7202_v61, 16  ;;  %v7203_v36 = vand.u32 65535, %v7202_v61 }
 0xd48   : > { %vm7103_vm13 = vcmp.eq.f32.partialorder %v24572_v7, %v7095_v59 }
 0xd49   : > { %v7111_v37 = vsel %vm7103_vm13, %v23026_v58, 64  ;;  %v7206_v33 = vcvt.s32.f32 %v7204_v31 }
 0xd4a   : > { %v7217_v9 = vsel %vm1169_vm0, %v7111_v37, 2147483647 }
 0xd4b   : > { %7207 = vmin.xlane.f32.xlu1 %v7206_v33  ;;  %v7219_v17 = vshra.s32 %v7217_v9, 16  ;;  %v7218_v39 = vand.u32 65535, %v7217_v9 }
 0xd4d   : > { %v7221_v0 = vcvt.s32.f32 %v7219_v17  ;;  %v7220_v61 = vcvt.s32.f32 %v7218_v39 }
 0xd4f   : > { %7222 = vmin.xlane.f32.xlu0 %v7221_v0 }
 0xdc0   : > { %v24678_v56 = vpop.xlane.xlu0 %7132 }
 0xdc1   : > { %vm7134_vm14 = vcmp.eq.f32.partialorder %v7131_v47, %v24678_v56  ;;  %v7145_v47 = vcvt.s32.f32 %v7143_v30 }
 0xdc2   : > { %v7135_v6 = vsel %vm7134_vm14, %v7130_v38, inf }
 0xdc3   : > { %7136 = vmin.xlane.f32.xlu0 %v7135_v6 }
 0xdc4   : > { %v24681_v63 = vpop.xlane.xlu1 %7117 }
 0xdc5   : > { %vm7119_vm15 = vcmp.eq.f32.partialorder %v7116_v35, %v24681_v63  ;;  %v7190_v35 = vcvt.s32.f32 %v7188_v49 }
 0xdc6   : > { %v7120_v42 = vsel %vm7119_vm15, %v7115_v51, inf }
 0xdc7   : > { %7121 = vmin.xlane.f32.xlu1 %v7120_v42  ;;  %v7139_v42 = vcvt.f32.s32 %v24678_v56 }
 0xdc8   : > { %v24684_v20 = vpop.xlane.xlu0 %7162 }
 0xdc9   : > { %vm7164_vm2 = vcmp.eq.f32.partialorder %v7161_v11, %v24684_v20  ;;  %v7175_v11 = vcvt.s32.f32 %v7173_v46  ;;  %v7140_v30 = vshll.u32 %v7139_v42, 16  ;;  %v7169_v46 = vcvt.f32.s32 %v24684_v20 }
 0xdca   : > { %v7165_v5 = vsel %vm7164_vm2, %v7160_v60, inf }
 0xdcb   : > { %7166 = vmin.xlane.f32.xlu0 %v7165_v5  ;;  %v7124_v5 = vcvt.f32.s32 %v24681_v63  ;;  %v7170_v39 = vshll.u32 %v7169_v46, 16 }
 0xdcc   : > { %v24687_v25 = vpop.xlane.xlu1 %7147 }
 0xdcd   : > { %vm7149_vm3 = vcmp.eq.f32.partialorder %v7146_v40, %v24687_v25  ;;  %v7205_v40 = vcvt.s32.f32 %v7203_v36 }
 0xdce   : > { %v7150_v16 = vsel %vm7149_vm3, %v7145_v47, inf }
 0xdcf   : > { %7151 = vmin.xlane.f32.xlu1 %v7150_v16 }
 0xdd0   : > { %v24690_v10 = vpop.xlane.xlu0 %7192 }
 0xdd1   : > { %vm7194_vm4 = vcmp.eq.f32.partialorder %v7191_v1, %v24690_v10 }
 0xdd2   : > { %v7195_v8 = vsel %vm7194_vm4, %v7190_v35, inf  ;;  %v7125_v35 = vshll.u32 %v7124_v5, 16 }
 0xdd3   : > { %7196 = vmin.xlane.f32.xlu0 %v7195_v8 }
 0xdd4   : > { %v24693_v45 = vpop.xlane.xlu1 %7177 }
 0xdd5   : > { %vm7179_vm5 = vcmp.eq.f32.partialorder %v7176_v53, %v24693_v45 }
 0xdd6   : > { %v7180_v2 = vsel %vm7179_vm5, %v7175_v11, inf }
 0xdd7   : > { %7181 = vmin.xlane.f32.xlu1 %v7180_v2 }
 0xdd8   : > { %v24696_v4 = vpop.xlane.xlu1 %7207 }
 0xdd9   : > { %v24698_v48 = vpop.f32.mrb[24].mxu0  ;;  %vm7209_vm6 = vcmp.eq.f32.partialorder %v7206_v33, %v24696_v4 }
 0xdda   : > { %v24703_v14 = vpop.f32.mrb[25].mxu0  ;;  %v7210_v41 = vsel %vm7209_vm6, %v7205_v40, inf }
 0xddb   : > { %7211 = vmin.xlane.f32.xlu1 %v7210_v41  ;;  %v7154_v41 = vcvt.f32.s32 %v24687_v25 }
 0xddc   : > { %v24707_v53 = vpop.xlane.xlu0 %7222 }
 0xddd   : > { %v24709_v59 = vpop.f32.mrb[26].mxu0  ;;  %vm7224_vm7 = vcmp.eq.f32.partialorder %v7221_v0, %v24707_v53 }
 0xdde   : > { %v24714_v37 = vpop.f32.mrb[27].mxu0  ;;  %v7225_v33 = vsel %vm7224_vm7, %v7220_v61, inf }
 0xddf   : > { %7226 = vmin.xlane.f32.xlu0 %v7225_v33 }
 0xde1   : > { %v24718_v17 = vpop.f32.mrb[28].mxu0 }
 0xde2   : > { %v24722_v38 = vpop.f32.mrb[29].mxu0 }
 0xde5   : > { %v24726_v55 = vpop.f32.mrb[30].mxu0 }
 0xde6   : > { %v24730_v51 = vpop.f32.mrb[31].mxu0 }
 0xe50   : > { %v7137_v60 = vpop.xlane.xlu0 %7136 }
 0xe51   : > { %v7138_v47 = vcvt.f32.s32 %v7137_v60 }
 0xe53   : > { %v7141_v49 = vadd.s32 %v7140_v30, %v7138_v47 }
 0xe54   : > { %v7122_v16 = vpop.xlane.xlu1 %7121 }
 0xe55   : > { %v7123_v8 = vcvt.f32.s32 %v7122_v16  ;;  %vm7233_vm8 = vcmp.eq.s32.totalorder %v23026_v58, %v7141_v49  ;;  %v7155_v49 = vshll.u32 %v7154_v41, 16 }
 0xe56   : > { %v24739_v11 = vsel %vm7233_vm8, inf, %v24458_v62  ;;  %v24742_v36 = vsel %vm7233_vm8, 1.0, %v27679_v50 }
 0xe57   : > { %v7126_v56 = vadd.s32 %v7125_v35, %v7123_v8  ;;  %v8059_v2 = vsel %vm1169_vm0, %v24739_v11, inf  ;;  %v7260_v63 = vsel %vm1169_vm0, %v24742_v36, 0 }
 0xe58   : > { %8060 = vmin.xlane.f32.xlu0 %v8059_v2  ;;  %v24748_v40 = vsub.f32 %v7260_v63, %v7260_v63  ;;  %v7167_v20 = vpop.xlane.xlu0 %7166 }
 0xe59   : > { %v7168_v61 = vcvt.f32.s32 %v7167_v20  ;;  %vm7232_vm9 = vcmp.eq.s32.totalorder %v23026_v58, %v7126_v56 }
 0xe5a   : > { %v24753_v62 = vsel %vm7232_vm9, inf, %v24472_v34  ;;  %v24756_v33 = vsel %vm7232_vm9, 1.0, %v27679_v50  ;;  %v7359_v5 = vand.u32 4294901760, %v24748_v40  ;;  %v7199_v34 = vcvt.f32.s32 %v24690_v10 }
 0xe5b   : > { %v7171_v42 = vadd.s32 %v7170_v39, %v7168_v61  ;;  %v8056_v60 = vsel %vm1169_vm0, %v24753_v62, inf  ;;  %v7257_v30 = vsel %vm1169_vm0, %v24756_v33, 0  ;;  %v7184_v61 = vcvt.f32.s32 %v24693_v45 }
 0xe5c   : > { %8057 = vmin.xlane.f32.xlu1 %v8056_v60  ;;  %v7152_v25 = vpop.xlane.xlu1 %7151  ;;  %v24763_v47 = vsub.f32 %v7257_v30, %v7257_v30  ;;  %v7360_v63 = vsub.f32 %v24748_v40, %v7359_v5  ;;  %v7200_v41 = vshll.u32 %v7199_v34, 16 }
 0xe5d   : > { %v7153_v16 = vcvt.f32.s32 %v7152_v25  ;;  %vm7235_vm10 = vcmp.eq.s32.totalorder %v23026_v58, %v7171_v42 }
 0xe5e   : > { %v24768_v35 = vsel %vm7235_vm10, inf, %v24487_v32  ;;  %v24771_v46 = vsel %vm7235_vm10, 1.0, %v27679_v50  ;;  %v7349_v8 = vand.u32 4294901760, %v24763_v47 }
 0xe5f   : > { %v7156_v56 = vadd.s32 %v7155_v49, %v7153_v16  ;;  %v8065_v2 = vsel %vm1169_vm0, %v24768_v35, inf  ;;  %v7266_v10 = vsel %vm1169_vm0, %v24771_v46, 0 }
 0xe60   : > { %8066 = vmin.xlane.f32.xlu0 %v8065_v2  ;;  %v7197_v20 = vpop.xlane.xlu0 %7196  ;;  %v7350_v32 = vsub.f32 %v24763_v47, %v7349_v8  ;;  %v24784_v39 = vsub.f32 %v7266_v10, %v7266_v10  ;;  %v7361_v10 = vand.u32 4294901760, %v7360_v63 }
 0xe61   : > { %v7198_v42 = vcvt.f32.s32 %v7197_v20  ;;  %vm7234_vm11 = vcmp.eq.s32.totalorder %v23026_v58, %v7156_v56  ;;  %v7214_v20 = vcvt.f32.s32 %v24696_v4 }
 0xe62   : > { %v7351_v60 = vand.u32 4294901760, %v7350_v32  ;;  %v24789_v30 = vsel %vm7234_vm11, inf, %v24508_v27  ;;  %v24792_v25 = vsel %vm7234_vm11, 1.0, %v27679_v50  ;;  %v7379_v49 = vand.u32 4294901760, %v24784_v39 }
 0xe63   : > { %v7201_v16 = vadd.s32 %v7200_v41, %v7198_v42  ;;  %v8062_v2 = vsel %vm1169_vm0, %v24789_v30, inf  ;;  %v7263_v45 = vsel %vm1169_vm0, %v24792_v25, 0  ;;  %v7185_v27 = vshll.u32 %v7184_v61, 16 }
 0xe64   : > { %20150 = vmatprep.mubr.f32.mxu1 %v7351_v60  ;;  %8063 = vmin.xlane.f32.xlu1 %v8062_v2  ;;  %v7182_v34 = vpop.xlane.xlu1 %7181  ;;  %v24799_v56 = vsub.f32 %v7263_v45, %v7263_v45  ;;  %v7380_v60 = vsub.f32 %v24784_v39, %v7379_v49  ;;  %v7215_v45 = vshll.u32 %v7214_v20, 16 }
 0xe65   : > { %v7183_v32 = vcvt.f32.s32 %v7182_v34  ;;  %20151 = vmatmul.mubr.f32.vlgmr.msra.gmra.mrb[24].mxu1 %v7361_v10  ;;  %vm7237_vm12 = vcmp.eq.s32.totalorder %v23026_v58, %v7201_v16  ;;  %v7229_v34 = vcvt.f32.s32 %v24707_v53 }
 0xe66   : > { %v24804_v41 = vsel %vm7237_vm12, inf, %v24523_v26  ;;  %v24807_v63 = vsel %vm7237_vm12, 1.0, %v27679_v50  ;;  %v7369_v42 = vand.u32 4294901760, %v24799_v56  ;;  %21377 = vmatpush3.bf16.xpose.msra.mxu1 %v22889_v24 }
 0xe67   : > { %v7186_v61 = vadd.s32 %v7185_v27, %v7183_v32  ;;  %v8071_v4 = vsel %vm1169_vm0, %v24804_v41, inf  ;;  %v7272_v16 = vsel %vm1169_vm0, %v24807_v63, 0  ;;  %21379 = vmatprep.subr.bf16.mxu1 %v22883_v18 }
 0xe68   : > { %8072 = vmin.xlane.f32.xlu0 %v8071_v4  ;;  %v7212_v26 = vpop.xlane.xlu1 %7211  ;;  %v7370_v2 = vsub.f32 %v24799_v56, %v7369_v42  ;;  %v24822_v10 = vsub.f32 %v7272_v16, %v7272_v16  ;;  %v7381_v4 = vand.u32 4294901760, %v7380_v60 }
 0xe69   : > { %v7213_v27 = vcvt.f32.s32 %v7212_v26  ;;  %vm7236_vm13 = vcmp.eq.s32.totalorder %v23026_v58, %v7186_v61  ;;  %v7230_v26 = vshll.u32 %v7229_v34, 16 }
 0xe6a   : > { %v7371_v32 = vand.u32 4294901760, %v7370_v2  ;;  %v24827_v28 = vsel %vm7236_vm13, inf, %v24546_v43  ;;  %v24830_v6 = vsel %vm7236_vm13, 1.0, %v27679_v50  ;;  %v7399_v53 = vand.u32 4294901760, %v24822_v10 }
 0xe6b   : > { %v7216_v0 = vadd.s32 %v7215_v45, %v7213_v27  ;;  %v8068_v12 = vsel %vm1169_vm0, %v24827_v28, inf  ;;  %v7269_v20 = vsel %vm1169_vm0, %v24830_v6, 0 }
 0xe6c   : > { %v7227_v16 = vpop.xlane.xlu0 %7226  ;;  %20153 = vmatprep.mubr.f32.mxu1 %v7371_v32  ;;  %8069 = vmin.xlane.f32.xlu1 %v8068_v12  ;;  %v7388_v61 = vsub.f32 %v7269_v20, %v7269_v20  ;;  %v7400_v12 = vsub.f32 %v24822_v10, %v7399_v53 }
 0xe6d   : > { %v7228_v43 = vcvt.f32.s32 %v7227_v16  ;;  %20154 = vmatmul.mubr.f32.gmra.mrb[26].mxu1 %v7381_v4  ;;  %vm7238_vm14 = vcmp.eq.s32.totalorder %v23026_v58, %v7216_v0 }
 0xe6e   : > { %v24839_v60 = vsel %vm7238_vm14, inf, %v24558_v19  ;;  %v24842_v2 = vsel %vm7238_vm14, 1.0, %v27679_v50  ;;  %v7389_v45 = vand.u32 4294901760, %v7388_v61 }
 0xe6f   : > { %v7231_v27 = vadd.s32 %v7230_v26, %v7228_v43  ;;  %v8074_v9 = vsel %vm1169_vm0, %v24839_v60, inf  ;;  %v7275_v34 = vsel %vm1169_vm0, %v24842_v2, 0  ;;  %v7401_v43 = vand.u32 4294901760, %v7400_v12 }
 0xe70   : > { %8075 = vmin.xlane.f32.xlu1 %v8074_v9  ;;  %v7390_v0 = vsub.f32 %v7388_v61, %v7389_v45  ;;  %v7408_v32 = vsub.f32 %v7275_v34, %v7275_v34 }
 0xe71   : > { %vm7239_vm15 = vcmp.eq.s32.totalorder %v23026_v58, %v7231_v27 }
 0xe72   : > { %v24853_v19 = vsel %vm7239_vm15, inf, %v24572_v7  ;;  %v24856_v4 = vsel %vm7239_vm15, 1.0, %v27679_v50  ;;  %v7391_v20 = vand.u32 4294901760, %v7390_v0  ;;  %v7409_v16 = vand.u32 4294901760, %v7408_v32 }
 0xe73   : > { %v8077_v26 = vsel %vm1169_vm0, %v24853_v19, inf  ;;  %v7278_v31 = vsel %vm1169_vm0, %v24856_v4, 0 }
 0xe74   : > { %8078 = vmin.xlane.f32.xlu0 %v8077_v26  ;;  %20156 = vmatprep.mubr.f32.mxu1 %v7391_v20  ;;  %v7410_v9 = vsub.f32 %v7408_v32, %v7409_v16  ;;  %v7418_v34 = vsub.f32 %v7278_v31, %v7278_v31 }
 0xe75   : > { %20157 = vmatmul.mubr.f32.gmra.mrb[28].mxu1 %v7401_v43 }
 0xe76   : > { %v7411_v27 = vand.u32 4294901760, %v7410_v9  ;;  %v7419_v7 = vand.u32 4294901760, %v7418_v34 }
 0xe78   : > { %20159 = vmatprep.mubr.f32.mxu1 %v7411_v27  ;;  %v7420_v52 = vsub.f32 %v7418_v34, %v7419_v7 }
 0xe7a   : > { %v7421_v1 = vand.u32 4294901760, %v7420_v52 }
 0xe7c   : > { %20160 = vmatmul.mubr.f32.gmra.mrb[30].mxu1 %v7421_v1 }
 0xe7d   : > { %20166 = vmatprep.mubr.msk.f32.mxu1 %vm1169_vm0, %v24756_v33 }
 0xe80   : > { %20167 = vmatmul.mubr.msk.f32.vlgmr.msra.gmra.mrb[24].mxu1 %vm1169_vm0, %v24742_v36 }
 0xe81   : > { %20169 = vmatprep.mubr.msk.f32.mxu1 %vm1169_vm0, %v24792_v25  ;;  %21381 = vmatpush3.bf16.xpose.msra.mxu1 %v22883_v18 }
 0xe82   : > { %21383 = vmatprep.subr.bf16.mxu1 %v22881_v13 }
 0xe84   : > { %20170 = vmatmul.mubr.msk.f32.gmra.mrb[26].mxu1 %vm1169_vm0, %v24771_v46 }
 0xe85   : > { %20172 = vmatprep.mubr.msk.f32.mxu1 %vm1169_vm0, %v24830_v6 }
 0xe88   : > { %20173 = vmatmul.mubr.msk.f32.gmra.mrb[28].mxu1 %vm1169_vm0, %v24807_v63 }
 0xe89   : > { %20175 = vmatprep.mubr.msk.f32.mxu1 %vm1169_vm0, %v24842_v2 }
 0xe8c   : > { %20176 = vmatmul.mubr.msk.f32.gmra.mrb[30].mxu1 %vm1169_vm0, %v24856_v4 }
 0xe8d   : > { %20182 = vmatprep.mubr.f32.mxu1 %v24763_v47 }
 0xe90   : > { %20183 = vmatmul.mubr.f32.vlgmr.msra.gmra.mrb[24].mxu1 %v24748_v40 }
 0xe91   : > { %20185 = vmatprep.mubr.f32.mxu1 %v24799_v56  ;;  %21385 = vmatpush3.bf16.xpose.msra.mxu1 %v22881_v13 }
 0xe92   : > { %21387 = vmatprep.subr.bf16.mxu1 %v22887_v21 }
 0xe94   : > { %20186 = vmatmul.mubr.f32.gmra.mrb[26].mxu1 %v24784_v39 }
 0xe95   : > { %20188 = vmatprep.mubr.f32.mxu1 %v7388_v61 }
 0xe98   : > { %20189 = vmatmul.mubr.f32.gmra.mrb[28].mxu1 %v24822_v10 }
 0xe99   : > { %20191 = vmatprep.mubr.f32.mxu1 %v7408_v32 }
 0xe9c   : > { %20192 = vmatmul.mubr.f32.gmra.mrb[30].mxu1 %v7418_v34 }
 0xe9d   : > { %20198 = vmatprep.mubr.f32.mxu1 %v7349_v8 }
 0xea0   : > { %20199 = vmatmul.mubr.f32.vlgmr.msra.gmra.mrb[24].mxu1 %v7359_v5 }
 0xea1   : > { %20201 = vmatprep.mubr.f32.mxu1 %v7369_v42  ;;  %21389 = vmatpush3.bf16.xpose.msra.mxu1 %v22887_v21 }
 0xea2   : > { %21391 = vmatprep.subr.bf16.mxu1 %v22881_v13 }
 0xea4   : > { %20202 = vmatmul.mubr.f32.gmra.mrb[26].mxu1 %v7379_v49 }
 0xea5   : > { %20204 = vmatprep.mubr.f32.mxu1 %v7389_v45 }
 0xea8   : > { %20205 = vmatmul.mubr.f32.gmra.mrb[28].mxu1 %v7399_v53 }
 0xea9   : > { %20207 = vmatprep.mubr.f32.mxu1 %v7409_v16 }
 0xeac   : > { %20208 = vmatmul.mubr.f32.gmra.mrb[30].mxu1 %v7419_v7 }
 0xead   : > { %20214 = vmatprep.mubr.msk.f32.mxu1 %vm1169_vm0, %v24756_v33 }
 0xeb0   : > { %20215 = vmatmul.mubr.msk.f32.vlgmr.msra.gmra.mrb[24].mxu1 %vm1169_vm0, %v24742_v36 }
 0xeb1   : > { %20217 = vmatprep.mubr.msk.f32.mxu1 %vm1169_vm0, %v24792_v25  ;;  %21393 = vmatpush3.bf16.xpose.msra.mxu1 %v22881_v13 }
 0xeb2   : > { %21419 = vmatprep.subr.bf16.mxu1 %v22881_v13 }
 0xeb4   : > { %20218 = vmatmul.mubr.msk.f32.gmra.mrb[26].mxu1 %vm1169_vm0, %v24771_v46 }
 0xeb5   : > { %20220 = vmatprep.mubr.msk.f32.mxu1 %vm1169_vm0, %v24830_v6 }
 0xeb8   : > { %20221 = vmatmul.mubr.msk.f32.gmra.mrb[28].mxu1 %vm1169_vm0, %v24807_v63 }
 0xeb9   : > { %20223 = vmatprep.mubr.msk.f32.mxu1 %vm1169_vm0, %v24842_v2 }
 0xebc   : > { %20224 = vmatmul.mubr.msk.f32.gmra.mrb[30].mxu1 %vm1169_vm0, %v24856_v4 }
 0xebd   : > { %20230 = vmatprep.mubr.msk.f32.mxu1 %vm1169_vm0, %v24756_v33 }
 0xec0   : > { %20231 = vmatmul.mubr.msk.f32.vlgmr.msra.gmra.mrb[24].mxu1 %vm1169_vm0, %v24742_v36 }
 0xec1   : > { %20233 = vmatprep.mubr.msk.f32.mxu1 %vm1169_vm0, %v24792_v25  ;;  %21421 = vmatpush3.bf16.xpose.msra.mxu1 %v22881_v13 }
 0xec2   : > { %21423 = vmatprep.subr.bf16.mxu1 %v22889_v24 }
 0xec4   : > { %20234 = vmatmul.mubr.msk.f32.gmra.mrb[26].mxu1 %vm1169_vm0, %v24771_v46 }
 0xec5   : > { %20236 = vmatprep.mubr.msk.f32.mxu1 %vm1169_vm0, %v24830_v6 }
 0xec8   : > { %20237 = vmatmul.mubr.msk.f32.gmra.mrb[28].mxu1 %vm1169_vm0, %v24807_v63 }
 0xec9   : > { %20239 = vmatprep.mubr.msk.f32.mxu1 %vm1169_vm0, %v24842_v2 }
 0xecc   : > { %20240 = vmatmul.mubr.msk.f32.gmra.mrb[30].mxu1 %vm1169_vm0, %v24856_v4 }
 0xee5   : > { %v8061_v1 = vpop.xlane.xlu0 %8060 }
 0xee6   : > { %vm8081_vm2 = vcmp.eq.f32.partialorder %v24739_v11, %v8061_v1 }
 0xee7   : > { %v8089_v52 = vsel %vm8081_vm2, %v23026_v58, 64 }
 0xee8   : > { %v8111_v31 = vsel %vm1169_vm0, %v8089_v52, 2147483647 }
 0xee9   : > { %v8058_v36 = vpop.xlane.xlu1 %8057  ;;  %v8113_v40 = vshra.s32 %v8111_v31, 16 }
 0xeea   : > { %vm8080_vm3 = vcmp.eq.f32.partialorder %v24753_v62, %v8058_v36 }
 0xeeb   : > { %v8088_v6 = vsel %vm8080_vm3, %v23026_v58, 64  ;;  %v8115_v33 = vcvt.s32.f32 %v8113_v40 }
 0xeec   : > { %v8096_v5 = vsel %vm1169_vm0, %v8088_v6, 2147483647 }
 0xeed   : > { %8116 = vmin.xlane.f32.xlu0 %v8115_v33  ;;  %v8067_v47 = vpop.xlane.xlu0 %8066  ;;  %v8098_v46 = vshra.s32 %v8096_v5, 16 }
 0xeee   : > { %vm8083_vm4 = vcmp.eq.f32.partialorder %v24768_v35, %v8067_v47 }
 0xeef   : > { %v8091_v8 = vsel %vm8083_vm4, %v23026_v58, 64  ;;  %v8100_v39 = vcvt.s32.f32 %v8098_v46  ;;  %v8112_v46 = vand.u32 65535, %v8111_v31 }
 0xef0   : > { %v8141_v25 = vsel %vm1169_vm0, %v8091_v8, 2147483647 }
 0xef1   : > { %8101 = vmin.xlane.f32.xlu1 %v8100_v39  ;;  %v8064_v49 = vpop.xlane.xlu1 %8063  ;;  %v8143_v56 = vshra.s32 %v8141_v25, 16 }
 0xef2   : > { %vm8082_vm5 = vcmp.eq.f32.partialorder %v24789_v30, %v8064_v49  ;;  %v8114_v49 = vcvt.s32.f32 %v8112_v46 }
 0xef3   : > { %v8090_v63 = vsel %vm8082_vm5, %v23026_v58, 64  ;;  %v8145_v42 = vcvt.s32.f32 %v8143_v56  ;;  %v8097_v56 = vand.u32 65535, %v8096_v5 }
 0xef4   : > { %v8126_v10 = vsel %vm1169_vm0, %v8090_v63, 2147483647 }
 0xef5   : > { %8146 = vmin.xlane.f32.xlu0 %v8145_v42  ;;  %v8073_v53 = vpop.xlane.xlu0 %8072  ;;  %v8128_v61 = vshra.s32 %v8126_v10, 16  ;;  %v8127_v31 = vand.u32 65535, %v8126_v10 }
 0xef6   : > { %vm8085_vm6 = vcmp.eq.f32.partialorder %v24804_v41, %v8073_v53 }
 0xef7   : > { %v8093_v2 = vsel %vm8085_vm6, %v23026_v58, 64  ;;  %v8130_v45 = vcvt.s32.f32 %v8128_v61  ;;  %v8099_v61 = vcvt.s32.f32 %v8097_v56 }
 0xef8   : > { %v8171_v12 = vsel %vm1169_vm0, %v8093_v2, 2147483647  ;;  %v8142_v2 = vand.u32 65535, %v8141_v25 }
 0xef9   : > { %8131 = vmin.xlane.f32.xlu1 %v8130_v45  ;;  %v8070_v0 = vpop.xlane.xlu1 %8069  ;;  %v8173_v32 = vshra.s32 %v8171_v12, 16 }
 0xefa   : > { %vm8084_vm7 = vcmp.eq.f32.partialorder %v24827_v28, %v8070_v0 }
 0xefb   : > { %v8092_v4 = vsel %vm8084_vm7, %v23026_v58, 64  ;;  %v8175_v20 = vcvt.s32.f32 %v8173_v32 }
 0xefc   : > { %v8156_v16 = vsel %vm1169_vm0, %v8092_v4, 2147483647  ;;  %v8144_v4 = vcvt.s32.f32 %v8142_v2 }
 0xefd   : > { %8176 = vmin.xlane.f32.xlu0 %v8175_v20  ;;  %v8076_v26 = vpop.xlane.xlu1 %8075  ;;  %v8158_v43 = vshra.s32 %v8156_v16, 16 }
 0xefe   : > { %vm8086_vm8 = vcmp.eq.f32.partialorder %v24839_v60, %v8076_v26 }
 0xeff   : > { %v8094_v9 = vsel %vm8086_vm8, %v23026_v58, 64  ;;  %v8160_v34 = vcvt.s32.f32 %v8158_v43  ;;  %v8172_v43 = vand.u32 65535, %v8171_v12 }
 0xf00   : > { %v8186_v27 = vsel %vm1169_vm0, %v8094_v9, 2147483647 }
 0xf01   : > { %v8079_v7 = vpop.xlane.xlu0 %8078  ;;  %8161 = vmin.xlane.f32.xlu1 %v8160_v34  ;;  %v8188_v1 = vshra.s32 %v8186_v27, 16 }
 0xf02   : > { %vm8087_vm9 = vcmp.eq.f32.partialorder %v24853_v19, %v8079_v7  ;;  %v8157_v7 = vand.u32 65535, %v8156_v16 }
 0xf03   : > { %v8095_v52 = vsel %vm8087_vm9, %v23026_v58, 64  ;;  %v8190_v36 = vcvt.s32.f32 %v8188_v1 }
 0xf04   : > { %v8201_v40 = vsel %vm1169_vm0, %v8095_v52, 2147483647  ;;  %v8187_v52 = vand.u32 65535, %v8186_v27  ;;  %v27689_v27 = vmax.f32 %v24418_v15, %v24703_v14 }
 0xf05   : > { %8191 = vmin.xlane.f32.xlu1 %v8190_v36  ;;  %v8203_v6 = vshra.s32 %v8201_v40, 16  ;;  %v8202_v46 = vand.u32 65535, %v8201_v40 }
 0xf07   : > { %v8205_v47 = vcvt.s32.f32 %v8203_v6  ;;  %v8204_v2 = vcvt.s32.f32 %v8202_v46 }
 0xf09   : > { %8206 = vmin.xlane.f32.xlu0 %v8205_v47 }
 0xf7a   : > { %v24959_v8 = vpop.xlane.xlu0 %8116 }
 0xf7b   : > { %vm8118_vm10 = vcmp.eq.f32.partialorder %v8115_v33, %v24959_v8  ;;  %v8129_v33 = vcvt.s32.f32 %v8127_v31  ;;  %v27692_v31 = vmax.f32 %v24436_v22, %v24718_v17  ;;  %v8123_v22 = vcvt.f32.s32 %v24959_v8 }
 0xf7c   : > { %v8119_v63 = vsel %vm8118_vm10, %v8114_v49, inf }
 0xf7d   : > { %8120 = vmin.xlane.f32.xlu0 %v8119_v63 }
 0xf7e   : > { %v24962_v53 = vpop.xlane.xlu1 %8101 }
 0xf7f   : > { %vm8103_vm11 = vcmp.eq.f32.partialorder %v8100_v39, %v24962_v53  ;;  %v8174_v39 = vcvt.s32.f32 %v8172_v43  ;;  %v27694_v43 = vmax.f32 %v24446_v44, %v24726_v55 }
 0xf80   : > { %v8104_v0 = vsel %vm8103_vm11, %v8099_v61, inf }
 0xf81   : > { %8105 = vmin.xlane.f32.xlu1 %v8104_v0 }
 0xf82   : > { %v24965_v32 = vpop.xlane.xlu0 %8146 }
 0xf83   : > { %vm8148_vm12 = vcmp.eq.f32.partialorder %v8145_v42, %v24965_v32  ;;  %v8159_v42 = vcvt.s32.f32 %v8157_v7  ;;  %v8124_v7 = vshll.u32 %v8123_v22, 16  ;;  %v8153_v44 = vcvt.f32.s32 %v24965_v32 }
 0xf84   : > { %v8149_v26 = vsel %vm8148_vm12, %v8144_v4, inf  ;;  %v27691_v4 = vmax.f32 %v24431_v3, %v24714_v37 }
 0xf85   : > { %8150 = vmin.xlane.f32.xlu0 %v8149_v26  ;;  %v8154_v46 = vshll.u32 %v8153_v44, 16 }
 0xf86   : > { %v24968_v5 = vpop.xlane.xlu1 %8131 }
 0xf87   : > { %vm8133_vm13 = vcmp.eq.f32.partialorder %v8130_v45, %v24968_v5  ;;  %v8189_v45 = vcvt.s32.f32 %v8187_v52 }
 0xf88   : > { %v8134_v9 = vsel %vm8133_vm13, %v8129_v33, inf }
 0xf89   : > { %8135 = vmin.xlane.f32.xlu1 %v8134_v9  ;;  %v27695_v9 = vmax.f32 %v24451_v29, %v24730_v51 }
 0xf8a   : > { %v24971_v25 = vpop.xlane.xlu0 %8176 }
 0xf8b   : > { %vm8178_vm14 = vcmp.eq.f32.partialorder %v8175_v20, %v24971_v25  ;;  %v27688_v20 = vmax.f32 %v24413_v57, %v24698_v48 }
 0xf8c   : > { %v8179_v1 = vsel %vm8178_vm14, %v8174_v39, inf }
 0xf8d   : > { %8180 = vmin.xlane.f32.xlu0 %v8179_v1 }
 0xf8e   : > { %v24974_v10 = vpop.xlane.xlu1 %8161 }
 0xf8f   : > { %vm8163_vm15 = vcmp.eq.f32.partialorder %v8160_v34, %v24974_v10  ;;  %v8168_v22 = vcvt.f32.s32 %v24974_v10 }
 0xf90   : > { %v8164_v6 = vsel %vm8163_vm15, %v8159_v42, inf }
 0xf91   : > { %8165 = vmin.xlane.f32.xlu1 %v8164_v6 }
 0xf92   : > { %v24977_v12 = vpop.xlane.xlu1 %8191 }
 0xf93   : > { %v20232_v49 = vpop.f32.mrb[24].mxu1  ;;  %vm8193_vm2 = vcmp.eq.f32.partialorder %v8190_v36, %v24977_v12  ;;  %v27690_v36 = vmax.f32 %v24426_v23, %v24709_v59  ;;  %v27693_v23 = vmax.f32 %v24441_v54, %v24722_v38  ;;  %v8108_v54 = vcvt.f32.s32 %v24962_v53 }
 0xf94   : > { %v24983_v16 = vmax.f32 %v27688_v20, %v20232_v49  ;;  %v7994_v56 = vpop.f32.mrb[25].mxu1  ;;  %v8194_v63 = vsel %vm8193_vm2, %v8189_v45, inf  ;;  %v8138_v49 = vcvt.f32.s32 %v24968_v5 }
 0xf95   : > { %v24988_v34 = vmax.f32 %v27689_v27, %v7994_v56  ;;  %8195 = vmin.xlane.f32.xlu1 %v8194_v63  ;;  %v8109_v52 = vshll.u32 %v8108_v54, 16 }
 0xf96   : > { %v24990_v61 = vpop.xlane.xlu0 %8206 }
 0xf97   : > { %v20235_v40 = vpop.f32.mrb[26].mxu1  ;;  %vm8208_vm3 = vcmp.eq.f32.partialorder %v8205_v47, %v24990_v61 }
 0xf98   : > { %v24996_v57 = vmax.f32 %v27690_v36, %v20235_v40  ;;  %v8006_v48 = vpop.f32.mrb[27].mxu1  ;;  %v8209_v0 = vsel %vm8208_vm3, %v8204_v2, inf }
 0xf99   : > { %v25001_v15 = vmax.f32 %v27691_v4, %v8006_v48  ;;  %8210 = vmin.xlane.f32.xlu0 %v8209_v0  ;;  %v8139_v48 = vshll.u32 %v8138_v49, 16 }
 0xf9b   : > { %v20238_v14 = vpop.f32.mrb[28].mxu1 }
 0xf9c   : > { %v25006_v26 = vmax.f32 %v27692_v31, %v20238_v14  ;;  %v8018_v47 = vpop.f32.mrb[29].mxu1 }
 0xf9d   : > { %v25011_v59 = vmax.f32 %v27693_v23, %v8018_v47 }
 0xf9f   : > { %v20241_v33 = vpop.f32.mrb[30].mxu1 }
 0xfa0   : > { %v25016_v3 = vmax.f32 %v27694_v43, %v20241_v33  ;;  %v8030_v37 = vpop.f32.mrb[31].mxu1 }
 0xfa1   : > { %v25021_v39 = vmax.f32 %v27695_v9, %v8030_v37 }
0x100a   : > { %v8121_v17 = vpop.xlane.xlu0 %8120 }
0x100b   : > { %v8122_v38 = vcvt.f32.s32 %v8121_v17 }
0x100d   : > { %v8125_v1 = vadd.s32 %v8124_v7, %v8122_v38 }
0x100e   : > { %v8106_v42 = vpop.xlane.xlu1 %8105 }
0x100f   : > { %v8107_v55 = vcvt.f32.s32 %v8106_v42  ;;  %vm8217_vm4 = vcmp.eq.s32.totalorder %v23026_v58, %v8125_v1 }
0x1010   : > { %v25028_v6 = vsel %vm8217_vm4, inf, %v24739_v11  ;;  %v25031_v29 = vsel %vm8217_vm4, 1.0, %v27679_v50 }
0x1011   : > { %v8110_v51 = vadd.s32 %v8109_v52, %v8107_v55  ;;  %v9043_v8 = vsel %vm1169_vm0, %v25028_v6, inf  ;;  %v8244_v53 = vsel %vm1169_vm0, %v25031_v29, 0 }
0x1012   : > { %9044 = vmin.xlane.f32.xlu0 %v9043_v8  ;;  %v25037_v45 = vsub.f32 %v8244_v53, %v8244_v53  ;;  %v8151_v32 = vpop.xlane.xlu0 %8150  ;;  %v8198_v8 = vcvt.f32.s32 %v24977_v12 }
0x1013   : > { %v8152_v20 = vcvt.f32.s32 %v8151_v32  ;;  %vm8216_vm5 = vcmp.eq.s32.totalorder %v23026_v58, %v8110_v51 }
0x1014   : > { %v25042_v11 = vsel %vm8216_vm5, inf, %v24753_v62  ;;  %v25045_v56 = vsel %vm8216_vm5, 1.0, %v27679_v50  ;;  %v8343_v40 = vand.u32 4294901760, %v25037_v45  ;;  %v8183_v62 = vcvt.f32.s32 %v24971_v25 }
0x1015   : > { %v8155_v63 = vadd.s32 %v8154_v46, %v8152_v20  ;;  %v9040_v27 = vsel %vm1169_vm0, %v25042_v11, inf  ;;  %v8241_v2 = vsel %vm1169_vm0, %v25045_v56, 0 }
0x1016   : > { %9041 = vmin.xlane.f32.xlu1 %v9040_v27  ;;  %v8136_v5 = vpop.xlane.xlu1 %8135  ;;  %v25052_v36 = vsub.f32 %v8241_v2, %v8241_v2  ;;  %v8344_v33 = vsub.f32 %v25037_v45, %v8343_v40  ;;  %v8184_v9 = vshll.u32 %v8183_v62, 16  ;;  %v8213_v62 = vcvt.f32.s32 %v24990_v61 }
0x1017   : > { %v8137_v0 = vcvt.f32.s32 %v8136_v5  ;;  %vm8219_vm6 = vcmp.eq.s32.totalorder %v23026_v58, %v8155_v63 }
0x1018   : > { %v25057_v4 = vsel %vm8219_vm6, inf, %v24768_v35  ;;  %v25060_v14 = vsel %vm8219_vm6, 1.0, %v27679_v50  ;;  %v8333_v31 = vand.u32 4294901760, %v25052_v36  ;;  %v8345_v44 = vand.u32 4294901760, %v8344_v33 }
0x1019   : > { %v8140_v47 = vadd.s32 %v8139_v48, %v8137_v0  ;;  %v9049_v23 = vsel %vm1169_vm0, %v25057_v4, inf  ;;  %v8250_v25 = vsel %vm1169_vm0, %v25060_v14, 0  ;;  %v8199_v48 = vshll.u32 %v8198_v8, 16 }
0x101a   : > { %9050 = vmin.xlane.f32.xlu0 %v9049_v23  ;;  %v8181_v43 = vpop.xlane.xlu0 %8180  ;;  %v8334_v35 = vsub.f32 %v25052_v36, %v8333_v31  ;;  %v25073_v37 = vsub.f32 %v8250_v25, %v8250_v25 }
0x101b   : > { %v8182_v17 = vcvt.f32.s32 %v8181_v43  ;;  %vm8218_vm7 = vcmp.eq.s32.totalorder %v23026_v58, %v8140_v47 }
0x101c   : > { %v8335_v7 = vand.u32 4294901760, %v8334_v35  ;;  %v25078_v54 = vsel %vm8218_vm7, inf, %v24789_v30  ;;  %v25081_v38 = vsel %vm8218_vm7, 1.0, %v27679_v50  ;;  %v8363_v1 = vand.u32 4294901760, %v25073_v37 }
0x101d   : > { %v8185_v42 = vadd.s32 %v8184_v9, %v8182_v17  ;;  %v9046_v52 = vsel %vm1169_vm0, %v25078_v54, inf  ;;  %v8247_v10 = vsel %vm1169_vm0, %v25081_v38, 0  ;;  %v8169_v30 = vshll.u32 %v8168_v22, 16 }
0x101e   : > { %20246 = vmatprep.mubr.f32.mxu0 %v8335_v7  ;;  %9047 = vmin.xlane.f32.xlu1 %v9046_v52  ;;  %v8166_v55 = vpop.xlane.xlu1 %8165  ;;  %v25088_v51 = vsub.f32 %v8247_v10, %v8247_v10  ;;  %v8364_v20 = vsub.f32 %v25073_v37, %v8363_v1  ;;  %v8214_v7 = vshll.u32 %v8213_v62, 16 }
0x101f   : > { %v8167_v53 = vcvt.f32.s32 %v8166_v55  ;;  %20247 = vmatmul.mubr.f32.vlgmr.msra.gmra.mrb[32].mxu0 %v8345_v44  ;;  %vm8221_vm8 = vcmp.eq.s32.totalorder %v23026_v58, %v8185_v42 }
0x1020   : > { %v25093_v32 = vsel %vm8221_vm8, inf, %v24804_v41  ;;  %v25096_v46 = vsel %vm8221_vm8, 1.0, %v27679_v50  ;;  %v8353_v49 = vand.u32 4294901760, %v25088_v51  ;;  %21401 = vmatpush3.bf16.xpose.msra.mxu0 %v22889_v24  ;;  %v8365_v25 = vand.u32 4294901760, %v8364_v20 }
0x1021   : > { %v8170_v63 = vadd.s32 %v8169_v30, %v8167_v53  ;;  %v9055_v12 = vsel %vm1169_vm0, %v25093_v32, inf  ;;  %v8256_v27 = vsel %vm1169_vm0, %v25096_v46, 0  ;;  %21403 = vmatprep.subr.bf16.mxu0 %v22883_v18 }
0x1022   : > { %9056 = vmin.xlane.f32.xlu0 %v9055_v12  ;;  %v8196_v41 = vpop.xlane.xlu1 %8195  ;;  %v8354_v2 = vsub.f32 %v25088_v51, %v8353_v49  ;;  %v25111_v5 = vsub.f32 %v8256_v27, %v8256_v27 }
0x1023   : > { %v8197_v0 = vcvt.f32.s32 %v8196_v41  ;;  %vm8220_vm9 = vcmp.eq.s32.totalorder %v23026_v58, %v8170_v63 }
0x1024   : > { %v8355_v47 = vand.u32 4294901760, %v8354_v2  ;;  %v25116_v23 = vsel %vm8220_vm9, inf, %v24827_v28  ;;  %v25119_v33 = vsel %vm8220_vm9, 1.0, %v27679_v50  ;;  %v8383_v61 = vand.u32 4294901760, %v25111_v5 }
0x1025   : > { %v8200_v43 = vadd.s32 %v8199_v48, %v8197_v0  ;;  %v9052_v35 = vsel %vm1169_vm0, %v25116_v23, inf  ;;  %v8253_v9 = vsel %vm1169_vm0, %v25119_v33, 0 }
0x1026   : > { %v8211_v22 = vpop.xlane.xlu0 %8210  ;;  %20249 = vmatprep.mubr.f32.mxu0 %v8355_v47  ;;  %9053 = vmin.xlane.f32.xlu1 %v9052_v35  ;;  %v8372_v17 = vsub.f32 %v8253_v9, %v8253_v9  ;;  %v8384_v30 = vsub.f32 %v25111_v5, %v8383_v61 }
0x1027   : > { %v8212_v28 = vcvt.f32.s32 %v8211_v22  ;;  %20250 = vmatmul.mubr.f32.gmra.mrb[34].mxu0 %v8365_v25  ;;  %vm8222_vm10 = vcmp.eq.s32.totalorder %v23026_v58, %v8200_v43 }
0x1028   : > { %v25128_v42 = vsel %vm8222_vm10, inf, %v24839_v60  ;;  %v25131_v52 = vsel %vm8222_vm10, 1.0, %v27679_v50  ;;  %v8373_v44 = vand.u32 4294901760, %v8372_v17  ;;  %v8385_v2 = vand.u32 4294901760, %v8384_v30 }
0x1029   : > { %v8215_v10 = vadd.s32 %v8214_v7, %v8212_v28  ;;  %v9058_v55 = vsel %vm1169_vm0, %v25128_v42, inf  ;;  %v8259_v8 = vsel %vm1169_vm0, %v25131_v52, 0 }
0x102a   : > { %9059 = vmin.xlane.f32.xlu1 %v9058_v55  ;;  %v8374_v53 = vsub.f32 %v8372_v17, %v8373_v44  ;;  %v8392_v20 = vsub.f32 %v8259_v8, %v8259_v8 }
0x102b   : > { %vm8223_vm11 = vcmp.eq.s32.totalorder %v23026_v58, %v8215_v10 }
0x102c   : > { %v25142_v60 = vsel %vm8223_vm11, inf, %v24853_v19  ;;  %v25145_v63 = vsel %vm8223_vm11, 1.0, %v27679_v50  ;;  %v8375_v12 = vand.u32 4294901760, %v8374_v53  ;;  %v8393_v27 = vand.u32 4294901760, %v8392_v20 }
0x102d   : > { %v9061_v41 = vsel %vm1169_vm0, %v25142_v60, inf  ;;  %v8262_v48 = vsel %vm1169_vm0, %v25145_v63, 0 }
0x102e   : > { %9062 = vmin.xlane.f32.xlu0 %v9061_v41  ;;  %20252 = vmatprep.mubr.f32.mxu0 %v8375_v12  ;;  %v8394_v62 = vsub.f32 %v8392_v20, %v8393_v27  ;;  %v8402_v0 = vsub.f32 %v8262_v48, %v8262_v48 }
0x102f   : > { %20253 = vmatmul.mubr.f32.gmra.mrb[36].mxu0 %v8385_v2 }
0x1030   : > { %v8395_v47 = vand.u32 4294901760, %v8394_v62  ;;  %v8403_v19 = vand.u32 4294901760, %v8402_v0 }
0x1032   : > { %20255 = vmatprep.mubr.f32.mxu0 %v8395_v47  ;;  %v8404_v25 = vsub.f32 %v8402_v0, %v8403_v19 }
0x1034   : > { %v8405_v43 = vand.u32 4294901760, %v8404_v25 }
0x1036   : > { %20256 = vmatmul.mubr.f32.gmra.mrb[38].mxu0 %v8405_v43 }
0x1037   : > { %20262 = vmatprep.mubr.msk.f32.mxu0 %vm1169_vm0, %v25045_v56 }
0x103a   : > { %20263 = vmatmul.mubr.msk.f32.vlgmr.msra.gmra.mrb[32].mxu0 %vm1169_vm0, %v25031_v29 }
0x103b   : > { %20265 = vmatprep.mubr.msk.f32.mxu0 %vm1169_vm0, %v25081_v38  ;;  %21405 = vmatpush3.bf16.xpose.msra.mxu0 %v22883_v18 }
0x103c   : > { %21407 = vmatprep.subr.bf16.mxu0 %v22881_v13 }
0x103e   : > { %20266 = vmatmul.mubr.msk.f32.gmra.mrb[34].mxu0 %vm1169_vm0, %v25060_v14 }
0x103f   : > { %20268 = vmatprep.mubr.msk.f32.mxu0 %vm1169_vm0, %v25119_v33 }
0x1042   : > { %20269 = vmatmul.mubr.msk.f32.gmra.mrb[36].mxu0 %vm1169_vm0, %v25096_v46 }
0x1043   : > { %20271 = vmatprep.mubr.msk.f32.mxu0 %vm1169_vm0, %v25131_v52 }
0x1046   : > { %20272 = vmatmul.mubr.msk.f32.gmra.mrb[38].mxu0 %vm1169_vm0, %v25145_v63 }
0x1047   : > { %20278 = vmatprep.mubr.f32.mxu0 %v25052_v36 }
0x104a   : > { %20279 = vmatmul.mubr.f32.vlgmr.msra.gmra.mrb[32].mxu0 %v25037_v45 }
0x104b   : > { %20281 = vmatprep.mubr.f32.mxu0 %v25088_v51  ;;  %21409 = vmatpush3.bf16.xpose.msra.mxu0 %v22881_v13 }
0x104c   : > { %21411 = vmatprep.subr.bf16.mxu0 %v22887_v21 }
0x104e   : > { %20282 = vmatmul.mubr.f32.gmra.mrb[34].mxu0 %v25073_v37 }
0x104f   : > { %20284 = vmatprep.mubr.f32.mxu0 %v8372_v17 }
0x1052   : > { %20285 = vmatmul.mubr.f32.gmra.mrb[36].mxu0 %v25111_v5 }
0x1053   : > { %20287 = vmatprep.mubr.f32.mxu0 %v8392_v20 }
0x1056   : > { %20288 = vmatmul.mubr.f32.gmra.mrb[38].mxu0 %v8402_v0 }
0x1057   : > { %20294 = vmatprep.mubr.f32.mxu0 %v8333_v31 }
0x105a   : > { %20295 = vmatmul.mubr.f32.vlgmr.msra.gmra.mrb[32].mxu0 %v8343_v40 }
0x105b   : > { %20297 = vmatprep.mubr.f32.mxu0 %v8353_v49  ;;  %21413 = vmatpush3.bf16.xpose.msra.mxu0 %v22887_v21 }
0x105c   : > { %21415 = vmatprep.subr.bf16.mxu0 %v22881_v13 }
0x105e   : > { %20298 = vmatmul.mubr.f32.gmra.mrb[34].mxu0 %v8363_v1 }
0x105f   : > { %20300 = vmatprep.mubr.f32.mxu0 %v8373_v44 }
0x1062   : > { %20301 = vmatmul.mubr.f32.gmra.mrb[36].mxu0 %v8383_v61 }
0x1063   : > { %20303 = vmatprep.mubr.f32.mxu0 %v8393_v27 }
0x1066   : > { %20304 = vmatmul.mubr.f32.gmra.mrb[38].mxu0 %v8403_v19 }
0x1067   : > { %20310 = vmatprep.mubr.msk.f32.mxu0 %vm1169_vm0, %v25045_v56 }
0x106a   : > { %20311 = vmatmul.mubr.msk.f32.vlgmr.msra.gmra.mrb[32].mxu0 %vm1169_vm0, %v25031_v29 }
0x106b   : > { %20313 = vmatprep.mubr.msk.f32.mxu0 %vm1169_vm0, %v25081_v38  ;;  %21417 = vmatpush3.bf16.xpose.msra.mxu0 %v22881_v13 }
0x106c   : > { %21443 = vmatprep.subr.bf16.mxu0 %v22881_v13 }
0x106e   : > { %20314 = vmatmul.mubr.msk.f32.gmra.mrb[34].mxu0 %vm1169_vm0, %v25060_v14 }
0x106f   : > { %20316 = vmatprep.mubr.msk.f32.mxu0 %vm1169_vm0, %v25119_v33 }
0x1072   : > { %20317 = vmatmul.mubr.msk.f32.gmra.mrb[36].mxu0 %vm1169_vm0, %v25096_v46 }
0x1073   : > { %20319 = vmatprep.mubr.msk.f32.mxu0 %vm1169_vm0, %v25131_v52 }
0x1076   : > { %20320 = vmatmul.mubr.msk.f32.gmra.mrb[38].mxu0 %vm1169_vm0, %v25145_v63 }
0x1077   : > { %20326 = vmatprep.mubr.msk.f32.mxu0 %vm1169_vm0, %v25045_v56 }
0x107a   : > { %20327 = vmatmul.mubr.msk.f32.vlgmr.msra.gmra.mrb[32].mxu0 %vm1169_vm0, %v25031_v29 }
0x107b   : > { %20329 = vmatprep.mubr.msk.f32.mxu0 %vm1169_vm0, %v25081_v38  ;;  %21445 = vmatpush3.bf16.xpose.msra.mxu0 %v22881_v13 }
0x107c   : > { %21447 = vmatprep.subr.bf16.mxu0 %v22889_v24 }
0x107e   : > { %20330 = vmatmul.mubr.msk.f32.gmra.mrb[34].mxu0 %vm1169_vm0, %v25060_v14 }
0x107f   : > { %20332 = vmatprep.mubr.msk.f32.mxu0 %vm1169_vm0, %v25119_v33 }
0x1082   : > { %20333 = vmatmul.mubr.msk.f32.gmra.mrb[36].mxu0 %vm1169_vm0, %v25096_v46 }
0x1083   : > { %20335 = vmatprep.mubr.msk.f32.mxu0 %vm1169_vm0, %v25131_v52 }
0x1086   : > { %20336 = vmatmul.mubr.msk.f32.gmra.mrb[38].mxu0 %vm1169_vm0, %v25145_v63 }
0x109f   : > { %v9045_v29 = vpop.xlane.xlu0 %9044 }
0x10a0   : > { %vm9065_vm12 = vcmp.eq.f32.partialorder %v25028_v6, %v9045_v29 }
0x10a1   : > { %v9073_v45 = vsel %vm9065_vm12, %v23026_v58, 64 }
0x10a2   : > { %v9095_v56 = vsel %vm1169_vm0, %v9073_v45, 2147483647 }
0x10a3   : > { %v9042_v40 = vpop.xlane.xlu1 %9041  ;;  %v9097_v36 = vshra.s32 %v9095_v56, 16  ;;  %v9096_v25 = vand.u32 65535, %v9095_v56 }
0x10a4   : > { %vm9064_vm13 = vcmp.eq.f32.partialorder %v25042_v11, %v9042_v40 }
0x10a5   : > { %v9072_v14 = vsel %vm9064_vm13, %v23026_v58, 64  ;;  %v9099_v31 = vcvt.s32.f32 %v9097_v36  ;;  %v9098_v29 = vcvt.s32.f32 %v9096_v25 }
0x10a6   : > { %v9080_v37 = vsel %vm1169_vm0, %v9072_v14, 2147483647 }
0x10a7   : > { %9100 = vmin.xlane.f32.xlu0 %v9099_v31  ;;  %v9051_v38 = vpop.xlane.xlu0 %9050  ;;  %v9082_v1 = vshra.s32 %v9080_v37, 16  ;;  %v9081_v45 = vand.u32 65535, %v9080_v37 }
0x10a8   : > { %vm9067_vm14 = vcmp.eq.f32.partialorder %v25057_v4, %v9051_v38 }
0x10a9   : > { %v9075_v51 = vsel %vm9067_vm14, %v23026_v58, 64  ;;  %v9084_v46 = vcvt.s32.f32 %v9082_v1  ;;  %v9083_v14 = vcvt.s32.f32 %v9081_v45 }
0x10aa   : > { %v9125_v49 = vsel %vm1169_vm0, %v9075_v51, 2147483647 }
0x10ab   : > { %9085 = vmin.xlane.f32.xlu1 %v9084_v46  ;;  %v9048_v5 = vpop.xlane.xlu1 %9047  ;;  %v9127_v33 = vshra.s32 %v9125_v49, 16  ;;  %v9126_v38 = vand.u32 65535, %v9125_v49 }
0x10ac   : > { %vm9066_vm15 = vcmp.eq.f32.partialorder %v25078_v54, %v9048_v5 }
0x10ad   : > { %v9074_v35 = vsel %vm9066_vm15, %v23026_v58, 64  ;;  %v9129_v9 = vcvt.s32.f32 %v9127_v33  ;;  %v9128_v5 = vcvt.s32.f32 %v9126_v38 }
0x10ae   : > { %v9110_v61 = vsel %vm1169_vm0, %v9074_v35, 2147483647 }
0x10af   : > { %9130 = vmin.xlane.f32.xlu0 %v9129_v9  ;;  %v9057_v22 = vpop.xlane.xlu0 %9056  ;;  %v9112_v17 = vshra.s32 %v9110_v61, 16  ;;  %v9111_v56 = vand.u32 65535, %v9110_v61 }
0x10b0   : > { %vm9069_vm2 = vcmp.eq.f32.partialorder %v25093_v32, %v9057_v22 }
0x10b1   : > { %v9077_v7 = vsel %vm9069_vm2, %v23026_v58, 64  ;;  %v9114_v28 = vcvt.s32.f32 %v9112_v17 }
0x10b2   : > { %v9155_v52 = vsel %vm1169_vm0, %v9077_v7, 2147483647 }
0x10b3   : > { %9115 = vmin.xlane.f32.xlu1 %v9114_v28  ;;  %v9054_v44 = vpop.xlane.xlu1 %9053  ;;  %v9157_v10 = vshra.s32 %v9155_v52, 16  ;;  %v9156_v35 = vand.u32 65535, %v9155_v52 }
0x10b4   : > { %vm9068_vm3 = vcmp.eq.f32.partialorder %v25116_v23, %v9054_v44 }
0x10b5   : > { %v9076_v55 = vsel %vm9068_vm3, %v23026_v58, 64  ;;  %v9159_v30 = vcvt.s32.f32 %v9157_v10 }
0x10b6   : > { %v9140_v8 = vsel %vm1169_vm0, %v9076_v55, 2147483647 }
0x10b7   : > { %9160 = vmin.xlane.f32.xlu0 %v9159_v30  ;;  %v9060_v53 = vpop.xlane.xlu1 %9059  ;;  %v9142_v20 = vshra.s32 %v9140_v8, 16  ;;  %v9141_v17 = vand.u32 65535, %v9140_v8 }
0x10b8   : > { %vm9070_vm4 = vcmp.eq.f32.partialorder %v25128_v42, %v9060_v53 }
0x10b9   : > { %v9078_v63 = vsel %vm9070_vm4, %v23026_v58, 64  ;;  %v9144_v12 = vcvt.s32.f32 %v9142_v20 }
0x10ba   : > { %v9170_v27 = vsel %vm1169_vm0, %v9078_v63, 2147483647 }
0x10bb   : > { %v9063_v41 = vpop.xlane.xlu0 %9062  ;;  %9145 = vmin.xlane.f32.xlu1 %v9144_v12  ;;  %v9172_v2 = vshra.s32 %v9170_v27, 16  ;;  %v9171_v44 = vand.u32 65535, %v9170_v27 }
0x10bc   : > { %vm9071_vm5 = vcmp.eq.f32.partialorder %v25142_v60, %v9063_v41 }
0x10bd   : > { %v9079_v48 = vsel %vm9071_vm5, %v23026_v58, 64  ;;  %v9174_v62 = vcvt.s32.f32 %v9172_v2 }
0x10be   : > { %v9185_v0 = vsel %vm1169_vm0, %v9079_v48, 2147483647 }
0x10bf   : > { %9175 = vmin.xlane.f32.xlu1 %v9174_v62  ;;  %v9187_v47 = vshra.s32 %v9185_v0, 16  ;;  %v9186_v55 = vand.u32 65535, %v9185_v0 }
0x10c1   : > { %v9189_v19 = vcvt.s32.f32 %v9187_v47  ;;  %v9188_v27 = vcvt.s32.f32 %v9186_v55 }
0x10c3   : > { %9190 = vmin.xlane.f32.xlu0 %v9189_v19 }
0x1134   : > { %v25248_v43 = vpop.xlane.xlu0 %9100 }
0x1135   : > { %vm9102_vm6 = vcmp.eq.f32.partialorder %v9099_v31, %v25248_v43  ;;  %v9113_v31 = vcvt.s32.f32 %v9111_v56 }
0x1136   : > { %v9103_v40 = vsel %vm9102_vm6, %v9098_v29, inf }
0x1137   : > { %9104 = vmin.xlane.f32.xlu0 %v9103_v40 }
0x1138   : > { %v25251_v36 = vpop.xlane.xlu1 %9085 }
0x1139   : > { %vm9087_vm7 = vcmp.eq.f32.partialorder %v9084_v46, %v25251_v36  ;;  %v9158_v46 = vcvt.s32.f32 %v9156_v35 }
0x113a   : > { %v9088_v1 = vsel %vm9087_vm7, %v9083_v14, inf }
0x113b   : > { %9089 = vmin.xlane.f32.xlu1 %v9088_v1  ;;  %v9107_v1 = vcvt.f32.s32 %v25248_v43 }
0x113c   : > { %v25254_v51 = vpop.xlane.xlu0 %9130 }
0x113d   : > { %vm9132_vm8 = vcmp.eq.f32.partialorder %v9129_v9, %v25254_v51  ;;  %v9143_v9 = vcvt.s32.f32 %v9141_v17  ;;  %v9108_v56 = vshll.u32 %v9107_v1, 16  ;;  %v9137_v17 = vcvt.f32.s32 %v25254_v51 }
0x113e   : > { %v9133_v33 = vsel %vm9132_vm8, %v9128_v5, inf }
0x113f   : > { %9134 = vmin.xlane.f32.xlu0 %v9133_v33  ;;  %v9092_v33 = vcvt.f32.s32 %v25251_v36  ;;  %v9138_v55 = vshll.u32 %v9137_v17, 16 }
0x1140   : > { %v25257_v37 = vpop.xlane.xlu1 %9115 }
0x1141   : > { %vm9117_vm9 = vcmp.eq.f32.partialorder %v9114_v28, %v25257_v37  ;;  %v9173_v28 = vcvt.s32.f32 %v9171_v44 }
0x1142   : > { %v9118_v22 = vsel %vm9117_vm9, %v9113_v31, inf }
0x1143   : > { %9119 = vmin.xlane.f32.xlu1 %v9118_v22 }
0x1144   : > { %v25260_v49 = vpop.xlane.xlu0 %9160 }
0x1145   : > { %vm9162_vm10 = vcmp.eq.f32.partialorder %v9159_v30, %v25260_v49 }
0x1146   : > { %v9163_v7 = vsel %vm9162_vm10, %v9158_v46, inf  ;;  %v9093_v46 = vshll.u32 %v9092_v33, 16 }
0x1147   : > { %9164 = vmin.xlane.f32.xlu0 %v9163_v7 }
0x1148   : > { %v25263_v61 = vpop.xlane.xlu1 %9145 }
0x1149   : > { %vm9147_vm11 = vcmp.eq.f32.partialorder %v9144_v12, %v25263_v61 }
0x114a   : > { %v9148_v10 = vsel %vm9147_vm11, %v9143_v9, inf }
0x114b   : > { %9149 = vmin.xlane.f32.xlu1 %v9148_v10 }
0x114c   : > { %v25266_v52 = vpop.xlane.xlu1 %9175 }
0x114d   : > { %v25268_v53 = vpop.f32.mrb[32].mxu0  ;;  %vm9177_vm12 = vcmp.eq.f32.partialorder %v9174_v62, %v25266_v52 }
0x114e   : > { %v25273_v8 = vpop.f32.mrb[33].mxu0  ;;  %v9178_v20 = vsel %vm9177_vm12, %v9173_v28, inf }
0x114f   : > { %9179 = vmin.xlane.f32.xlu1 %v9178_v20  ;;  %v9122_v20 = vcvt.f32.s32 %v25257_v37 }
0x1150   : > { %v25277_v12 = vpop.xlane.xlu0 %9190 }
0x1151   : > { %v25279_v41 = vpop.f32.mrb[34].mxu0  ;;  %vm9192_vm13 = vcmp.eq.f32.partialorder %v9189_v19, %v25277_v12 }
0x1152   : > { %v25284_v48 = vpop.f32.mrb[35].mxu0  ;;  %v9193_v62 = vsel %vm9192_vm13, %v9188_v27, inf }
0x1153   : > { %9194 = vmin.xlane.f32.xlu0 %v9193_v62 }
0x1155   : > { %v25288_v47 = vpop.f32.mrb[36].mxu0 }
0x1156   : > { %v25292_v29 = vpop.f32.mrb[37].mxu0 }
0x1159   : > { %v25296_v45 = vpop.f32.mrb[38].mxu0 }
0x115a   : > { %v25300_v14 = vpop.f32.mrb[39].mxu0 }
0x11c4   : > { %v9105_v5 = vpop.xlane.xlu0 %9104 }
0x11c5   : > { %v9106_v31 = vcvt.f32.s32 %v9105_v5 }
0x11c7   : > { %v9109_v35 = vadd.s32 %v9108_v56, %v9106_v31 }
0x11c8   : > { %v9090_v22 = vpop.xlane.xlu1 %9089 }
0x11c9   : > { %v9091_v7 = vcvt.f32.s32 %v9090_v22  ;;  %vm9201_vm14 = vcmp.eq.s32.totalorder %v23026_v58, %v9109_v35  ;;  %v9123_v35 = vshll.u32 %v9122_v20, 16 }
0x11ca   : > { %v25309_v9 = vsel %vm9201_vm14, inf, %v25028_v6  ;;  %v25312_v44 = vsel %vm9201_vm14, 1.0, %v27679_v50 }
0x11cb   : > { %v9094_v43 = vadd.s32 %v9093_v46, %v9091_v7  ;;  %v10027_v10 = vsel %vm1169_vm0, %v25309_v9, inf  ;;  %v9228_v36 = vsel %vm1169_vm0, %v25312_v44, 0 }
0x11cc   : > { %10028 = vmin.xlane.f32.xlu0 %v10027_v10  ;;  %v25318_v28 = vsub.f32 %v9228_v36, %v9228_v36  ;;  %v9135_v51 = vpop.xlane.xlu0 %9134 }
0x11cd   : > { %v9136_v27 = vcvt.f32.s32 %v9135_v51  ;;  %vm9200_vm15 = vcmp.eq.s32.totalorder %v23026_v58, %v9094_v43 }
0x11ce   : > { %v25323_v6 = vsel %vm9200_vm15, inf, %v25042_v11  ;;  %v25326_v62 = vsel %vm9200_vm15, 1.0, %v27679_v50  ;;  %v9327_v33 = vand.u32 4294901760, %v25318_v28  ;;  %v9167_v11 = vcvt.f32.s32 %v25260_v49 }
0x11cf   : > { %v9139_v1 = vadd.s32 %v9138_v55, %v9136_v27  ;;  %v10024_v5 = vsel %vm1169_vm0, %v25323_v6, inf  ;;  %v9225_v56 = vsel %vm1169_vm0, %v25326_v62, 0  ;;  %v9152_v27 = vcvt.f32.s32 %v25263_v61 }
0x11d0   : > { %10025 = vmin.xlane.f32.xlu1 %v10024_v5  ;;  %v9120_v37 = vpop.xlane.xlu1 %9119  ;;  %v25333_v31 = vsub.f32 %v9225_v56, %v9225_v56  ;;  %v9328_v36 = vsub.f32 %v25318_v28, %v9327_v33  ;;  %v9168_v20 = vshll.u32 %v9167_v11, 16 }
0x11d1   : > { %v9121_v22 = vcvt.f32.s32 %v9120_v37  ;;  %vm9203_vm2 = vcmp.eq.s32.totalorder %v23026_v58, %v9139_v1 }
0x11d2   : > { %v25338_v46 = vsel %vm9203_vm2, inf, %v25057_v4  ;;  %v25341_v17 = vsel %vm9203_vm2, 1.0, %v27679_v50  ;;  %v9317_v7 = vand.u32 4294901760, %v25333_v31 }
0x11d3   : > { %v9124_v43 = vadd.s32 %v9123_v35, %v9121_v22  ;;  %v10033_v10 = vsel %vm1169_vm0, %v25338_v46, inf  ;;  %v9234_v49 = vsel %vm1169_vm0, %v25341_v17, 0 }
0x11d4   : > { %10034 = vmin.xlane.f32.xlu0 %v10033_v10  ;;  %v9165_v51 = vpop.xlane.xlu0 %9164  ;;  %v9318_v4 = vsub.f32 %v25333_v31, %v9317_v7  ;;  %v25354_v55 = vsub.f32 %v9234_v49, %v9234_v49  ;;  %v9329_v49 = vand.u32 4294901760, %v9328_v36 }
0x11d5   : > { %v9166_v1 = vcvt.f32.s32 %v9165_v51  ;;  %vm9202_vm3 = vcmp.eq.s32.totalorder %v23026_v58, %v9124_v43  ;;  %v9182_v51 = vcvt.f32.s32 %v25266_v52 }
0x11d6   : > { %v9319_v5 = vand.u32 4294901760, %v9318_v4  ;;  %v25359_v56 = vsel %vm9202_vm3, inf, %v25078_v54  ;;  %v25362_v37 = vsel %vm9202_vm3, 1.0, %v27679_v50  ;;  %v9347_v35 = vand.u32 4294901760, %v25354_v55 }
0x11d7   : > { %v9169_v22 = vadd.s32 %v9168_v20, %v9166_v1  ;;  %v10030_v10 = vsel %vm1169_vm0, %v25359_v56, inf  ;;  %v9231_v61 = vsel %vm1169_vm0, %v25362_v37, 0  ;;  %v9153_v54 = vshll.u32 %v9152_v27, 16 }
0x11d8   : > { %20342 = vmatprep.mubr.f32.mxu1 %v9319_v5  ;;  %10031 = vmin.xlane.f32.xlu1 %v10030_v10  ;;  %v9150_v11 = vpop.xlane.xlu1 %9149  ;;  %v25369_v43 = vsub.f32 %v9231_v61, %v9231_v61  ;;  %v9348_v5 = vsub.f32 %v25354_v55, %v9347_v35  ;;  %v9183_v61 = vshll.u32 %v9182_v51, 16 }
0x11d9   : > { %v9151_v4 = vcvt.f32.s32 %v9150_v11  ;;  %20343 = vmatmul.mubr.f32.vlgmr.msra.gmra.mrb[32].mxu1 %v9329_v49  ;;  %vm9205_vm4 = vcmp.eq.s32.totalorder %v23026_v58, %v9169_v22  ;;  %v9197_v11 = vcvt.f32.s32 %v25277_v12 }
0x11da   : > { %v25374_v20 = vsel %vm9205_vm4, inf, %v25093_v32  ;;  %v25377_v36 = vsel %vm9205_vm4, 1.0, %v27679_v50  ;;  %v9337_v1 = vand.u32 4294901760, %v25369_v43  ;;  %21425 = vmatpush3.bf16.xpose.msra.mxu1 %v22889_v24 }
0x11db   : > { %v9154_v27 = vadd.s32 %v9153_v54, %v9151_v4  ;;  %v10039_v52 = vsel %vm1169_vm0, %v25374_v20, inf  ;;  %v9240_v22 = vsel %vm1169_vm0, %v25377_v36, 0  ;;  %21427 = vmatprep.subr.bf16.mxu1 %v22883_v18 }
0x11dc   : > { %10040 = vmin.xlane.f32.xlu0 %v10039_v52  ;;  %v9180_v32 = vpop.xlane.xlu1 %9179  ;;  %v9338_v10 = vsub.f32 %v25369_v43, %v9337_v1  ;;  %v25392_v49 = vsub.f32 %v9240_v22, %v9240_v22  ;;  %v9349_v52 = vand.u32 4294901760, %v9348_v5 }
0x11dd   : > { %v9181_v54 = vcvt.f32.s32 %v9180_v32  ;;  %vm9204_vm5 = vcmp.eq.s32.totalorder %v23026_v58, %v9154_v27  ;;  %v9198_v32 = vshll.u32 %v9197_v11, 16 }
0x11de   : > { %v9339_v4 = vand.u32 4294901760, %v9338_v10  ;;  %v25397_v38 = vsel %vm9204_vm5, inf, %v25116_v23  ;;  %v25400_v40 = vsel %vm9204_vm5, 1.0, %v27679_v50  ;;  %v9367_v12 = vand.u32 4294901760, %v25392_v49 }
0x11df   : > { %v9184_v19 = vadd.s32 %v9183_v61, %v9181_v54  ;;  %v10036_v25 = vsel %vm1169_vm0, %v25397_v38, inf  ;;  %v9237_v51 = vsel %vm1169_vm0, %v25400_v40, 0 }
0x11e0   : > { %v9195_v22 = vpop.xlane.xlu0 %9194  ;;  %20345 = vmatprep.mubr.f32.mxu1 %v9339_v4  ;;  %10037 = vmin.xlane.f32.xlu1 %v10036_v25  ;;  %v9356_v27 = vsub.f32 %v9237_v51, %v9237_v51  ;;  %v9368_v25 = vsub.f32 %v25392_v49, %v9367_v12 }
0x11e1   : > { %v9196_v23 = vcvt.f32.s32 %v9195_v22  ;;  %20346 = vmatmul.mubr.f32.gmra.mrb[34].mxu1 %v9349_v52  ;;  %vm9206_vm6 = vcmp.eq.s32.totalorder %v23026_v58, %v9184_v19 }
0x11e2   : > { %v25409_v5 = vsel %vm9206_vm6, inf, %v25128_v42  ;;  %v25412_v10 = vsel %vm9206_vm6, 1.0, %v27679_v50  ;;  %v9357_v61 = vand.u32 4294901760, %v9356_v27 }
0x11e3   : > { %v9199_v54 = vadd.s32 %v9198_v32, %v9196_v23  ;;  %v10042_v0 = vsel %vm1169_vm0, %v25409_v5, inf  ;;  %v9243_v11 = vsel %vm1169_vm0, %v25412_v10, 0  ;;  %v9369_v23 = vand.u32 4294901760, %v9368_v25 }
0x11e4   : > { %10043 = vmin.xlane.f32.xlu1 %v10042_v0  ;;  %v9358_v19 = vsub.f32 %v9356_v27, %v9357_v61  ;;  %v9376_v4 = vsub.f32 %v9243_v11, %v9243_v11 }
0x11e5   : > { %vm9207_vm7 = vcmp.eq.s32.totalorder %v23026_v58, %v9199_v54 }
0x11e6   : > { %v25423_v42 = vsel %vm9207_vm7, inf, %v25142_v60  ;;  %v25426_v52 = vsel %vm9207_vm7, 1.0, %v27679_v50  ;;  %v9359_v51 = vand.u32 4294901760, %v9358_v19  ;;  %v9377_v22 = vand.u32 4294901760, %v9376_v4 }
0x11e7   : > { %v10045_v32 = vsel %vm1169_vm0, %v25423_v42, inf  ;;  %v9246_v2 = vsel %vm1169_vm0, %v25426_v52, 0 }
0x11e8   : > { %10046 = vmin.xlane.f32.xlu0 %v10045_v32  ;;  %20348 = vmatprep.mubr.f32.mxu1 %v9359_v51  ;;  %v9378_v0 = vsub.f32 %v9376_v4, %v9377_v22  ;;  %v9386_v11 = vsub.f32 %v9246_v2, %v9246_v2 }
0x11e9   : > { %20349 = vmatmul.mubr.f32.gmra.mrb[36].mxu1 %v9369_v23 }
0x11ea   : > { %v9379_v54 = vand.u32 4294901760, %v9378_v0  ;;  %v9387_v60 = vand.u32 4294901760, %v9386_v11 }
0x11ec   : > { %20351 = vmatprep.mubr.f32.mxu1 %v9379_v54  ;;  %v9388_v63 = vsub.f32 %v9386_v11, %v9387_v60 }
0x11ee   : > { %v9389_v30 = vand.u32 4294901760, %v9388_v63 }
0x11f0   : > { %20352 = vmatmul.mubr.f32.gmra.mrb[38].mxu1 %v9389_v30 }
0x11f1   : > { %20358 = vmatprep.mubr.msk.f32.mxu1 %vm1169_vm0, %v25326_v62 }
0x11f4   : > { %20359 = vmatmul.mubr.msk.f32.vlgmr.msra.gmra.mrb[32].mxu1 %vm1169_vm0, %v25312_v44 }
0x11f5   : > { %20361 = vmatprep.mubr.msk.f32.mxu1 %vm1169_vm0, %v25362_v37  ;;  %21429 = vmatpush3.bf16.xpose.msra.mxu1 %v22883_v18 }
0x11f6   : > { %21431 = vmatprep.subr.bf16.mxu1 %v22881_v13 }
0x11f8   : > { %20362 = vmatmul.mubr.msk.f32.gmra.mrb[34].mxu1 %vm1169_vm0, %v25341_v17 }
0x11f9   : > { %20364 = vmatprep.mubr.msk.f32.mxu1 %vm1169_vm0, %v25400_v40 }
0x11fc   : > { %20365 = vmatmul.mubr.msk.f32.gmra.mrb[36].mxu1 %vm1169_vm0, %v25377_v36 }
0x11fd   : > { %20367 = vmatprep.mubr.msk.f32.mxu1 %vm1169_vm0, %v25412_v10 }
0x1200   : > { %20368 = vmatmul.mubr.msk.f32.gmra.mrb[38].mxu1 %vm1169_vm0, %v25426_v52 }
0x1201   : > { %20374 = vmatprep.mubr.f32.mxu1 %v25333_v31 }
0x1204   : > { %20375 = vmatmul.mubr.f32.vlgmr.msra.gmra.mrb[32].mxu1 %v25318_v28 }
0x1205   : > { %20377 = vmatprep.mubr.f32.mxu1 %v25369_v43  ;;  %21433 = vmatpush3.bf16.xpose.msra.mxu1 %v22881_v13 }
0x1206   : > { %21435 = vmatprep.subr.bf16.mxu1 %v22887_v21 }
0x1208   : > { %20378 = vmatmul.mubr.f32.gmra.mrb[34].mxu1 %v25354_v55 }
0x1209   : > { %20380 = vmatprep.mubr.f32.mxu1 %v9356_v27 }
0x120c   : > { %20381 = vmatmul.mubr.f32.gmra.mrb[36].mxu1 %v25392_v49 }
0x120d   : > { %20383 = vmatprep.mubr.f32.mxu1 %v9376_v4 }
0x1210   : > { %20384 = vmatmul.mubr.f32.gmra.mrb[38].mxu1 %v9386_v11 }
0x1211   : > { %20390 = vmatprep.mubr.f32.mxu1 %v9317_v7 }
0x1214   : > { %20391 = vmatmul.mubr.f32.vlgmr.msra.gmra.mrb[32].mxu1 %v9327_v33 }
0x1215   : > { %20393 = vmatprep.mubr.f32.mxu1 %v9337_v1  ;;  %21437 = vmatpush3.bf16.xpose.msra.mxu1 %v22887_v21 }
0x1216   : > { %21439 = vmatprep.subr.bf16.mxu1 %v22881_v13 }
0x1218   : > { %20394 = vmatmul.mubr.f32.gmra.mrb[34].mxu1 %v9347_v35 }
0x1219   : > { %20396 = vmatprep.mubr.f32.mxu1 %v9357_v61 }
0x121c   : > { %20397 = vmatmul.mubr.f32.gmra.mrb[36].mxu1 %v9367_v12 }
0x121d   : > { %20399 = vmatprep.mubr.f32.mxu1 %v9377_v22 }
0x1220   : > { %20400 = vmatmul.mubr.f32.gmra.mrb[38].mxu1 %v9387_v60 }
0x1221   : > { %20406 = vmatprep.mubr.msk.f32.mxu1 %vm1169_vm0, %v25326_v62 }
0x1224   : > { %20407 = vmatmul.mubr.msk.f32.vlgmr.msra.gmra.mrb[32].mxu1 %vm1169_vm0, %v25312_v44 }
0x1225   : > { %20409 = vmatprep.mubr.msk.f32.mxu1 %vm1169_vm0, %v25362_v37  ;;  %21441 = vmatpush3.bf16.xpose.msra.mxu1 %v22881_v13 }
0x1226   : > { %21467 = vmatprep.subr.bf16.mxu1 %v22881_v13 }
0x1228   : > { %20410 = vmatmul.mubr.msk.f32.gmra.mrb[34].mxu1 %vm1169_vm0, %v25341_v17 }
0x1229   : > { %20412 = vmatprep.mubr.msk.f32.mxu1 %vm1169_vm0, %v25400_v40 }
0x122c   : > { %20413 = vmatmul.mubr.msk.f32.gmra.mrb[36].mxu1 %vm1169_vm0, %v25377_v36 }
0x122d   : > { %20415 = vmatprep.mubr.msk.f32.mxu1 %vm1169_vm0, %v25412_v10 }
0x1230   : > { %20416 = vmatmul.mubr.msk.f32.gmra.mrb[38].mxu1 %vm1169_vm0, %v25426_v52 }
0x1231   : > { %20422 = vmatprep.mubr.msk.f32.mxu1 %vm1169_vm0, %v25326_v62 }
0x1234   : > { %20423 = vmatmul.mubr.msk.f32.vlgmr.msra.gmra.mrb[32].mxu1 %vm1169_vm0, %v25312_v44 }
0x1235   : > { %20425 = vmatprep.mubr.msk.f32.mxu1 %vm1169_vm0, %v25362_v37  ;;  %21469 = vmatpush3.bf16.xpose.msra.mxu1 %v22881_v13 }
0x1236   : > { %21471 = vmatprep.subr.bf16.mxu1 %v22889_v24 }
0x1238   : > { %20426 = vmatmul.mubr.msk.f32.gmra.mrb[34].mxu1 %vm1169_vm0, %v25341_v17 }
0x1239   : > { %20428 = vmatprep.mubr.msk.f32.mxu1 %vm1169_vm0, %v25400_v40 }
0x123c   : > { %20429 = vmatmul.mubr.msk.f32.gmra.mrb[36].mxu1 %vm1169_vm0, %v25377_v36 }
0x123d   : > { %20431 = vmatprep.mubr.msk.f32.mxu1 %vm1169_vm0, %v25412_v10 }
0x1240   : > { %20432 = vmatmul.mubr.msk.f32.gmra.mrb[38].mxu1 %vm1169_vm0, %v25426_v52 }
0x1259   : > { %v10029_v30 = vpop.xlane.xlu0 %10028 }
0x125a   : > { %vm10049_vm8 = vcmp.eq.f32.partialorder %v25309_v9, %v10029_v30 }
0x125b   : > { %v10057_v63 = vsel %vm10049_vm8, %v23026_v58, 64 }
0x125c   : > { %v10079_v2 = vsel %vm1169_vm0, %v10057_v63, 2147483647 }
0x125d   : > { %v10026_v44 = vpop.xlane.xlu1 %10025  ;;  %v10081_v28 = vshra.s32 %v10079_v2, 16 }
0x125e   : > { %vm10048_vm9 = vcmp.eq.f32.partialorder %v25323_v6, %v10026_v44 }
0x125f   : > { %v10056_v40 = vsel %vm10048_vm9, %v23026_v58, 64  ;;  %v10083_v62 = vcvt.s32.f32 %v10081_v28 }
0x1260   : > { %v10064_v33 = vsel %vm1169_vm0, %v10056_v40, 2147483647 }
0x1261   : > { %10084 = vmin.xlane.f32.xlu0 %v10083_v62  ;;  %v10035_v31 = vpop.xlane.xlu0 %10034  ;;  %v10066_v17 = vshra.s32 %v10064_v33, 16 }
0x1262   : > { %vm10051_vm10 = vcmp.eq.f32.partialorder %v25338_v46, %v10035_v31 }
0x1263   : > { %v10059_v7 = vsel %vm10051_vm10, %v23026_v58, 64  ;;  %v10068_v55 = vcvt.s32.f32 %v10066_v17  ;;  %v10080_v17 = vand.u32 65535, %v10079_v2 }
0x1264   : > { %v10109_v37 = vsel %vm1169_vm0, %v10059_v7, 2147483647 }
0x1265   : > { %10069 = vmin.xlane.f32.xlu1 %v10068_v55  ;;  %v10032_v35 = vpop.xlane.xlu1 %10031  ;;  %v10111_v43 = vshra.s32 %v10109_v37, 16 }
0x1266   : > { %vm10050_vm11 = vcmp.eq.f32.partialorder %v25359_v56, %v10032_v35  ;;  %v10082_v35 = vcvt.s32.f32 %v10080_v17 }
0x1267   : > { %v10058_v36 = vsel %vm10050_vm11, %v23026_v58, 64  ;;  %v10113_v1 = vcvt.s32.f32 %v10111_v43  ;;  %v10065_v43 = vand.u32 65535, %v10064_v33 }
0x1268   : > { %v10094_v49 = vsel %vm1169_vm0, %v10058_v36, 2147483647 }
0x1269   : > { %10114 = vmin.xlane.f32.xlu0 %v10113_v1  ;;  %v10041_v12 = vpop.xlane.xlu0 %10040  ;;  %v10096_v27 = vshra.s32 %v10094_v49, 16  ;;  %v10095_v2 = vand.u32 65535, %v10094_v49 }
0x126a   : > { %vm10053_vm12 = vcmp.eq.f32.partialorder %v25374_v20, %v10041_v12 }
0x126b   : > { %v10061_v10 = vsel %vm10053_vm12, %v23026_v58, 64  ;;  %v10098_v61 = vcvt.s32.f32 %v10096_v27  ;;  %v10067_v27 = vcvt.s32.f32 %v10065_v43 }
0x126c   : > { %v10139_v25 = vsel %vm1169_vm0, %v10061_v10, 2147483647  ;;  %v10110_v10 = vand.u32 65535, %v10109_v37 }
0x126d   : > { %10099 = vmin.xlane.f32.xlu1 %v10098_v61  ;;  %v10038_v19 = vpop.xlane.xlu1 %10037  ;;  %v10141_v4 = vshra.s32 %v10139_v25, 16 }
0x126e   : > { %vm10052_vm13 = vcmp.eq.f32.partialorder %v25397_v38, %v10038_v19 }
0x126f   : > { %v10060_v52 = vsel %vm10052_vm13, %v23026_v58, 64  ;;  %v10143_v51 = vcvt.s32.f32 %v10141_v4 }
0x1270   : > { %v10124_v22 = vsel %vm1169_vm0, %v10060_v52, 2147483647  ;;  %v10112_v52 = vcvt.s32.f32 %v10110_v10 }
0x1271   : > { %10144 = vmin.xlane.f32.xlu0 %v10143_v51  ;;  %v10044_v32 = vpop.xlane.xlu1 %10043  ;;  %v10126_v23 = vshra.s32 %v10124_v22, 16 }
0x1272   : > { %vm10054_vm14 = vcmp.eq.f32.partialorder %v25409_v5, %v10044_v32 }
0x1273   : > { %v10062_v0 = vsel %vm10054_vm14, %v23026_v58, 64  ;;  %v10128_v11 = vcvt.s32.f32 %v10126_v23  ;;  %v10140_v23 = vand.u32 65535, %v10139_v25 }
0x1274   : > { %v10154_v54 = vsel %vm1169_vm0, %v10062_v0, 2147483647 }
0x1275   : > { %v10047_v60 = vpop.xlane.xlu0 %10046  ;;  %10129 = vmin.xlane.f32.xlu1 %v10128_v11  ;;  %v10156_v30 = vshra.s32 %v10154_v54, 16 }
0x1276   : > { %vm10055_vm15 = vcmp.eq.f32.partialorder %v25423_v42, %v10047_v60  ;;  %v10125_v60 = vand.u32 65535, %v10124_v22 }
0x1277   : > { %v10063_v63 = vsel %vm10055_vm15, %v23026_v58, 64  ;;  %v10158_v44 = vcvt.s32.f32 %v10156_v30 }
0x1278   : > { %v10169_v28 = vsel %vm1169_vm0, %v10063_v63, 2147483647  ;;  %v10155_v63 = vand.u32 65535, %v10154_v54  ;;  %v27697_v54 = vmax.f32 %v24988_v34, %v25273_v8 }
0x1279   : > { %10159 = vmin.xlane.f32.xlu1 %v10158_v44  ;;  %v10171_v40 = vshra.s32 %v10169_v28, 16  ;;  %v10170_v17 = vand.u32 65535, %v10169_v28 }
0x127b   : > { %v10173_v31 = vcvt.s32.f32 %v10171_v40  ;;  %v10172_v10 = vcvt.s32.f32 %v10170_v17 }
0x127d   : > { %10174 = vmin.xlane.f32.xlu0 %v10173_v31 }
0x12ee   : > { %v25529_v7 = vpop.xlane.xlu0 %10084 }
0x12ef   : > { %vm10086_vm2 = vcmp.eq.f32.partialorder %v10083_v62, %v25529_v7  ;;  %v10097_v62 = vcvt.s32.f32 %v10095_v2  ;;  %v27700_v2 = vmax.f32 %v25006_v26, %v25288_v47  ;;  %v10091_v26 = vcvt.f32.s32 %v25529_v7 }
0x12f0   : > { %v10087_v36 = vsel %vm10086_vm2, %v10082_v35, inf }
0x12f1   : > { %10088 = vmin.xlane.f32.xlu0 %v10087_v36 }
0x12f2   : > { %v25532_v12 = vpop.xlane.xlu1 %10069 }
0x12f3   : > { %vm10071_vm3 = vcmp.eq.f32.partialorder %v10068_v55, %v25532_v12  ;;  %v10142_v55 = vcvt.s32.f32 %v10140_v23  ;;  %v27702_v23 = vmax.f32 %v25016_v3, %v25296_v45 }
0x12f4   : > { %v10072_v19 = vsel %vm10071_vm3, %v10067_v27, inf }
0x12f5   : > { %10073 = vmin.xlane.f32.xlu1 %v10072_v19 }
0x12f6   : > { %v25535_v4 = vpop.xlane.xlu0 %10114 }
0x12f7   : > { %vm10116_vm4 = vcmp.eq.f32.partialorder %v10113_v1, %v25535_v4  ;;  %v10127_v1 = vcvt.s32.f32 %v10125_v60  ;;  %v10092_v60 = vshll.u32 %v10091_v26, 16  ;;  %v10121_v3 = vcvt.f32.s32 %v25535_v4 }
0x12f8   : > { %v10117_v32 = vsel %vm10116_vm4, %v10112_v52, inf  ;;  %v27699_v52 = vmax.f32 %v25001_v15, %v25284_v48 }
0x12f9   : > { %10118 = vmin.xlane.f32.xlu0 %v10117_v32  ;;  %v10122_v17 = vshll.u32 %v10121_v3, 16 }
0x12fa   : > { %v25538_v33 = vpop.xlane.xlu1 %10099 }
0x12fb   : > { %vm10101_vm5 = vcmp.eq.f32.partialorder %v10098_v61, %v25538_v33  ;;  %v10157_v61 = vcvt.s32.f32 %v10155_v63 }
0x12fc   : > { %v10102_v0 = vsel %vm10101_vm5, %v10097_v62, inf }
0x12fd   : > { %10103 = vmin.xlane.f32.xlu1 %v10102_v0  ;;  %v27703_v0 = vmax.f32 %v25021_v39, %v25300_v14 }
0x12fe   : > { %v25541_v37 = vpop.xlane.xlu0 %10144 }
0x12ff   : > { %vm10146_vm6 = vcmp.eq.f32.partialorder %v10143_v51, %v25541_v37  ;;  %v27696_v51 = vmax.f32 %v24983_v16, %v25268_v53 }
0x1300   : > { %v10147_v30 = vsel %vm10146_vm6, %v10142_v55, inf }
0x1301   : > { %10148 = vmin.xlane.f32.xlu0 %v10147_v30 }
0x1302   : > { %v25544_v49 = vpop.xlane.xlu1 %10129 }
0x1303   : > { %vm10131_vm7 = vcmp.eq.f32.partialorder %v10128_v11, %v25544_v49  ;;  %v10136_v26 = vcvt.f32.s32 %v25544_v49 }
0x1304   : > { %v10132_v40 = vsel %vm10131_vm7, %v10127_v1, inf }
0x1305   : > { %10133 = vmin.xlane.f32.xlu1 %v10132_v40 }
0x1306   : > { %v25547_v25 = vpop.xlane.xlu1 %10159 }
0x1307   : > { %v20424_v35 = vpop.f32.mrb[32].mxu1  ;;  %vm10161_vm8 = vcmp.eq.f32.partialorder %v10158_v44, %v25547_v25  ;;  %v27698_v44 = vmax.f32 %v24996_v57, %v25279_v41  ;;  %v27701_v57 = vmax.f32 %v25011_v59, %v25292_v29  ;;  %v10076_v59 = vcvt.f32.s32 %v25532_v12 }
0x1308   : > { %v25553_v22 = vmax.f32 %v27696_v51, %v20424_v35  ;;  %v9962_v43 = vpop.f32.mrb[33].mxu1  ;;  %v10162_v36 = vsel %vm10161_vm8, %v10157_v61, inf  ;;  %v10106_v35 = vcvt.f32.s32 %v25538_v33 }
0x1309   : > { %v25558_v11 = vmax.f32 %v27697_v54, %v9962_v43  ;;  %10163 = vmin.xlane.f32.xlu1 %v10162_v36  ;;  %v10077_v63 = vshll.u32 %v10076_v59, 16 }
0x130a   : > { %v25560_v27 = vpop.xlane.xlu0 %10174 }
0x130b   : > { %v20427_v28 = vpop.f32.mrb[34].mxu1  ;;  %vm10176_vm9 = vcmp.eq.f32.partialorder %v10173_v31, %v25560_v27 }
0x130c   : > { %v25566_v16 = vmax.f32 %v27698_v44, %v20427_v28  ;;  %v9974_v53 = vpop.f32.mrb[35].mxu1  ;;  %v10177_v19 = vsel %vm10176_vm9, %v10172_v10, inf }
0x130d   : > { %v25571_v34 = vmax.f32 %v27699_v52, %v9974_v53  ;;  %10178 = vmin.xlane.f32.xlu0 %v10177_v19  ;;  %v10107_v53 = vshll.u32 %v10106_v35, 16 }
0x130f   : > { %v20430_v8 = vpop.f32.mrb[36].mxu1 }
0x1310   : > { %v25576_v32 = vmax.f32 %v27700_v2, %v20430_v8  ;;  %v9986_v31 = vpop.f32.mrb[37].mxu1 }
0x1311   : > { %v25581_v41 = vmax.f32 %v27701_v57, %v9986_v31 }
0x1313   : > { %v20433_v62 = vpop.f32.mrb[38].mxu1 }
0x1314   : > { %v25586_v15 = vmax.f32 %v27702_v23, %v20433_v62  ;;  %v9998_v48 = vpop.f32.mrb[39].mxu1 }
0x1315   : > { %v25591_v55 = vmax.f32 %v27703_v0, %v9998_v48 }
0x137e   : > { %v10089_v47 = vpop.xlane.xlu0 %10088 }
0x137f   : > { %v10090_v29 = vcvt.f32.s32 %v10089_v47 }
0x1381   : > { %v10093_v30 = vadd.s32 %v10092_v60, %v10090_v29 }
0x1382   : > { %v10074_v1 = vpop.xlane.xlu1 %10073 }
0x1383   : > { %v10075_v45 = vcvt.f32.s32 %v10074_v1  ;;  %vm10185_vm10 = vcmp.eq.s32.totalorder %v23026_v58, %v10093_v30 }
0x1384   : > { %v25598_v40 = vsel %vm10185_vm10, inf, %v25309_v9  ;;  %v25601_v39 = vsel %vm10185_vm10, 1.0, %v27679_v50 }
0x1385   : > { %v10078_v14 = vadd.s32 %v10077_v63, %v10075_v45  ;;  %v11011_v7 = vsel %vm1169_vm0, %v25598_v40, inf  ;;  %v10212_v12 = vsel %vm1169_vm0, %v25601_v39, 0 }
0x1386   : > { %11012 = vmin.xlane.f32.xlu0 %v11011_v7  ;;  %v25607_v61 = vsub.f32 %v10212_v12, %v10212_v12  ;;  %v10119_v4 = vpop.xlane.xlu0 %10118  ;;  %v10166_v7 = vcvt.f32.s32 %v25547_v25 }
0x1387   : > { %v10120_v51 = vcvt.f32.s32 %v10119_v4  ;;  %vm10184_vm11 = vcmp.eq.s32.totalorder %v23026_v58, %v10078_v14 }
0x1388   : > { %v25612_v9 = vsel %vm10184_vm11, inf, %v25323_v6  ;;  %v25615_v43 = vsel %vm10184_vm11, 1.0, %v27679_v50  ;;  %v10311_v28 = vand.u32 4294901760, %v25607_v61  ;;  %v10151_v6 = vcvt.f32.s32 %v25541_v37 }
0x1389   : > { %v10123_v36 = vadd.s32 %v10122_v17, %v10120_v51  ;;  %v11008_v54 = vsel %vm1169_vm0, %v25612_v9, inf  ;;  %v10209_v10 = vsel %vm1169_vm0, %v25615_v43, 0 }
0x138a   : > { %11009 = vmin.xlane.f32.xlu1 %v11008_v54  ;;  %v10104_v33 = vpop.xlane.xlu1 %10103  ;;  %v25622_v44 = vsub.f32 %v10209_v10, %v10209_v10  ;;  %v10312_v62 = vsub.f32 %v25607_v61, %v10311_v28  ;;  %v10152_v0 = vshll.u32 %v10151_v6, 16  ;;  %v10181_v6 = vcvt.f32.s32 %v25560_v27 }
0x138b   : > { %v10105_v19 = vcvt.f32.s32 %v10104_v33  ;;  %vm10187_vm12 = vcmp.eq.s32.totalorder %v23026_v58, %v10123_v36 }
0x138c   : > { %v25627_v52 = vsel %vm10187_vm12, inf, %v25338_v46  ;;  %v25630_v8 = vsel %vm10187_vm12, 1.0, %v27679_v50  ;;  %v10301_v2 = vand.u32 4294901760, %v25622_v44  ;;  %v10313_v3 = vand.u32 4294901760, %v10312_v62 }
0x138d   : > { %v10108_v31 = vadd.s32 %v10107_v53, %v10105_v19  ;;  %v11017_v57 = vsel %vm1169_vm0, %v25627_v52, inf  ;;  %v10218_v37 = vsel %vm1169_vm0, %v25630_v8, 0  ;;  %v10167_v53 = vshll.u32 %v10166_v7, 16 }
0x138e   : > { %11018 = vmin.xlane.f32.xlu0 %v11017_v57  ;;  %v10149_v23 = vpop.xlane.xlu0 %10148  ;;  %v10302_v46 = vsub.f32 %v25622_v44, %v10301_v2  ;;  %v25643_v48 = vsub.f32 %v10218_v37, %v10218_v37 }
0x138f   : > { %v10150_v47 = vcvt.f32.s32 %v10149_v23  ;;  %vm10186_vm13 = vcmp.eq.s32.totalorder %v23026_v58, %v10108_v31 }
0x1390   : > { %v10303_v60 = vand.u32 4294901760, %v10302_v46  ;;  %v25648_v59 = vsel %vm10186_vm13, inf, %v25359_v56  ;;  %v25651_v29 = vsel %vm10186_vm13, 1.0, %v27679_v50  ;;  %v10331_v30 = vand.u32 4294901760, %v25643_v48 }
0x1391   : > { %v10153_v1 = vadd.s32 %v10152_v0, %v10150_v47  ;;  %v11014_v63 = vsel %vm1169_vm0, %v25648_v59, inf  ;;  %v10215_v49 = vsel %vm1169_vm0, %v25651_v29, 0  ;;  %v10137_v56 = vshll.u32 %v10136_v26, 16 }
0x1392   : > { %20438 = vmatprep.mubr.f32.mxu0 %v10303_v60  ;;  %11015 = vmin.xlane.f32.xlu1 %v11014_v63  ;;  %v10134_v45 = vpop.xlane.xlu1 %10133  ;;  %v25658_v14 = vsub.f32 %v10215_v49, %v10215_v49  ;;  %v10332_v51 = vsub.f32 %v25643_v48, %v10331_v30  ;;  %v10182_v60 = vshll.u32 %v10181_v6, 16 }
0x1393   : > { %v10135_v12 = vcvt.f32.s32 %v10134_v45  ;;  %20439 = vmatmul.mubr.f32.vlgmr.msra.gmra.mrb[40].mxu0 %v10313_v3  ;;  %vm10189_vm14 = vcmp.eq.s32.totalorder %v23026_v58, %v10153_v1 }
0x1394   : > { %v25663_v4 = vsel %vm10189_vm14, inf, %v25374_v20  ;;  %v25666_v17 = vsel %vm10189_vm14, 1.0, %v27679_v50  ;;  %v10321_v35 = vand.u32 4294901760, %v25658_v14  ;;  %21449 = vmatpush3.bf16.xpose.msra.mxu0 %v22889_v24  ;;  %v10333_v37 = vand.u32 4294901760, %v10332_v51 }
0x1395   : > { %v10138_v36 = vadd.s32 %v10137_v56, %v10135_v12  ;;  %v11023_v25 = vsel %vm1169_vm0, %v25663_v4, inf  ;;  %v10224_v54 = vsel %vm1169_vm0, %v25666_v17, 0  ;;  %21451 = vmatprep.subr.bf16.mxu0 %v22883_v18 }
0x1396   : > { %11024 = vmin.xlane.f32.xlu0 %v11023_v25  ;;  %v10164_v20 = vpop.xlane.xlu1 %10163  ;;  %v10322_v10 = vsub.f32 %v25658_v14, %v10321_v35  ;;  %v25681_v33 = vsub.f32 %v10224_v54, %v10224_v54 }
0x1397   : > { %v10165_v19 = vcvt.f32.s32 %v10164_v20  ;;  %vm10188_vm15 = vcmp.eq.s32.totalorder %v23026_v58, %v10138_v36 }
0x1398   : > { %v10323_v31 = vand.u32 4294901760, %v10322_v10  ;;  %v25686_v57 = vsel %vm10188_vm15, inf, %v25397_v38  ;;  %v25689_v62 = vsel %vm10188_vm15, 1.0, %v27679_v50  ;;  %v10351_v27 = vand.u32 4294901760, %v25681_v33 }
0x1399   : > { %v10168_v23 = vadd.s32 %v10167_v53, %v10165_v19  ;;  %v11020_v46 = vsel %vm1169_vm0, %v25686_v57, inf  ;;  %v10221_v0 = vsel %vm1169_vm0, %v25689_v62, 0 }
0x139a   : > { %v10179_v26 = vpop.xlane.xlu0 %10178  ;;  %20441 = vmatprep.mubr.f32.mxu0 %v10323_v31  ;;  %11021 = vmin.xlane.f32.xlu1 %v11020_v46  ;;  %v10340_v47 = vsub.f32 %v10221_v0, %v10221_v0  ;;  %v10352_v56 = vsub.f32 %v25681_v33, %v10351_v27 }
0x139b   : > { %v10180_v38 = vcvt.f32.s32 %v10179_v26  ;;  %20442 = vmatmul.mubr.f32.gmra.mrb[42].mxu0 %v10333_v37  ;;  %vm10190_vm2 = vcmp.eq.s32.totalorder %v23026_v58, %v10168_v23 }
0x139c   : > { %v25698_v1 = vsel %vm10190_vm2, inf, %v25409_v5  ;;  %v25701_v63 = vsel %vm10190_vm2, 1.0, %v27679_v50  ;;  %v10341_v3 = vand.u32 4294901760, %v10340_v47  ;;  %v10353_v10 = vand.u32 4294901760, %v10352_v56 }
0x139d   : > { %v10183_v49 = vadd.s32 %v10182_v60, %v10180_v38  ;;  %v11026_v45 = vsel %vm1169_vm0, %v25698_v1, inf  ;;  %v10227_v7 = vsel %vm1169_vm0, %v25701_v63, 0 }
0x139e   : > { %11027 = vmin.xlane.f32.xlu1 %v11026_v45  ;;  %v10342_v12 = vsub.f32 %v10340_v47, %v10341_v3  ;;  %v10360_v51 = vsub.f32 %v10227_v7, %v10227_v7 }
0x139f   : > { %vm10191_vm3 = vcmp.eq.s32.totalorder %v23026_v58, %v10183_v49 }
0x13a0   : > { %v25712_v5 = vsel %vm10191_vm3, inf, %v25423_v42  ;;  %v25715_v36 = vsel %vm10191_vm3, 1.0, %v27679_v50  ;;  %v10343_v25 = vand.u32 4294901760, %v10342_v12  ;;  %v10361_v54 = vand.u32 4294901760, %v10360_v51 }
0x13a1   : > { %v11029_v20 = vsel %vm1169_vm0, %v25712_v5, inf  ;;  %v10230_v53 = vsel %vm1169_vm0, %v25715_v36, 0 }
0x13a2   : > { %11030 = vmin.xlane.f32.xlu0 %v11029_v20  ;;  %20444 = vmatprep.mubr.f32.mxu0 %v10343_v25  ;;  %v10362_v6 = vsub.f32 %v10360_v51, %v10361_v54  ;;  %v10370_v19 = vsub.f32 %v10230_v53, %v10230_v53 }
0x13a3   : > { %20445 = vmatmul.mubr.f32.gmra.mrb[44].mxu0 %v10353_v10 }
0x13a4   : > { %v10363_v31 = vand.u32 4294901760, %v10362_v6  ;;  %v10371_v42 = vand.u32 4294901760, %v10370_v19 }
0x13a6   : > { %20447 = vmatprep.mubr.f32.mxu0 %v10363_v31  ;;  %v10372_v37 = vsub.f32 %v10370_v19, %v10371_v42 }
0x13a8   : > { %v10373_v23 = vand.u32 4294901760, %v10372_v37 }
0x13aa   : > { %20448 = vmatmul.mubr.f32.gmra.mrb[46].mxu0 %v10373_v23 }
0x13ab   : > { %20454 = vmatprep.mubr.msk.f32.mxu0 %vm1169_vm0, %v25615_v43 }
0x13ae   : > { %20455 = vmatmul.mubr.msk.f32.vlgmr.msra.gmra.mrb[40].mxu0 %vm1169_vm0, %v25601_v39 }
0x13af   : > { %20457 = vmatprep.mubr.msk.f32.mxu0 %vm1169_vm0, %v25651_v29  ;;  %21453 = vmatpush3.bf16.xpose.msra.mxu0 %v22883_v18 }
0x13b0   : > { %21455 = vmatprep.subr.bf16.mxu0 %v22881_v13 }
0x13b2   : > { %20458 = vmatmul.mubr.msk.f32.gmra.mrb[42].mxu0 %vm1169_vm0, %v25630_v8 }
0x13b3   : > { %20460 = vmatprep.mubr.msk.f32.mxu0 %vm1169_vm0, %v25689_v62 }
0x13b6   : > { %20461 = vmatmul.mubr.msk.f32.gmra.mrb[44].mxu0 %vm1169_vm0, %v25666_v17 }
0x13b7   : > { %20463 = vmatprep.mubr.msk.f32.mxu0 %vm1169_vm0, %v25701_v63 }
0x13ba   : > { %20464 = vmatmul.mubr.msk.f32.gmra.mrb[46].mxu0 %vm1169_vm0, %v25715_v36 }
0x13bb   : > { %20470 = vmatprep.mubr.f32.mxu0 %v25622_v44 }
0x13be   : > { %20471 = vmatmul.mubr.f32.vlgmr.msra.gmra.mrb[40].mxu0 %v25607_v61 }
0x13bf   : > { %20473 = vmatprep.mubr.f32.mxu0 %v25658_v14  ;;  %21457 = vmatpush3.bf16.xpose.msra.mxu0 %v22881_v13 }
0x13c0   : > { %21459 = vmatprep.subr.bf16.mxu0 %v22887_v21 }
0x13c2   : > { %20474 = vmatmul.mubr.f32.gmra.mrb[42].mxu0 %v25643_v48 }
0x13c3   : > { %20476 = vmatprep.mubr.f32.mxu0 %v10340_v47 }
0x13c6   : > { %20477 = vmatmul.mubr.f32.gmra.mrb[44].mxu0 %v25681_v33 }
0x13c7   : > { %20479 = vmatprep.mubr.f32.mxu0 %v10360_v51 }
0x13ca   : > { %20480 = vmatmul.mubr.f32.gmra.mrb[46].mxu0 %v10370_v19 }
0x13cb   : > { %20486 = vmatprep.mubr.f32.mxu0 %v10301_v2 }
0x13ce   : > { %20487 = vmatmul.mubr.f32.vlgmr.msra.gmra.mrb[40].mxu0 %v10311_v28 }
0x13cf   : > { %20489 = vmatprep.mubr.f32.mxu0 %v10321_v35  ;;  %21461 = vmatpush3.bf16.xpose.msra.mxu0 %v22887_v21 }
0x13d0   : > { %21463 = vmatprep.subr.bf16.mxu0 %v22881_v13 }
0x13d2   : > { %20490 = vmatmul.mubr.f32.gmra.mrb[42].mxu0 %v10331_v30 }
0x13d3   : > { %20492 = vmatprep.mubr.f32.mxu0 %v10341_v3 }
0x13d6   : > { %20493 = vmatmul.mubr.f32.gmra.mrb[44].mxu0 %v10351_v27 }
0x13d7   : > { %20495 = vmatprep.mubr.f32.mxu0 %v10361_v54 }
0x13da   : > { %20496 = vmatmul.mubr.f32.gmra.mrb[46].mxu0 %v10371_v42 }
0x13db   : > { %20502 = vmatprep.mubr.msk.f32.mxu0 %vm1169_vm0, %v25615_v43 }
0x13de   : > { %20503 = vmatmul.mubr.msk.f32.vlgmr.msra.gmra.mrb[40].mxu0 %vm1169_vm0, %v25601_v39 }
0x13df   : > { %20505 = vmatprep.mubr.msk.f32.mxu0 %vm1169_vm0, %v25651_v29  ;;  %21465 = vmatpush3.bf16.xpose.msra.mxu0 %v22881_v13 }
0x13e0   : > { %21491 = vmatprep.subr.bf16.mxu0 %v22881_v13 }
0x13e2   : > { %20506 = vmatmul.mubr.msk.f32.gmra.mrb[42].mxu0 %vm1169_vm0, %v25630_v8 }
0x13e3   : > { %20508 = vmatprep.mubr.msk.f32.mxu0 %vm1169_vm0, %v25689_v62 }
0x13e6   : > { %20509 = vmatmul.mubr.msk.f32.gmra.mrb[44].mxu0 %vm1169_vm0, %v25666_v17 }
0x13e7   : > { %20511 = vmatprep.mubr.msk.f32.mxu0 %vm1169_vm0, %v25701_v63 }
0x13ea   : > { %20512 = vmatmul.mubr.msk.f32.gmra.mrb[46].mxu0 %vm1169_vm0, %v25715_v36 }
0x13eb   : > { %20518 = vmatprep.mubr.msk.f32.mxu0 %vm1169_vm0, %v25615_v43 }
0x13ee   : > { %20519 = vmatmul.mubr.msk.f32.vlgmr.msra.gmra.mrb[40].mxu0 %vm1169_vm0, %v25601_v39 }
0x13ef   : > { %20521 = vmatprep.mubr.msk.f32.mxu0 %vm1169_vm0, %v25651_v29  ;;  %21493 = vmatpush3.bf16.xpose.msra.mxu0 %v22881_v13 }
0x13f0   : > { %21495 = vmatprep.subr.bf16.mxu0 %v22889_v24 }
0x13f2   : > { %20522 = vmatmul.mubr.msk.f32.gmra.mrb[42].mxu0 %vm1169_vm0, %v25630_v8 }
0x13f3   : > { %20524 = vmatprep.mubr.msk.f32.mxu0 %vm1169_vm0, %v25689_v62 }
0x13f6   : > { %20525 = vmatmul.mubr.msk.f32.gmra.mrb[44].mxu0 %vm1169_vm0, %v25666_v17 }
0x13f7   : > { %20527 = vmatprep.mubr.msk.f32.mxu0 %vm1169_vm0, %v25701_v63 }
0x13fa   : > { %20528 = vmatmul.mubr.msk.f32.gmra.mrb[46].mxu0 %vm1169_vm0, %v25715_v36 }
0x1413   : > { %v11013_v39 = vpop.xlane.xlu0 %11012 }
0x1414   : > { %vm11033_vm4 = vcmp.eq.f32.partialorder %v25598_v40, %v11013_v39 }
0x1415   : > { %v11041_v61 = vsel %vm11033_vm4, %v23026_v58, 64 }
0x1416   : > { %v11063_v43 = vsel %vm1169_vm0, %v11041_v61, 2147483647 }
0x1417   : > { %v11010_v28 = vpop.xlane.xlu1 %11009  ;;  %v11065_v44 = vshra.s32 %v11063_v43, 16  ;;  %v11064_v37 = vand.u32 65535, %v11063_v43 }
0x1418   : > { %vm11032_vm5 = vcmp.eq.f32.partialorder %v25612_v9, %v11010_v28 }
0x1419   : > { %v11040_v8 = vsel %vm11032_vm5, %v23026_v58, 64  ;;  %v11067_v2 = vcvt.s32.f32 %v11065_v44  ;;  %v11066_v39 = vcvt.s32.f32 %v11064_v37 }
0x141a   : > { %v11048_v48 = vsel %vm1169_vm0, %v11040_v8, 2147483647 }
0x141b   : > { %11068 = vmin.xlane.f32.xlu0 %v11067_v2  ;;  %v11019_v29 = vpop.xlane.xlu0 %11018  ;;  %v11050_v30 = vshra.s32 %v11048_v48, 16  ;;  %v11049_v61 = vand.u32 65535, %v11048_v48 }
0x141c   : > { %vm11035_vm6 = vcmp.eq.f32.partialorder %v25627_v52, %v11019_v29 }
0x141d   : > { %v11043_v14 = vsel %vm11035_vm6, %v23026_v58, 64  ;;  %v11052_v17 = vcvt.s32.f32 %v11050_v30  ;;  %v11051_v8 = vcvt.s32.f32 %v11049_v61 }
0x141e   : > { %v11093_v35 = vsel %vm1169_vm0, %v11043_v14, 2147483647 }
0x141f   : > { %11053 = vmin.xlane.f32.xlu1 %v11052_v17  ;;  %v11016_v33 = vpop.xlane.xlu1 %11015  ;;  %v11095_v62 = vshra.s32 %v11093_v35, 16  ;;  %v11094_v29 = vand.u32 65535, %v11093_v35 }
0x1420   : > { %vm11034_vm7 = vcmp.eq.f32.partialorder %v25648_v59, %v11016_v33 }
0x1421   : > { %v11042_v46 = vsel %vm11034_vm7, %v23026_v58, 64  ;;  %v11097_v0 = vcvt.s32.f32 %v11095_v62  ;;  %v11096_v33 = vcvt.s32.f32 %v11094_v29 }
0x1422   : > { %v11078_v27 = vsel %vm1169_vm0, %v11042_v46, 2147483647 }
0x1423   : > { %11098 = vmin.xlane.f32.xlu0 %v11097_v0  ;;  %v11025_v26 = vpop.xlane.xlu0 %11024  ;;  %v11080_v47 = vshra.s32 %v11078_v27, 16  ;;  %v11079_v43 = vand.u32 65535, %v11078_v27 }
0x1424   : > { %vm11037_vm8 = vcmp.eq.f32.partialorder %v25663_v4, %v11025_v26 }
0x1425   : > { %v11045_v60 = vsel %vm11037_vm8, %v23026_v58, 64  ;;  %v11082_v38 = vcvt.s32.f32 %v11080_v47 }
0x1426   : > { %v11123_v63 = vsel %vm1169_vm0, %v11045_v60, 2147483647 }
0x1427   : > { %11083 = vmin.xlane.f32.xlu1 %v11082_v38  ;;  %v11022_v3 = vpop.xlane.xlu1 %11021  ;;  %v11125_v49 = vshra.s32 %v11123_v63, 16  ;;  %v11124_v46 = vand.u32 65535, %v11123_v63 }
0x1428   : > { %vm11036_vm9 = vcmp.eq.f32.partialorder %v25686_v57, %v11022_v3 }
0x1429   : > { %v11044_v45 = vsel %vm11036_vm9, %v23026_v58, 64  ;;  %v11127_v56 = vcvt.s32.f32 %v11125_v49 }
0x142a   : > { %v11108_v7 = vsel %vm1169_vm0, %v11044_v45, 2147483647 }
0x142b   : > { %11128 = vmin.xlane.f32.xlu0 %v11127_v56  ;;  %v11028_v12 = vpop.xlane.xlu1 %11027  ;;  %v11110_v51 = vshra.s32 %v11108_v7, 16  ;;  %v11109_v47 = vand.u32 65535, %v11108_v7 }
0x142c   : > { %vm11038_vm10 = vcmp.eq.f32.partialorder %v25698_v1, %v11028_v12 }
0x142d   : > { %v11046_v36 = vsel %vm11038_vm10, %v23026_v58, 64  ;;  %v11112_v25 = vcvt.s32.f32 %v11110_v51 }
0x142e   : > { %v11138_v54 = vsel %vm1169_vm0, %v11046_v36, 2147483647 }
0x142f   : > { %v11031_v20 = vpop.xlane.xlu0 %11030  ;;  %11113 = vmin.xlane.f32.xlu1 %v11112_v25  ;;  %v11140_v10 = vshra.s32 %v11138_v54, 16  ;;  %v11139_v3 = vand.u32 65535, %v11138_v54 }
0x1430   : > { %vm11039_vm11 = vcmp.eq.f32.partialorder %v25712_v5, %v11031_v20 }
0x1431   : > { %v11047_v53 = vsel %vm11039_vm11, %v23026_v58, 64  ;;  %v11142_v6 = vcvt.s32.f32 %v11140_v10 }
0x1432   : > { %v11153_v19 = vsel %vm1169_vm0, %v11047_v53, 2147483647 }
0x1433   : > { %11143 = vmin.xlane.f32.xlu1 %v11142_v6  ;;  %v11155_v31 = vshra.s32 %v11153_v19, 16  ;;  %v11154_v45 = vand.u32 65535, %v11153_v19 }
0x1435   : > { %v11157_v42 = vcvt.s32.f32 %v11155_v31  ;;  %v11156_v54 = vcvt.s32.f32 %v11154_v45 }
0x1437   : > { %11158 = vmin.xlane.f32.xlu0 %v11157_v42 }
0x14a8   : > { %v25818_v23 = vpop.xlane.xlu0 %11068 }
0x14a9   : > { %vm11070_vm12 = vcmp.eq.f32.partialorder %v11067_v2, %v25818_v23  ;;  %v11081_v2 = vcvt.s32.f32 %v11079_v43 }
0x14aa   : > { %v11071_v28 = vsel %vm11070_vm12, %v11066_v39, inf }
0x14ab   : > { %11072 = vmin.xlane.f32.xlu0 %v11071_v28 }
0x14ac   : > { %v25821_v44 = vpop.xlane.xlu1 %11053 }
0x14ad   : > { %vm11055_vm13 = vcmp.eq.f32.partialorder %v11052_v17, %v25821_v44  ;;  %v11126_v17 = vcvt.s32.f32 %v11124_v46 }
0x14ae   : > { %v11056_v30 = vsel %vm11055_vm13, %v11051_v8, inf }
0x14af   : > { %11057 = vmin.xlane.f32.xlu1 %v11056_v30  ;;  %v11075_v30 = vcvt.f32.s32 %v25818_v23 }
0x14b0   : > { %v25824_v14 = vpop.xlane.xlu0 %11098 }
0x14b1   : > { %vm11100_vm14 = vcmp.eq.f32.partialorder %v11097_v0, %v25824_v14  ;;  %v11111_v0 = vcvt.s32.f32 %v11109_v47  ;;  %v11076_v43 = vshll.u32 %v11075_v30, 16  ;;  %v11105_v47 = vcvt.f32.s32 %v25824_v14 }
0x14b2   : > { %v11101_v62 = vsel %vm11100_vm14, %v11096_v33, inf }
0x14b3   : > { %11102 = vmin.xlane.f32.xlu0 %v11101_v62  ;;  %v11060_v62 = vcvt.f32.s32 %v25821_v44  ;;  %v11106_v45 = vshll.u32 %v11105_v47, 16 }
0x14b4   : > { %v25827_v48 = vpop.xlane.xlu1 %11083 }
0x14b5   : > { %vm11085_vm15 = vcmp.eq.f32.partialorder %v11082_v38, %v25827_v48  ;;  %v11141_v38 = vcvt.s32.f32 %v11139_v3 }
0x14b6   : > { %v11086_v26 = vsel %vm11085_vm15, %v11081_v2, inf }
0x14b7   : > { %11087 = vmin.xlane.f32.xlu1 %v11086_v26 }
0x14b8   : > { %v25830_v35 = vpop.xlane.xlu0 %11128 }
0x14b9   : > { %vm11130_vm2 = vcmp.eq.f32.partialorder %v11127_v56, %v25830_v35 }
0x14ba   : > { %v11131_v60 = vsel %vm11130_vm2, %v11126_v17, inf  ;;  %v11061_v17 = vshll.u32 %v11060_v62, 16 }
0x14bb   : > { %11132 = vmin.xlane.f32.xlu0 %v11131_v60 }
0x14bc   : > { %v25833_v27 = vpop.xlane.xlu1 %11113 }
0x14bd   : > { %vm11115_vm3 = vcmp.eq.f32.partialorder %v11112_v25, %v25833_v27 }
0x14be   : > { %v11116_v49 = vsel %vm11115_vm3, %v11111_v0, inf }
0x14bf   : > { %11117 = vmin.xlane.f32.xlu1 %v11116_v49 }
0x14c0   : > { %v25836_v63 = vpop.xlane.xlu1 %11143 }
0x14c1   : > { %v25838_v12 = vpop.f32.mrb[40].mxu0  ;;  %vm11145_vm4 = vcmp.eq.f32.partialorder %v11142_v6, %v25836_v63 }
0x14c2   : > { %v25843_v7 = vpop.f32.mrb[41].mxu0  ;;  %v11146_v51 = vsel %vm11145_vm4, %v11141_v38, inf }
0x14c3   : > { %11147 = vmin.xlane.f32.xlu1 %v11146_v51  ;;  %v11090_v51 = vcvt.f32.s32 %v25827_v48 }
0x14c4   : > { %v25847_v25 = vpop.xlane.xlu0 %11158 }
0x14c5   : > { %v25849_v20 = vpop.f32.mrb[42].mxu0  ;;  %vm11160_vm5 = vcmp.eq.f32.partialorder %v11157_v42, %v25847_v25 }
0x14c6   : > { %v25854_v53 = vpop.f32.mrb[43].mxu0  ;;  %v11161_v6 = vsel %vm11160_vm5, %v11156_v54, inf }
0x14c7   : > { %11162 = vmin.xlane.f32.xlu0 %v11161_v6 }
0x14c9   : > { %v25858_v31 = vpop.f32.mrb[44].mxu0 }
0x14ca   : > { %v25862_v39 = vpop.f32.mrb[45].mxu0 }
0x14cd   : > { %v25866_v61 = vpop.f32.mrb[46].mxu0 }
0x14ce   : > { %v25870_v8 = vpop.f32.mrb[47].mxu0 }
0x1538   : > { %v11073_v33 = vpop.xlane.xlu0 %11072 }
0x1539   : > { %v11074_v2 = vcvt.f32.s32 %v11073_v33 }
0x153b   : > { %v11077_v46 = vadd.s32 %v11076_v43, %v11074_v2 }
0x153c   : > { %v11058_v26 = vpop.xlane.xlu1 %11057 }
0x153d   : > { %v11059_v60 = vcvt.f32.s32 %v11058_v26  ;;  %vm11169_vm6 = vcmp.eq.s32.totalorder %v23026_v58, %v11077_v46  ;;  %v11091_v46 = vshll.u32 %v11090_v51, 16 }
0x153e   : > { %v25879_v0 = vsel %vm11169_vm6, inf, %v25598_v40  ;;  %v25882_v3 = vsel %vm11169_vm6, 1.0, %v27679_v50 }
0x153f   : > { %v11062_v23 = vadd.s32 %v11061_v17, %v11059_v60  ;;  %v11995_v49 = vsel %vm1169_vm0, %v25879_v0, inf  ;;  %v11196_v44 = vsel %vm1169_vm0, %v25882_v3, 0 }
0x1540   : > { %11996 = vmin.xlane.f32.xlu0 %v11995_v49  ;;  %v25888_v38 = vsub.f32 %v11196_v44, %v11196_v44  ;;  %v11103_v14 = vpop.xlane.xlu0 %11102 }
0x1541   : > { %v11104_v54 = vcvt.f32.s32 %v11103_v14  ;;  %vm11168_vm7 = vcmp.eq.s32.totalorder %v23026_v58, %v11062_v23 }
0x1542   : > { %v25893_v40 = vsel %vm11168_vm7, inf, %v25612_v9  ;;  %v25896_v6 = vsel %vm11168_vm7, 1.0, %v27679_v50  ;;  %v11295_v62 = vand.u32 4294901760, %v25888_v38  ;;  %v11135_v9 = vcvt.f32.s32 %v25830_v35 }
0x1543   : > { %v11107_v30 = vadd.s32 %v11106_v45, %v11104_v54  ;;  %v11992_v33 = vsel %vm1169_vm0, %v25893_v40, inf  ;;  %v11193_v43 = vsel %vm1169_vm0, %v25896_v6, 0  ;;  %v11120_v54 = vcvt.f32.s32 %v25833_v27 }
0x1544   : > { %11993 = vmin.xlane.f32.xlu1 %v11992_v33  ;;  %v11088_v48 = vpop.xlane.xlu1 %11087  ;;  %v25903_v2 = vsub.f32 %v11193_v43, %v11193_v43  ;;  %v11296_v44 = vsub.f32 %v25888_v38, %v11295_v62  ;;  %v11136_v51 = vshll.u32 %v11135_v9, 16 }
0x1545   : > { %v11089_v26 = vcvt.f32.s32 %v11088_v48  ;;  %vm11171_vm8 = vcmp.eq.s32.totalorder %v23026_v58, %v11107_v30 }
0x1546   : > { %v25908_v17 = vsel %vm11171_vm8, inf, %v25627_v52  ;;  %v25911_v47 = vsel %vm11171_vm8, 1.0, %v27679_v50  ;;  %v11285_v60 = vand.u32 4294901760, %v25903_v2 }
0x1547   : > { %v11092_v23 = vadd.s32 %v11091_v46, %v11089_v26  ;;  %v12001_v49 = vsel %vm1169_vm0, %v25908_v17, inf  ;;  %v11202_v35 = vsel %vm1169_vm0, %v25911_v47, 0 }
0x1548   : > { %12002 = vmin.xlane.f32.xlu0 %v12001_v49  ;;  %v11133_v14 = vpop.xlane.xlu0 %11132  ;;  %v11286_v52 = vsub.f32 %v25903_v2, %v11285_v60  ;;  %v25924_v45 = vsub.f32 %v11202_v35, %v11202_v35  ;;  %v11297_v35 = vand.u32 4294901760, %v11296_v44 }
0x1549   : > { %v11134_v30 = vcvt.f32.s32 %v11133_v14  ;;  %vm11170_vm9 = vcmp.eq.s32.totalorder %v23026_v58, %v11092_v23  ;;  %v11150_v14 = vcvt.f32.s32 %v25836_v63 }
0x154a   : > { %v11287_v33 = vand.u32 4294901760, %v11286_v52  ;;  %v25929_v43 = vsel %vm11170_vm9, inf, %v25648_v59  ;;  %v25932_v48 = vsel %vm11170_vm9, 1.0, %v27679_v50  ;;  %v11315_v46 = vand.u32 4294901760, %v25924_v45 }
0x154b   : > { %v11137_v26 = vadd.s32 %v11136_v51, %v11134_v30  ;;  %v11998_v49 = vsel %vm1169_vm0, %v25929_v43, inf  ;;  %v11199_v27 = vsel %vm1169_vm0, %v25932_v48, 0  ;;  %v11121_v59 = vshll.u32 %v11120_v54, 16 }
0x154c   : > { %20534 = vmatprep.mubr.f32.mxu1 %v11287_v33  ;;  %11999 = vmin.xlane.f32.xlu1 %v11998_v49  ;;  %v11118_v9 = vpop.xlane.xlu1 %11117  ;;  %v25939_v23 = vsub.f32 %v11199_v27, %v11199_v27  ;;  %v11316_v33 = vsub.f32 %v25924_v45, %v11315_v46  ;;  %v11151_v27 = vshll.u32 %v11150_v14, 16 }
0x154d   : > { %v11119_v52 = vcvt.f32.s32 %v11118_v9  ;;  %20535 = vmatmul.mubr.f32.vlgmr.msra.gmra.mrb[40].mxu1 %v11297_v35  ;;  %vm11173_vm10 = vcmp.eq.s32.totalorder %v23026_v58, %v11137_v26  ;;  %v11165_v9 = vcvt.f32.s32 %v25847_v25 }
0x154e   : > { %v25944_v51 = vsel %vm11173_vm10, inf, %v25663_v4  ;;  %v25947_v44 = vsel %vm11173_vm10, 1.0, %v27679_v50  ;;  %v11305_v30 = vand.u32 4294901760, %v25939_v23  ;;  %21473 = vmatpush3.bf16.xpose.msra.mxu1 %v22889_v24 }
0x154f   : > { %v11122_v54 = vadd.s32 %v11121_v59, %v11119_v52  ;;  %v12007_v63 = vsel %vm1169_vm0, %v25944_v51, inf  ;;  %v11208_v26 = vsel %vm1169_vm0, %v25947_v44, 0  ;;  %21475 = vmatprep.subr.bf16.mxu1 %v22883_v18 }
0x1550   : > { %12008 = vmin.xlane.f32.xlu0 %v12007_v63  ;;  %v11148_v4 = vpop.xlane.xlu1 %11147  ;;  %v11306_v49 = vsub.f32 %v25939_v23, %v11305_v30  ;;  %v25962_v35 = vsub.f32 %v11208_v26, %v11208_v26  ;;  %v11317_v63 = vand.u32 4294901760, %v11316_v33 }
0x1551   : > { %v11149_v59 = vcvt.f32.s32 %v11148_v4  ;;  %vm11172_vm11 = vcmp.eq.s32.totalorder %v23026_v58, %v11122_v54  ;;  %v11166_v4 = vshll.u32 %v11165_v9, 16 }
0x1552   : > { %v11307_v52 = vand.u32 4294901760, %v11306_v49  ;;  %v25967_v29 = vsel %vm11172_vm11, inf, %v25686_v57  ;;  %v25970_v28 = vsel %vm11172_vm11, 1.0, %v27679_v50  ;;  %v11335_v25 = vand.u32 4294901760, %v25962_v35 }
0x1553   : > { %v11152_v42 = vadd.s32 %v11151_v27, %v11149_v59  ;;  %v12004_v37 = vsel %vm1169_vm0, %v25967_v29, inf  ;;  %v11205_v14 = vsel %vm1169_vm0, %v25970_v28, 0 }
0x1554   : > { %v11163_v26 = vpop.xlane.xlu0 %11162  ;;  %20537 = vmatprep.mubr.f32.mxu1 %v11307_v52  ;;  %12005 = vmin.xlane.f32.xlu1 %v12004_v37  ;;  %v11324_v54 = vsub.f32 %v11205_v14, %v11205_v14  ;;  %v11336_v37 = vsub.f32 %v25962_v35, %v11335_v25 }
0x1555   : > { %v11164_v57 = vcvt.f32.s32 %v11163_v26  ;;  %20538 = vmatmul.mubr.f32.gmra.mrb[42].mxu1 %v11317_v63  ;;  %vm11174_vm12 = vcmp.eq.s32.totalorder %v23026_v58, %v11152_v42 }
0x1556   : > { %v25979_v33 = vsel %vm11174_vm12, inf, %v25698_v1  ;;  %v25982_v49 = vsel %vm11174_vm12, 1.0, %v27679_v50  ;;  %v11325_v27 = vand.u32 4294901760, %v11324_v54 }
0x1557   : > { %v11167_v59 = vadd.s32 %v11166_v4, %v11164_v57  ;;  %v12010_v19 = vsel %vm1169_vm0, %v25979_v33, inf  ;;  %v11211_v9 = vsel %vm1169_vm0, %v25982_v49, 0  ;;  %v11337_v57 = vand.u32 4294901760, %v11336_v37 }
0x1558   : > { %12011 = vmin.xlane.f32.xlu1 %v12010_v19  ;;  %v11326_v42 = vsub.f32 %v11324_v54, %v11325_v27  ;;  %v11344_v52 = vsub.f32 %v11211_v9, %v11211_v9 }
0x1559   : > { %vm11175_vm13 = vcmp.eq.s32.totalorder %v23026_v58, %v11167_v59 }
0x155a   : > { %v25993_v1 = vsel %vm11175_vm13, inf, %v25712_v5  ;;  %v25996_v63 = vsel %vm11175_vm13, 1.0, %v27679_v50  ;;  %v11327_v14 = vand.u32 4294901760, %v11326_v42  ;;  %v11345_v26 = vand.u32 4294901760, %v11344_v52 }
0x155b   : > { %v12013_v4 = vsel %vm1169_vm0, %v25993_v1, inf  ;;  %v11214_v10 = vsel %vm1169_vm0, %v25996_v63, 0 }
0x155c   : > { %12014 = vmin.xlane.f32.xlu0 %v12013_v4  ;;  %20540 = vmatprep.mubr.f32.mxu1 %v11327_v14  ;;  %v11346_v19 = vsub.f32 %v11344_v52, %v11345_v26  ;;  %v11354_v9 = vsub.f32 %v11214_v10, %v11214_v10 }
0x155d   : > { %20541 = vmatmul.mubr.f32.gmra.mrb[44].mxu1 %v11337_v57 }
0x155e   : > { %v11347_v59 = vand.u32 4294901760, %v11346_v19  ;;  %v11355_v5 = vand.u32 4294901760, %v11354_v9 }
0x1560   : > { %20543 = vmatprep.mubr.f32.mxu1 %v11347_v59  ;;  %v11356_v36 = vsub.f32 %v11354_v9, %v11355_v5 }
0x1562   : > { %v11357_v56 = vand.u32 4294901760, %v11356_v36 }
0x1564   : > { %20544 = vmatmul.mubr.f32.gmra.mrb[46].mxu1 %v11357_v56 }
0x1565   : > { %20550 = vmatprep.mubr.msk.f32.mxu1 %vm1169_vm0, %v25896_v6 }
0x1568   : > { %20551 = vmatmul.mubr.msk.f32.vlgmr.msra.gmra.mrb[40].mxu1 %vm1169_vm0, %v25882_v3 }
0x1569   : > { %20553 = vmatprep.mubr.msk.f32.mxu1 %vm1169_vm0, %v25932_v48  ;;  %21477 = vmatpush3.bf16.xpose.msra.mxu1 %v22883_v18 }
0x156a   : > { %21479 = vmatprep.subr.bf16.mxu1 %v22881_v13 }
0x156c   : > { %20554 = vmatmul.mubr.msk.f32.gmra.mrb[42].mxu1 %vm1169_vm0, %v25911_v47 }
0x156d   : > { %20556 = vmatprep.mubr.msk.f32.mxu1 %vm1169_vm0, %v25970_v28 }
0x1570   : > { %20557 = vmatmul.mubr.msk.f32.gmra.mrb[44].mxu1 %vm1169_vm0, %v25947_v44 }
0x1571   : > { %20559 = vmatprep.mubr.msk.f32.mxu1 %vm1169_vm0, %v25982_v49 }
0x1574   : > { %20560 = vmatmul.mubr.msk.f32.gmra.mrb[46].mxu1 %vm1169_vm0, %v25996_v63 }
0x1575   : > { %20566 = vmatprep.mubr.f32.mxu1 %v25903_v2 }
0x1578   : > { %20567 = vmatmul.mubr.f32.vlgmr.msra.gmra.mrb[40].mxu1 %v25888_v38 }
0x1579   : > { %20569 = vmatprep.mubr.f32.mxu1 %v25939_v23  ;;  %21481 = vmatpush3.bf16.xpose.msra.mxu1 %v22881_v13 }
0x157a   : > { %21483 = vmatprep.subr.bf16.mxu1 %v22887_v21 }
0x157c   : > { %20570 = vmatmul.mubr.f32.gmra.mrb[42].mxu1 %v25924_v45 }
0x157d   : > { %20572 = vmatprep.mubr.f32.mxu1 %v11324_v54 }
0x1580   : > { %20573 = vmatmul.mubr.f32.gmra.mrb[44].mxu1 %v25962_v35 }
0x1581   : > { %20575 = vmatprep.mubr.f32.mxu1 %v11344_v52 }
0x1584   : > { %20576 = vmatmul.mubr.f32.gmra.mrb[46].mxu1 %v11354_v9 }
0x1585   : > { %20582 = vmatprep.mubr.f32.mxu1 %v11285_v60 }
0x1588   : > { %20583 = vmatmul.mubr.f32.vlgmr.msra.gmra.mrb[40].mxu1 %v11295_v62 }
0x1589   : > { %20585 = vmatprep.mubr.f32.mxu1 %v11305_v30  ;;  %21485 = vmatpush3.bf16.xpose.msra.mxu1 %v22887_v21 }
0x158a   : > { %21487 = vmatprep.subr.bf16.mxu1 %v22881_v13 }
0x158c   : > { %20586 = vmatmul.mubr.f32.gmra.mrb[42].mxu1 %v11315_v46 }
0x158d   : > { %20588 = vmatprep.mubr.f32.mxu1 %v11325_v27 }
0x1590   : > { %20589 = vmatmul.mubr.f32.gmra.mrb[44].mxu1 %v11335_v25 }
0x1591   : > { %20591 = vmatprep.mubr.f32.mxu1 %v11345_v26 }
0x1594   : > { %20592 = vmatmul.mubr.f32.gmra.mrb[46].mxu1 %v11355_v5 }
0x1595   : > { %20598 = vmatprep.mubr.msk.f32.mxu1 %vm1169_vm0, %v25896_v6 }
0x1598   : > { %20599 = vmatmul.mubr.msk.f32.vlgmr.msra.gmra.mrb[40].mxu1 %vm1169_vm0, %v25882_v3 }
0x1599   : > { %20601 = vmatprep.mubr.msk.f32.mxu1 %vm1169_vm0, %v25932_v48  ;;  %21489 = vmatpush3.bf16.xpose.msra.mxu1 %v22881_v13 }
0x159a   : > { %21515 = vmatprep.subr.bf16.mxu1 %v22881_v13 }
0x159c   : > { %20602 = vmatmul.mubr.msk.f32.gmra.mrb[42].mxu1 %vm1169_vm0, %v25911_v47 }
0x159d   : > { %20604 = vmatprep.mubr.msk.f32.mxu1 %vm1169_vm0, %v25970_v28 }
0x15a0   : > { %20605 = vmatmul.mubr.msk.f32.gmra.mrb[44].mxu1 %vm1169_vm0, %v25947_v44 }
0x15a1   : > { %20607 = vmatprep.mubr.msk.f32.mxu1 %vm1169_vm0, %v25982_v49 }
0x15a4   : > { %20608 = vmatmul.mubr.msk.f32.gmra.mrb[46].mxu1 %vm1169_vm0, %v25996_v63 }
0x15a5   : > { %20614 = vmatprep.mubr.msk.f32.mxu1 %vm1169_vm0, %v25896_v6 }
0x15a8   : > { %20615 = vmatmul.mubr.msk.f32.vlgmr.msra.gmra.mrb[40].mxu1 %vm1169_vm0, %v25882_v3 }
0x15a9   : > { %20617 = vmatprep.mubr.msk.f32.mxu1 %vm1169_vm0, %v25932_v48  ;;  %21517 = vmatpush3.bf16.xpose.msra.mxu1 %v22881_v13 }
0x15aa   : > { %21519 = vmatprep.subr.bf16.mxu1 %v22889_v24 }
0x15ac   : > { %20618 = vmatmul.mubr.msk.f32.gmra.mrb[42].mxu1 %vm1169_vm0, %v25911_v47 }
0x15ad   : > { %20620 = vmatprep.mubr.msk.f32.mxu1 %vm1169_vm0, %v25970_v28 }
0x15b0   : > { %20621 = vmatmul.mubr.msk.f32.gmra.mrb[44].mxu1 %vm1169_vm0, %v25947_v44 }
0x15b1   : > { %20623 = vmatprep.mubr.msk.f32.mxu1 %vm1169_vm0, %v25982_v49 }
0x15b4   : > { %20624 = vmatmul.mubr.msk.f32.gmra.mrb[46].mxu1 %vm1169_vm0, %v25996_v63 }
0x15cd   : > { %v11997_v56 = vpop.xlane.xlu0 %11996 }
0x15ce   : > { %vm12017_vm14 = vcmp.eq.f32.partialorder %v25879_v0, %v11997_v56 }
0x15cf   : > { %v12025_v36 = vsel %vm12017_vm14, %v23026_v58, 64 }
0x15d0   : > { %v12047_v10 = vsel %vm1169_vm0, %v12025_v36, 2147483647 }
0x15d1   : > { %v11994_v3 = vpop.xlane.xlu1 %11993  ;;  %v12049_v38 = vshra.s32 %v12047_v10, 16 }
0x15d2   : > { %vm12016_vm15 = vcmp.eq.f32.partialorder %v25893_v40, %v11994_v3 }
0x15d3   : > { %v12024_v28 = vsel %vm12016_vm15, %v23026_v58, 64  ;;  %v12051_v6 = vcvt.s32.f32 %v12049_v38 }
0x15d4   : > { %v12032_v62 = vsel %vm1169_vm0, %v12024_v28, 2147483647 }
0x15d5   : > { %12052 = vmin.xlane.f32.xlu0 %v12051_v6  ;;  %v12003_v2 = vpop.xlane.xlu0 %12002  ;;  %v12034_v47 = vshra.s32 %v12032_v62, 16 }
0x15d6   : > { %vm12019_vm2 = vcmp.eq.f32.partialorder %v25908_v17, %v12003_v2 }
0x15d7   : > { %v12027_v60 = vsel %vm12019_vm2, %v23026_v58, 64  ;;  %v12036_v45 = vcvt.s32.f32 %v12034_v47  ;;  %v12048_v47 = vand.u32 65535, %v12047_v10 }
0x15d8   : > { %v12077_v48 = vsel %vm1169_vm0, %v12027_v60, 2147483647 }
0x15d9   : > { %12037 = vmin.xlane.f32.xlu1 %v12036_v45  ;;  %v12000_v46 = vpop.xlane.xlu1 %11999  ;;  %v12079_v23 = vshra.s32 %v12077_v48, 16 }
0x15da   : > { %vm12018_vm3 = vcmp.eq.f32.partialorder %v25929_v43, %v12000_v46  ;;  %v12050_v46 = vcvt.s32.f32 %v12048_v47 }
0x15db   : > { %v12026_v44 = vsel %vm12018_vm3, %v23026_v58, 64  ;;  %v12081_v30 = vcvt.s32.f32 %v12079_v23  ;;  %v12033_v23 = vand.u32 65535, %v12032_v62 }
0x15dc   : > { %v12062_v35 = vsel %vm1169_vm0, %v12026_v44, 2147483647 }
0x15dd   : > { %12082 = vmin.xlane.f32.xlu0 %v12081_v30  ;;  %v12009_v25 = vpop.xlane.xlu0 %12008  ;;  %v12064_v54 = vshra.s32 %v12062_v35, 16  ;;  %v12063_v10 = vand.u32 65535, %v12062_v35 }
0x15de   : > { %vm12021_vm4 = vcmp.eq.f32.partialorder %v25944_v51, %v12009_v25 }
0x15df   : > { %v12029_v49 = vsel %vm12021_vm4, %v23026_v58, 64  ;;  %v12066_v27 = vcvt.s32.f32 %v12064_v54  ;;  %v12035_v54 = vcvt.s32.f32 %v12033_v23 }
0x15e0   : > { %v12107_v37 = vsel %vm1169_vm0, %v12029_v49, 2147483647  ;;  %v12078_v49 = vand.u32 65535, %v12077_v48 }
0x15e1   : > { %12067 = vmin.xlane.f32.xlu1 %v12066_v27  ;;  %v12006_v42 = vpop.xlane.xlu1 %12005  ;;  %v12109_v52 = vshra.s32 %v12107_v37, 16 }
0x15e2   : > { %vm12020_vm5 = vcmp.eq.f32.partialorder %v25967_v29, %v12006_v42 }
0x15e3   : > { %v12028_v63 = vsel %vm12020_vm5, %v23026_v58, 64  ;;  %v12111_v14 = vcvt.s32.f32 %v12109_v52 }
0x15e4   : > { %v12092_v26 = vsel %vm1169_vm0, %v12028_v63, 2147483647  ;;  %v12080_v63 = vcvt.s32.f32 %v12078_v49 }
0x15e5   : > { %12112 = vmin.xlane.f32.xlu0 %v12111_v14  ;;  %v12012_v4 = vpop.xlane.xlu1 %12011  ;;  %v12094_v57 = vshra.s32 %v12092_v26, 16 }
0x15e6   : > { %vm12022_vm6 = vcmp.eq.f32.partialorder %v25979_v33, %v12012_v4 }
0x15e7   : > { %v12030_v19 = vsel %vm12022_vm6, %v23026_v58, 64  ;;  %v12096_v9 = vcvt.s32.f32 %v12094_v57  ;;  %v12108_v57 = vand.u32 65535, %v12107_v37 }
0x15e8   : > { %v12122_v59 = vsel %vm1169_vm0, %v12030_v19, 2147483647 }
0x15e9   : > { %v12015_v5 = vpop.xlane.xlu0 %12014  ;;  %12097 = vmin.xlane.f32.xlu1 %v12096_v9  ;;  %v12124_v56 = vshra.s32 %v12122_v59, 16 }
0x15ea   : > { %vm12023_vm7 = vcmp.eq.f32.partialorder %v25993_v1, %v12015_v5  ;;  %v12093_v5 = vand.u32 65535, %v12092_v26 }
0x15eb   : > { %v12031_v36 = vsel %vm12023_vm7, %v23026_v58, 64  ;;  %v12126_v3 = vcvt.s32.f32 %v12124_v56 }
0x15ec   : > { %v12137_v38 = vsel %vm1169_vm0, %v12031_v36, 2147483647  ;;  %v12123_v36 = vand.u32 65535, %v12122_v59  ;;  %v27705_v59 = vmax.f32 %v25558_v11, %v25843_v7 }
0x15ed   : > { %12127 = vmin.xlane.f32.xlu1 %v12126_v3  ;;  %v12139_v28 = vshra.s32 %v12137_v38, 16  ;;  %v12138_v47 = vand.u32 65535, %v12137_v38 }
0x15ef   : > { %v12141_v2 = vcvt.s32.f32 %v12139_v28  ;;  %v12140_v49 = vcvt.s32.f32 %v12138_v47 }
0x15f1   : > { %12142 = vmin.xlane.f32.xlu0 %v12141_v2 }
0x1662   : > { %v26099_v60 = vpop.xlane.xlu0 %12052 }
0x1663   : > { %vm12054_vm8 = vcmp.eq.f32.partialorder %v12051_v6, %v26099_v60  ;;  %v12065_v6 = vcvt.s32.f32 %v12063_v10  ;;  %v27708_v10 = vmax.f32 %v25576_v32, %v25858_v31  ;;  %v12059_v32 = vcvt.f32.s32 %v26099_v60 }
0x1664   : > { %v12055_v44 = vsel %vm12054_vm8, %v12050_v46, inf }
0x1665   : > { %12056 = vmin.xlane.f32.xlu0 %v12055_v44 }
0x1666   : > { %v26102_v25 = vpop.xlane.xlu1 %12037 }
0x1667   : > { %vm12039_vm9 = vcmp.eq.f32.partialorder %v12036_v45, %v26102_v25  ;;  %v12110_v45 = vcvt.s32.f32 %v12108_v57  ;;  %v27710_v57 = vmax.f32 %v25586_v15, %v25866_v61 }
0x1668   : > { %v12040_v42 = vsel %vm12039_vm9, %v12035_v54, inf }
0x1669   : > { %12041 = vmin.xlane.f32.xlu1 %v12040_v42 }
0x166a   : > { %v26105_v52 = vpop.xlane.xlu0 %12082 }
0x166b   : > { %vm12084_vm10 = vcmp.eq.f32.partialorder %v12081_v30, %v26105_v52  ;;  %v12095_v30 = vcvt.s32.f32 %v12093_v5  ;;  %v12060_v5 = vshll.u32 %v12059_v32, 16  ;;  %v12089_v15 = vcvt.f32.s32 %v26105_v52 }
0x166c   : > { %v12085_v4 = vsel %vm12084_vm10, %v12080_v63, inf  ;;  %v27707_v63 = vmax.f32 %v25571_v34, %v25854_v53 }
0x166d   : > { %12086 = vmin.xlane.f32.xlu0 %v12085_v4  ;;  %v12090_v47 = vshll.u32 %v12089_v15, 16 }
0x166e   : > { %v26108_v62 = vpop.xlane.xlu1 %12067 }
0x166f   : > { %vm12069_vm11 = vcmp.eq.f32.partialorder %v12066_v27, %v26108_v62  ;;  %v12125_v27 = vcvt.s32.f32 %v12123_v36 }
0x1670   : > { %v12070_v19 = vsel %vm12069_vm11, %v12065_v6, inf }
0x1671   : > { %12071 = vmin.xlane.f32.xlu1 %v12070_v19  ;;  %v27711_v19 = vmax.f32 %v25591_v55, %v25870_v8 }
0x1672   : > { %v26111_v48 = vpop.xlane.xlu0 %12112 }
0x1673   : > { %vm12114_vm12 = vcmp.eq.f32.partialorder %v12111_v14, %v26111_v48  ;;  %v27704_v14 = vmax.f32 %v25553_v22, %v25838_v12 }
0x1674   : > { %v12115_v56 = vsel %vm12114_vm12, %v12110_v45, inf }
0x1675   : > { %12116 = vmin.xlane.f32.xlu0 %v12115_v56 }
0x1676   : > { %v26114_v35 = vpop.xlane.xlu1 %12097 }
0x1677   : > { %vm12099_vm13 = vcmp.eq.f32.partialorder %v12096_v9, %v26114_v35  ;;  %v12104_v32 = vcvt.f32.s32 %v26114_v35 }
0x1678   : > { %v12100_v28 = vsel %vm12099_vm13, %v12095_v30, inf }
0x1679   : > { %12101 = vmin.xlane.f32.xlu1 %v12100_v28 }
0x167a   : > { %v26117_v37 = vpop.xlane.xlu1 %12127 }
0x167b   : > { %v20616_v46 = vpop.f32.mrb[40].mxu1  ;;  %vm12129_vm14 = vcmp.eq.f32.partialorder %v12126_v3, %v26117_v37  ;;  %v27706_v3 = vmax.f32 %v25566_v16, %v25849_v20  ;;  %v27709_v16 = vmax.f32 %v25581_v41, %v25862_v39  ;;  %v12044_v41 = vcvt.f32.s32 %v26102_v25 }
0x167c   : > { %v26123_v26 = vmax.f32 %v27704_v14, %v20616_v46  ;;  %v11930_v23 = vpop.f32.mrb[41].mxu1  ;;  %v12130_v44 = vsel %vm12129_vm14, %v12125_v27, inf  ;;  %v12074_v46 = vcvt.f32.s32 %v26108_v62 }
0x167d   : > { %v26128_v9 = vmax.f32 %v27705_v59, %v11930_v23  ;;  %12131 = vmin.xlane.f32.xlu1 %v12130_v44  ;;  %v12045_v36 = vshll.u32 %v12044_v41, 16 }
0x167e   : > { %v26130_v54 = vpop.xlane.xlu0 %12142 }
0x167f   : > { %v20619_v38 = vpop.f32.mrb[42].mxu1  ;;  %vm12144_vm15 = vcmp.eq.f32.partialorder %v12141_v2, %v26130_v54 }
0x1680   : > { %v26136_v22 = vmax.f32 %v27706_v3, %v20619_v38  ;;  %v11942_v12 = vpop.f32.mrb[43].mxu1  ;;  %v12145_v42 = vsel %vm12144_vm15, %v12140_v49, inf }
0x1681   : > { %v26141_v11 = vmax.f32 %v27707_v63, %v11942_v12  ;;  %12146 = vmin.xlane.f32.xlu0 %v12145_v42  ;;  %v12075_v12 = vshll.u32 %v12074_v46, 16 }
0x1683   : > { %v20622_v7 = vpop.f32.mrb[44].mxu1 }
0x1684   : > { %v26146_v4 = vmax.f32 %v27708_v10, %v20622_v7  ;;  %v11954_v2 = vpop.f32.mrb[45].mxu1 }
0x1685   : > { %v26151_v20 = vmax.f32 %v27709_v16, %v11954_v2 }
0x1687   : > { %v20625_v6 = vpop.f32.mrb[46].mxu1 }
0x1688   : > { %v26156_v34 = vmax.f32 %v27710_v57, %v20625_v6  ;;  %v11966_v53 = vpop.f32.mrb[47].mxu1 }
0x1689   : > { %v26161_v45 = vmax.f32 %v27711_v19, %v11966_v53 }
0x16f2   : > { %v12057_v31 = vpop.xlane.xlu0 %12056 }
0x16f3   : > { %v12058_v39 = vcvt.f32.s32 %v12057_v31 }
0x16f5   : > { %v12061_v56 = vadd.s32 %v12060_v5, %v12058_v39 }
0x16f6   : > { %v12042_v30 = vpop.xlane.xlu1 %12041 }
0x16f7   : > { %v12043_v61 = vcvt.f32.s32 %v12042_v30  ;;  %vm12153_vm2 = vcmp.eq.s32.totalorder %v23026_v58, %v12061_v56 }
0x16f8   : > { %v26168_v28 = vsel %vm12153_vm2, inf, %v25879_v0  ;;  %v26171_v55 = vsel %vm12153_vm2, 1.0, %v27679_v50 }
0x16f9   : > { %v12046_v8 = vadd.s32 %v12045_v36, %v12043_v61  ;;  %v12979_v60 = vsel %vm1169_vm0, %v26168_v28, inf  ;;  %v12180_v25 = vsel %vm1169_vm0, %v26171_v55, 0 }
0x16fa   : > { %12980 = vmin.xlane.f32.xlu0 %v12979_v60  ;;  %v26177_v27 = vsub.f32 %v12180_v25, %v12180_v25  ;;  %v12087_v52 = vpop.xlane.xlu0 %12086  ;;  %v12134_v60 = vcvt.f32.s32 %v26117_v37 }
0x16fb   : > { %v12088_v14 = vcvt.f32.s32 %v12087_v52  ;;  %vm12152_vm3 = vcmp.eq.s32.totalorder %v23026_v58, %v12046_v8 }
0x16fc   : > { %v26182_v0 = vsel %vm12152_vm3, inf, %v25893_v40  ;;  %v26185_v23 = vsel %vm12152_vm3, 1.0, %v27679_v50  ;;  %v12279_v38 = vand.u32 4294901760, %v26177_v27  ;;  %v12119_v40 = vcvt.f32.s32 %v26111_v48 }
0x16fd   : > { %v12091_v44 = vadd.s32 %v12090_v47, %v12088_v14  ;;  %v12976_v59 = vsel %vm1169_vm0, %v26182_v0, inf  ;;  %v12177_v49 = vsel %vm1169_vm0, %v26185_v23, 0 }
0x16fe   : > { %12977 = vmin.xlane.f32.xlu1 %v12976_v59  ;;  %v12072_v62 = vpop.xlane.xlu1 %12071  ;;  %v26192_v3 = vsub.f32 %v12177_v49, %v12177_v49  ;;  %v12280_v6 = vsub.f32 %v26177_v27, %v12279_v38  ;;  %v12120_v19 = vshll.u32 %v12119_v40, 16  ;;  %v12149_v40 = vcvt.f32.s32 %v26130_v54 }
0x16ff   : > { %v12073_v42 = vcvt.f32.s32 %v12072_v62  ;;  %vm12155_vm4 = vcmp.eq.s32.totalorder %v23026_v58, %v12091_v44 }
0x1700   : > { %v26197_v63 = vsel %vm12155_vm4, inf, %v25908_v17  ;;  %v26200_v7 = vsel %vm12155_vm4, 1.0, %v27679_v50  ;;  %v12269_v10 = vand.u32 4294901760, %v26192_v3  ;;  %v12281_v15 = vand.u32 4294901760, %v12280_v6 }
0x1701   : > { %v12076_v2 = vadd.s32 %v12075_v12, %v12073_v42  ;;  %v12985_v16 = vsel %vm1169_vm0, %v26197_v63, inf  ;;  %v12186_v48 = vsel %vm1169_vm0, %v26200_v7, 0  ;;  %v12135_v12 = vshll.u32 %v12134_v60, 16 }
0x1702   : > { %12986 = vmin.xlane.f32.xlu0 %v12985_v16  ;;  %v12117_v57 = vpop.xlane.xlu0 %12116  ;;  %v12270_v17 = vsub.f32 %v26192_v3, %v12269_v10  ;;  %v26213_v53 = vsub.f32 %v12186_v48, %v12186_v48 }
0x1703   : > { %v12118_v31 = vcvt.f32.s32 %v12117_v57  ;;  %vm12154_vm5 = vcmp.eq.s32.totalorder %v23026_v58, %v12076_v2 }
0x1704   : > { %v12271_v5 = vand.u32 4294901760, %v12270_v17  ;;  %v26218_v41 = vsel %vm12154_vm5, inf, %v25929_v43  ;;  %v26221_v39 = vsel %vm12154_vm5, 1.0, %v27679_v50  ;;  %v12299_v56 = vand.u32 4294901760, %v26213_v53 }
0x1705   : > { %v12121_v30 = vadd.s32 %v12120_v19, %v12118_v31  ;;  %v12982_v36 = vsel %vm1169_vm0, %v26218_v41, inf  ;;  %v12183_v35 = vsel %vm1169_vm0, %v26221_v39, 0  ;;  %v12105_v43 = vshll.u32 %v12104_v32, 16 }
0x1706   : > { %20630 = vmatprep.mubr.f32.mxu0 %v12271_v5  ;;  %12983 = vmin.xlane.f32.xlu1 %v12982_v36  ;;  %v12102_v61 = vpop.xlane.xlu1 %12101  ;;  %v26228_v8 = vsub.f32 %v12183_v35, %v12183_v35  ;;  %v12300_v14 = vsub.f32 %v26213_v53, %v12299_v56  ;;  %v12150_v5 = vshll.u32 %v12149_v40, 16 }
0x1707   : > { %v12103_v25 = vcvt.f32.s32 %v12102_v61  ;;  %20631 = vmatmul.mubr.f32.vlgmr.msra.gmra.mrb[48].mxu0 %v12281_v15  ;;  %vm12157_vm6 = vcmp.eq.s32.totalorder %v23026_v58, %v12121_v30 }
0x1708   : > { %v26233_v52 = vsel %vm12157_vm6, inf, %v25944_v51  ;;  %v26236_v47 = vsel %vm12157_vm6, 1.0, %v27679_v50  ;;  %v12289_v46 = vand.u32 4294901760, %v26228_v8  ;;  %21497 = vmatpush3.bf16.xpose.msra.mxu0 %v22889_v24  ;;  %v12301_v48 = vand.u32 4294901760, %v12300_v14 }
0x1709   : > { %v12106_v44 = vadd.s32 %v12105_v43, %v12103_v25  ;;  %v12991_v37 = vsel %vm1169_vm0, %v26233_v52, inf  ;;  %v12192_v59 = vsel %vm1169_vm0, %v26236_v47, 0  ;;  %21499 = vmatprep.subr.bf16.mxu0 %v22883_v18 }
0x170a   : > { %12992 = vmin.xlane.f32.xlu0 %v12991_v37  ;;  %v12132_v51 = vpop.xlane.xlu1 %12131  ;;  %v12290_v49 = vsub.f32 %v26228_v8, %v12289_v46  ;;  %v26251_v62 = vsub.f32 %v12192_v59, %v12192_v59 }
0x170b   : > { %v12133_v42 = vcvt.f32.s32 %v12132_v51  ;;  %vm12156_vm7 = vcmp.eq.s32.totalorder %v23026_v58, %v12106_v44 }
0x170c   : > { %v12291_v2 = vand.u32 4294901760, %v12290_v49  ;;  %v26256_v16 = vsel %vm12156_vm7, inf, %v25967_v29  ;;  %v26259_v6 = vsel %vm12156_vm7, 1.0, %v27679_v50  ;;  %v12319_v54 = vand.u32 4294901760, %v26251_v62 }
0x170d   : > { %v12136_v57 = vadd.s32 %v12135_v12, %v12133_v42  ;;  %v12988_v17 = vsel %vm1169_vm0, %v26256_v16, inf  ;;  %v12189_v19 = vsel %vm1169_vm0, %v26259_v6, 0 }
0x170e   : > { %v12147_v32 = vpop.xlane.xlu0 %12146  ;;  %20633 = vmatprep.mubr.f32.mxu0 %v12291_v2  ;;  %12989 = vmin.xlane.f32.xlu1 %v12988_v17  ;;  %v12308_v31 = vsub.f32 %v12189_v19, %v12189_v19  ;;  %v12320_v43 = vsub.f32 %v26251_v62, %v12319_v54 }
0x170f   : > { %vm12158_vm8 = vcmp.eq.s32.totalorder %v23026_v58, %v12136_v57  ;;  %v12148_v29 = vcvt.f32.s32 %v12147_v32  ;;  %20634 = vmatmul.mubr.f32.gmra.mrb[50].mxu0 %v12301_v48 }
0x1710   : > { %v26268_v30 = vsel %vm12158_vm8, 1.0, %v27679_v50  ;;  %v26271_v36 = vsel %vm12158_vm8, inf, %v25979_v33  ;;  %v12309_v15 = vand.u32 4294901760, %v12308_v31  ;;  %v12321_v49 = vand.u32 4294901760, %v12320_v43 }
0x1711   : > { %v12151_v35 = vadd.s32 %v12150_v5, %v12148_v29  ;;  %v12994_v61 = vsel %vm1169_vm0, %v26271_v36, inf  ;;  %v12195_v60 = vsel %vm1169_vm0, %v26268_v30, 0 }
0x1712   : > { %12995 = vmin.xlane.f32.xlu1 %v12994_v61  ;;  %v12310_v25 = vsub.f32 %v12308_v31, %v12309_v15  ;;  %v12328_v14 = vsub.f32 %v12195_v60, %v12195_v60 }
0x1713   : > { %vm12159_vm9 = vcmp.eq.s32.totalorder %v23026_v58, %v12151_v35 }
0x1714   : > { %v26282_v33 = vsel %vm12159_vm9, 1.0, %v27679_v50  ;;  %v26285_v44 = vsel %vm12159_vm9, inf, %v25993_v1  ;;  %v12311_v37 = vand.u32 4294901760, %v12310_v25  ;;  %v12329_v59 = vand.u32 4294901760, %v12328_v14 }
0x1715   : > { %v12997_v51 = vsel %vm1169_vm0, %v26285_v44, inf  ;;  %v12198_v12 = vsel %vm1169_vm0, %v26282_v33, 0 }
0x1716   : > { %12998 = vmin.xlane.f32.xlu0 %v12997_v51  ;;  %20636 = vmatprep.mubr.f32.mxu0 %v12311_v37  ;;  %v12330_v40 = vsub.f32 %v12328_v14, %v12329_v59  ;;  %v12338_v42 = vsub.f32 %v12198_v12, %v12198_v12 }
0x1717   : > { %20637 = vmatmul.mubr.f32.gmra.mrb[52].mxu0 %v12321_v49 }
0x1718   : > { %v12331_v2 = vand.u32 4294901760, %v12330_v40  ;;  %v12339_v48 = vand.u32 4294901760, %v12338_v42 }
0x171a   : > { %20639 = vmatprep.mubr.f32.mxu0 %v12331_v2  ;;  %v12340_v57 = vsub.f32 %v12338_v42, %v12339_v48 }
0x171c   : > { %v12341_v1 = vand.u32 4294901760, %v12340_v57 }
0x171e   : > { %20640 = vmatmul.mubr.f32.gmra.mrb[54].mxu0 %v12341_v1 }
0x171f   : > { %20646 = vmatprep.mubr.msk.f32.mxu0 %vm1169_vm0, %v26185_v23 }
0x1722   : > { %20647 = vmatmul.mubr.msk.f32.vlgmr.msra.gmra.mrb[48].mxu0 %vm1169_vm0, %v26171_v55 }
0x1723   : > { %20649 = vmatprep.mubr.msk.f32.mxu0 %vm1169_vm0, %v26221_v39  ;;  %21501 = vmatpush3.bf16.xpose.msra.mxu0 %v22883_v18 }
0x1724   : > { %21503 = vmatprep.subr.bf16.mxu0 %v22881_v13 }
0x1726   : > { %20650 = vmatmul.mubr.msk.f32.gmra.mrb[50].mxu0 %vm1169_vm0, %v26200_v7 }
0x1727   : > { %20652 = vmatprep.mubr.msk.f32.mxu0 %vm1169_vm0, %v26259_v6 }
0x172a   : > { %20653 = vmatmul.mubr.msk.f32.gmra.mrb[52].mxu0 %vm1169_vm0, %v26236_v47 }
0x172b   : > { %20655 = vmatprep.mubr.msk.f32.mxu0 %vm1169_vm0, %v26268_v30 }
0x172e   : > { %20656 = vmatmul.mubr.msk.f32.gmra.mrb[54].mxu0 %vm1169_vm0, %v26282_v33 }
0x172f   : > { %20662 = vmatprep.mubr.f32.mxu0 %v26192_v3 }
0x1732   : > { %20663 = vmatmul.mubr.f32.vlgmr.msra.gmra.mrb[48].mxu0 %v26177_v27 }
0x1733   : > { %20665 = vmatprep.mubr.f32.mxu0 %v26228_v8  ;;  %21505 = vmatpush3.bf16.xpose.msra.mxu0 %v22881_v13 }
0x1734   : > { %21507 = vmatprep.subr.bf16.mxu0 %v22887_v21 }
0x1736   : > { %20666 = vmatmul.mubr.f32.gmra.mrb[50].mxu0 %v26213_v53 }
0x1737   : > { %20668 = vmatprep.mubr.f32.mxu0 %v12308_v31 }
0x173a   : > { %20669 = vmatmul.mubr.f32.gmra.mrb[52].mxu0 %v26251_v62 }
0x173b   : > { %20671 = vmatprep.mubr.f32.mxu0 %v12328_v14 }
0x173e   : > { %20672 = vmatmul.mubr.f32.gmra.mrb[54].mxu0 %v12338_v42 }
0x173f   : > { %20678 = vmatprep.mubr.f32.mxu0 %v12269_v10 }
0x1742   : > { %20679 = vmatmul.mubr.f32.vlgmr.msra.gmra.mrb[48].mxu0 %v12279_v38 }
0x1743   : > { %20681 = vmatprep.mubr.f32.mxu0 %v12289_v46  ;;  %21509 = vmatpush3.bf16.xpose.msra.mxu0 %v22887_v21 }
0x1744   : > { %21511 = vmatprep.subr.bf16.mxu0 %v22881_v13 }
0x1746   : > { %20682 = vmatmul.mubr.f32.gmra.mrb[50].mxu0 %v12299_v56 }
0x1747   : > { %20684 = vmatprep.mubr.f32.mxu0 %v12309_v15 }
0x174a   : > { %20685 = vmatmul.mubr.f32.gmra.mrb[52].mxu0 %v12319_v54 }
0x174b   : > { %20687 = vmatprep.mubr.f32.mxu0 %v12329_v59 }
0x174e   : > { %20688 = vmatmul.mubr.f32.gmra.mrb[54].mxu0 %v12339_v48 }
0x174f   : > { %20694 = vmatprep.mubr.msk.f32.mxu0 %vm1169_vm0, %v26185_v23 }
0x1752   : > { %20695 = vmatmul.mubr.msk.f32.vlgmr.msra.gmra.mrb[48].mxu0 %vm1169_vm0, %v26171_v55 }
0x1753   : > { %20697 = vmatprep.mubr.msk.f32.mxu0 %vm1169_vm0, %v26221_v39  ;;  %21513 = vmatpush3.bf16.xpose.msra.mxu0 %v22881_v13 }
0x1754   : > { %21539 = vmatprep.subr.bf16.mxu0 %v22881_v13 }
0x1756   : > { %20698 = vmatmul.mubr.msk.f32.gmra.mrb[50].mxu0 %vm1169_vm0, %v26200_v7 }
0x1757   : > { %20700 = vmatprep.mubr.msk.f32.mxu0 %vm1169_vm0, %v26259_v6 }
0x175a   : > { %20701 = vmatmul.mubr.msk.f32.gmra.mrb[52].mxu0 %vm1169_vm0, %v26236_v47 }
0x175b   : > { %20703 = vmatprep.mubr.msk.f32.mxu0 %vm1169_vm0, %v26268_v30 }
0x175e   : > { %20704 = vmatmul.mubr.msk.f32.gmra.mrb[54].mxu0 %vm1169_vm0, %v26282_v33 }
0x175f   : > { %20710 = vmatprep.mubr.msk.f32.mxu0 %vm1169_vm0, %v26185_v23 }
0x1762   : > { %20711 = vmatmul.mubr.msk.f32.vlgmr.msra.gmra.mrb[48].mxu0 %vm1169_vm0, %v26171_v55 }
0x1763   : > { %20713 = vmatprep.mubr.msk.f32.mxu0 %vm1169_vm0, %v26221_v39  ;;  %21541 = vmatpush3.bf16.xpose.msra.mxu0 %v22881_v13 }
0x1764   : > { %21543 = vmatprep.subr.bf16.mxu0 %v22889_v24 }
0x1766   : > { %20714 = vmatmul.mubr.msk.f32.gmra.mrb[50].mxu0 %vm1169_vm0, %v26200_v7 }
0x1767   : > { %20716 = vmatprep.mubr.msk.f32.mxu0 %vm1169_vm0, %v26259_v6 }
0x176a   : > { %20717 = vmatmul.mubr.msk.f32.gmra.mrb[52].mxu0 %vm1169_vm0, %v26236_v47 }
0x176b   : > { %20719 = vmatprep.mubr.msk.f32.mxu0 %vm1169_vm0, %v26268_v30 }
0x176e   : > { %20720 = vmatmul.mubr.msk.f32.gmra.mrb[54].mxu0 %vm1169_vm0, %v26282_v33 }
0x1787   : > { %v12981_v55 = vpop.xlane.xlu0 %12980 }
0x1788   : > { %vm13001_vm10 = vcmp.eq.f32.partialorder %v26168_v28, %v12981_v55 }
0x1789   : > { %v13009_v27 = vsel %vm13001_vm10, %v23026_v58, 64 }
0x178a   : > { %v13031_v23 = vsel %vm1169_vm0, %v13009_v27, 2147483647 }
0x178b   : > { %v13033_v38 = vshra.s32 %v13031_v23, 16  ;;  %v12978_v3 = vpop.xlane.xlu1 %12977  ;;  %v13032_v57 = vand.u32 65535, %v13031_v23 }
0x178c   : > { %vm13000_vm11 = vcmp.eq.f32.partialorder %v26182_v0, %v12978_v3 }
0x178d   : > { %v13008_v7 = vsel %vm13000_vm11, %v23026_v58, 64  ;;  %v13035_v10 = vcvt.s32.f32 %v13033_v38  ;;  %v13034_v27 = vcvt.s32.f32 %v13032_v57 }
0x178e   : > { %v13016_v53 = vsel %vm1169_vm0, %v13008_v7, 2147483647 }
0x178f   : > { %v13018_v39 = vshra.s32 %v13016_v53, 16  ;;  %13036 = vmin.xlane.f32.xlu0 %v13035_v10  ;;  %v12987_v56 = vpop.xlane.xlu0 %12986  ;;  %v13017_v1 = vand.u32 65535, %v13016_v53 }
0x1790   : > { %vm13003_vm12 = vcmp.eq.f32.partialorder %v26197_v63, %v12987_v56 }
0x1791   : > { %v13011_v8 = vsel %vm13003_vm12, %v23026_v58, 64  ;;  %v13020_v47 = vcvt.s32.f32 %v13018_v39  ;;  %v13019_v39 = vcvt.s32.f32 %v13017_v1 }
0x1792   : > { %v13061_v46 = vsel %vm1169_vm0, %v13011_v8, 2147483647 }
0x1793   : > { %v13063_v62 = vshra.s32 %v13061_v46, 16  ;;  %13021 = vmin.xlane.f32.xlu1 %v13020_v47  ;;  %v12984_v6 = vpop.xlane.xlu1 %12983  ;;  %v13062_v3 = vand.u32 65535, %v13061_v46 }
0x1794   : > { %vm13002_vm13 = vcmp.eq.f32.partialorder %v26218_v41, %v12984_v6 }
0x1795   : > { %v13010_v17 = vsel %vm13002_vm13, %v23026_v58, 64  ;;  %v13065_v19 = vcvt.s32.f32 %v13063_v62  ;;  %v13064_v23 = vcvt.s32.f32 %v13062_v3 }
0x1796   : > { %v13046_v54 = vsel %vm1169_vm0, %v13010_v17, 2147483647 }
0x1797   : > { %v13048_v32 = vshra.s32 %v13046_v54, 16  ;;  %13066 = vmin.xlane.f32.xlu0 %v13065_v19  ;;  %v12993_v31 = vpop.xlane.xlu0 %12992  ;;  %v13047_v8 = vand.u32 65535, %v13046_v54 }
0x1798   : > { %vm13005_vm14 = vcmp.eq.f32.partialorder %v26233_v52, %v12993_v31 }
0x1799   : > { %v13013_v5 = vsel %vm13005_vm14, %v23026_v58, 64  ;;  %v13050_v29 = vcvt.s32.f32 %v13048_v32  ;;  %v13049_v17 = vcvt.s32.f32 %v13047_v8 }
0x179a   : > { %v13091_v30 = vsel %vm1169_vm0, %v13013_v5, 2147483647 }
0x179b   : > { %v13093_v15 = vshra.s32 %v13091_v30, 16  ;;  %13051 = vmin.xlane.f32.xlu1 %v13050_v29  ;;  %v12990_v35 = vpop.xlane.xlu1 %12989  ;;  %v13092_v6 = vand.u32 65535, %v13091_v30 }
0x179c   : > { %vm13004_vm15 = vcmp.eq.f32.partialorder %v26256_v16, %v12990_v35 }
0x179d   : > { %v13012_v61 = vsel %vm13004_vm15, %v23026_v58, 64  ;;  %v13095_v43 = vcvt.s32.f32 %v13093_v15  ;;  %v13094_v31 = vcvt.s32.f32 %v13092_v6 }
0x179e   : > { %v13076_v60 = vsel %vm1169_vm0, %v13012_v61, 2147483647 }
0x179f   : > { %v13078_v25 = vshra.s32 %v13076_v60, 16  ;;  %13096 = vmin.xlane.f32.xlu0 %v13095_v43  ;;  %v12996_v14 = vpop.xlane.xlu1 %12995  ;;  %v13077_v32 = vand.u32 65535, %v13076_v60 }
0x17a0   : > { %vm13006_vm2 = vcmp.eq.f32.partialorder %v26271_v36, %v12996_v14 }
0x17a1   : > { %v13014_v33 = vsel %vm13006_vm2, %v23026_v58, 64  ;;  %v13080_v37 = vcvt.s32.f32 %v13078_v25  ;;  %v13079_v15 = vcvt.s32.f32 %v13077_v32 }
0x17a2   : > { %v13106_v59 = vsel %vm1169_vm0, %v13014_v33, 2147483647 }
0x17a3   : > { %v13108_v51 = vshra.s32 %v13106_v59, 16  ;;  %v12999_v49 = vpop.xlane.xlu0 %12998  ;;  %13081 = vmin.xlane.f32.xlu1 %v13080_v37  ;;  %v13107_v5 = vand.u32 65535, %v13106_v59 }
0x17a4   : > { %vm13007_vm3 = vcmp.eq.f32.partialorder %v26285_v44, %v12999_v49 }
0x17a5   : > { %v13015_v12 = vsel %vm13007_vm3, %v23026_v58, 64  ;;  %v13110_v40 = vcvt.s32.f32 %v13108_v51  ;;  %v13109_v61 = vcvt.s32.f32 %v13107_v5 }
0x17a6   : > { %v13121_v42 = vsel %vm1169_vm0, %v13015_v12, 2147483647 }
0x17a7   : > { %v13123_v2 = vshra.s32 %v13121_v42, 16  ;;  %13111 = vmin.xlane.f32.xlu1 %v13110_v40  ;;  %v13122_v35 = vand.u32 65535, %v13121_v42 }
0x17a9   : > { %v13125_v48 = vcvt.s32.f32 %v13123_v2  ;;  %v13124_v59 = vcvt.s32.f32 %v13122_v35 }
0x17ab   : > { %13126 = vmin.xlane.f32.xlu0 %v13125_v48 }
0x181c   : > { %v26388_v55 = vpop.xlane.xlu0 %13036 }
0x181d   : > { %vm13038_vm4 = vcmp.eq.f32.partialorder %v13035_v10, %v26388_v55 }
0x181e   : > { %v13039_v38 = vsel %vm13038_vm4, %v13034_v27, inf }
0x181f   : > { %13040 = vmin.xlane.f32.xlu0 %v13039_v38 }
0x1820   : > { %v26391_v7 = vpop.xlane.xlu1 %13021 }
0x1821   : > { %vm13023_vm5 = vcmp.eq.f32.partialorder %v13020_v47, %v26391_v7 }
0x1822   : > { %v13024_v56 = vsel %vm13023_vm5, %v13019_v39, inf }
0x1823   : > { %13025 = vmin.xlane.f32.xlu1 %v13024_v56  ;;  %v13043_v56 = vcvt.f32.s32 %v26388_v55 }
0x1824   : > { %v26394_v62 = vpop.xlane.xlu0 %13066 }
0x1825   : > { %vm13068_vm6 = vcmp.eq.f32.partialorder %v13065_v19, %v26394_v62 }
0x1826   : > { %v13069_v53 = vsel %vm13068_vm6, %v13064_v23, inf  ;;  %v13044_v23 = vshll.u32 %v13043_v56, 16 }
0x1827   : > { %13070 = vmin.xlane.f32.xlu0 %v13069_v53  ;;  %v13028_v53 = vcvt.f32.s32 %v26391_v7 }
0x1828   : > { %v26397_v10 = vpop.xlane.xlu1 %13051 }
0x1829   : > { %vm13053_vm7 = vcmp.eq.f32.partialorder %v13050_v29, %v26397_v10  ;;  %v13029_v32 = vshll.u32 %v13028_v53, 16 }
0x182a   : > { %v13054_v46 = vsel %vm13053_vm7, %v13049_v17, inf }
0x182b   : > { %13055 = vmin.xlane.f32.xlu1 %v13054_v46 }
0x182c   : > { %v26400_v47 = vpop.xlane.xlu0 %13096 }
0x182d   : > { %vm13098_vm8 = vcmp.eq.f32.partialorder %v13095_v43, %v26400_v47 }
0x182e   : > { %v13099_v54 = vsel %vm13098_vm8, %v13094_v31, inf  ;;  %v13073_v31 = vcvt.f32.s32 %v26394_v62 }
0x182f   : > { %13100 = vmin.xlane.f32.xlu0 %v13099_v54 }
0x1830   : > { %v26403_v19 = vpop.xlane.xlu1 %13081 }
0x1831   : > { %vm13083_vm9 = vcmp.eq.f32.partialorder %v13080_v37, %v26403_v19 }
0x1832   : > { %v13084_v30 = vsel %vm13083_vm9, %v13079_v15, inf }
0x1833   : > { %13085 = vmin.xlane.f32.xlu1 %v13084_v30 }
0x1834   : > { %v26406_v29 = vpop.xlane.xlu1 %13111 }
0x1835   : > { %vm13113_vm10 = vcmp.eq.f32.partialorder %v13110_v40, %v26406_v29  ;;  %v26409_v60 = vpop.f32.mrb[48].mxu0 }
0x1836   : > { %v26413_v25 = vpop.f32.mrb[49].mxu0  ;;  %v13114_v14 = vsel %vm13113_vm10, %v13109_v61, inf  ;;  %v13074_v61 = vshll.u32 %v13073_v31, 16 }
0x1837   : > { %13115 = vmin.xlane.f32.xlu1 %v13114_v14  ;;  %v13058_v14 = vcvt.f32.s32 %v26397_v10 }
0x1838   : > { %v26417_v37 = vpop.xlane.xlu0 %13126 }
0x1839   : > { %vm13128_vm11 = vcmp.eq.f32.partialorder %v13125_v48, %v26417_v37  ;;  %v26420_v51 = vpop.f32.mrb[50].mxu0 }
0x183a   : > { %v26424_v12 = vpop.f32.mrb[51].mxu0  ;;  %v13129_v40 = vsel %vm13128_vm11, %v13124_v59, inf }
0x183b   : > { %13130 = vmin.xlane.f32.xlu0 %v13129_v40 }
0x183d   : > { %v26428_v2 = vpop.f32.mrb[52].mxu0 }
0x183e   : > { %v26432_v1 = vpop.f32.mrb[53].mxu0 }
0x1841   : > { %v26436_v27 = vpop.f32.mrb[54].mxu0 }
0x1842   : > { %v26440_v3 = vpop.f32.mrb[55].mxu0 }
0x18ac   : > { %v13041_v8 = vpop.xlane.xlu0 %13040 }
0x18ad   : > { %v13042_v6 = vcvt.f32.s32 %v13041_v8 }
0x18af   : > { %v13045_v17 = vadd.s32 %v13044_v23, %v13042_v6 }
0x18b0   : > { %v13026_v46 = vpop.xlane.xlu1 %13025 }
0x18b1   : > { %vm13137_vm12 = vcmp.eq.s32.totalorder %v23026_v58, %v13045_v17  ;;  %v13027_v54 = vcvt.f32.s32 %v13026_v46  ;;  %v13059_v17 = vshll.u32 %v13058_v14, 16  ;;  %v13103_v46 = vcvt.f32.s32 %v26400_v47 }
0x18b2   : > { %v26449_v5 = vsel %vm13137_vm12, 1.0, %v27679_v50  ;;  %v26452_v15 = vsel %vm13137_vm12, inf, %v26168_v28 }
0x18b3   : > { %v13164_v55 = vsel %vm1169_vm0, %v26449_v5, 0  ;;  %v13030_v30 = vadd.s32 %v13029_v32, %v13027_v54  ;;  %v13963_v7 = vsel %vm1169_vm0, %v26452_v15, inf  ;;  %v13104_v14 = vshll.u32 %v13103_v46, 16 }
0x18b4   : > { %v26458_v35 = vsub.f32 %v13164_v55, %v13164_v55  ;;  %13964 = vmin.xlane.f32.xlu0 %v13963_v7  ;;  %v13071_v62 = vpop.xlane.xlu0 %13070 }
0x18b5   : > { %vm13136_vm13 = vcmp.eq.s32.totalorder %v23026_v58, %v13030_v30  ;;  %v13072_v59 = vcvt.f32.s32 %v13071_v62 }
0x18b6   : > { %v26463_v28 = vsel %vm13136_vm13, 1.0, %v27679_v50  ;;  %v26466_v40 = vsel %vm13136_vm13, inf, %v26182_v0  ;;  %v13263_v56 = vand.u32 4294901760, %v26458_v35 }
0x18b7   : > { %v13075_v8 = vadd.s32 %v13074_v61, %v13072_v59  ;;  %v13960_v23 = vsel %vm1169_vm0, %v26466_v40, inf  ;;  %v13161_v53 = vsel %vm1169_vm0, %v26463_v28, 0  ;;  %v13088_v59 = vcvt.f32.s32 %v26403_v19 }
0x18b8   : > { %13961 = vmin.xlane.f32.xlu1 %v13960_v23  ;;  %v13056_v10 = vpop.xlane.xlu1 %13055  ;;  %v26473_v6 = vsub.f32 %v13161_v53, %v13161_v53  ;;  %v13264_v7 = vsub.f32 %v26458_v35, %v13263_v56 }
0x18b9   : > { %vm13139_vm14 = vcmp.eq.s32.totalorder %v23026_v58, %v13075_v8  ;;  %v13057_v0 = vcvt.f32.s32 %v13056_v10 }
0x18ba   : > { %v26478_v32 = vsel %vm13139_vm14, 1.0, %v27679_v50  ;;  %v26481_v31 = vsel %vm13139_vm14, inf, %v26197_v63  ;;  %v13253_v54 = vand.u32 4294901760, %v26473_v6 }
0x18bb   : > { %v13060_v55 = vadd.s32 %v13059_v17, %v13057_v0  ;;  %v13969_v30 = vsel %vm1169_vm0, %v26481_v31, inf  ;;  %v13170_v47 = vsel %vm1169_vm0, %v26478_v32, 0 }
0x18bc   : > { %13970 = vmin.xlane.f32.xlu0 %v13969_v30  ;;  %v13101_v62 = vpop.xlane.xlu0 %13100  ;;  %v13254_v63 = vsub.f32 %v26473_v6, %v13253_v54  ;;  %v26494_v61 = vsub.f32 %v13170_v47, %v13170_v47  ;;  %v13265_v47 = vand.u32 4294901760, %v13264_v7 }
0x18bd   : > { %vm13138_vm15 = vcmp.eq.s32.totalorder %v23026_v58, %v13060_v55  ;;  %v13102_v8 = vcvt.f32.s32 %v13101_v62  ;;  %v13089_v62 = vshll.u32 %v13088_v59, 16 }
0x18be   : > { %v26499_v23 = vsel %vm13138_vm15, 1.0, %v27679_v50  ;;  %v13255_v53 = vand.u32 4294901760, %v13254_v63  ;;  %v26502_v10 = vsel %vm13138_vm15, inf, %v26218_v41  ;;  %v13283_v17 = vand.u32 4294901760, %v26494_v61 }
0x18bf   : > { %v13105_v0 = vadd.s32 %v13104_v14, %v13102_v8  ;;  %v13966_v30 = vsel %vm1169_vm0, %v26502_v10, inf  ;;  %v13167_v19 = vsel %vm1169_vm0, %v26499_v23, 0  ;;  %v13118_v63 = vcvt.f32.s32 %v26406_v29 }
0x18c0   : > { %20726 = vmatprep.mubr.f32.mxu1 %v13255_v53  ;;  %13967 = vmin.xlane.f32.xlu1 %v13966_v30  ;;  %v13086_v46 = vpop.xlane.xlu1 %13085  ;;  %v26509_v55 = vsub.f32 %v13167_v19, %v13167_v19  ;;  %v13284_v53 = vsub.f32 %v26494_v61, %v13283_v17 }
0x18c1   : > { %vm13141_vm2 = vcmp.eq.s32.totalorder %v23026_v58, %v13105_v0  ;;  %v13087_v41 = vcvt.f32.s32 %v13086_v46  ;;  %20727 = vmatmul.mubr.f32.vlgmr.msra.gmra.mrb[48].mxu1 %v13265_v47  ;;  %v13119_v19 = vshll.u32 %v13118_v63, 16  ;;  %v13133_v46 = vcvt.f32.s32 %v26417_v37 }
0x18c2   : > { %v26514_v14 = vsel %vm13141_vm2, 1.0, %v27679_v50  ;;  %v26517_v7 = vsel %vm13141_vm2, inf, %v26233_v52  ;;  %v13273_v8 = vand.u32 4294901760, %v26509_v55  ;;  %21521 = vmatpush3.bf16.xpose.msra.mxu1 %v22889_v24 }
0x18c3   : > { %v13090_v59 = vadd.s32 %v13089_v62, %v13087_v41  ;;  %v13975_v29 = vsel %vm1169_vm0, %v26517_v7, inf  ;;  %v13176_v0 = vsel %vm1169_vm0, %v26514_v14, 0  ;;  %21523 = vmatprep.subr.bf16.mxu1 %v22883_v18 }
0x18c4   : > { %13976 = vmin.xlane.f32.xlu0 %v13975_v29  ;;  %v13116_v52 = vpop.xlane.xlu1 %13115  ;;  %v13274_v30 = vsub.f32 %v26509_v55, %v13273_v8  ;;  %v26532_v47 = vsub.f32 %v13176_v0, %v13176_v0  ;;  %v13285_v29 = vand.u32 4294901760, %v13284_v53 }
0x18c5   : > { %vm13140_vm3 = vcmp.eq.s32.totalorder %v23026_v58, %v13090_v59  ;;  %v13117_v62 = vcvt.f32.s32 %v13116_v52  ;;  %v13134_v52 = vshll.u32 %v13133_v46, 16 }
0x18c6   : > { %v26537_v41 = vsel %vm13140_vm3, 1.0, %v27679_v50  ;;  %v13275_v39 = vand.u32 4294901760, %v13274_v30  ;;  %v26540_v38 = vsel %vm13140_vm3, inf, %v26256_v16  ;;  %v13303_v37 = vand.u32 4294901760, %v26532_v47 }
0x18c7   : > { %v13120_v48 = vadd.s32 %v13119_v19, %v13117_v62  ;;  %v13972_v57 = vsel %vm1169_vm0, %v26540_v38, inf  ;;  %v13173_v63 = vsel %vm1169_vm0, %v26537_v41, 0 }
0x18c8   : > { %v13131_v0 = vpop.xlane.xlu0 %13130  ;;  %20729 = vmatprep.mubr.f32.mxu1 %v13275_v39  ;;  %13973 = vmin.xlane.f32.xlu1 %v13972_v57  ;;  %v13292_v59 = vsub.f32 %v13173_v63, %v13173_v63  ;;  %v13304_v57 = vsub.f32 %v26532_v47, %v13303_v37 }
0x18c9   : > { %vm13142_vm4 = vcmp.eq.s32.totalorder %v23026_v58, %v13120_v48  ;;  %v13132_v30 = vcvt.f32.s32 %v13131_v0  ;;  %20730 = vmatmul.mubr.f32.gmra.mrb[50].mxu1 %v13285_v29 }
0x18ca   : > { %v26549_v16 = vsel %vm13142_vm4, 1.0, %v27679_v50  ;;  %v26552_v53 = vsel %vm13142_vm4, inf, %v26271_v36  ;;  %v13293_v19 = vand.u32 4294901760, %v13292_v59 }
0x18cb   : > { %v13135_v62 = vadd.s32 %v13134_v52, %v13132_v30  ;;  %v13978_v42 = vsel %vm1169_vm0, %v26552_v53, inf  ;;  %v13179_v48 = vsel %vm1169_vm0, %v26549_v16, 0  ;;  %v13305_v30 = vand.u32 4294901760, %v13304_v57 }
0x18cc   : > { %13979 = vmin.xlane.f32.xlu1 %v13978_v42  ;;  %v13294_v39 = vsub.f32 %v13292_v59, %v13293_v19  ;;  %v13312_v46 = vsub.f32 %v13179_v48, %v13179_v48 }
0x18cd   : > { %vm13143_vm5 = vcmp.eq.s32.totalorder %v23026_v58, %v13135_v62 }
0x18ce   : > { %v26563_v36 = vsel %vm13143_vm5, 1.0, %v27679_v50  ;;  %v26566_v29 = vsel %vm13143_vm5, inf, %v26285_v44  ;;  %v13295_v63 = vand.u32 4294901760, %v13294_v39  ;;  %v13313_v0 = vand.u32 4294901760, %v13312_v46 }
0x18cf   : > { %v13981_v52 = vsel %vm1169_vm0, %v26566_v29, inf  ;;  %v13182_v49 = vsel %vm1169_vm0, %v26563_v36, 0 }
0x18d0   : > { %13982 = vmin.xlane.f32.xlu0 %v13981_v52  ;;  %20732 = vmatprep.mubr.f32.mxu1 %v13295_v63  ;;  %v13314_v42 = vsub.f32 %v13312_v46, %v13313_v0  ;;  %v13322_v48 = vsub.f32 %v13182_v49, %v13182_v49 }
0x18d1   : > { %20733 = vmatmul.mubr.f32.gmra.mrb[52].mxu1 %v13305_v30 }
0x18d2   : > { %v13315_v62 = vand.u32 4294901760, %v13314_v42  ;;  %v13323_v33 = vand.u32 4294901760, %v13322_v48 }
0x18d4   : > { %20735 = vmatprep.mubr.f32.mxu1 %v13315_v62  ;;  %v13324_v43 = vsub.f32 %v13322_v48, %v13323_v33 }
0x18d6   : > { %v13325_v44 = vand.u32 4294901760, %v13324_v43 }
0x18d8   : > { %20736 = vmatmul.mubr.f32.gmra.mrb[54].mxu1 %v13325_v44 }
0x18d9   : > { %20742 = vmatprep.mubr.msk.f32.mxu1 %vm1169_vm0, %v26463_v28 }
0x18dc   : > { %20743 = vmatmul.mubr.msk.f32.vlgmr.msra.gmra.mrb[48].mxu1 %vm1169_vm0, %v26449_v5 }
0x18dd   : > { %20745 = vmatprep.mubr.msk.f32.mxu1 %vm1169_vm0, %v26499_v23  ;;  %21525 = vmatpush3.bf16.xpose.msra.mxu1 %v22883_v18 }
0x18de   : > { %21527 = vmatprep.subr.bf16.mxu1 %v22881_v13 }
0x18e0   : > { %20746 = vmatmul.mubr.msk.f32.gmra.mrb[50].mxu1 %vm1169_vm0, %v26478_v32 }
0x18e1   : > { %20748 = vmatprep.mubr.msk.f32.mxu1 %vm1169_vm0, %v26537_v41 }
0x18e4   : > { %20749 = vmatmul.mubr.msk.f32.gmra.mrb[52].mxu1 %vm1169_vm0, %v26514_v14 }
0x18e5   : > { %20751 = vmatprep.mubr.msk.f32.mxu1 %vm1169_vm0, %v26549_v16 }
0x18e8   : > { %20752 = vmatmul.mubr.msk.f32.gmra.mrb[54].mxu1 %vm1169_vm0, %v26563_v36 }
0x18e9   : > { %20758 = vmatprep.mubr.f32.mxu1 %v26473_v6 }
0x18ec   : > { %20759 = vmatmul.mubr.f32.vlgmr.msra.gmra.mrb[48].mxu1 %v26458_v35 }
0x18ed   : > { %20761 = vmatprep.mubr.f32.mxu1 %v26509_v55  ;;  %21529 = vmatpush3.bf16.xpose.msra.mxu1 %v22881_v13 }
0x18ee   : > { %21531 = vmatprep.subr.bf16.mxu1 %v22887_v21 }
0x18f0   : > { %20762 = vmatmul.mubr.f32.gmra.mrb[50].mxu1 %v26494_v61 }
0x18f1   : > { %20764 = vmatprep.mubr.f32.mxu1 %v13292_v59 }
0x18f4   : > { %20765 = vmatmul.mubr.f32.gmra.mrb[52].mxu1 %v26532_v47 }
0x18f5   : > { %20767 = vmatprep.mubr.f32.mxu1 %v13312_v46 }
0x18f8   : > { %20768 = vmatmul.mubr.f32.gmra.mrb[54].mxu1 %v13322_v48 }
0x18f9   : > { %20774 = vmatprep.mubr.f32.mxu1 %v13253_v54 }
0x18fc   : > { %20775 = vmatmul.mubr.f32.vlgmr.msra.gmra.mrb[48].mxu1 %v13263_v56 }
0x18fd   : > { %20777 = vmatprep.mubr.f32.mxu1 %v13273_v8  ;;  %21533 = vmatpush3.bf16.xpose.msra.mxu1 %v22887_v21 }
0x18fe   : > { %21535 = vmatprep.subr.bf16.mxu1 %v22881_v13 }
0x1900   : > { %20778 = vmatmul.mubr.f32.gmra.mrb[50].mxu1 %v13283_v17 }
0x1901   : > { %20780 = vmatprep.mubr.f32.mxu1 %v13293_v19 }
0x1904   : > { %20781 = vmatmul.mubr.f32.gmra.mrb[52].mxu1 %v13303_v37 }
0x1905   : > { %20783 = vmatprep.mubr.f32.mxu1 %v13313_v0 }
0x1908   : > { %20784 = vmatmul.mubr.f32.gmra.mrb[54].mxu1 %v13323_v33 }
0x1909   : > { %20790 = vmatprep.mubr.msk.f32.mxu1 %vm1169_vm0, %v26463_v28 }
0x190c   : > { %20791 = vmatmul.mubr.msk.f32.vlgmr.msra.gmra.mrb[48].mxu1 %vm1169_vm0, %v26449_v5 }
0x190d   : > { %20793 = vmatprep.mubr.msk.f32.mxu1 %vm1169_vm0, %v26499_v23  ;;  %21537 = vmatpush3.bf16.xpose.msra.mxu1 %v22881_v13 }
0x190e   : > { %21563 = vmatprep.subr.bf16.mxu1 %v22881_v13 }
0x1910   : > { %20794 = vmatmul.mubr.msk.f32.gmra.mrb[50].mxu1 %vm1169_vm0, %v26478_v32 }
0x1911   : > { %20796 = vmatprep.mubr.msk.f32.mxu1 %vm1169_vm0, %v26537_v41 }
0x1914   : > { %20797 = vmatmul.mubr.msk.f32.gmra.mrb[52].mxu1 %vm1169_vm0, %v26514_v14 }
0x1915   : > { %20799 = vmatprep.mubr.msk.f32.mxu1 %vm1169_vm0, %v26549_v16 }
0x1918   : > { %20800 = vmatmul.mubr.msk.f32.gmra.mrb[54].mxu1 %vm1169_vm0, %v26563_v36 }
0x1919   : > { %20806 = vmatprep.mubr.msk.f32.mxu1 %vm1169_vm0, %v26463_v28 }
0x191c   : > { %20807 = vmatmul.mubr.msk.f32.vlgmr.msra.gmra.mrb[48].mxu1 %vm1169_vm0, %v26449_v5 }
0x191d   : > { %20809 = vmatprep.mubr.msk.f32.mxu1 %vm1169_vm0, %v26499_v23  ;;  %21565 = vmatpush3.bf16.xpose.msra.mxu1 %v22881_v13 }
0x191e   : > { %21567 = vmatprep.subr.bf16.mxu1 %v22889_v24 }
0x1920   : > { %20810 = vmatmul.mubr.msk.f32.gmra.mrb[50].mxu1 %vm1169_vm0, %v26478_v32 }
0x1921   : > { %20812 = vmatprep.mubr.msk.f32.mxu1 %vm1169_vm0, %v26537_v41 }
0x1924   : > { %20813 = vmatmul.mubr.msk.f32.gmra.mrb[52].mxu1 %vm1169_vm0, %v26514_v14 }
0x1925   : > { %20815 = vmatprep.mubr.msk.f32.mxu1 %vm1169_vm0, %v26549_v16 }
0x1928   : > { %20816 = vmatmul.mubr.msk.f32.gmra.mrb[54].mxu1 %vm1169_vm0, %v26563_v36 }
0x1941   : > { %v13965_v43 = vpop.xlane.xlu0 %13964 }
0x1942   : > { %vm13985_vm6 = vcmp.eq.f32.partialorder %v26452_v15, %v13965_v43 }
0x1943   : > { %v13993_v33 = vsel %vm13985_vm6, %v23026_v58, 64 }
0x1944   : > { %v14015_v49 = vsel %vm1169_vm0, %v13993_v33, 2147483647 }
0x1945   : > { %v14017_v5 = vshra.s32 %v14015_v49, 16  ;;  %v13962_v35 = vpop.xlane.xlu1 %13961 }
0x1946   : > { %vm13984_vm7 = vcmp.eq.f32.partialorder %v26466_v40, %v13962_v35 }
0x1947   : > { %v13992_v28 = vsel %vm13984_vm7, %v23026_v58, 64  ;;  %v14019_v56 = vcvt.s32.f32 %v14017_v5 }
0x1948   : > { %v14000_v6 = vsel %vm1169_vm0, %v13992_v28, 2147483647 }
0x1949   : > { %v14002_v32 = vshra.s32 %v14000_v6, 16  ;;  %14020 = vmin.xlane.f32.xlu0 %v14019_v56  ;;  %v13971_v54 = vpop.xlane.xlu0 %13970 }
0x194a   : > { %vm13987_vm8 = vcmp.eq.f32.partialorder %v26481_v31, %v13971_v54  ;;  %v14016_v54 = vand.u32 65535, %v14015_v49 }
0x194b   : > { %v13995_v61 = vsel %vm13987_vm8, %v23026_v58, 64  ;;  %v14004_v23 = vcvt.s32.f32 %v14002_v32 }
0x194c   : > { %v14045_v17 = vsel %vm1169_vm0, %v13995_v61, 2147483647  ;;  %v14001_v61 = vand.u32 65535, %v14000_v6 }
0x194d   : > { %v14047_v55 = vshra.s32 %v14045_v17, 16  ;;  %14005 = vmin.xlane.f32.xlu1 %v14004_v23  ;;  %v13968_v14 = vpop.xlane.xlu1 %13967 }
0x194e   : > { %vm13986_vm9 = vcmp.eq.f32.partialorder %v26502_v10, %v13968_v14  ;;  %v14018_v14 = vcvt.s32.f32 %v14016_v54 }
0x194f   : > { %v13994_v8 = vsel %vm13986_vm9, %v23026_v58, 64  ;;  %v14049_v47 = vcvt.s32.f32 %v14047_v55 }
0x1950   : > { %v14030_v41 = vsel %vm1169_vm0, %v13994_v8, 2147483647 }
0x1951   : > { %v14032_v37 = vshra.s32 %v14030_v41, 16  ;;  %14050 = vmin.xlane.f32.xlu0 %v14049_v47  ;;  %v13977_v59 = vpop.xlane.xlu0 %13976 }
0x1952   : > { %vm13989_vm10 = vcmp.eq.f32.partialorder %v26517_v7, %v13977_v59 }
0x1953   : > { %v13997_v16 = vsel %vm13989_vm10, %v23026_v58, 64  ;;  %v14034_v19 = vcvt.s32.f32 %v14032_v37  ;;  %v14046_v37 = vand.u32 65535, %v14045_v17 }
0x1954   : > { %v14075_v57 = vsel %vm1169_vm0, %v13997_v16, 2147483647  ;;  %v14003_v16 = vcvt.s32.f32 %v14001_v61 }
0x1955   : > { %v14077_v39 = vshra.s32 %v14075_v57, 16  ;;  %14035 = vmin.xlane.f32.xlu1 %v14034_v19  ;;  %v13974_v46 = vpop.xlane.xlu1 %13973  ;;  %v14048_v49 = vcvt.s32.f32 %v14046_v37 }
0x1956   : > { %vm13988_vm11 = vcmp.eq.f32.partialorder %v26540_v38, %v13974_v46  ;;  %v14031_v46 = vand.u32 65535, %v14030_v41 }
0x1957   : > { %v13996_v36 = vsel %vm13988_vm11, %v23026_v58, 64  ;;  %v14079_v63 = vcvt.s32.f32 %v14077_v39 }
0x1958   : > { %v14060_v0 = vsel %vm1169_vm0, %v13996_v36, 2147483647 }
0x1959   : > { %v14062_v52 = vshra.s32 %v14060_v0, 16  ;;  %14080 = vmin.xlane.f32.xlu0 %v14079_v63  ;;  %v13980_v30 = vpop.xlane.xlu1 %13979 }
0x195a   : > { %vm13990_vm12 = vcmp.eq.f32.partialorder %v26552_v53, %v13980_v30  ;;  %v14033_v30 = vcvt.s32.f32 %v14031_v46  ;;  %v27715_v46 = vmax.f32 %v26141_v11, %v26424_v12 }
0x195b   : > { %v13998_v42 = vsel %vm13990_vm12, %v23026_v58, 64  ;;  %v14064_v48 = vcvt.s32.f32 %v14062_v52  ;;  %v14076_v52 = vand.u32 65535, %v14075_v57 }
0x195c   : > { %v14090_v62 = vsel %vm1169_vm0, %v13998_v42, 2147483647  ;;  %v14061_v42 = vand.u32 65535, %v14060_v0 }
0x195d   : > { %v14092_v44 = vshra.s32 %v14090_v62, 16  ;;  %v13983_v43 = vpop.xlane.xlu0 %13982  ;;  %14065 = vmin.xlane.f32.xlu1 %v14064_v48 }
0x195e   : > { %vm13991_vm13 = vcmp.eq.f32.partialorder %v26566_v29, %v13983_v43  ;;  %v14091_v43 = vand.u32 65535, %v14090_v62 }
0x195f   : > { %v13999_v33 = vsel %vm13991_vm13, %v23026_v58, 64  ;;  %v14094_v5 = vcvt.s32.f32 %v14092_v44  ;;  %v14078_v44 = vcvt.s32.f32 %v14076_v52 }
0x1960   : > { %v14105_v35 = vsel %vm1169_vm0, %v13999_v33, 2147483647  ;;  %v14063_v33 = vcvt.s32.f32 %v14061_v42  ;;  %v14093_v54 = vcvt.s32.f32 %v14091_v43 }
0x1961   : > { %v14107_v28 = vshra.s32 %v14105_v35, 16  ;;  %14095 = vmin.xlane.f32.xlu1 %v14094_v5 }
0x1963   : > { %v14109_v32 = vcvt.s32.f32 %v14107_v28  ;;  %v14106_v28 = vand.u32 65535, %v14105_v35 }
0x1965   : > { %14110 = vmin.xlane.f32.xlu0 %v14109_v32  ;;  %v14108_v37 = vcvt.s32.f32 %v14106_v28 }
0x19d6   : > { %v26669_v55 = vpop.xlane.xlu0 %14020 }
0x19d7   : > { %vm14022_vm14 = vcmp.eq.f32.partialorder %v14019_v56, %v26669_v55 }
0x19d8   : > { %v14023_v8 = vsel %vm14022_vm14, %v14018_v14, inf }
0x19d9   : > { %14024 = vmin.xlane.f32.xlu0 %v14023_v8  ;;  %v27713_v8 = vmax.f32 %v26128_v9, %v26413_v25 }
0x19da   : > { %v26672_v59 = vpop.xlane.xlu1 %14005 }
0x19db   : > { %vm14007_vm15 = vcmp.eq.f32.partialorder %v14004_v23, %v26672_v59 }
0x19dc   : > { %v14008_v39 = vsel %vm14007_vm15, %v14003_v16, inf  ;;  %v27714_v16 = vmax.f32 %v26136_v22, %v26420_v51  ;;  %v27717_v22 = vmax.f32 %v26151_v20, %v26432_v1  ;;  %v14012_v20 = vcvt.f32.s32 %v26672_v59 }
0x19dd   : > { %14009 = vmin.xlane.f32.xlu1 %v14008_v39 }
0x19de   : > { %v26675_v36 = vpop.xlane.xlu0 %14050 }
0x19df   : > { %vm14052_vm2 = vcmp.eq.f32.partialorder %v14049_v47, %v26675_v36 }
0x19e0   : > { %v14053_v6 = vsel %vm14052_vm2, %v14048_v49, inf  ;;  %v27716_v49 = vmax.f32 %v26146_v4, %v26428_v2  ;;  %v14027_v4 = vcvt.f32.s32 %v26669_v55 }
0x19e1   : > { %14054 = vmin.xlane.f32.xlu0 %v14053_v6 }
0x19e2   : > { %v26678_v56 = vpop.xlane.xlu1 %14035 }
0x19e3   : > { %vm14037_vm3 = vcmp.eq.f32.partialorder %v14034_v19, %v26678_v56 }
0x19e4   : > { %v14038_v17 = vsel %vm14037_vm3, %v14033_v30, inf  ;;  %v27718_v30 = vmax.f32 %v26156_v34, %v26436_v27  ;;  %v14057_v34 = vcvt.f32.s32 %v26675_v36 }
0x19e5   : > { %14039 = vmin.xlane.f32.xlu1 %v14038_v17  ;;  %v27719_v17 = vmax.f32 %v26161_v45, %v26440_v3 }
0x19e6   : > { %v26681_v23 = vpop.xlane.xlu0 %14080 }
0x19e7   : > { %vm14082_vm4 = vcmp.eq.f32.partialorder %v14079_v63, %v26681_v23  ;;  %v27712_v63 = vmax.f32 %v26123_v26, %v26409_v60 }
0x19e8   : > { %v14083_v41 = vsel %vm14082_vm4, %v14078_v44, inf  ;;  %v14028_v44 = vshll.u32 %v14027_v4, 16 }
0x19e9   : > { %14084 = vmin.xlane.f32.xlu0 %v14083_v41 }
0x19ea   : > { %v26684_v47 = vpop.xlane.xlu1 %14065 }
0x19eb   : > { %vm14067_vm5 = vcmp.eq.f32.partialorder %v14064_v48, %v26684_v47  ;;  %v14072_v4 = vcvt.f32.s32 %v26684_v47 }
0x19ec   : > { %v14068_v57 = vsel %vm14067_vm5, %v14063_v33, inf  ;;  %v14013_v33 = vshll.u32 %v14012_v20, 16 }
0x19ed   : > { %14069 = vmin.xlane.f32.xlu1 %v14068_v57 }
0x19ee   : > { %v26687_v19 = vpop.xlane.xlu1 %14095 }
0x19ef   : > { %vm14097_vm6 = vcmp.eq.f32.partialorder %v14094_v5, %v26687_v19  ;;  %v20808_v0 = vpop.f32.mrb[48].mxu1 }
0x19f0   : > { %v26693_v61 = vmax.f32 %v27712_v63, %v20808_v0  ;;  %v13898_v62 = vpop.f32.mrb[49].mxu1  ;;  %v14098_v14 = vsel %vm14097_vm6, %v14093_v54, inf  ;;  %v14058_v54 = vshll.u32 %v14057_v34, 16  ;;  %v14042_v0 = vcvt.f32.s32 %v26678_v56 }
0x19f1   : > { %v26698_v48 = vmax.f32 %v27713_v8, %v13898_v62  ;;  %14099 = vmin.xlane.f32.xlu1 %v14098_v14 }
0x19f2   : > { %v26700_v35 = vpop.xlane.xlu0 %14110 }
0x19f3   : > { %vm14112_vm7 = vcmp.eq.f32.partialorder %v14109_v32, %v26700_v35  ;;  %v20811_v5 = vpop.f32.mrb[50].mxu1 }
0x19f4   : > { %v26706_v26 = vmax.f32 %v27714_v16, %v20811_v5  ;;  %v13910_v60 = vpop.f32.mrb[51].mxu1  ;;  %v14113_v39 = vsel %vm14112_vm7, %v14108_v37, inf }
0x19f5   : > { %v26711_v9 = vmax.f32 %v27715_v46, %v13910_v60  ;;  %14114 = vmin.xlane.f32.xlu0 %v14113_v39  ;;  %v14043_v60 = vshll.u32 %v14042_v0, 16  ;;  %v14087_v39 = vcvt.f32.s32 %v26681_v23 }
0x19f7   : > { %v20814_v25 = vpop.f32.mrb[52].mxu1 }
0x19f8   : > { %v26716_v6 = vmax.f32 %v27716_v49, %v20814_v25  ;;  %v13922_v32 = vpop.f32.mrb[53].mxu1 }
0x19f9   : > { %v26721_v51 = vmax.f32 %v27717_v22, %v13922_v32 }
0x19fb   : > { %v20817_v52 = vpop.f32.mrb[54].mxu1 }
0x19fc   : > { %v26726_v11 = vmax.f32 %v27718_v30, %v20817_v52  ;;  %v13934_v12 = vpop.f32.mrb[55].mxu1 }
0x19fd   : > { %v26731_v42 = vmax.f32 %v27719_v17, %v13934_v12  ;;  %v14088_v17 = vshll.u32 %v14087_v39, 16  ;;  %v14117_v39 = vcvt.f32.s32 %v26700_v35 }
0x1a66   : > { %v14025_v2 = vpop.xlane.xlu0 %14024 }
0x1a67   : > { %v14026_v1 = vcvt.f32.s32 %v14025_v2 }
0x1a69   : > { %v14029_v41 = vadd.s32 %v14028_v44, %v14026_v1 }
0x1a6a   : > { %v14010_v43 = vpop.xlane.xlu1 %14009 }
0x1a6b   : > { %vm14121_vm8 = vcmp.eq.s32.totalorder %v23026_v58, %v14029_v41  ;;  %v14011_v27 = vcvt.f32.s32 %v14010_v43 }
0x1a6c   : > { %v26738_v57 = vsel %vm14121_vm8, 1.0, %v27679_v50  ;;  %v26741_v45 = vsel %vm14121_vm8, inf, %v26452_v15 }
0x1a6d   : > { %v14148_v3 = vsel %vm1169_vm0, %v26738_v57, 0  ;;  %v14014_v55 = vadd.s32 %v14013_v33, %v14011_v27  ;;  %v14947_v59 = vsel %vm1169_vm0, %v26741_v45, inf }
0x1a6e   : > { %v26747_v28 = vsub.f32 %v14148_v3, %v14148_v3  ;;  %14948 = vmin.xlane.f32.xlu0 %v14947_v59  ;;  %v14055_v36 = vpop.xlane.xlu0 %14054  ;;  %v14102_v59 = vcvt.f32.s32 %v26687_v19 }
0x1a6f   : > { %vm14120_vm9 = vcmp.eq.s32.totalorder %v23026_v58, %v14014_v55  ;;  %v14056_v63 = vcvt.f32.s32 %v14055_v36  ;;  %v14073_v55 = vshll.u32 %v14072_v4, 16 }
0x1a70   : > { %v26752_v15 = vsel %vm14120_vm9, 1.0, %v27679_v50  ;;  %v26755_v62 = vsel %vm14120_vm9, inf, %v26466_v40  ;;  %v14247_v14 = vand.u32 4294901760, %v26747_v28 }
0x1a71   : > { %v14059_v8 = vadd.s32 %v14058_v54, %v14056_v63  ;;  %v14944_v37 = vsel %vm1169_vm0, %v26755_v62, inf  ;;  %v14145_v5 = vsel %vm1169_vm0, %v26752_v15, 0 }
0x1a72   : > { %14945 = vmin.xlane.f32.xlu1 %v14944_v37  ;;  %v14040_v56 = vpop.xlane.xlu1 %14039  ;;  %v26762_v16 = vsub.f32 %v14145_v5, %v14145_v5  ;;  %v14248_v52 = vsub.f32 %v26747_v28, %v14247_v14 }
0x1a73   : > { %vm14123_vm10 = vcmp.eq.s32.totalorder %v23026_v58, %v14059_v8  ;;  %v14041_v40 = vcvt.f32.s32 %v14040_v56 }
0x1a74   : > { %v26767_v46 = vsel %vm14123_vm10, 1.0, %v27679_v50  ;;  %v26770_v25 = vsel %vm14123_vm10, inf, %v26481_v31  ;;  %v14237_v49 = vand.u32 4294901760, %v26762_v16  ;;  %v14249_v34 = vand.u32 4294901760, %v14248_v52 }
0x1a75   : > { %v14044_v32 = vadd.s32 %v14043_v60, %v14041_v40  ;;  %v14953_v22 = vsel %vm1169_vm0, %v26770_v25, inf  ;;  %v14154_v23 = vsel %vm1169_vm0, %v26767_v46, 0  ;;  %v14103_v60 = vshll.u32 %v14102_v59, 16 }
0x1a76   : > { %14954 = vmin.xlane.f32.xlu0 %v14953_v22  ;;  %v14085_v30 = vpop.xlane.xlu0 %14084  ;;  %v14238_v31 = vsub.f32 %v26762_v16, %v14237_v49  ;;  %v26783_v12 = vsub.f32 %v14154_v23, %v14154_v23 }
0x1a77   : > { %vm14122_vm11 = vcmp.eq.s32.totalorder %v23026_v58, %v14044_v32  ;;  %v14086_v2 = vcvt.f32.s32 %v14085_v30 }
0x1a78   : > { %v26788_v44 = vsel %vm14122_vm11, 1.0, %v27679_v50  ;;  %v14239_v20 = vand.u32 4294901760, %v14238_v31  ;;  %v26791_v1 = vsel %vm14122_vm11, inf, %v26502_v10  ;;  %v14267_v41 = vand.u32 4294901760, %v26783_v12 }
0x1a79   : > { %v14089_v43 = vadd.s32 %v14088_v17, %v14086_v2  ;;  %v14950_v33 = vsel %vm1169_vm0, %v26791_v1, inf  ;;  %v14151_v47 = vsel %vm1169_vm0, %v26788_v44, 0 }
0x1a7a   : > { %20822 = vmatprep.mubr.f32.mxu0 %v14239_v20  ;;  %14951 = vmin.xlane.f32.xlu1 %v14950_v33  ;;  %v14070_v27 = vpop.xlane.xlu1 %14069  ;;  %v26798_v3 = vsub.f32 %v14151_v47, %v14151_v47  ;;  %v14268_v63 = vsub.f32 %v26783_v12, %v14267_v41  ;;  %v14118_v20 = vshll.u32 %v14117_v39, 16 }
0x1a7b   : > { %vm14125_vm12 = vcmp.eq.s32.totalorder %v23026_v58, %v14089_v43  ;;  %v14071_v10 = vcvt.f32.s32 %v14070_v27  ;;  %20823 = vmatmul.mubr.f32.vlgmr.msra.gmra.mrb[56].mxu0 %v14249_v34 }
0x1a7c   : > { %v26803_v36 = vsel %vm14125_vm12, 1.0, %v27679_v50  ;;  %v26806_v54 = vsel %vm14125_vm12, inf, %v26517_v7  ;;  %v14257_v0 = vand.u32 4294901760, %v26798_v3  ;;  %21545 = vmatpush3.bf16.xpose.msra.mxu0 %v22889_v24  ;;  %v14269_v23 = vand.u32 4294901760, %v14268_v63 }
0x1a7d   : > { %v14074_v8 = vadd.s32 %v14073_v55, %v14071_v10  ;;  %v14959_v19 = vsel %vm1169_vm0, %v26806_v54, inf  ;;  %v14160_v37 = vsel %vm1169_vm0, %v26803_v36, 0  ;;  %21547 = vmatprep.subr.bf16.mxu0 %v22883_v18 }
0x1a7e   : > { %14960 = vmin.xlane.f32.xlu0 %v14959_v19  ;;  %v14100_v7 = vpop.xlane.xlu1 %14099  ;;  %v14258_v5 = vsub.f32 %v26798_v3, %v14257_v0  ;;  %v26821_v56 = vsub.f32 %v14160_v37, %v14160_v37 }
0x1a7f   : > { %vm14124_vm13 = vcmp.eq.s32.totalorder %v23026_v58, %v14074_v8  ;;  %v14101_v40 = vcvt.f32.s32 %v14100_v7 }
0x1a80   : > { %v26826_v32 = vsel %vm14124_vm13, 1.0, %v27679_v50  ;;  %v14259_v22 = vand.u32 4294901760, %v14258_v5  ;;  %v26829_v52 = vsel %vm14124_vm13, inf, %v26540_v38  ;;  %v14287_v35 = vand.u32 4294901760, %v26821_v56 }
0x1a81   : > { %v14104_v30 = vadd.s32 %v14103_v60, %v14101_v40  ;;  %v14956_v31 = vsel %vm1169_vm0, %v26829_v52, inf  ;;  %v14157_v17 = vsel %vm1169_vm0, %v26826_v32, 0 }
0x1a82   : > { %v14115_v4 = vpop.xlane.xlu0 %14114  ;;  %20825 = vmatprep.mubr.f32.mxu0 %v14259_v22  ;;  %14957 = vmin.xlane.f32.xlu1 %v14956_v31  ;;  %v14276_v2 = vsub.f32 %v14157_v17, %v14157_v17  ;;  %v14288_v55 = vsub.f32 %v26821_v56, %v14287_v35 }
0x1a83   : > { %vm14126_vm14 = vcmp.eq.s32.totalorder %v23026_v58, %v14104_v30  ;;  %v14116_v43 = vcvt.f32.s32 %v14115_v4  ;;  %20826 = vmatmul.mubr.f32.gmra.mrb[58].mxu0 %v14269_v23 }
0x1a84   : > { %v26838_v38 = vsel %vm14126_vm14, 1.0, %v27679_v50  ;;  %v26841_v33 = vsel %vm14126_vm14, inf, %v26552_v53  ;;  %v14277_v34 = vand.u32 4294901760, %v14276_v2  ;;  %v14289_v5 = vand.u32 4294901760, %v14288_v55 }
0x1a85   : > { %v14119_v47 = vadd.s32 %v14118_v20, %v14116_v43  ;;  %v14962_v27 = vsel %vm1169_vm0, %v26841_v33, inf  ;;  %v14163_v59 = vsel %vm1169_vm0, %v26838_v38, 0 }
0x1a86   : > { %14963 = vmin.xlane.f32.xlu1 %v14962_v27  ;;  %v14278_v10 = vsub.f32 %v14276_v2, %v14277_v34  ;;  %v14296_v63 = vsub.f32 %v14163_v59, %v14163_v59 }
0x1a87   : > { %vm14127_vm15 = vcmp.eq.s32.totalorder %v23026_v58, %v14119_v47 }
0x1a88   : > { %v26852_v53 = vsel %vm14127_vm15, 1.0, %v27679_v50  ;;  %v26855_v8 = vsel %vm14127_vm15, inf, %v26566_v29  ;;  %v14279_v19 = vand.u32 4294901760, %v14278_v10  ;;  %v14297_v37 = vand.u32 4294901760, %v14296_v63 }
0x1a89   : > { %v14965_v7 = vsel %vm1169_vm0, %v26855_v8, inf  ;;  %v14166_v60 = vsel %vm1169_vm0, %v26852_v53, 0 }
0x1a8a   : > { %14966 = vmin.xlane.f32.xlu0 %v14965_v7  ;;  %20828 = vmatprep.mubr.f32.mxu0 %v14279_v19  ;;  %v14298_v39 = vsub.f32 %v14296_v63, %v14297_v37  ;;  %v14306_v40 = vsub.f32 %v14166_v60, %v14166_v60 }
0x1a8b   : > { %20829 = vmatmul.mubr.f32.gmra.mrb[60].mxu0 %v14289_v5 }
0x1a8c   : > { %v14299_v22 = vand.u32 4294901760, %v14298_v39  ;;  %v14307_v23 = vand.u32 4294901760, %v14306_v40 }
0x1a8e   : > { %20831 = vmatprep.mubr.f32.mxu0 %v14299_v22  ;;  %v14308_v30 = vsub.f32 %v14306_v40, %v14307_v23 }
0x1a90   : > { %v14309_v29 = vand.u32 4294901760, %v14308_v30 }
0x1a92   : > { %20832 = vmatmul.mubr.f32.gmra.mrb[62].mxu0 %v14309_v29 }
0x1a93   : > { %20838 = vmatprep.mubr.msk.f32.mxu0 %vm1169_vm0, %v26752_v15 }
0x1a96   : > { %20839 = vmatmul.mubr.msk.f32.vlgmr.msra.gmra.mrb[56].mxu0 %vm1169_vm0, %v26738_v57 }
0x1a97   : > { %20841 = vmatprep.mubr.msk.f32.mxu0 %vm1169_vm0, %v26788_v44  ;;  %21549 = vmatpush3.bf16.xpose.msra.mxu0 %v22883_v18 }
0x1a98   : > { %21551 = vmatprep.subr.bf16.mxu0 %v22881_v13 }
0x1a9a   : > { %20842 = vmatmul.mubr.msk.f32.gmra.mrb[58].mxu0 %vm1169_vm0, %v26767_v46 }
0x1a9b   : > { %20844 = vmatprep.mubr.msk.f32.mxu0 %vm1169_vm0, %v26826_v32 }
0x1a9e   : > { %20845 = vmatmul.mubr.msk.f32.gmra.mrb[60].mxu0 %vm1169_vm0, %v26803_v36 }
0x1a9f   : > { %20847 = vmatprep.mubr.msk.f32.mxu0 %vm1169_vm0, %v26838_v38 }
0x1aa2   : > { %20848 = vmatmul.mubr.msk.f32.gmra.mrb[62].mxu0 %vm1169_vm0, %v26852_v53 }
0x1aa3   : > { %20854 = vmatprep.mubr.f32.mxu0 %v26762_v16 }
0x1aa6   : > { %20855 = vmatmul.mubr.f32.vlgmr.msra.gmra.mrb[56].mxu0 %v26747_v28 }
0x1aa7   : > { %20857 = vmatprep.mubr.f32.mxu0 %v26798_v3  ;;  %21553 = vmatpush3.bf16.xpose.msra.mxu0 %v22881_v13 }
0x1aa8   : > { %21555 = vmatprep.subr.bf16.mxu0 %v22887_v21 }
0x1aaa   : > { %20858 = vmatmul.mubr.f32.gmra.mrb[58].mxu0 %v26783_v12 }
0x1aab   : > { %20860 = vmatprep.mubr.f32.mxu0 %v14276_v2 }
0x1aae   : > { %20861 = vmatmul.mubr.f32.gmra.mrb[60].mxu0 %v26821_v56 }
0x1aaf   : > { %20863 = vmatprep.mubr.f32.mxu0 %v14296_v63 }
0x1ab2   : > { %20864 = vmatmul.mubr.f32.gmra.mrb[62].mxu0 %v14306_v40 }
0x1ab3   : > { %20870 = vmatprep.mubr.f32.mxu0 %v14237_v49 }
0x1ab6   : > { %20871 = vmatmul.mubr.f32.vlgmr.msra.gmra.mrb[56].mxu0 %v14247_v14 }
0x1ab7   : > { %20873 = vmatprep.mubr.f32.mxu0 %v14257_v0  ;;  %21557 = vmatpush3.bf16.xpose.msra.mxu0 %v22887_v21 }
0x1ab8   : > { %21559 = vmatprep.subr.bf16.mxu0 %v22881_v13 }
0x1aba   : > { %20874 = vmatmul.mubr.f32.gmra.mrb[58].mxu0 %v14267_v41 }
0x1abb   : > { %20876 = vmatprep.mubr.f32.mxu0 %v14277_v34 }
0x1abe   : > { %20877 = vmatmul.mubr.f32.gmra.mrb[60].mxu0 %v14287_v35 }
0x1abf   : > { %20879 = vmatprep.mubr.f32.mxu0 %v14297_v37 }
0x1ac2   : > { %20880 = vmatmul.mubr.f32.gmra.mrb[62].mxu0 %v14307_v23 }
0x1ac3   : > { %20886 = vmatprep.mubr.msk.f32.mxu0 %vm1169_vm0, %v26752_v15 }
0x1ac6   : > { %20887 = vmatmul.mubr.msk.f32.vlgmr.msra.gmra.mrb[56].mxu0 %vm1169_vm0, %v26738_v57 }
0x1ac7   : > { %20889 = vmatprep.mubr.msk.f32.mxu0 %vm1169_vm0, %v26788_v44  ;;  %21561 = vmatpush3.bf16.xpose.msra.mxu0 %v22881_v13 }
0x1ac8   : > { %21587 = vmatprep.subr.bf16.mxu0 %v22881_v13 }
0x1aca   : > { %20890 = vmatmul.mubr.msk.f32.gmra.mrb[58].mxu0 %vm1169_vm0, %v26767_v46 }
0x1acb   : > { %20892 = vmatprep.mubr.msk.f32.mxu0 %vm1169_vm0, %v26826_v32 }
0x1ace   : > { %20893 = vmatmul.mubr.msk.f32.gmra.mrb[60].mxu0 %vm1169_vm0, %v26803_v36 }
0x1acf   : > { %20895 = vmatprep.mubr.msk.f32.mxu0 %vm1169_vm0, %v26838_v38 }
0x1ad2   : > { %20896 = vmatmul.mubr.msk.f32.gmra.mrb[62].mxu0 %vm1169_vm0, %v26852_v53 }
0x1ad3   : > { %20902 = vmatprep.mubr.msk.f32.mxu0 %vm1169_vm0, %v26752_v15 }
0x1ad6   : > { %20903 = vmatmul.mubr.msk.f32.vlgmr.msra.gmra.mrb[56].mxu0 %vm1169_vm0, %v26738_v57 }
0x1ad7   : > { %20905 = vmatprep.mubr.msk.f32.mxu0 %vm1169_vm0, %v26788_v44  ;;  %21589 = vmatpush3.bf16.xpose.msra.mxu0 %v22881_v13 }
0x1ad8   : > { %21591 = vmatprep.subr.bf16.mxu0 %v22889_v24 }
0x1ada   : > { %20906 = vmatmul.mubr.msk.f32.gmra.mrb[58].mxu0 %vm1169_vm0, %v26767_v46 }
0x1adb   : > { %20908 = vmatprep.mubr.msk.f32.mxu0 %vm1169_vm0, %v26826_v32 }
0x1ade   : > { %20909 = vmatmul.mubr.msk.f32.gmra.mrb[60].mxu0 %vm1169_vm0, %v26803_v36 }
0x1adf   : > { %20911 = vmatprep.mubr.msk.f32.mxu0 %vm1169_vm0, %v26838_v38 }
0x1ae2   : > { %20912 = vmatmul.mubr.msk.f32.gmra.mrb[62].mxu0 %vm1169_vm0, %v26852_v53 }
0x1afb   : > { %v14949_v57 = vpop.xlane.xlu0 %14948 }
0x1afc   : > { %vm14969_vm2 = vcmp.eq.f32.partialorder %v26741_v45, %v14949_v57 }
0x1afd   : > { %v14977_v28 = vsel %vm14969_vm2, %v23026_v58, 64 }
0x1afe   : > { %v14999_v15 = vsel %vm1169_vm0, %v14977_v28, 2147483647 }
0x1aff   : > { %v15001_v14 = vshra.s32 %v14999_v15, 16  ;;  %v14946_v16 = vpop.xlane.xlu1 %14945  ;;  %v15000_v30 = vand.u32 65535, %v14999_v15 }
0x1b00   : > { %vm14968_vm3 = vcmp.eq.f32.partialorder %v26755_v62, %v14946_v16 }
0x1b01   : > { %v14976_v46 = vsel %vm14968_vm3, %v23026_v58, 64  ;;  %v15003_v49 = vcvt.s32.f32 %v15001_v14  ;;  %v15002_v28 = vcvt.s32.f32 %v15000_v30 }
0x1b02   : > { %v14984_v12 = vsel %vm1169_vm0, %v14976_v46, 2147483647 }
0x1b03   : > { %v14986_v44 = vshra.s32 %v14984_v12, 16  ;;  %15004 = vmin.xlane.f32.xlu0 %v15003_v49  ;;  %v14955_v41 = vpop.xlane.xlu0 %14954  ;;  %v14985_v29 = vand.u32 65535, %v14984_v12 }
0x1b04   : > { %vm14971_vm4 = vcmp.eq.f32.partialorder %v26770_v25, %v14955_v41 }
0x1b05   : > { %v14979_v3 = vsel %vm14971_vm4, %v23026_v58, 64  ;;  %v14988_v36 = vcvt.s32.f32 %v14986_v44  ;;  %v14987_v44 = vcvt.s32.f32 %v14985_v29 }
0x1b06   : > { %v15029_v0 = vsel %vm1169_vm0, %v14979_v3, 2147483647 }
0x1b07   : > { %v15031_v56 = vshra.s32 %v15029_v0, 16  ;;  %14989 = vmin.xlane.f32.xlu1 %v14988_v36  ;;  %v14952_v32 = vpop.xlane.xlu1 %14951  ;;  %v15030_v16 = vand.u32 65535, %v15029_v0 }
0x1b08   : > { %vm14970_vm5 = vcmp.eq.f32.partialorder %v26791_v1, %v14952_v32 }
0x1b09   : > { %v14978_v31 = vsel %vm14970_vm5, %v23026_v58, 64  ;;  %v15033_v17 = vcvt.s32.f32 %v15031_v56  ;;  %v15032_v15 = vcvt.s32.f32 %v15030_v16 }
0x1b0a   : > { %v15014_v35 = vsel %vm1169_vm0, %v14978_v31, 2147483647 }
0x1b0b   : > { %v15016_v4 = vshra.s32 %v15014_v35, 16  ;;  %15034 = vmin.xlane.f32.xlu0 %v15033_v17  ;;  %v14961_v2 = vpop.xlane.xlu0 %14960  ;;  %v15015_v3 = vand.u32 65535, %v15014_v35 }
0x1b0c   : > { %vm14973_vm6 = vcmp.eq.f32.partialorder %v26806_v54, %v14961_v2 }
0x1b0d   : > { %v14981_v20 = vsel %vm14973_vm6, %v23026_v58, 64  ;;  %v15018_v43 = vcvt.s32.f32 %v15016_v4  ;;  %v15017_v31 = vcvt.s32.f32 %v15015_v3 }
0x1b0e   : > { %v15059_v38 = vsel %vm1169_vm0, %v14981_v20, 2147483647 }
0x1b0f   : > { %v15061_v34 = vshra.s32 %v15059_v38, 16  ;;  %15019 = vmin.xlane.f32.xlu1 %v15018_v43  ;;  %v14958_v47 = vpop.xlane.xlu1 %14957  ;;  %v15060_v32 = vand.u32 65535, %v15059_v38 }
0x1b10   : > { %vm14972_vm7 = vcmp.eq.f32.partialorder %v26829_v52, %v14958_v47 }
0x1b11   : > { %v14980_v27 = vsel %vm14972_vm7, %v23026_v58, 64  ;;  %v15063_v55 = vcvt.s32.f32 %v15061_v34  ;;  %v15062_v2 = vcvt.s32.f32 %v15060_v32 }
0x1b12   : > { %v15044_v59 = vsel %vm1169_vm0, %v14980_v27, 2147483647 }
0x1b13   : > { %v15046_v10 = vshra.s32 %v15044_v59, 16  ;;  %15064 = vmin.xlane.f32.xlu0 %v15063_v55  ;;  %v14964_v63 = vpop.xlane.xlu1 %14963  ;;  %v15045_v4 = vand.u32 65535, %v15044_v59 }
0x1b14   : > { %vm14974_vm8 = vcmp.eq.f32.partialorder %v26841_v33, %v14964_v63 }
0x1b15   : > { %v14982_v53 = vsel %vm14974_vm8, %v23026_v58, 64  ;;  %v15048_v19 = vcvt.s32.f32 %v15046_v10  ;;  %v15047_v34 = vcvt.s32.f32 %v15045_v4 }
0x1b16   : > { %v15074_v37 = vsel %vm1169_vm0, %v14982_v53, 2147483647 }
0x1b17   : > { %v15076_v7 = vshra.s32 %v15074_v37, 16  ;;  %v14967_v5 = vpop.xlane.xlu0 %14966  ;;  %15049 = vmin.xlane.f32.xlu1 %v15048_v19  ;;  %v15075_v20 = vand.u32 65535, %v15074_v37 }
0x1b18   : > { %vm14975_vm9 = vcmp.eq.f32.partialorder %v26855_v8, %v14967_v5 }
0x1b19   : > { %v14983_v60 = vsel %vm14975_vm9, %v23026_v58, 64  ;;  %v15078_v39 = vcvt.s32.f32 %v15076_v7  ;;  %v15077_v27 = vcvt.s32.f32 %v15075_v20 }
0x1b1a   : > { %v15089_v40 = vsel %vm1169_vm0, %v14983_v60, 2147483647 }
0x1b1b   : > { %v15091_v22 = vshra.s32 %v15089_v40, 16  ;;  %15079 = vmin.xlane.f32.xlu1 %v15078_v39  ;;  %v15090_v47 = vand.u32 65535, %v15089_v40 }
0x1b1d   : > { %v15093_v23 = vcvt.s32.f32 %v15091_v22  ;;  %v15092_v37 = vcvt.s32.f32 %v15090_v47 }
0x1b1f   : > { %15094 = vmin.xlane.f32.xlu0 %v15093_v23 }
0x1b90   : > { %v26958_v57 = vpop.xlane.xlu0 %15004 }
0x1b91   : > { %vm15006_vm10 = vcmp.eq.f32.partialorder %v15003_v49, %v26958_v57 }
0x1b92   : > { %v15007_v14 = vsel %vm15006_vm10, %v15002_v28, inf }
0x1b93   : > { %15008 = vmin.xlane.f32.xlu0 %v15007_v14 }
0x1b94   : > { %v26961_v46 = vpop.xlane.xlu1 %14989 }
0x1b95   : > { %vm14991_vm11 = vcmp.eq.f32.partialorder %v14988_v36, %v26961_v46 }
0x1b96   : > { %v14992_v41 = vsel %vm14991_vm11, %v14987_v44, inf }
0x1b97   : > { %14993 = vmin.xlane.f32.xlu1 %v14992_v41  ;;  %v15011_v41 = vcvt.f32.s32 %v26958_v57 }
0x1b98   : > { %v26964_v56 = vpop.xlane.xlu0 %15034 }
0x1b99   : > { %vm15036_vm12 = vcmp.eq.f32.partialorder %v15033_v17, %v26964_v56 }
0x1b9a   : > { %v15037_v12 = vsel %vm15036_vm12, %v15032_v15, inf  ;;  %v15012_v15 = vshll.u32 %v15011_v41, 16 }
0x1b9b   : > { %15038 = vmin.xlane.f32.xlu0 %v15037_v12  ;;  %v14996_v12 = vcvt.f32.s32 %v26961_v46 }
0x1b9c   : > { %v26967_v49 = vpop.xlane.xlu1 %15019 }
0x1b9d   : > { %vm15021_vm13 = vcmp.eq.f32.partialorder %v15018_v43, %v26967_v49  ;;  %v14997_v4 = vshll.u32 %v14996_v12, 16 }
0x1b9e   : > { %v15022_v0 = vsel %vm15021_vm13, %v15017_v31, inf }
0x1b9f   : > { %15023 = vmin.xlane.f32.xlu1 %v15022_v0 }
0x1ba0   : > { %v26970_v36 = vpop.xlane.xlu0 %15064 }
0x1ba1   : > { %vm15066_vm14 = vcmp.eq.f32.partialorder %v15063_v55, %v26970_v36 }
0x1ba2   : > { %v15067_v35 = vsel %vm15066_vm14, %v15062_v2, inf  ;;  %v15041_v2 = vcvt.f32.s32 %v26964_v56 }
0x1ba3   : > { %15068 = vmin.xlane.f32.xlu0 %v15067_v35 }
0x1ba4   : > { %v26973_v17 = vpop.xlane.xlu1 %15049 }
0x1ba5   : > { %vm15051_vm15 = vcmp.eq.f32.partialorder %v15048_v19, %v26973_v17 }
0x1ba6   : > { %v15052_v38 = vsel %vm15051_vm15, %v15047_v34, inf }
0x1ba7   : > { %15053 = vmin.xlane.f32.xlu1 %v15052_v38 }
0x1ba8   : > { %v26976_v43 = vpop.xlane.xlu1 %15079 }
0x1ba9   : > { %vm15081_vm2 = vcmp.eq.f32.partialorder %v15078_v39, %v26976_v43  ;;  %v26979_v59 = vpop.f32.mrb[56].mxu0 }
0x1baa   : > { %v26983_v10 = vpop.f32.mrb[57].mxu0  ;;  %v15082_v63 = vsel %vm15081_vm2, %v15077_v27, inf  ;;  %v15042_v27 = vshll.u32 %v15041_v2, 16 }
0x1bab   : > { %15083 = vmin.xlane.f32.xlu1 %v15082_v63  ;;  %v15026_v63 = vcvt.f32.s32 %v26967_v49 }
0x1bac   : > { %v26987_v19 = vpop.xlane.xlu0 %15094 }
0x1bad   : > { %vm15096_vm3 = vcmp.eq.f32.partialorder %v15093_v23, %v26987_v19  ;;  %v26990_v7 = vpop.f32.mrb[58].mxu0 }
0x1bae   : > { %v26994_v60 = vpop.f32.mrb[59].mxu0  ;;  %v15097_v39 = vsel %vm15096_vm3, %v15092_v37, inf }
0x1baf   : > { %15098 = vmin.xlane.f32.xlu0 %v15097_v39 }
0x1bb1   : > { %v26998_v22 = vpop.f32.mrb[60].mxu0 }
0x1bb2   : > { %v27002_v29 = vpop.f32.mrb[61].mxu0 }
0x1bb5   : > { %v27006_v28 = vpop.f32.mrb[62].mxu0 }
0x1bb6   : > { %v27010_v16 = vpop.f32.mrb[63].mxu0 }
0x1c20   : > { %v15009_v3 = vpop.xlane.xlu0 %15008 }
0x1c21   : > { %v15010_v32 = vcvt.f32.s32 %v15009_v3 }
0x1c23   : > { %v15013_v31 = vadd.s32 %v15012_v15, %v15010_v32 }
0x1c24   : > { %v14994_v0 = vpop.xlane.xlu1 %14993 }
0x1c25   : > { %v14995_v35 = vcvt.f32.s32 %v14994_v0  ;;  %vm15105_vm4 = vcmp.eq.s32.totalorder %v23026_v58, %v15013_v31  ;;  %v15027_v31 = vshll.u32 %v15026_v63, 16 }
0x1c26   : > { %v27019_v20 = vsel %vm15105_vm4, inf, %v26741_v45  ;;  %v27022_v34 = vsel %vm15105_vm4, 1.0, %v27679_v50 }
0x1c27   : > { %v14998_v57 = vadd.s32 %v14997_v4, %v14995_v35  ;;  %v15931_v38 = vsel %vm1169_vm0, %v27019_v20, inf  ;;  %v15132_v46 = vsel %vm1169_vm0, %v27022_v34, 0 }
0x1c28   : > { %15932 = vmin.xlane.f32.xlu0 %v15931_v38  ;;  %v27028_v47 = vsub.f32 %v15132_v46, %v15132_v46  ;;  %v15039_v56 = vpop.xlane.xlu0 %15038 }
0x1c29   : > { %v15040_v37 = vcvt.f32.s32 %v15039_v56  ;;  %vm15104_vm5 = vcmp.eq.s32.totalorder %v23026_v58, %v14998_v57 }
0x1c2a   : > { %v27033_v45 = vsel %vm15104_vm5, inf, %v26755_v62  ;;  %v27036_v39 = vsel %vm15104_vm5, 1.0, %v27679_v50  ;;  %v15231_v41 = vand.u32 4294901760, %v27028_v47  ;;  %v15071_v62 = vcvt.f32.s32 %v26970_v36 }
0x1c2b   : > { %v15043_v3 = vadd.s32 %v15042_v27, %v15040_v37  ;;  %v15928_v15 = vsel %vm1169_vm0, %v27033_v45, inf  ;;  %v15129_v12 = vsel %vm1169_vm0, %v27036_v39, 0  ;;  %v15056_v37 = vcvt.f32.s32 %v26973_v17 }
0x1c2c   : > { %15929 = vmin.xlane.f32.xlu1 %v15928_v15  ;;  %v15024_v49 = vpop.xlane.xlu1 %15023  ;;  %v27043_v32 = vsub.f32 %v15129_v12, %v15129_v12  ;;  %v15232_v36 = vsub.f32 %v27028_v47, %v15231_v41  ;;  %v15072_v63 = vshll.u32 %v15071_v62, 16 }
0x1c2d   : > { %v15025_v0 = vcvt.f32.s32 %v15024_v49  ;;  %vm15107_vm6 = vcmp.eq.s32.totalorder %v23026_v58, %v15043_v3 }
0x1c2e   : > { %v27048_v4 = vsel %vm15107_vm6, inf, %v26770_v25  ;;  %v27051_v2 = vsel %vm15107_vm6, 1.0, %v27679_v50  ;;  %v15221_v35 = vand.u32 4294901760, %v27043_v32  ;;  %v15233_v17 = vand.u32 4294901760, %v15232_v36 }
0x1c2f   : > { %v15028_v57 = vadd.s32 %v15027_v31, %v15025_v0  ;;  %v15937_v38 = vsel %vm1169_vm0, %v27048_v4, inf  ;;  %v15138_v46 = vsel %vm1169_vm0, %v27051_v2, 0 }
0x1c30   : > { %15938 = vmin.xlane.f32.xlu0 %v15937_v38  ;;  %v15069_v56 = vpop.xlane.xlu0 %15068  ;;  %v15222_v25 = vsub.f32 %v27043_v32, %v15221_v35  ;;  %v27064_v27 = vsub.f32 %v15138_v46, %v15138_v46 }
0x1c31   : > { %v15070_v3 = vcvt.f32.s32 %v15069_v56  ;;  %vm15106_vm7 = vcmp.eq.s32.totalorder %v23026_v58, %v15028_v57  ;;  %v15086_v56 = vcvt.f32.s32 %v26976_v43 }
0x1c32   : > { %v15223_v15 = vand.u32 4294901760, %v15222_v25  ;;  %v27069_v12 = vsel %vm15106_vm7, inf, %v26791_v1  ;;  %v27072_v49 = vsel %vm15106_vm7, 1.0, %v27679_v50  ;;  %v15251_v31 = vand.u32 4294901760, %v27064_v27 }
0x1c33   : > { %v15073_v0 = vadd.s32 %v15072_v63, %v15070_v3  ;;  %v15934_v38 = vsel %vm1169_vm0, %v27069_v12, inf  ;;  %v15135_v62 = vsel %vm1169_vm0, %v27072_v49, 0  ;;  %v15057_v1 = vshll.u32 %v15056_v37, 16 }
0x1c34   : > { %20918 = vmatprep.mubr.f32.mxu1 %v15223_v15  ;;  %15935 = vmin.xlane.f32.xlu1 %v15934_v38  ;;  %v15054_v57 = vpop.xlane.xlu1 %15053  ;;  %v27079_v46 = vsub.f32 %v15135_v62, %v15135_v62  ;;  %v15252_v15 = vsub.f32 %v27064_v27, %v15251_v31 }
0x1c35   : > { %v15055_v25 = vcvt.f32.s32 %v15054_v57  ;;  %20919 = vmatmul.mubr.f32.vlgmr.msra.gmra.mrb[56].mxu1 %v15233_v17  ;;  %vm15109_vm8 = vcmp.eq.s32.totalorder %v23026_v58, %v15073_v0  ;;  %v15087_v17 = vshll.u32 %v15086_v56, 16  ;;  %v15101_v57 = vcvt.f32.s32 %v26987_v19 }
0x1c36   : > { %v27084_v63 = vsel %vm15109_vm8, inf, %v26806_v54  ;;  %v27087_v3 = vsel %vm15109_vm8, 1.0, %v27679_v50  ;;  %v15241_v36 = vand.u32 4294901760, %v27079_v46  ;;  %21569 = vmatpush3.bf16.xpose.msra.mxu1 %v22889_v24 }
0x1c37   : > { %v15058_v37 = vadd.s32 %v15057_v1, %v15055_v25  ;;  %v15943_v43 = vsel %vm1169_vm0, %v27084_v63, inf  ;;  %v15144_v0 = vsel %vm1169_vm0, %v27087_v3, 0  ;;  %21571 = vmatprep.subr.bf16.mxu1 %v22883_v18 }
0x1c38   : > { %15944 = vmin.xlane.f32.xlu0 %v15943_v43  ;;  %v15084_v54 = vpop.xlane.xlu1 %15083  ;;  %v15242_v38 = vsub.f32 %v27079_v46, %v15241_v36  ;;  %v27102_v62 = vsub.f32 %v15144_v0, %v15144_v0  ;;  %v15253_v43 = vand.u32 4294901760, %v15252_v15 }
0x1c39   : > { %v15085_v1 = vcvt.f32.s32 %v15084_v54  ;;  %vm15108_vm9 = vcmp.eq.s32.totalorder %v23026_v58, %v15058_v37  ;;  %v15102_v54 = vshll.u32 %v15101_v57, 16 }
0x1c3a   : > { %v15243_v25 = vand.u32 4294901760, %v15242_v38  ;;  %v27107_v44 = vsel %vm15108_vm9, inf, %v26829_v52  ;;  %v27110_v14 = vsel %vm15108_vm9, 1.0, %v27679_v50  ;;  %v15271_v19 = vand.u32 4294901760, %v27102_v62 }
0x1c3b   : > { %v15088_v23 = vadd.s32 %v15087_v17, %v15085_v1  ;;  %v15940_v30 = vsel %vm1169_vm0, %v27107_v44, inf  ;;  %v15141_v56 = vsel %vm1169_vm0, %v27110_v14, 0 }
0x1c3c   : > { %v15099_v0 = vpop.xlane.xlu0 %15098  ;;  %20921 = vmatprep.mubr.f32.mxu1 %v15243_v25  ;;  %15941 = vmin.xlane.f32.xlu1 %v15940_v30  ;;  %v15260_v37 = vsub.f32 %v15141_v56, %v15141_v56  ;;  %v15272_v57 = vsub.f32 %v27102_v62, %v15271_v19 }
0x1c3d   : > { %v15100_v52 = vcvt.f32.s32 %v15099_v0  ;;  %20922 = vmatmul.mubr.f32.gmra.mrb[58].mxu1 %v15253_v43  ;;  %vm15110_vm10 = vcmp.eq.s32.totalorder %v23026_v58, %v15088_v23 }
0x1c3e   : > { %v27119_v15 = vsel %vm15110_vm10, inf, %v26841_v33  ;;  %v27122_v38 = vsel %vm15110_vm10, 1.0, %v27679_v50  ;;  %v15261_v17 = vand.u32 4294901760, %v15260_v37  ;;  %v15273_v5 = vand.u32 4294901760, %v15272_v57 }
0x1c3f   : > { %v15103_v1 = vadd.s32 %v15102_v54, %v15100_v52  ;;  %v15946_v40 = vsel %vm1169_vm0, %v27119_v15, inf  ;;  %v15147_v30 = vsel %vm1169_vm0, %v27122_v38, 0 }
0x1c40   : > { %15947 = vmin.xlane.f32.xlu1 %v15946_v40  ;;  %v15262_v23 = vsub.f32 %v15260_v37, %v15261_v17  ;;  %v15280_v25 = vsub.f32 %v15147_v30, %v15147_v30 }
0x1c41   : > { %vm15111_vm11 = vcmp.eq.s32.totalorder %v23026_v58, %v15103_v1 }
0x1c42   : > { %v27133_v33 = vsel %vm15111_vm11, inf, %v26855_v8  ;;  %v27136_v43 = vsel %vm15111_vm11, 1.0, %v27679_v50  ;;  %v15263_v56 = vand.u32 4294901760, %v15262_v23  ;;  %v15281_v0 = vand.u32 4294901760, %v15280_v25 }
0x1c43   : > { %v15949_v54 = vsel %vm1169_vm0, %v27133_v33, inf  ;;  %v15150_v52 = vsel %vm1169_vm0, %v27136_v43, 0 }
0x1c44   : > { %15950 = vmin.xlane.f32.xlu0 %v15949_v54  ;;  %20924 = vmatprep.mubr.f32.mxu1 %v15263_v56  ;;  %v15282_v40 = vsub.f32 %v15280_v25, %v15281_v0  ;;  %v15290_v30 = vsub.f32 %v15150_v52, %v15150_v52 }
0x1c45   : > { %20925 = vmatmul.mubr.f32.gmra.mrb[60].mxu1 %v15273_v5 }
0x1c46   : > { %v15283_v1 = vand.u32 4294901760, %v15282_v40  ;;  %v15291_v8 = vand.u32 4294901760, %v15290_v30 }
0x1c48   : > { %20927 = vmatprep.mubr.f32.mxu1 %v15283_v1  ;;  %v15292_v53 = vsub.f32 %v15290_v30, %v15291_v8 }
0x1c4a   : > { %v15293_v55 = vand.u32 4294901760, %v15292_v53 }
0x1c4c   : > { %20928 = vmatmul.mubr.f32.gmra.mrb[62].mxu1 %v15293_v55 }
0x1c4d   : > { %20934 = vmatprep.mubr.msk.f32.mxu1 %vm1169_vm0, %v27036_v39 }
0x1c50   : > { %20935 = vmatmul.mubr.msk.f32.vlgmr.msra.gmra.mrb[56].mxu1 %vm1169_vm0, %v27022_v34 }
0x1c51   : > { %20937 = vmatprep.mubr.msk.f32.mxu1 %vm1169_vm0, %v27072_v49  ;;  %21573 = vmatpush3.bf16.xpose.msra.mxu1 %v22883_v18 }
0x1c52   : > { %21575 = vmatprep.subr.bf16.mxu1 %v22881_v13 }
0x1c54   : > { %20938 = vmatmul.mubr.msk.f32.gmra.mrb[58].mxu1 %vm1169_vm0, %v27051_v2 }
0x1c55   : > { %20940 = vmatprep.mubr.msk.f32.mxu1 %vm1169_vm0, %v27110_v14 }
0x1c58   : > { %20941 = vmatmul.mubr.msk.f32.gmra.mrb[60].mxu1 %vm1169_vm0, %v27087_v3 }
0x1c59   : > { %20943 = vmatprep.mubr.msk.f32.mxu1 %vm1169_vm0, %v27122_v38 }
0x1c5c   : > { %20944 = vmatmul.mubr.msk.f32.gmra.mrb[62].mxu1 %vm1169_vm0, %v27136_v43 }
0x1c5d   : > { %20950 = vmatprep.mubr.f32.mxu1 %v27043_v32 }
0x1c60   : > { %20951 = vmatmul.mubr.f32.vlgmr.msra.gmra.mrb[56].mxu1 %v27028_v47 }
0x1c61   : > { %20953 = vmatprep.mubr.f32.mxu1 %v27079_v46  ;;  %21577 = vmatpush3.bf16.xpose.msra.mxu1 %v22881_v13 }
0x1c62   : > { %21579 = vmatprep.subr.bf16.mxu1 %v22887_v21 }
0x1c64   : > { %20954 = vmatmul.mubr.f32.gmra.mrb[58].mxu1 %v27064_v27 }
0x1c65   : > { %20956 = vmatprep.mubr.f32.mxu1 %v15260_v37 }
0x1c68   : > { %20957 = vmatmul.mubr.f32.gmra.mrb[60].mxu1 %v27102_v62 }
0x1c69   : > { %20959 = vmatprep.mubr.f32.mxu1 %v15280_v25 }
0x1c6c   : > { %20960 = vmatmul.mubr.f32.gmra.mrb[62].mxu1 %v15290_v30 }
0x1c6d   : > { %20966 = vmatprep.mubr.f32.mxu1 %v15221_v35 }
0x1c70   : > { %20967 = vmatmul.mubr.f32.vlgmr.msra.gmra.mrb[56].mxu1 %v15231_v41 }
0x1c71   : > { %20969 = vmatprep.mubr.f32.mxu1 %v15241_v36  ;;  %21581 = vmatpush3.bf16.xpose.msra.mxu1 %v22887_v21 }
0x1c72   : > { %21583 = vmatprep.subr.bf16.mxu1 %v22881_v13 }
0x1c74   : > { %20970 = vmatmul.mubr.f32.gmra.mrb[58].mxu1 %v15251_v31 }
0x1c75   : > { %20972 = vmatprep.mubr.f32.mxu1 %v15261_v17 }
0x1c78   : > { %20973 = vmatmul.mubr.f32.gmra.mrb[60].mxu1 %v15271_v19 }
0x1c79   : > { %20975 = vmatprep.mubr.f32.mxu1 %v15281_v0 }
0x1c7c   : > { %20976 = vmatmul.mubr.f32.gmra.mrb[62].mxu1 %v15291_v8 }
0x1c7d   : > { %20982 = vmatprep.mubr.msk.f32.mxu1 %vm1169_vm0, %v27036_v39 }
0x1c80   : > { %20983 = vmatmul.mubr.msk.f32.vlgmr.msra.gmra.mrb[56].mxu1 %vm1169_vm0, %v27022_v34 }
0x1c81   : > { %20985 = vmatprep.mubr.msk.f32.mxu1 %vm1169_vm0, %v27072_v49  ;;  %21585 = vmatpush3.bf16.xpose.msra.mxu1 %v22881_v13 }
0x1c84   : > { %20986 = vmatmul.mubr.msk.f32.gmra.mrb[58].mxu1 %vm1169_vm0, %v27051_v2 }
0x1c85   : > { %20988 = vmatprep.mubr.msk.f32.mxu1 %vm1169_vm0, %v27110_v14 }
0x1c88   : > { %20989 = vmatmul.mubr.msk.f32.gmra.mrb[60].mxu1 %vm1169_vm0, %v27087_v3 }
0x1c89   : > { %20991 = vmatprep.mubr.msk.f32.mxu1 %vm1169_vm0, %v27122_v38 }
0x1c8c   : > { %20992 = vmatmul.mubr.msk.f32.gmra.mrb[62].mxu1 %vm1169_vm0, %v27136_v43 }
0x1c8d   : > { %20998 = vmatprep.mubr.msk.f32.mxu1 %vm1169_vm0, %v27036_v39 }
0x1c90   : > { %20999 = vmatmul.mubr.msk.f32.vlgmr.msra.gmra.mrb[56].mxu1 %vm1169_vm0, %v27022_v34 }
0x1c91   : > { %21001 = vmatprep.mubr.msk.f32.mxu1 %vm1169_vm0, %v27072_v49 }
0x1c94   : > { %21002 = vmatmul.mubr.msk.f32.gmra.mrb[58].mxu1 %vm1169_vm0, %v27051_v2 }
0x1c95   : > { %21004 = vmatprep.mubr.msk.f32.mxu1 %vm1169_vm0, %v27110_v14 }
0x1c98   : > { %21005 = vmatmul.mubr.msk.f32.gmra.mrb[60].mxu1 %vm1169_vm0, %v27087_v3 }
0x1c99   : > { %21007 = vmatprep.mubr.msk.f32.mxu1 %vm1169_vm0, %v27122_v38 }
0x1c9c   : > { %21008 = vmatmul.mubr.msk.f32.gmra.mrb[62].mxu1 %vm1169_vm0, %v27136_v43 }
0x1cb5   : > { %v15933_v55 = vpop.xlane.xlu0 %15932 }
0x1cb6   : > { %vm15953_vm12 = vcmp.eq.f32.partialorder %v27019_v20, %v15933_v55 }
0x1cb7   : > { %v15961_v53 = vsel %vm15953_vm12, %v23026_v58, 64 }
0x1cb8   : > { %v15983_v5 = vsel %vm1169_vm0, %v15961_v53, 2147483647 }
0x1cb9   : > { %v15985_v34 = vshra.s32 %v15983_v5, 16  ;;  %v15930_v47 = vpop.xlane.xlu1 %15929 }
0x1cba   : > { %vm15952_vm13 = vcmp.eq.f32.partialorder %v27033_v45, %v15930_v47 }
0x1cbb   : > { %v15960_v14 = vsel %vm15952_vm13, %v23026_v58, 64  ;;  %v15987_v39 = vcvt.s32.f32 %v15985_v34 }
0x1cbc   : > { %v15968_v41 = vsel %vm1169_vm0, %v15960_v14, 2147483647 }
0x1cbd   : > { %v15970_v32 = vshra.s32 %v15968_v41, 16  ;;  %15988 = vmin.xlane.f32.xlu0 %v15987_v39  ;;  %v15939_v2 = vpop.xlane.xlu0 %15938  ;;  %v15969_v55 = vand.u32 65535, %v15968_v41 }
0x1cbe   : > { %vm15955_vm14 = vcmp.eq.f32.partialorder %v27048_v4, %v15939_v2 }
0x1cbf   : > { %v15963_v20 = vsel %vm15955_vm14, %v23026_v58, 64  ;;  %v15972_v35 = vcvt.s32.f32 %v15970_v32  ;;  %v15971_v32 = vcvt.s32.f32 %v15969_v55 }
0x1cc0   : > { %v16013_v27 = vsel %vm1169_vm0, %v15963_v20, 2147483647 }
0x1cc1   : > { %v16015_v49 = vshra.s32 %v16013_v27, 16  ;;  %15973 = vmin.xlane.f32.xlu1 %v15972_v35  ;;  %v15936_v31 = vpop.xlane.xlu1 %15935  ;;  %v16014_v14 = vand.u32 65535, %v16013_v27 }
0x1cc2   : > { %vm15954_vm15 = vcmp.eq.f32.partialorder %v27069_v12, %v15936_v31 }
0x1cc3   : > { %v15962_v45 = vsel %vm15954_vm15, %v23026_v58, 64  ;;  %v16017_v46 = vcvt.s32.f32 %v16015_v49 }
0x1cc4   : > { %v15998_v3 = vsel %vm1169_vm0, %v15962_v45, 2147483647 }
0x1cc5   : > { %v16000_v36 = vshra.s32 %v15998_v3, 16  ;;  %16018 = vmin.xlane.f32.xlu0 %v16017_v46  ;;  %v15945_v62 = vpop.xlane.xlu0 %15944  ;;  %v15999_v20 = vand.u32 65535, %v15998_v3 }
0x1cc6   : > { %vm15957_vm2 = vcmp.eq.f32.partialorder %v27084_v63, %v15945_v62 }
0x1cc7   : > { %v15965_v4 = vsel %vm15957_vm2, %v23026_v58, 64  ;;  %v16002_v19 = vcvt.s32.f32 %v16000_v36  ;;  %v16001_v45 = vcvt.s32.f32 %v15999_v20 }
0x1cc8   : > { %v16043_v37 = vsel %vm1169_vm0, %v15965_v4, 2147483647 }
0x1cc9   : > { %v16045_v38 = vshra.s32 %v16043_v37, 16  ;;  %16003 = vmin.xlane.f32.xlu1 %v16002_v19  ;;  %v15942_v17 = vpop.xlane.xlu1 %15941  ;;  %v16044_v31 = vand.u32 65535, %v16043_v37 }
0x1cca   : > { %vm15956_vm3 = vcmp.eq.f32.partialorder %v27107_v44, %v15942_v17 }
0x1ccb   : > { %v15964_v12 = vsel %vm15956_vm3, %v23026_v58, 64  ;;  %v16047_v57 = vcvt.s32.f32 %v16045_v38  ;;  %v16046_v62 = vcvt.s32.f32 %v16044_v31 }
0x1ccc   : > { %v16028_v23 = vsel %vm1169_vm0, %v15964_v12, 2147483647 }
0x1ccd   : > { %v16030_v25 = vshra.s32 %v16028_v23, 16  ;;  %16048 = vmin.xlane.f32.xlu0 %v16047_v57  ;;  %v15948_v43 = vpop.xlane.xlu1 %15947  ;;  %v16029_v36 = vand.u32 65535, %v16028_v23 }
0x1cce   : > { %vm15958_vm4 = vcmp.eq.f32.partialorder %v27119_v15, %v15948_v43  ;;  %v15984_v15 = vand.u32 65535, %v15983_v5  ;;  %v16016_v5 = vcvt.s32.f32 %v16014_v14  ;;  %v27727_v14 = vmax.f32 %v26731_v42, %v27010_v16 }
0x1ccf   : > { %v15966_v63 = vsel %vm15958_vm4, %v23026_v58, 64  ;;  %v16032_v56 = vcvt.s32.f32 %v16030_v25  ;;  %v16031_v38 = vcvt.s32.f32 %v16029_v36 }
0x1cd0   : > { %v16058_v0 = vsel %vm1169_vm0, %v15966_v63, 2147483647  ;;  %v15986_v34 = vcvt.s32.f32 %v15984_v15  ;;  %v27724_v15 = vmax.f32 %v26716_v6, %v26998_v22  ;;  %v27300_v6 = vld [vmem:[#allocation7] sm:$0xff]  ;;  %v27302_v22 = vld [vmem:[#allocation7 + $0x8] sm:$0xff] }
0x1cd1   : > { %v16060_v54 = vshra.s32 %v16058_v0, 16  ;;  %v15951_v52 = vpop.xlane.xlu0 %15950  ;;  %16033 = vmin.xlane.f32.xlu1 %v16032_v56  ;;  %v16059_v4 = vand.u32 65535, %v16058_v0  ;;  %v27721_v0 = vmax.f32 %v26698_v48, %v26983_v10 }
0x1cd2   : > { %vm15959_vm5 = vcmp.eq.f32.partialorder %v27133_v33, %v15951_v52 }
0x1cd3   : > { %v15967_v44 = vsel %vm15959_vm5, %v23026_v58, 64  ;;  %v16062_v40 = vcvt.s32.f32 %v16060_v54  ;;  %v16061_v12 = vcvt.s32.f32 %v16059_v4 }
0x1cd4   : > { %v16073_v30 = vsel %vm1169_vm0, %v15967_v44, 2147483647 }
0x1cd5   : > { %v16075_v1 = vshra.s32 %v16073_v30, 16  ;;  %16063 = vmin.xlane.f32.xlu1 %v16062_v40  ;;  %v16074_v17 = vand.u32 65535, %v16073_v30 }
0x1cd7   : > { %v16077_v8 = vcvt.s32.f32 %v16075_v1  ;;  %v16076_v52 = vcvt.s32.f32 %v16074_v17  ;;  %v27723_v1 = vmax.f32 %v26711_v9, %v26994_v60 }
0x1cd9   : > { %16078 = vmin.xlane.f32.xlu0 %v16077_v8 }
0x1d4a   : > { %v27236_v53 = vpop.xlane.xlu0 %15988 }
0x1d4b   : > { %vm15990_vm6 = vcmp.eq.f32.partialorder %v15987_v39, %v27236_v53 }
0x1d4c   : > { %v15991_v47 = vsel %vm15990_vm6, %v15986_v34, inf }
0x1d4d   : > { %15992 = vmin.xlane.f32.xlu0 %v15991_v47  ;;  %v27726_v47 = vmax.f32 %v26726_v11, %v27006_v28 }
0x1d4e   : > { %v27239_v33 = vpop.xlane.xlu1 %15973 }
0x1d4f   : > { %vm15975_vm7 = vcmp.eq.f32.partialorder %v15972_v35, %v27239_v33  ;;  %v15980_v16 = vcvt.f32.s32 %v27239_v33 }
0x1d50   : > { %v15976_v2 = vsel %vm15975_vm7, %v15971_v32, inf }
0x1d51   : > { %15977 = vmin.xlane.f32.xlu1 %v15976_v2  ;;  %v16941_v2 = vand.u32 4294901760, %v27302_v22 }
0x1d52   : > { %v27242_v49 = vpop.xlane.xlu0 %16018 }
0x1d53   : > { %vm16020_vm8 = vcmp.eq.f32.partialorder %v16017_v46, %v27242_v49  ;;  %v16025_v31 = vcvt.f32.s32 %v27242_v49 }
0x1d54   : > { %v16021_v41 = vsel %vm16020_vm8, %v16016_v5, inf }
0x1d55   : > { %16022 = vmin.xlane.f32.xlu0 %v16021_v41  ;;  %v15981_v41 = vshll.u32 %v15980_v16, 16  ;;  %v16026_v4 = vshll.u32 %v16025_v31, 16 }
0x1d56   : > { %v27245_v39 = vpop.xlane.xlu1 %16003 }
0x1d57   : > { %vm16005_vm9 = vcmp.eq.f32.partialorder %v16002_v19, %v27245_v39 }
0x1d58   : > { %v16006_v27 = vsel %vm16005_vm9, %v16001_v45, inf }
0x1d59   : > { %16007 = vmin.xlane.f32.xlu1 %v16006_v27 }
0x1d5a   : > { %v27248_v35 = vpop.xlane.xlu0 %16048 }
0x1d5b   : > { %vm16050_vm10 = vcmp.eq.f32.partialorder %v16047_v57, %v27248_v35  ;;  %v27720_v57 = vmax.f32 %v26693_v61, %v26979_v59 }
0x1d5c   : > { %v16051_v3 = vsel %vm16050_vm10, %v16046_v62, inf }
0x1d5d   : > { %16052 = vmin.xlane.f32.xlu0 %v16051_v3 }
0x1d5e   : > { %v27251_v46 = vpop.xlane.xlu1 %16033 }
0x1d5f   : > { %vm16035_vm11 = vcmp.eq.f32.partialorder %v16032_v56, %v27251_v46 }
0x1d60   : > { %v16036_v37 = vsel %vm16035_vm11, %v16031_v38, inf  ;;  %v16010_v38 = vcvt.f32.s32 %v27245_v39 }
0x1d61   : > { %16037 = vmin.xlane.f32.xlu1 %v16036_v37 }
0x1d62   : > { %v27254_v19 = vpop.xlane.xlu1 %16063 }
0x1d63   : > { %vm16065_vm12 = vcmp.eq.f32.partialorder %v16062_v40, %v27254_v19  ;;  %v21000_v23 = vpop.f32.mrb[56].mxu1  ;;  %v27722_v40 = vmax.f32 %v26706_v26, %v26990_v7  ;;  %v27725_v26 = vmax.f32 %v26721_v51, %v27002_v29  ;;  %v15995_v51 = vcvt.f32.s32 %v27236_v53 }
0x1d64   : > { %v27260_v25 = vmax.f32 %v27720_v57, %v21000_v23  ;;  %v15866_v43 = vpop.f32.mrb[57].mxu1  ;;  %v16066_v63 = vsel %vm16065_vm12, %v16061_v12, inf  ;;  %v16938_v29 = vand.u32 4294901760, %v27300_v6 }
0x1d65   : > { %v27265_v56 = vmax.f32 %v27721_v0, %v15866_v43  ;;  %16067 = vmin.xlane.f32.xlu1 %v16066_v63  ;;  %v15996_v42 = vshll.u32 %v15995_v51, 16  ;;  %v16011_v63 = vshll.u32 %v16010_v38, 16  ;;  %v16055_v0 = vcvt.f32.s32 %v27248_v35 }
0x1d66   : > { %v27267_v54 = vpop.xlane.xlu0 %16078  ;;  %v27311_v11 = vpack.c.bf16 %v16941_v2, %v16938_v29 }
0x1d67   : > { %vm16080_vm13 = vcmp.eq.f32.partialorder %v16077_v8, %v27267_v54  ;;  %v21003_v44 = vpop.f32.mrb[58].mxu1 }
0x1d68   : > { %v27273_v61 = vmax.f32 %v27722_v40, %v21003_v44  ;;  %v15878_v59 = vpop.f32.mrb[59].mxu1  ;;  %v16081_v30 = vsel %vm16080_vm13, %v16076_v52, inf  ;;  %21611 = vmatprep.subr.bf16.mxu1 %v27311_v11 }
0x1d69   : > { %v27278_v48 = vmax.f32 %v27723_v1, %v15878_v59  ;;  %16082 = vmin.xlane.f32.xlu0 %v16081_v30  ;;  %21613 = vmatpush3.bf16.msra.mxu1 %v27311_v11 }
0x1d6b   : > { %v21006_v10 = vpop.f32.mrb[60].mxu1 }
0x1d6c   : > { %v27283_v55 = vmax.f32 %v27724_v15, %v21006_v10  ;;  %v15890_v8 = vpop.f32.mrb[61].mxu1  ;;  %v16056_v15 = vshll.u32 %v16055_v0, 16 }
0x1d6d   : > { %v27288_v7 = vmax.f32 %v27725_v26, %v15890_v8  ;;  %v16040_v8 = vcvt.f32.s32 %v27251_v46  ;;  %v16070_v46 = vcvt.f32.s32 %v27254_v19 }
0x1d6f   : > { %v21009_v34 = vpop.f32.mrb[62].mxu1 }
0x1d70   : > { %v27293_v9 = vmax.f32 %v27726_v47, %v21009_v34  ;;  %v15902_v60 = vpop.f32.mrb[63].mxu1 }
0x1d71   : > { %v27298_v32 = vmax.f32 %v27727_v14, %v15902_v60 }
0x1dda   : > { %v15993_v28 = vpop.xlane.xlu0 %15992 }
0x1ddb   : > { %v15994_v20 = vcvt.f32.s32 %v15993_v28 }
0x1ddd   : > { %v15997_v53 = vadd.s32 %v15996_v42, %v15994_v20  ;;  %v16041_v20 = vshll.u32 %v16040_v8, 16 }
0x1dde   : > { %v15978_v5 = vpop.xlane.xlu1 %15977 }
0x1ddf   : > { %vm16089_vm14 = vcmp.eq.s32.totalorder %v23026_v58, %v15997_v53  ;;  %v15979_v45 = vcvt.f32.s32 %v15978_v5 }
0x1de0   : > { %v27319_v27 = vsel %vm16089_vm14, 1.0, %v27679_v50 }
0x1de1   : > { %v16116_v36 = vsel %vm1169_vm0, %v27319_v27, 0  ;;  %v15982_v33 = vadd.s32 %v15981_v41, %v15979_v45 }
0x1de2   : > { %v27323_v62 = vsub.f32 %v16116_v36, %v16116_v36  ;;  %v16023_v3 = vpop.xlane.xlu0 %16022 }
0x1de3   : > { %vm16088_vm15 = vcmp.eq.s32.totalorder %v23026_v58, %v15982_v33  ;;  %v16024_v37 = vcvt.f32.s32 %v16023_v3 }
0x1de4   : > { %v27328_v49 = vsel %vm16088_vm15, 1.0, %v27679_v50  ;;  %v16215_v17 = vand.u32 4294901760, %v27323_v62 }
0x1de5   : > { %v16027_v12 = vadd.s32 %v16026_v4, %v16024_v37  ;;  %v16113_v23 = vsel %vm1169_vm0, %v27328_v49, 0  ;;  %v16071_v4 = vshll.u32 %v16070_v46, 16 }
0x1de6   : > { %v16008_v57 = vpop.xlane.xlu1 %16007  ;;  %v27333_v43 = vsub.f32 %v16113_v23, %v16113_v23  ;;  %v16216_v59 = vsub.f32 %v27323_v62, %v16215_v17 }
0x1de7   : > { %vm16091_vm2 = vcmp.eq.s32.totalorder %v23026_v58, %v16027_v12  ;;  %v16009_v39 = vcvt.f32.s32 %v16008_v57 }
0x1de8   : > { %v27338_v52 = vsel %vm16091_vm2, 1.0, %v27679_v50  ;;  %v16205_v44 = vand.u32 4294901760, %v27333_v43  ;;  %v16217_v14 = vand.u32 4294901760, %v16216_v59 }
0x1de9   : > { %v16012_v40 = vadd.s32 %v16011_v63, %v16009_v39  ;;  %v16122_v30 = vsel %vm1169_vm0, %v27338_v52, 0 }
0x1dea   : > { %v16053_v1 = vpop.xlane.xlu0 %16052  ;;  %v16206_v35 = vsub.f32 %v27333_v43, %v16205_v44  ;;  %v27349_v10 = vsub.f32 %v16122_v30, %v16122_v30 }
0x1deb   : > { %vm16090_vm3 = vcmp.eq.s32.totalorder %v23026_v58, %v16012_v40  ;;  %v16054_v26 = vcvt.f32.s32 %v16053_v1 }
0x1dec   : > { %v27354_v34 = vsel %vm16090_vm3, 1.0, %v27679_v50  ;;  %v16207_v47 = vand.u32 4294901760, %v16206_v35  ;;  %v16235_v28 = vand.u32 4294901760, %v27349_v10 }
0x1ded   : > { %v16057_v60 = vadd.s32 %v16056_v15, %v16054_v26  ;;  %v16119_v51 = vsel %vm1169_vm0, %v27354_v34, 0 }
0x1dee   : > { %21014 = vmatprep.mubr.f32.mxu0 %v16207_v47  ;;  %v16038_v42 = vpop.xlane.xlu1 %16037  ;;  %v27359_v16 = vsub.f32 %v16119_v51, %v16119_v51  ;;  %v16236_v45 = vsub.f32 %v27349_v10, %v16235_v28 }
0x1def   : > { %vm16093_vm4 = vcmp.eq.s32.totalorder %v23026_v58, %v16057_v60  ;;  %v16039_v53 = vcvt.f32.s32 %v16038_v42  ;;  %21015 = vmatmul.mubr.f32.vlgmr.msra.gmra.mrb[64].mxu0 %v16217_v14 }
0x1df0   : > { %v27364_v5 = vsel %vm16093_vm4, 1.0, %v27679_v50  ;;  %v16225_v41 = vand.u32 4294901760, %v27359_v16  ;;  %21593 = vmatpush3.bf16.xpose.msra.mxu0 %v22889_v24  ;;  %v16085_v24 = vcvt.f32.s32 %v27267_v54  ;;  %v16237_v57 = vand.u32 4294901760, %v16236_v45 }
0x1df1   : > { %v16042_v31 = vadd.s32 %v16041_v20, %v16039_v53  ;;  %v16128_v36 = vsel %vm1169_vm0, %v27364_v5, 0  ;;  %21595 = vmatprep.subr.bf16.mxu0 %v22883_v18 }
0x1df2   : > { %v16068_v19 = vpop.xlane.xlu1 %16067  ;;  %v16226_v33 = vsub.f32 %v27359_v16, %v16225_v41  ;;  %v27377_v3 = vsub.f32 %v16128_v36, %v16128_v36  ;;  %v16086_v59 = vshll.u32 %v16085_v24, 16 }
0x1df3   : > { %vm16092_vm5 = vcmp.eq.s32.totalorder %v23026_v58, %v16042_v31  ;;  %v16069_v38 = vcvt.f32.s32 %v16068_v19 }
0x1df4   : > { %v27382_v37 = vsel %vm16092_vm5, 1.0, %v27679_v50  ;;  %v16227_v12 = vand.u32 4294901760, %v16226_v33  ;;  %v16255_v0 = vand.u32 4294901760, %v27377_v3 }
0x1df5   : > { %v16072_v23 = vadd.s32 %v16071_v4, %v16069_v38  ;;  %v16125_v63 = vsel %vm1169_vm0, %v27382_v37, 0 }
0x1df6   : > { %v16083_v39 = vpop.xlane.xlu0 %16082  ;;  %21017 = vmatprep.mubr.f32.mxu0 %v16227_v12  ;;  %v16244_v40 = vsub.f32 %v16125_v63, %v16125_v63  ;;  %v16256_v8 = vsub.f32 %v27377_v3, %v16255_v0 }
0x1df7   : > { %vm16094_vm6 = vcmp.eq.s32.totalorder %v23026_v58, %v16072_v23  ;;  %v16084_v54 = vcvt.f32.s32 %v16083_v39  ;;  %21018 = vmatmul.mubr.f32.gmra.mrb[66].mxu0 %v16237_v57 }
0x1df8   : > { %v27389_v30 = vsel %vm16094_vm6, 1.0, %v27679_v50  ;;  %v16245_v1 = vand.u32 4294901760, %v16244_v40  ;;  %v16257_v20 = vand.u32 4294901760, %v16256_v8 }
0x1df9   : > { %v16131_v35 = vsel %vm1169_vm0, %v27389_v30, 0  ;;  %v16087_v15 = vadd.s32 %v16086_v59, %v16084_v54 }
0x1dfa   : > { %v16246_v26 = vsub.f32 %v16244_v40, %v16245_v1  ;;  %v16264_v47 = vsub.f32 %v16131_v35, %v16131_v35 }
0x1dfb   : > { %vm16095_vm7 = vcmp.eq.s32.totalorder %v23026_v58, %v16087_v15 }
0x1dfc   : > { %v18360_v60 = vsel %vm16095_vm7, 1.0, %v27679_v50  ;;  %v16247_v14 = vand.u32 4294901760, %v16246_v26  ;;  %v16265_v51 = vand.u32 4294901760, %v16264_v47 }
0x1dfd   : > { %v16134_v42 = vsel %vm1169_vm0, %v18360_v60, 0 }
0x1dfe   : > { %21020 = vmatprep.mubr.f32.mxu0 %v16247_v14  ;;  %v16266_v46 = vsub.f32 %v16264_v47, %v16265_v51  ;;  %v16274_v53 = vsub.f32 %v16134_v42, %v16134_v42 }
0x1dff   : > { %21021 = vmatmul.mubr.f32.gmra.mrb[68].mxu0 %v16257_v20 }
0x1e00   : > { %v16267_v31 = vand.u32 4294901760, %v16266_v46  ;;  %v16275_v45 = vand.u32 4294901760, %v16274_v53 }
0x1e02   : > { %21023 = vmatprep.mubr.f32.mxu0 %v16267_v31  ;;  %v16276_v36 = vsub.f32 %v16274_v53, %v16275_v45 }
0x1e04   : > { %v16277_v19 = vand.u32 4294901760, %v16276_v36 }
0x1e06   : > { %21024 = vmatmul.mubr.f32.gmra.mrb[70].mxu0 %v16277_v19 }
0x1e07   : > { %21030 = vmatprep.mubr.msk.f32.mxu0 %vm1169_vm0, %v27328_v49 }
0x1e0a   : > { %21031 = vmatmul.mubr.msk.f32.vlgmr.msra.gmra.mrb[64].mxu0 %vm1169_vm0, %v27319_v27 }
0x1e0b   : > { %21597 = vmatpush3.bf16.xpose.msra.mxu0 %v22883_v18  ;;  %21033 = vmatprep.mubr.msk.f32.mxu0 %vm1169_vm0, %v27354_v34  ;;  %v17093_v18 = vsub.f32 %v27302_v22, %v16941_v2 }
0x1e0c   : > { %21599 = vmatprep.subr.bf16.mxu0 %v22881_v13 }
0x1e0d   : > { %v17094_v58 = vand.u32 4294901760, %v17093_v18 }
0x1e0e   : > { %21034 = vmatmul.mubr.msk.f32.gmra.mrb[66].mxu0 %vm1169_vm0, %v27338_v52 }
0x1e0f   : > { %21036 = vmatprep.mubr.msk.f32.mxu0 %vm1169_vm0, %v27382_v37 }
0x1e12   : > { %21037 = vmatmul.mubr.msk.f32.gmra.mrb[68].mxu0 %vm1169_vm0, %v27364_v5 }
0x1e13   : > { %21039 = vmatprep.mubr.msk.f32.mxu0 %vm1169_vm0, %v27389_v30 }
0x1e16   : > { %21040 = vmatmul.mubr.msk.f32.gmra.mrb[70].mxu0 %vm1169_vm0, %v18360_v60 }
0x1e17   : > { %21046 = vmatprep.mubr.f32.mxu0 %v27333_v43 }
0x1e1a   : > { %21047 = vmatmul.mubr.f32.vlgmr.msra.gmra.mrb[64].mxu0 %v27323_v62 }
0x1e1b   : > { %21601 = vmatpush3.bf16.xpose.msra.mxu0 %v22881_v13  ;;  %21049 = vmatprep.mubr.f32.mxu0 %v27359_v16 }
0x1e1c   : > { %21603 = vmatprep.subr.bf16.mxu0 %v22887_v21 }
0x1e1e   : > { %21050 = vmatmul.mubr.f32.gmra.mrb[66].mxu0 %v27349_v10 }
0x1e1f   : > { %21052 = vmatprep.mubr.f32.mxu0 %v16244_v40 }
0x1e22   : > { %21053 = vmatmul.mubr.f32.gmra.mrb[68].mxu0 %v27377_v3 }
0x1e23   : > { %21055 = vmatprep.mubr.f32.mxu0 %v16264_v47 }
0x1e26   : > { %21056 = vmatmul.mubr.f32.gmra.mrb[70].mxu0 %v16274_v53 }
0x1e27   : > { %21062 = vmatprep.mubr.f32.mxu0 %v16205_v44 }
0x1e2a   : > { %21063 = vmatmul.mubr.f32.vlgmr.msra.gmra.mrb[64].mxu0 %v16215_v17 }
0x1e2b   : > { %21605 = vmatpush3.bf16.xpose.msra.mxu0 %v22887_v21  ;;  %21065 = vmatprep.mubr.f32.mxu0 %v16225_v41 }
0x1e2c   : > { %21607 = vmatprep.subr.bf16.mxu0 %v22881_v13 }
0x1e2e   : > { %21066 = vmatmul.mubr.f32.gmra.mrb[66].mxu0 %v16235_v28 }
0x1e2f   : > { %21068 = vmatprep.mubr.f32.mxu0 %v16245_v1 }
0x1e32   : > { %21069 = vmatmul.mubr.f32.gmra.mrb[68].mxu0 %v16255_v0 }
0x1e33   : > { %21071 = vmatprep.mubr.f32.mxu0 %v16265_v51 }
0x1e36   : > { %21072 = vmatmul.mubr.f32.gmra.mrb[70].mxu0 %v16275_v45 }
0x1e37   : > { %21078 = vmatprep.mubr.msk.f32.mxu0 %vm1169_vm0, %v27328_v49 }
0x1e3a   : > { %21079 = vmatmul.mubr.msk.f32.vlgmr.msra.gmra.mrb[64].mxu0 %vm1169_vm0, %v27319_v27 }
0x1e3b   : > { %21609 = vmatpush3.bf16.xpose.msra.mxu0 %v22881_v13  ;;  %21081 = vmatprep.mubr.msk.f32.mxu0 %vm1169_vm0, %v27354_v34  ;;  %v17086_v13 = vsub.f32 %v27300_v6, %v16938_v29 }
0x1e3d   : > { %v17087_v21 = vand.u32 4294901760, %v17086_v13  ;;  %v27468_v43 = vpack.c.bf16 %v17093_v18, %v17086_v13 }
0x1e3e   : > { %21082 = vmatmul.mubr.msk.f32.gmra.mrb[66].mxu0 %vm1169_vm0, %v27338_v52 }
0x1e3f   : > { %21084 = vmatprep.mubr.msk.f32.mxu0 %vm1169_vm0, %v27382_v37  ;;  %v17088_v50 = vsub.f32 %v17086_v13, %v17087_v21 }
0x1e41   : > { %v17089_v62 = vand.u32 4294901760, %v17088_v50 }
0x1e42   : > { %21085 = vmatmul.mubr.msk.f32.gmra.mrb[68].mxu0 %vm1169_vm0, %v27364_v5 }
0x1e43   : > { %21087 = vmatprep.mubr.msk.f32.mxu0 %vm1169_vm0, %v27389_v30 }
0x1e46   : > { %21088 = vmatmul.mubr.msk.f32.gmra.mrb[70].mxu0 %vm1169_vm0, %v18360_v60 }
0x1e47   : > { %21094 = vmatprep.mubr.msk.f32.mxu0 %vm1169_vm0, %v27328_v49 }
0x1e4a   : > { %21095 = vmatmul.mubr.msk.f32.vlgmr.msra.gmra.mrb[64].mxu0 %vm1169_vm0, %v27319_v27  ;;  %v17095_v27 = vsub.f32 %v17093_v18, %v17094_v58 }
0x1e4b   : > { %21097 = vmatprep.mubr.msk.f32.mxu0 %vm1169_vm0, %v27354_v34 }
0x1e4c   : > { %v17096_v49 = vand.u32 4294901760, %v17095_v27 }
0x1e4e   : > { %21098 = vmatmul.mubr.msk.f32.gmra.mrb[66].mxu0 %vm1169_vm0, %v27338_v52  ;;  %v21614_v17 = vpack.c.bf16 %v17096_v49, %v17089_v62  ;;  %v27470_v52 = vpack.c.bf16 %v17094_v58, %v17087_v21 }
0x1e4f   : > { %21100 = vmatprep.mubr.msk.f32.mxu0 %vm1169_vm0, %v27382_v37 }
0x1e50   : > { %21615 = vmatprep.subr.bf16.mxu1 %v21614_v17 }
0x1e52   : > { %21101 = vmatmul.mubr.msk.f32.gmra.mrb[68].mxu0 %vm1169_vm0, %v27364_v5 }
0x1e53   : > { %21103 = vmatprep.mubr.msk.f32.mxu0 %vm1169_vm0, %v27389_v30 }
0x1e56   : > { %21104 = vmatmul.mubr.msk.f32.gmra.mrb[70].mxu0 %vm1169_vm0, %v18360_v60 }
0x1f1d   : > { %v21096_v44 = vpop.f32.mrb[64].mxu0 }
0x1f1e   : > { %v16897_v10 = vmax.f32 %v27260_v25, %v21096_v44  ;;  %v16850_v6 = vpop.f32.mrb[65].mxu0 }
0x1f1f   : > { %v16896_v29 = vmax.f32 %v27265_v56, %v16850_v6 }
0x1f20   : > { %v16917_v22 = vsel %vm368_vm1, %v16897_v10, 0 }
0x1f21   : > { %v27475_v2 = vand.u32 4294901760, %v16917_v22  ;;  %v16914_v34 = vsel %vm368_vm1, %v16896_v29, 0  ;;  %v21099_v28 = vpop.f32.mrb[66].mxu0 }
0x1f22   : > { %v27478_v16 = vand.u32 4294901760, %v16914_v34  ;;  %v16899_v5 = vmax.f32 %v27273_v61, %v21099_v28  ;;  %v16862_v41 = vpop.f32.mrb[67].mxu0 }
0x1f23   : > { %v27482_v33 = vsub.f32 %v16917_v22, %v27475_v2  ;;  %v16898_v25 = vmax.f32 %v27278_v48, %v16862_v41 }
0x1f24   : > { %v27486_v3 = vsub.f32 %v16914_v34, %v27478_v16  ;;  %v16923_v56 = vsel %vm368_vm1, %v16899_v5, 0 }
0x1f25   : > { %v17016_v4 = vand.u32 4294901760, %v27482_v33  ;;  %v27490_v24 = vand.u32 4294901760, %v16923_v56  ;;  %v16920_v38 = vsel %vm368_vm1, %v16898_v25, 0  ;;  %v21102_v37 = vpop.f32.mrb[68].mxu0 }
0x1f26   : > { %v27493_v12 = vand.u32 4294901760, %v16920_v38  ;;  %v16901_v61 = vmax.f32 %v27283_v55, %v21102_v37  ;;  %v16874_v23 = vpop.f32.mrb[69].mxu0  ;;  %v17006_v57 = vand.u32 4294901760, %v27486_v3 }
0x1f27   : > { %v17017_v48 = vsub.f32 %v27482_v33, %v17016_v4  ;;  %v27501_v63 = vsub.f32 %v16923_v56, %v27490_v24  ;;  %v16900_v0 = vmax.f32 %v27288_v7, %v16874_v23 }
0x1f28   : > { %v27505_v39 = vsub.f32 %v16920_v38, %v27493_v12  ;;  %v16929_v40 = vsel %vm368_vm1, %v16901_v61, 0  ;;  %v17007_v55 = vsub.f32 %v27486_v3, %v17006_v57 }
0x1f29   : > { %v27511_v59 = vand.u32 4294901760, %v16929_v40  ;;  %v16926_v54 = vsel %vm368_vm1, %v16900_v0, 0  ;;  %v21105_v30 = vpop.f32.mrb[70].mxu0  ;;  %v17036_v1 = vand.u32 4294901760, %v27501_v63  ;;  %v17018_v47 = vand.u32 4294901760, %v17017_v48 }
0x1f2a   : > { %v27515_v35 = vand.u32 4294901760, %v16926_v54  ;;  %v16903_v7 = vmax.f32 %v27293_v9, %v21105_v30  ;;  %v16886_v15 = vpop.f32.mrb[71].mxu0  ;;  %v17008_v8 = vand.u32 4294901760, %v17007_v55  ;;  %v17026_v26 = vand.u32 4294901760, %v27505_v39 }
0x1f2b   : > { %v17055_v60 = vsub.f32 %v16929_v40, %v27511_v59  ;;  %v16902_v14 = vmax.f32 %v27298_v32, %v16886_v15  ;;  %v17037_v51 = vsub.f32 %v27501_v63, %v17036_v1 }
0x1f2c   : > { %v17045_v42 = vsub.f32 %v16926_v54, %v27515_v35  ;;  %v16935_v20 = vsel %vm368_vm1, %v16903_v7, 0  ;;  %21110 = vmatprep.mubr.f32.mxu1 %v17008_v8  ;;  %v17027_v9 = vsub.f32 %v27505_v39, %v17026_v26 }
0x1f2d   : > { %v27527_v46 = vand.u32 4294901760, %v16935_v20  ;;  %v16932_v53 = vsel %vm368_vm1, %v16902_v14, 0  ;;  %21111 = vmatmul.mubr.f32.vlgmr.msra.gmra.mrb[64].mxu1 %v17018_v47  ;;  %v17056_v31 = vand.u32 4294901760, %v17055_v60  ;;  %v17038_v13 = vand.u32 4294901760, %v17037_v51 }
0x1f2e   : > { %v27530_v45 = vand.u32 4294901760, %v16932_v53  ;;  %21617 = vmatpush3.bf16.msra.mxu1 %v21614_v17  ;;  %v17028_v32 = vand.u32 4294901760, %v17027_v9  ;;  %v17046_v36 = vand.u32 4294901760, %v17045_v42 }
0x1f2f   : > { %v17075_v19 = vsub.f32 %v16935_v20, %v27527_v46  ;;  %v17057_v18 = vsub.f32 %v17055_v60, %v17056_v31  ;;  %21619 = vmatprep.subr.bf16.mxu1 %v27468_v43 }
0x1f30   : > { %v17065_v21 = vsub.f32 %v16932_v53, %v27530_v45  ;;  %21113 = vmatprep.mubr.f32.mxu1 %v17028_v32  ;;  %v17047_v58 = vsub.f32 %v17045_v42, %v17046_v36 }
0x1f31   : > { %21114 = vmatmul.mubr.f32.gmra.mrb[66].mxu1 %v17038_v13  ;;  %v17076_v50 = vand.u32 4294901760, %v17075_v19  ;;  %v17058_v49 = vand.u32 4294901760, %v17057_v18 }
0x1f32   : > { %v17048_v27 = vand.u32 4294901760, %v17047_v58  ;;  %v17066_v62 = vand.u32 4294901760, %v17065_v21 }
0x1f33   : > { %v17077_v44 = vsub.f32 %v17075_v19, %v17076_v50 }
0x1f34   : > { %21116 = vmatprep.mubr.f32.mxu1 %v17048_v27  ;;  %v17067_v17 = vsub.f32 %v17065_v21, %v17066_v62 }
0x1f35   : > { %21117 = vmatmul.mubr.f32.gmra.mrb[68].mxu1 %v17058_v49  ;;  %v17078_v6 = vand.u32 4294901760, %v17077_v44 }
0x1f36   : > { %v17068_v10 = vand.u32 4294901760, %v17067_v17 }
0x1f38   : > { %21119 = vmatprep.mubr.f32.mxu1 %v17068_v10 }
0x1f39   : > { %21120 = vmatmul.mubr.f32.gmra.mrb[70].mxu1 %v17078_v6 }
0x1f3a   : > { %21126 = vmatprep.mubr.f32.mxu1 %v27478_v16 }
0x1f3d   : > { %21127 = vmatmul.mubr.f32.vlgmr.msra.gmra.mrb[64].mxu1 %v27475_v2 }
0x1f3e   : > { %21621 = vmatpush3.bf16.msra.mxu1 %v27468_v43  ;;  %21129 = vmatprep.mubr.f32.mxu1 %v27493_v12 }
0x1f3f   : > { %21623 = vmatprep.subr.bf16.mxu1 %v27311_v11 }
0x1f41   : > { %21130 = vmatmul.mubr.f32.gmra.mrb[66].mxu1 %v27490_v24 }
0x1f42   : > { %21132 = vmatprep.mubr.f32.mxu1 %v27515_v35 }
0x1f45   : > { %21133 = vmatmul.mubr.f32.gmra.mrb[68].mxu1 %v27511_v59 }
0x1f46   : > { %21135 = vmatprep.mubr.f32.mxu1 %v27530_v45 }
0x1f49   : > { %21136 = vmatmul.mubr.f32.gmra.mrb[70].mxu1 %v27527_v46 }
0x1f4a   : > { %21142 = vmatprep.mubr.f32.mxu1 %v27486_v3 }
0x1f4d   : > { %21143 = vmatmul.mubr.f32.vlgmr.msra.gmra.mrb[64].mxu1 %v27482_v33 }
0x1f4e   : > { %21625 = vmatpush3.bf16.msra.mxu1 %v27311_v11  ;;  %21145 = vmatprep.mubr.f32.mxu1 %v27505_v39 }
0x1f4f   : > { %21627 = vmatprep.subr.bf16.mxu1 %v27470_v52 }
0x1f51   : > { %21146 = vmatmul.mubr.f32.gmra.mrb[66].mxu1 %v27501_v63 }
0x1f52   : > { %21148 = vmatprep.mubr.f32.mxu1 %v17045_v42 }
0x1f55   : > { %21149 = vmatmul.mubr.f32.gmra.mrb[68].mxu1 %v17055_v60 }
0x1f56   : > { %21151 = vmatprep.mubr.f32.mxu1 %v17065_v21 }
0x1f59   : > { %21152 = vmatmul.mubr.f32.gmra.mrb[70].mxu1 %v17075_v19 }
0x1f5a   : > { %21158 = vmatprep.mubr.f32.mxu1 %v17006_v57 }
0x1f5d   : > { %21159 = vmatmul.mubr.f32.vlgmr.msra.gmra.mrb[64].mxu1 %v17016_v4 }
0x1f5e   : > { %21629 = vmatpush3.bf16.msra.mxu1 %v27470_v52  ;;  %21161 = vmatprep.mubr.f32.mxu1 %v17026_v26 }
0x1f5f   : > { %21631 = vmatprep.subr.bf16.mxu1 %v27311_v11 }
0x1f61   : > { %21162 = vmatmul.mubr.f32.gmra.mrb[66].mxu1 %v17036_v1 }
0x1f62   : > { %21164 = vmatprep.mubr.f32.mxu1 %v17046_v36 }
0x1f65   : > { %21165 = vmatmul.mubr.f32.gmra.mrb[68].mxu1 %v17056_v31 }
0x1f66   : > { %21167 = vmatprep.mubr.f32.mxu1 %v17066_v62 }
0x1f69   : > { %21168 = vmatmul.mubr.f32.gmra.mrb[70].mxu1 %v17076_v50 }
0x1f6a   : > { %21174 = vmatprep.mubr.f32.mxu1 %v27478_v16 }
0x1f6d   : > { %21175 = vmatmul.mubr.f32.vlgmr.msra.gmra.mrb[64].mxu1 %v27475_v2 }
0x1f6e   : > { %21633 = vmatpush3.bf16.msra.mxu1 %v27311_v11  ;;  %21177 = vmatprep.mubr.f32.mxu1 %v27493_v12  ;;  %v18385_v11 = vld [vmem:[%s27639_s4] ss:$0 sm:$0xff] }
0x1f71   : > { %21178 = vmatmul.mubr.f32.gmra.mrb[66].mxu1 %v27490_v24 }
0x1f72   : > { %21180 = vmatprep.mubr.f32.mxu1 %v27515_v35 }
0x1f75   : > { %21181 = vmatmul.mubr.f32.gmra.mrb[68].mxu1 %v27511_v59 }
0x1f76   : > { %21183 = vmatprep.mubr.f32.mxu1 %v27530_v45 }
0x1f79   : > { %21184 = vmatmul.mubr.f32.gmra.mrb[70].mxu1 %v27527_v46 }
0x1f7a   : > { %21190 = vmatprep.mubr.f32.mxu1 %v27478_v16 }
0x1f7d   : > { %21191 = vmatmul.mubr.f32.vlgmr.msra.gmra.mrb[64].mxu1 %v27475_v2 }
0x1f7e   : > { %21193 = vmatprep.mubr.f32.mxu1 %v27493_v12 }
0x1f81   : > { %21194 = vmatmul.mubr.f32.gmra.mrb[66].mxu1 %v27490_v24 }
0x1f82   : > { %21196 = vmatprep.mubr.f32.mxu1 %v27515_v35 }
0x1f85   : > { %21197 = vmatmul.mubr.f32.gmra.mrb[68].mxu1 %v27511_v59 }
0x1f86   : > { %21199 = vmatprep.mubr.f32.mxu1 %v27530_v45 }
0x1f89   : > { %21200 = vmatmul.mubr.f32.gmra.mrb[70].mxu1 %v27527_v46 }
0x2050   : > { %v21192_v43 = vpop.f32.mrb[64].mxu1 }
0x2051   : > { %v21634_v52 = vadd.f32 %v21192_v43, %v18385_v11  ;;  %v17651_v29 = vpop.f32.mrb[65].mxu1 }
0x2052   : > { %v21635_v22 = vadd.f32 %v18385_v11, %v17651_v29 }
0x2053   : > { %v17698_v2 = vmax.f32 %v21634_v52, 0.0 }
0x2054   : > { %v17697_v34 = vmax.f32 %v21635_v22, 0.0  ;;  %v21195_v28 = vpop.f32.mrb[66].mxu1 }
0x2055   : > { %17706 = vst [vmem:[%s324_s15 + $0x8] sm:$0xff] %v17698_v2  ;;  %v21636_v16 = vadd.f32 %v21195_v28, %v18385_v11  ;;  %v17663_v5 = vpop.f32.mrb[67].mxu1 }
0x2056   : > { %17705 = vst [vmem:[%s324_s15] sm:$0xff] %v17697_v34  ;;  %v21637_v41 = vadd.f32 %v18385_v11, %v17663_v5 }
0x2057   : > { %v17700_v33 = vmax.f32 %v21636_v16, 0.0 }
0x2058   : > { %v17699_v25 = vmax.f32 %v21637_v41, 0.0  ;;  %v21198_v3 = vpop.f32.mrb[68].mxu1 }
0x2059   : > { %17708 = vst [vmem:[%s324_s15 + $0x18] sm:$0xff] %v17700_v33  ;;  %v21638_v56 = vadd.f32 %v21198_v3, %v18385_v11  ;;  %v17675_v4 = vpop.f32.mrb[69].mxu1 }
0x205a   : > { %17707 = vst [vmem:[%s324_s15 + $0x10] sm:$0xff] %v17699_v25  ;;  %v21639_v24 = vadd.f32 %v18385_v11, %v17675_v4 }
0x205b   : > { %v17702_v38 = vmax.f32 %v21638_v56, 0.0 }
0x205c   : > { %v17701_v37 = vmax.f32 %v21639_v24, 0.0  ;;  %v21201_v12 = vpop.f32.mrb[70].mxu1 }
0x205d   : > { %17710 = vst [vmem:[%s324_s15 + $0x28] sm:$0xff] %v17702_v38  ;;  %v21640_v61 = vadd.f32 %v21201_v12, %v18385_v11  ;;  %v17687_v23 = vpop.f32.mrb[71].mxu1 }
0x205e   : > { %17709 = vst [vmem:[%s324_s15 + $0x20] sm:$0xff] %v17701_v37  ;;  %v21641_v57 = vadd.f32 %v18385_v11, %v17687_v23 }
0x205f   : > { %v17704_v48 = vmax.f32 %v21640_v61, 0.0 }
0x2060   : > { %v17703_v63 = vmax.f32 %v21641_v57, 0.0 }
0x2061   : > { %17712 = vst [vmem:[%s324_s15 + $0x38] sm:$0xff] %v17704_v48 }
0x2062   : > { %17711 = vst [vmem:[%s324_s15 + $0x30] sm:$0xff] %v17703_v63 }
0x2063   : > { %22546 = shalt.err (!%p22543_p12)
}
0x2064   : > { %s22547_s28 = scalar_lea.hbm %s27586_s13, 1024  ;;  %s22551_s14 = scalar_lea.hbm %s27640_s5, 2048 }
0x2065   : > { %p22548_p11 = scmp.ne.s32.totalorder %s27586_s13, %s22547_s28  ;;  %p22552_p13 = scmp.lt.u32.totalorder %s27586_s13, %s27640_s5 }
0x2066   : > { %p22553_p0 = scmp.lt.u32.totalorder %s22551_s14, %s22547_s28  ;;  %p22555_p9 = scmp.lt.u32.totalorder %s22547_s28, %s27586_s13 }
0x2067   : > { %p22549_p3 = pnand %p22548_p11, %p22759_p10 }
0x2068   : > { %p22554_p5 = por %p22553_p0, %p22552_p13 }
0x2069   : > { %p22550_p6 = pneg %p22549_p3 }
0x206a   : > { %p22556_p1 = por %p22555_p9, %p22554_p5 }
0x206c   : > { %p22557_p2 = pnand %p22556_p1, %p22550_p6 }
0x206e   : > { %22560 = shalt.err (!%p22557_p2)
}
0x206f   : > { %s22632_s8 = smov 128   ;;  %s22633_s11 = smov 8  }
0x2070   : > { %22370 = dma.vmem_to_hbm [thread:$0]  (%p22759_p10), %s27581_s7, 1024, %s27586_s13, %s17714_s21, %s22632_s8, %s22632_s8, %s22633_s11  }
0x2071 PF: > { %s17744_s15 = sand.u32 1, %s22603_s18   ;;  %p27728_p7 = scmp.ne.s32.totalorder %s27656_s27, 0 }
0x2072   : > { %p27729_p4 = scmp.ge.s32.totalorder %s22623_s23, 2  ;;  %s17745_s16 = scalar_lea.sflag [#allocation4], %s17744_s15 }
0x2074   : > { %p22384_p8 = pnand %p27729_p4, %p27728_p7 }
0x2076   : > { %22598 = dma.done.wait (!%p22384_p8), %s17745_s16, 1024  }
0x2077   : > { %22600 = vsyncadd (!%p22384_p8), %s17745_s16, 4294966272  ;;  %s24_s23 = sadd.s32 1, %s22623_s23   ;;  %s27730_s21 = sld [smem:[#allocation13_spill]] }
0x2078   : > { %p21_p12 = scmp.ge.s32.totalorder %s24_s23, 4   ;;  %s27731_s22 = sld [smem:[#allocation14_spill]] }
0x2079   : > { %s27732_s18 = smov %s22607_s19  ;;  %s27733_s19 = smov %s22611_s20 }
0x207a   : > { %s27734_s20 = smov %s22768_s12  ;;  %23 = sbr.rel (!%p21_p12) target bundleno = 11 (0xb), region = 105 }
0x2081   :  { %17750 = vsyncpa [#allocation3], 1 }
0x2082   :  { %17752 = vsyncpa [#allocation3 + $0x1], 1 }
0x2083   :  { %17753 = vsyncpa [#allocation6], 1 }
0x2084   :  { %17755 = vsyncpa [#allocation6 + $0x1], 1 }
0x2085   :  { %17756 = vsyncpa [#allocation4], 1 }
0x2086   :  { %17758 = vsyncpa [#allocation4 + $0x1], 1 }

</bundles_post_ra>
